<compile_context>
chip_gen: v7x
topology: tpu7x:2x2x1
jax: 0.10.0
libtpu: 0.0.40
codegen_flags: <defaults>
</compile_context>

<pallas_src>
import functools

import jax
import jax.numpy as jnp
from jax.experimental import pallas as pl
from jax.experimental.pallas import tpu as pltpu

BN_EPS = 1e-5
LANE = 128


# ----------------------------------------------------------------------------
# small helpers
# ----------------------------------------------------------------------------
def _round_up(x, m):
    return (x + m - 1) // m * m


def _nbytes(*arrays):
    return sum(int(a.size) * jnp.dtype(a.dtype).itemsize for a in arrays)


def _compiler_params(operand_bytes, dimension_semantics=None):
    # Scale the scoped-VMEM cap with the actual working set (weights +
    # activations + f32 intermediates + double buffering), clamped to a range
    # that is safe on v5e/v6e (128 MiB physical) and v7x (64 MiB physical).
    limit = int(min(96 << 20, max(32 << 20, 4 * operand_bytes)))
    return pltpu.CompilerParams(dimension_semantics=dimension_semantics,
                                vmem_limit_bytes=limit)


def _vmem():
    return pl.BlockSpec(memory_space=pltpu.MemorySpace.VMEM)


def _bn_relu(y, gamma, beta):
    """Training-mode BatchNorm (single-pass biased batch stats, f32) + ReLU."""
    inv_m = 1.0 / y.shape[0]
    mean = jnp.sum(y, axis=0, keepdims=True) * inv_m
    msq = jnp.sum(y * y, axis=0, keepdims=True) * inv_m
    var = jnp.maximum(msq - mean * mean, 0.0)
    scale = jax.lax.rsqrt(var + BN_EPS) * gamma
    shift = beta - mean * scale
    return jnp.maximum(y * scale + shift, 0.0)


# ----------------------------------------------------------------------------
# Kernel 1: conv block 1 (im2col matmul + BN + ReLU), channel-parallel grid
# ----------------------------------------------------------------------------
def conv_bn_relu_kernel(p_ref, w_ref, g_ref, b_ref, o_ref):
    # p_ref: (M, K) bf16 patches (resident across the channel grid)
    # w_ref: (K, TILE_C) bf16 ; g_ref/b_ref: (1, TILE_C) f32 ; o_ref bf16
    y = jnp.dot(p_ref[...], w_ref[...], preferred_element_type=jnp.float32)
    o_ref[...] = _bn_relu(y, g_ref[...], b_ref[...]).astype(o_ref.dtype)


def conv_bn_relu(patches, w, gamma, beta, *, tile_c=LANE):
    m, k = patches.shape
    c = w.shape[1]
    assert c % tile_c == 0
    return pl.pallas_call(
        conv_bn_relu_kernel,
        out_shape=jax.ShapeDtypeStruct((m, c), jnp.bfloat16),
        grid=(c // tile_c,),
        in_specs=[
            pl.BlockSpec((m, k), lambda ci: (0, 0)),        # patches: resident
            pl.BlockSpec((k, tile_c), lambda ci: (0, ci)),  # weight tile
            pl.BlockSpec((1, tile_c), lambda ci: (0, ci)),  # BN gamma tile
            pl.BlockSpec((1, tile_c), lambda ci: (0, ci)),  # BN beta tile
        ],
        out_specs=pl.BlockSpec((m, tile_c), lambda ci: (0, ci)),
        compiler_params=_compiler_params(
            _nbytes(patches, w, gamma, beta) + m * c * 2, ("parallel",)),
    )(patches, w, gamma, beta)


# ----------------------------------------------------------------------------
# Kernel 2: fused tail = conv blocks 2..5 (+BN+ReLU) + [mu | logvar] heads
# ----------------------------------------------------------------------------
def _im2col_rows(a_ref, h, w, n, p_ref):
    """In-kernel im2col for a 4x4 / stride-2 / pad-1 conv.

    a_ref: (h*w*n, C) position-major activation (row = (r*w + s)*n + image).
    p_ref: (ho*wo*n, 16*C) patch scratch, filled position-major with
           tap-major columns (matches the HWIO-flattened weight).
    Out-of-range taps are the conv's zero padding.  Only contiguous static
    row slices and lane-dim concats are used.
    """
    c = a_ref.shape[1]
    ho, wo = h // 2, w // 2
    zero_tap = jnp.zeros((n, c), a_ref.dtype)
    for i in range(ho):
        for j in range(wo):
            taps = []
            for ki in range(4):
                for kj in range(4):
                    r, s = 2 * i - 1 + ki, 2 * j - 1 + kj
                    if 0 <= r < h and 0 <= s < w:
                        off = (r * w + s) * n
                        taps.append(a_ref[off:off + n, :])
                    else:
                        taps.append(zero_tap)
            row0 = (i * wo + j) * n
            p_ref[row0:row0 + n, :] = jnp.concatenate(taps, axis=1)


def tail_kernel(p2_ref, w2_ref, g2_ref, b2_ref,
                w3_ref, g3_ref, b3_ref,
                w4_ref, g4_ref, b4_ref,
                w5_ref, g5_ref, b5_ref,
                wh_ref, bh_ref, o_ref,
                a2_s, p3_s, a3_s, p4_s, a4_s):
    n = p2_ref.shape[0] // 64            # conv2's output grid is 8x8

    # conv block 2: host-built position-major patches -> one MXU matmul.
    y2 = jnp.dot(p2_ref[...], w2_ref[...], preferred_element_type=jnp.float32)
    a2_s[...] = _bn_relu(y2, g2_ref[...], b2_ref[...]).astype(a2_s.dtype)

    # conv block 3: in-kernel im2col (8x8 -> 4x4), single matmul.
    _im2col_rows(a2_s, 8, 8, n, p3_s)
    y3 = jnp.dot(p3_s[...], w3_ref[...], preferred_element_type=jnp.float32)
    a3_s[...] = _bn_relu(y3, g3_ref[...], b3_ref[...]).astype(a3_s.dtype)

    # conv block 4: in-kernel im2col (4x4 -> 2x2); ONE (4N, K4) @ (K4, C4)
    # matmul, BN stats taken once over the 4N rows.
    _im2col_rows(a3_s, 4, 4, n, p4_s)
    y4 = jnp.dot(p4_s[...], w4_ref[...], preferred_element_type=jnp.float32)
    a4_s[...] = _bn_relu(y4, g4_ref[...], b4_ref[...]).astype(a4_s.dtype)

    # conv block 5 (2x2 -> 1x1): only the centre 2x2 taps of its 4x4 kernel
    # ever see non-padding data, and those 4 taps are exactly the 4 position
    # blocks of a4 -> ONE (N, 4*C4) @ (4*C4, C5) contraction (the MXU does
    # the tap accumulation).
    p5 = jnp.concatenate([a4_s[q * n:(q + 1) * n, :] for q in range(4)], axis=1)
    y5 = jnp.dot(p5, w5_ref[...], preferred_element_type=jnp.float32)
    a5 = _bn_relu(y5, g5_ref[...], b5_ref[...]).astype(jnp.bfloat16)

    # heads: [mu | logvar] in one lane-dense (128-wide padded) matmul + bias.
    o_ref[...] = (jnp.dot(a5, wh_ref[...], preferred_element_type=jnp.float32)
                  + bh_ref[...])


def tail_fused(p2, w2, g2, b2, w3, g3, b3, w4, g4, b4, w5c, g5, b5, wh, bh):
    m2 = p2.shape[0]
    assert m2 % 64 == 0, "tail expects position-major (8*8*N, K2) conv2 patches"
    n = m2 // 64
    c2, c3, c4 = w2.shape[1], w3.shape[1], w4.shape[1]
    head_pad = wh.shape[1]
    args = (p2, w2, g2, b2, w3, g3, b3, w4, g4, b4, w5c, g5, b5, wh, bh)
    return pl.pallas_call(
        tail_kernel,
        out_shape=jax.ShapeDtypeStruct((n, head_pad), jnp.float32),
        in_specs=[_vmem() for _ in args],
        out_specs=_vmem(),
        scratch_shapes=[
            pltpu.VMEM((64 * n, c2), jnp.bfloat16),       # a2 (8x8 grid)
            pltpu.VMEM((16 * n, 16 * c2), jnp.bfloat16),  # conv3 patches
            pltpu.VMEM((16 * n, c3), jnp.bfloat16),       # a3 (4x4 grid)
            pltpu.VMEM((4 * n, 16 * c3), jnp.bfloat16),   # conv4 patches
            pltpu.VMEM((4 * n, c4), jnp.bfloat16),        # a4 (2x2 grid)
        ],
        compiler_params=_compiler_params(_nbytes(*args)),
    )(*args)


# ----------------------------------------------------------------------------
# Plain-JAX glue: host-side im2col (slices/concat only) for blocks 1 and 2
# ----------------------------------------------------------------------------
def im2col_nhwc(x, k=4, s=2, p=1):
    n, h, w, c = x.shape
    xp = jnp.pad(x, ((0, 0), (p, p), (p, p), (0, 0)))
    ho = (h + 2 * p - k) // s + 1
    wo = (w + 2 * p - k) // s + 1
    cols = []
    for ki in range(k):
        for kj in range(k):
            cols.append(xp[:, ki:ki + s * ho:s, kj:kj + s * wo:s, :])
    return jnp.concatenate(cols, axis=-1), ho, wo      # (N, Ho, Wo, k*k*C)


# ----------------------------------------------------------------------------
# Parameters (mirror CIFAR10Encoder.__init__) + TPU packing (pad + bf16)
# ----------------------------------------------------------------------------
def make_params(key, code_size, in_ch=3, base_channels=8,
                channel_mults=(1, 2, 2, 2, 2)):
    # Channel bookkeeping mirrors the PyTorch reference EXACTLY, including its
    # quirk of indexing `channel_mults[idx + 1]` with the multiplier VALUE.
    layer_dims = []
    prev_ch = in_ch
    next_ch = channel_mults[0] * base_channels
    for idx in channel_mults:
        layer_dims.append((prev_ch, next_ch))
        prev_ch = next_ch
        next_ch = channel_mults[idx + 1] * next_ch

    params = {"convs": []}
    for (cin, cout) in layer_dims:
        key, kw = jax.random.split(key)
        fan_in = 4 * 4 * cin
        scale = 1.0 / jnp.sqrt(fan_in)
        w = jax.random.normal(kw, (4, 4, cin, cout), jnp.float32) * scale  # HWIO
        # nn.Conv2d bias omitted on purpose: training-mode BatchNorm2d's mean
        # subtraction cancels it exactly, so it never affects the forward.
        params["convs"].append((w,
                                jnp.ones((1, cout), jnp.float32),     # BN gamma
                                jnp.zeros((1, cout), jnp.float32)))   # BN beta

    key, kmu, kbmu, klv, kblv = jax.random.split(key, 5)
    scale = 1.0 / jnp.sqrt(prev_ch)
    params["mu"] = (
        jax.random.normal(kmu, (prev_ch, code_size), jnp.float32) * scale,
        jax.random.normal(kbmu, (1, code_size), jnp.float32) * scale)
    params["logvar"] = (
        jax.random.normal(klv, (prev_ch, code_size), jnp.float32) * scale,
        jax.random.normal(kblv, (1, code_size), jnp.float32) * scale)
    return params, prev_ch


def pack_params(params):
    """Zero-pad channels to 128 lanes, cast matmul operands to bf16, flatten
    conv weights tap-major, and pre-pack conv5 / head weights for the tail."""
    n_layers = len(params["convs"])
    prev_pad = _round_up(params["convs"][0][0].shape[2], 8)   # K1 = 16*8 = 128
    convs = []
    for li, (w, gamma, beta) in enumerate(params["convs"]):
        kh, kw, cin, cout = w.shape
        cout_pad = _round_up(cout, LANE)
        wp = jnp.zeros((kh, kw, prev_pad, cout_pad), jnp.float32)
        wp = wp.at[:, :, :cin, :cout].set(w)
        gp = jnp.zeros((1, cout_pad), jnp.float32).at[:, :cout].set(gamma)
        bp = jnp.zeros((1, cout_pad), jnp.float32).at[:, :cout].set(beta)
        if li < n_layers - 1:
            convs.append((wp.reshape(kh * kw * prev_pad, cout_pad)
                          .astype(jnp.bfloat16), gp, bp))
        else:
            # conv5: 2x2 input, 1x1 output -> only the centre 2x2 taps touch
            # data; flatten them into the contraction dim: (4*Cin_pad, C5_pad).
            w5c = (wp[1:3, 1:3].reshape(4 * prev_pad, cout_pad)
                   .astype(jnp.bfloat16))
            convs.append((w5c, gp, bp))
        prev_pad = cout_pad

    wmu, bmu = params["mu"]
    wlv, blv = params["logvar"]
    c5, code = wmu.shape
    head_pad = _round_up(2 * code, LANE)          # lane-dense head output
    wh = jnp.zeros((prev_pad, head_pad), jnp.float32)
    wh = wh.at[:c5, :code].set(wmu).at[:c5, code:2 * code].set(wlv)
    bh = jnp.zeros((1, head_pad), jnp.float32)
    bh = bh.at[:, :code].set(bmu).at[:, code:2 * code].set(blv)
    return {"convs": convs, "heads": (wh.astype(jnp.bfloat16), bh)}


# ----------------------------------------------------------------------------
# Forward pass
# ----------------------------------------------------------------------------
@functools.partial(jax.jit, static_argnames=("code_size",))
def cifar10_encoder_forward(x_nchw, packed, *, code_size):
    ((w1, g1, b1), (w2, g2, b2), (w3, g3, b3),
     (w4, g4, b4), (w5, g5, b5)) = packed["convs"]
    wh, bh = packed["heads"]

    # NCHW (PyTorch) -> NHWC, pad input channels so K1 = 16*Cin_pad is
    # lane-dense, cast to bf16 for the MXU.
    x = jnp.transpose(x_nchw, (0, 2, 3, 1)).astype(jnp.float32)
    cin_pad = w1.shape[0] // 16
    x = jnp.pad(x, ((0, 0), (0, 0), (0, 0), (0, cin_pad - x.shape[-1])))
    x = x.astype(jnp.bfloat16)
    n = x.shape[0]

    # conv block 1: host im2col (only cin_pad channels get duplicated — cheap)
    # + channel-parallel matmul/BN/ReLU kernel.
    p1, h1, w1o = im2col_nhwc(x)
    a1 = conv_bn_relu(p1.reshape(n * h1 * w1o, -1), w1, g1, b1)
    a1 = a1.reshape(n, h1, w1o, -1)

    # conv block 2 patches: host im2col of a1, laid out position-major
    # (pixel-major, image-minor) so the fused tail's in-kernel im2col for
    # blocks 3-5 reduces to contiguous row slices of VMEM-resident data.
    p2, h2, w2o = im2col_nhwc(a1)
    assert (h2, w2o) == (8, 8), "tail kernel assumes a 32x32 input (CIFAR-10)"
    p2 = jnp.transpose(p2, (1, 2, 0, 3)).reshape(h2 * w2o * n, -1)

    # Fused tail: conv blocks 2..5 (+BN+ReLU) and both linear heads; output is
    # a lane-dense (N, 128) [mu | logvar | zero-pad] slab.
    out = tail_fused(p2, w2, g2, b2, w3, g3, b3, w4, g4, b4, w5, g5, b5, wh, bh)
    return out[:, :code_size], out[:, code_size:2 * code_size]


# ----------------------------------------------------------------------------
# Main
# ----------------------------------------------------------------------------
if __name__ == "__main__":
    code_size = 16
    in_ch = 3
    base_channels = 8      # small for the test; channels still pad to 128 lanes
    batch = 2
    spatial = 32           # 5 stride-2 convs: 32 -> 16 -> 8 -> 4 -> 2 -> 1

    key = jax.random.PRNGKey(0)
    kx, kp = jax.random.split(key)
    x = jax.random.normal(kx, (batch, in_ch, spatial, spatial), jnp.float32)

    params, feat_dim = make_params(kp, code_size, in_ch=in_ch,
                                   base_channels=base_channels)
    packed = pack_params(params)

    mu, logvar = cifar10_encoder_forward(x, packed, code_size=code_size)
    jax.block_until_ready((mu, logvar))

    assert mu.shape == (batch, code_size), mu.shape
    assert logvar.shape == (batch, code_size), logvar.shape
    assert bool(jnp.all(jnp.isfinite(mu))) and bool(jnp.all(jnp.isfinite(logvar)))
    print("KERNEL_OK")
</pallas_src>

<mosaic_0001>
module attributes {stable_mosaic.version = 11 : i64} {
  func.func @conv_bn_relu_kernel(%arg0: i32, %arg1: memref<512x128xbf16, #tpu.memory_space<vmem>>, %arg2: memref<128x128xbf16, #tpu.memory_space<vmem>>, %arg3: memref<1x128xf32, #tpu.memory_space<vmem>>, %arg4: memref<1x128xf32, #tpu.memory_space<vmem>>, %arg5: memref<512x128xbf16, #tpu.memory_space<vmem>>) attributes {dimension_semantics = [#tpu.dimension_semantics<parallel>], iteration_bounds = array<i64: 1>, scalar_prefetch = 0 : i64, scratch_operands = 0 : i64, tpu.core_type = #tpu.core_type<tc>, window_params = [{pipeline_mode = #tpu.pipeline_mode<synchronous>, transform_indices = @transform_0, window_bounds = array<i64: 512, 128>}, {transform_indices = @transform_1, window_bounds = array<i64: 128, 128>}, {transform_indices = @transform_2, window_bounds = array<i64: 1, 128>}, {transform_indices = @transform_3, window_bounds = array<i64: 1, 128>}, {transform_indices = @transform_4, window_bounds = array<i64: 512, 128>}]} {
    %c0 = arith.constant 0 : index
    %c0_0 = arith.constant 0 : index
    %0 = vector.load %arg1[%c0, %c0_0] : memref<512x128xbf16, #tpu.memory_space<vmem>>, vector<512x128xbf16>
    %c0_1 = arith.constant 0 : index
    %c0_2 = arith.constant 0 : index
    %1 = vector.load %arg2[%c0_1, %c0_2] : memref<128x128xbf16, #tpu.memory_space<vmem>>, vector<128x128xbf16>
    %cst = arith.constant dense<0.000000e+00> : vector<512x128xf32>
    %2 = tpu.matmul %0, %1, %cst {dimension_numbers = #tpu.dot_dimension_numbers<[1], [0], [0], [1], [0, 0, 1, 1], [], []>} : vector<512x128xbf16>, vector<128x128xbf16>, vector<512x128xf32> -> vector<512x128xf32>
    %c0_3 = arith.constant 0 : index
    %c0_4 = arith.constant 0 : index
    %3 = vector.load %arg3[%c0_3, %c0_4] : memref<1x128xf32, #tpu.memory_space<vmem>>, vector<1x128xf32>
    %c0_5 = arith.constant 0 : index
    %c0_6 = arith.constant 0 : index
    %4 = vector.load %arg4[%c0_5, %c0_6] : memref<1x128xf32, #tpu.memory_space<vmem>>, vector<1x128xf32>
    %cst_7 = arith.constant dense<0.000000e+00> : vector<128xf32>
    %5 = vector.multi_reduction <add>, %2, %cst_7 [0] : vector<512x128xf32> to vector<128xf32>
    %6 = vector.shape_cast %5 : vector<128xf32> to vector<1x128xf32>
    %cst_8 = arith.constant 0.001953125 : f32
    %7 = vector.broadcast %cst_8 : f32 to vector<1x128xf32>
    %8 = arith.mulf %6, %7 : vector<1x128xf32>
    %9 = arith.mulf %2, %2 : vector<512x128xf32>
    %cst_9 = arith.constant dense<0.000000e+00> : vector<128xf32>
    %10 = vector.multi_reduction <add>, %9, %cst_9 [0] : vector<512x128xf32> to vector<128xf32>
    %11 = vector.shape_cast %10 : vector<128xf32> to vector<1x128xf32>
    %cst_10 = arith.constant 0.001953125 : f32
    %12 = vector.broadcast %cst_10 : f32 to vector<1x128xf32>
    %13 = arith.mulf %11, %12 : vector<1x128xf32>
    %14 = arith.mulf %8, %8 : vector<1x128xf32>
    %15 = arith.subf %13, %14 : vector<1x128xf32>
    %cst_11 = arith.constant 0.000000e+00 : f32
    %16 = vector.broadcast %cst_11 : f32 to vector<1x128xf32>
    %17 = arith.maximumf %15, %16 : vector<1x128xf32>
    %cst_12 = arith.constant 9.99999974E-6 : f32
    %18 = vector.broadcast %cst_12 : f32 to vector<1x128xf32>
    %19 = arith.addf %17, %18 : vector<1x128xf32>
    %20 = math.rsqrt %19 : vector<1x128xf32>
    %21 = arith.mulf %20, %3 : vector<1x128xf32>
    %22 = arith.mulf %8, %21 : vector<1x128xf32>
    %23 = arith.subf %4, %22 : vector<1x128xf32>
    %24 = vector.broadcast %21 : vector<1x128xf32> to vector<512x128xf32>
    %25 = arith.mulf %2, %24 : vector<512x128xf32>
    %26 = vector.broadcast %23 : vector<1x128xf32> to vector<512x128xf32>
    %27 = arith.addf %25, %26 : vector<512x128xf32>
    %cst_13 = arith.constant 0.000000e+00 : f32
    %28 = vector.broadcast %cst_13 : f32 to vector<512x128xf32>
    %29 = arith.maximumf %27, %28 : vector<512x128xf32>
    %30 = arith.truncf %29 : vector<512x128xf32> to vector<512x128xbf16>
    %c0_14 = arith.constant 0 : index
    %c0_15 = arith.constant 0 : index
    %31 = vector.load %arg5[%c0_14, %c0_15] : memref<512x128xbf16, #tpu.memory_space<vmem>>, vector<512x128xbf16>
    tpu.vector_store %arg5[%c0_14, %c0_15], %30 {strides = array<i32>} : memref<512x128xbf16, #tpu.memory_space<vmem>>, vector<512x128xbf16>,
    return
  }
  func.func @transform_0(%arg0: i32) -> (i32, i32) {
    %c0_i32 = arith.constant 0 : i32
    %c0_i32_0 = arith.constant 0 : i32
    %c0_i32_1 = arith.constant 0 : i32
    return %c0_i32, %c0_i32_0 : i32, i32
  }
  func.func @transform_1(%arg0: i32) -> (i32, i32) {
    %c0_i32 = arith.constant 0 : i32
    %c0_i32_0 = arith.constant 0 : i32
    return %c0_i32, %arg0 : i32, i32
  }
  func.func @transform_2(%arg0: i32) -> (i32, i32) {
    %c0_i32 = arith.constant 0 : i32
    %c0_i32_0 = arith.constant 0 : i32
    return %c0_i32, %arg0 : i32, i32
  }
  func.func @transform_3(%arg0: i32) -> (i32, i32) {
    %c0_i32 = arith.constant 0 : i32
    %c0_i32_0 = arith.constant 0 : i32
    return %c0_i32, %arg0 : i32, i32
  }
  func.func @transform_4(%arg0: i32) -> (i32, i32) {
    %c0_i32 = arith.constant 0 : i32
    %c0_i32_0 = arith.constant 0 : i32
    return %c0_i32, %arg0 : i32, i32
  }
}

module attributes {stable_mosaic.version = 11 : i64} {
  func.func @tail_kernel(%arg0: memref<128x2048xbf16, #tpu.memory_space<vmem>>, %arg1: memref<2048x128xbf16, #tpu.memory_space<vmem>>, %arg2: memref<1x128xf32, #tpu.memory_space<vmem>>, %arg3: memref<1x128xf32, #tpu.memory_space<vmem>>, %arg4: memref<2048x128xbf16, #tpu.memory_space<vmem>>, %arg5: memref<1x128xf32, #tpu.memory_space<vmem>>, %arg6: memref<1x128xf32, #tpu.memory_space<vmem>>, %arg7: memref<2048x128xbf16, #tpu.memory_space<vmem>>, %arg8: memref<1x128xf32, #tpu.memory_space<vmem>>, %arg9: memref<1x128xf32, #tpu.memory_space<vmem>>, %arg10: memref<512x128xbf16, #tpu.memory_space<vmem>>, %arg11: memref<1x128xf32, #tpu.memory_space<vmem>>, %arg12: memref<1x128xf32, #tpu.memory_space<vmem>>, %arg13: memref<128x128xbf16, #tpu.memory_space<vmem>>, %arg14: memref<1x128xf32, #tpu.memory_space<vmem>>, %arg15: memref<2x128xf32, #tpu.memory_space<vmem>>, %arg16: memref<128x128xbf16, #tpu.memory_space<vmem>>, %arg17: memref<32x2048xbf16, #tpu.memory_space<vmem>>, %arg18: memref<32x128xbf16, #tpu.memory_space<vmem>>, %arg19: memref<8x2048xbf16, #tpu.memory_space<vmem>>, %arg20: memref<8x128xbf16, #tpu.memory_space<vmem>>) attributes {dimension_semantics = [], scalar_prefetch = 0 : i64, scratch_operands = 5 : i64, tpu.core_type = #tpu.core_type<tc>} {
    %c0 = arith.constant 0 : index
    %c0_0 = arith.constant 0 : index
    %0 = vector.load %arg0[%c0, %c0_0] : memref<128x2048xbf16, #tpu.memory_space<vmem>>, vector<128x2048xbf16>
    %c0_1 = arith.constant 0 : index
    %c0_2 = arith.constant 0 : index
    %1 = vector.load %arg1[%c0_1, %c0_2] : memref<2048x128xbf16, #tpu.memory_space<vmem>>, vector<2048x128xbf16>
    %cst = arith.constant dense<0.000000e+00> : vector<128x128xf32>
    %2 = tpu.matmul %0, %1, %cst {dimension_numbers = #tpu.dot_dimension_numbers<[1], [0], [0], [1], [0, 0, 1, 1], [], []>} : vector<128x2048xbf16>, vector<2048x128xbf16>, vector<128x128xf32> -> vector<128x128xf32>
    %c0_3 = arith.constant 0 : index
    %c0_4 = arith.constant 0 : index
    %3 = vector.load %arg2[%c0_3, %c0_4] : memref<1x128xf32, #tpu.memory_space<vmem>>, vector<1x128xf32>
    %c0_5 = arith.constant 0 : index
    %c0_6 = arith.constant 0 : index
    %4 = vector.load %arg3[%c0_5, %c0_6] : memref<1x128xf32, #tpu.memory_space<vmem>>, vector<1x128xf32>
    %cst_7 = arith.constant dense<0.000000e+00> : vector<128xf32>
    %5 = vector.multi_reduction <add>, %2, %cst_7 [0] : vector<128x128xf32> to vector<128xf32>
    %6 = vector.shape_cast %5 : vector<128xf32> to vector<1x128xf32>
    %cst_8 = arith.constant 7.812500e-03 : f32
    %7 = vector.broadcast %cst_8 : f32 to vector<1x128xf32>
    %8 = arith.mulf %6, %7 : vector<1x128xf32>
    %9 = arith.mulf %2, %2 : vector<128x128xf32>
    %cst_9 = arith.constant dense<0.000000e+00> : vector<128xf32>
    %10 = vector.multi_reduction <add>, %9, %cst_9 [0] : vector<128x128xf32> to vector<128xf32>
    %11 = vector.shape_cast %10 : vector<128xf32> to vector<1x128xf32>
    %cst_10 = arith.constant 7.812500e-03 : f32
    %12 = vector.broadcast %cst_10 : f32 to vector<1x128xf32>
    %13 = arith.mulf %11, %12 : vector<1x128xf32>
    %14 = arith.mulf %8, %8 : vector<1x128xf32>
    %15 = arith.subf %13, %14 : vector<1x128xf32>
    %cst_11 = arith.constant 0.000000e+00 : f32
    %16 = vector.broadcast %cst_11 : f32 to vector<1x128xf32>
    %17 = arith.maximumf %15, %16 : vector<1x128xf32>
    %cst_12 = arith.constant 9.99999974E-6 : f32
    %18 = vector.broadcast %cst_12 : f32 to vector<1x128xf32>
    %19 = arith.addf %17, %18 : vector<1x128xf32>
    %20 = math.rsqrt %19 : vector<1x128xf32>
    %21 = arith.mulf %20, %3 : vector<1x128xf32>
    %22 = arith.mulf %8, %21 : vector<1x128xf32>
    %23 = arith.subf %4, %22 : vector<1x128xf32>
    %24 = vector.broadcast %21 : vector<1x128xf32> to vector<128x128xf32>
    %25 = arith.mulf %2, %24 : vector<128x128xf32>
    %26 = vector.broadcast %23 : vector<1x128xf32> to vector<128x128xf32>
    %27 = arith.addf %25, %26 : vector<128x128xf32>
    %cst_13 = arith.constant 0.000000e+00 : f32
    %28 = vector.broadcast %cst_13 : f32 to vector<128x128xf32>
    %29 = arith.maximumf %27, %28 : vector<128x128xf32>
    %30 = arith.truncf %29 : vector<128x128xf32> to vector<128x128xbf16>
    %c0_14 = arith.constant 0 : index
    %c0_15 = arith.constant 0 : index
    %31 = vector.load %arg16[%c0_14, %c0_15] : memref<128x128xbf16, #tpu.memory_space<vmem>>, vector<128x128xbf16>
    tpu.vector_store %arg16[%c0_14, %c0_15], %30 {strides = array<i32>} : memref<128x128xbf16, #tpu.memory_space<vmem>>, vector<128x128xbf16>,
    %cst_16 = arith.constant 0.000000e+00 : bf16
    %32 = vector.broadcast %cst_16 : bf16 to vector<2x128xbf16>
    %c0_17 = arith.constant 0 : index
    %c0_18 = arith.constant 0 : index
    %33 = vector.load %arg16[%c0_17, %c0_18] : memref<128x128xbf16, #tpu.memory_space<vmem>>, vector<2x128xbf16>
    %c2 = arith.constant 2 : index
    %c0_19 = arith.constant 0 : index
    %34 = vector.load %arg16[%c2, %c0_19] : memref<128x128xbf16, #tpu.memory_space<vmem>>, vector<2x128xbf16>
    %c4 = arith.constant 4 : index
    %c0_20 = arith.constant 0 : index
    %35 = vector.load %arg16[%c4, %c0_20] : memref<128x128xbf16, #tpu.memory_space<vmem>>, vector<2x128xbf16>
    %c16 = arith.constant 16 : index
    %c0_21 = arith.constant 0 : index
    %36 = vector.load %arg16[%c16, %c0_21] : memref<128x128xbf16, #tpu.memory_space<vmem>>, vector<2x128xbf16>
    %c18 = arith.constant 18 : index
    %c0_22 = arith.constant 0 : index
    %37 = vector.load %arg16[%c18, %c0_22] : memref<128x128xbf16, #tpu.memory_space<vmem>>, vector<2x128xbf16>
    %c20 = arith.constant 20 : index
    %c0_23 = arith.constant 0 : index
    %38 = vector.load %arg16[%c20, %c0_23] : memref<128x128xbf16, #tpu.memory_space<vmem>>, vector<2x128xbf16>
    %c32 = arith.constant 32 : index
    %c0_24 = arith.constant 0 : index
    %39 = vector.load %arg16[%c32, %c0_24] : memref<128x128xbf16, #tpu.memory_space<vmem>>, vector<2x128xbf16>
    %c34 = arith.constant 34 : index
    %c0_25 = arith.constant 0 : index
    %40 = vector.load %arg16[%c34, %c0_25] : memref<128x128xbf16, #tpu.memory_space<vmem>>, vector<2x128xbf16>
    %c36 = arith.constant 36 : index
    %c0_26 = arith.constant 0 : index
    %41 = vector.load %arg16[%c36, %c0_26] : memref<128x128xbf16, #tpu.memory_space<vmem>>, vector<2x128xbf16>
    %42 = tpu.concatenate %32, %32, %32, %32, %32, %33, %34, %35, %32, %36, %37, %38, %32, %39, %40, %41 in 1 : vector<2x128xbf16>, vector<2x128xbf16>, vector<2x128xbf16>, vector<2x128xbf16>, vector<2x128xbf16>, vector<2x128xbf16>, vector<2x128xbf16>, vector<2x128xbf16>, vector<2x128xbf16>, vector<2x128xbf16>, vector<2x128xbf16>, vector<2x128xbf16>, vector<2x128xbf16>, vector<2x128xbf16>, vector<2x128xbf16>, vector<2x128xbf16> -> vector<2x2048xbf16>
    %c0_27 = arith.constant 0 : index
    %c0_28 = arith.constant 0 : index
    %43 = vector.load %arg17[%c0_27, %c0_28] : memref<32x2048xbf16, #tpu.memory_space<vmem>>, vector<2x2048xbf16>
    tpu.vector_store %arg17[%c0_27, %c0_28], %42 {strides = array<i32>} : memref<32x2048xbf16, #tpu.memory_space<vmem>>, vector<2x2048xbf16>,
    %c2_29 = arith.constant 2 : index
    %c0_30 = arith.constant 0 : index
    %44 = vector.load %arg16[%c2_29, %c0_30] : memref<128x128xbf16, #tpu.memory_space<vmem>>, vector<2x128xbf16>
    %c4_31 = arith.constant 4 : index
    %c0_32 = arith.constant 0 : index
    %45 = vector.load %arg16[%c4_31, %c0_32] : memref<128x128xbf16, #tpu.memory_space<vmem>>, vector<2x128xbf16>
    %c6 = arith.constant 6 : index
    %c0_33 = arith.constant 0 : index
    %46 = vector.load %arg16[%c6, %c0_33] : memref<128x128xbf16, #tpu.memory_space<vmem>>, vector<2x128xbf16>
    %c8 = arith.constant 8 : index
    %c0_34 = arith.constant 0 : index
    %47 = vector.load %arg16[%c8, %c0_34] : memref<128x128xbf16, #tpu.memory_space<vmem>>, vector<2x128xbf16>
    %c18_35 = arith.constant 18 : index
    %c0_36 = arith.constant 0 : index
    %48 = vector.load %arg16[%c18_35, %c0_36] : memref<128x128xbf16, #tpu.memory_space<vmem>>, vector<2x128xbf16>
    %c20_37 = arith.constant 20 : index
    %c0_38 = arith.constant 0 : index
    %49 = vector.load %arg16[%c20_37, %c0_38] : memref<128x128xbf16, #tpu.memory_space<vmem>>, vector<2x128xbf16>
    %c22 = arith.constant 22 : index
    %c0_39 = arith.constant 0 : index
    %50 = vector.load %arg16[%c22, %c0_39] : memref<128x128xbf16, #tpu.memory_space<vmem>>, vector<2x128xbf16>
    %c24 = arith.constant 24 : index
    %c0_40 = arith.constant 0 : index
    %51 = vector.load %arg16[%c24, %c0_40] : memref<128x128xbf16, #tpu.memory_space<vmem>>, vector<2x128xbf16>
    %c34_41 = arith.constant 34 : index
    %c0_42 = arith.constant 0 : index
    %52 = vector.load %arg16[%c34_41, %c0_42] : memref<128x128xbf16, #tpu.memory_space<vmem>>, vector<2x128xbf16>
    %c36_43 = arith.constant 36 : index
    %c0_44 = arith.constant 0 : index
    %53 = vector.load %arg16[%c36_43, %c0_44] : memref<128x128xbf16, #tpu.memory_space<vmem>>, vector<2x128xbf16>
    %c38 = arith.constant 38 : index
    %c0_45 = arith.constant 0 : index
    %54 = vector.load %arg16[%c38, %c0_45] : memref<128x128xbf16, #tpu.memory_space<vmem>>, vector<2x128xbf16>
    %c40 = arith.constant 40 : index
    %c0_46 = arith.constant 0 : index
    %55 = vector.load %arg16[%c40, %c0_46] : memref<128x128xbf16, #tpu.memory_space<vmem>>, vector<2x128xbf16>
    %56 = tpu.concatenate %32, %32, %32, %32, %44, %45, %46, %47, %48, %49, %50, %51, %52, %53, %54, %55 in 1 : vector<2x128xbf16>, vector<2x128xbf16>, vector<2x128xbf16>, vector<2x128xbf16>, vector<2x128xbf16>, vector<2x128xbf16>, vector<2x128xbf16>, vector<2x128xbf16>, vector<2x128xbf16>, vector<2x128xbf16>, vector<2x128xbf16>, vector<2x128xbf16>, vector<2x128xbf16>, vector<2x128xbf16>, vector<2x128xbf16>, vector<2x128xbf16> -> vector<2x2048xbf16>
    %c2_47 = arith.constant 2 : index
    %c0_48 = arith.constant 0 : index
    %57 = vector.load %arg17[%c2_47, %c0_48] : memref<32x2048xbf16, #tpu.memory_space<vmem>>, vector<2x2048xbf16>
    tpu.vector_store %arg17[%c2_47, %c0_48], %56 {strides = array<i32>} : memref<32x2048xbf16, #tpu.memory_space<vmem>>, vector<2x2048xbf16>,
    %c6_49 = arith.constant 6 : index
    %c0_50 = arith.constant 0 : index
    %58 = vector.load %arg16[%c6_49, %c0_50] : memref<128x128xbf16, #tpu.memory_space<vmem>>, vector<2x128xbf16>
    %c8_51 = arith.constant 8 : index
    %c0_52 = arith.constant 0 : index
    %59 = vector.load %arg16[%c8_51, %c0_52] : memref<128x128xbf16, #tpu.memory_space<vmem>>, vector<2x128xbf16>
    %c10 = arith.constant 10 : index
    %c0_53 = arith.constant 0 : index
    %60 = vector.load %arg16[%c10, %c0_53] : memref<128x128xbf16, #tpu.memory_space<vmem>>, vector<2x128xbf16>
    %c12 = arith.constant 12 : index
    %c0_54 = arith.constant 0 : index
    %61 = vector.load %arg16[%c12, %c0_54] : memref<128x128xbf16, #tpu.memory_space<vmem>>, vector<2x128xbf16>
    %c22_55 = arith.constant 22 : index
    %c0_56 = arith.constant 0 : index
    %62 = vector.load %arg16[%c22_55, %c0_56] : memref<128x128xbf16, #tpu.memory_space<vmem>>, vector<2x128xbf16>
    %c24_57 = arith.constant 24 : index
    %c0_58 = arith.constant 0 : index
    %63 = vector.load %arg16[%c24_57, %c0_58] : memref<128x128xbf16, #tpu.memory_space<vmem>>, vector<2x128xbf16>
    %c26 = arith.constant 26 : index
    %c0_59 = arith.constant 0 : index
    %64 = vector.load %arg16[%c26, %c0_59] : memref<128x128xbf16, #tpu.memory_space<vmem>>, vector<2x128xbf16>
    %c28 = arith.constant 28 : index
    %c0_60 = arith.constant 0 : index
    %65 = vector.load %arg16[%c28, %c0_60] : memref<128x128xbf16, #tpu.memory_space<vmem>>, vector<2x128xbf16>
    %c38_61 = arith.constant 38 : index
    %c0_62 = arith.constant 0 : index
    %66 = vector.load %arg16[%c38_61, %c0_62] : memref<128x128xbf16, #tpu.memory_space<vmem>>, vector<2x128xbf16>
    %c40_63 = arith.constant 40 : index
    %c0_64 = arith.constant 0 : index
    %67 = vector.load %arg16[%c40_63, %c0_64] : memref<128x128xbf16, #tpu.memory_space<vmem>>, vector<2x128xbf16>
    %c42 = arith.constant 42 : index
    %c0_65 = arith.constant 0 : index
    %68 = vector.load %arg16[%c42, %c0_65] : memref<128x128xbf16, #tpu.memory_space<vmem>>, vector<2x128xbf16>
    %c44 = arith.constant 44 : index
    %c0_66 = arith.constant 0 : index
    %69 = vector.load %arg16[%c44, %c0_66] : memref<128x128xbf16, #tpu.memory_space<vmem>>, vector<2x128xbf16>
    %70 = tpu.concatenate %32, %32, %32, %32, %58, %59, %60, %61, %62, %63, %64, %65, %66, %67, %68, %69 in 1 : vector<2x128xbf16>, vector<2x128xbf16>, vector<2x128xbf16>, vector<2x128xbf16>, vector<2x128xbf16>, vector<2x128xbf16>, vector<2x128xbf16>, vector<2x128xbf16>, vector<2x128xbf16>, vector<2x128xbf16>, vector<2x128xbf16>, vector<2x128xbf16>, vector<2x128xbf16>, vector<2x128xbf16>, vector<2x128xbf16>, vector<2x128xbf16> -> vector<2x2048xbf16>
    %c4_67 = arith.constant 4 : index
    %c0_68 = arith.constant 0 : index
    %71 = vector.load %arg17[%c4_67, %c0_68] : memref<32x2048xbf16, #tpu.memory_space<vmem>>, vector<2x2048xbf16>
    tpu.vector_store %arg17[%c4_67, %c0_68], %70 {strides = array<i32>} : memref<32x2048xbf16, #tpu.memory_space<vmem>>, vector<2x2048xbf16>,
    %c10_69 = arith.constant 10 : index
    %c0_70 = arith.constant 0 : index
    %72 = vector.load %arg16[%c10_69, %c0_70] : memref<128x128xbf16, #tpu.memory_space<vmem>>, vector<2x128xbf16>
    %c12_71 = arith.constant 12 : index
    %c0_72 = arith.constant 0 : index
    %73 = vector.load %arg16[%c12_71, %c0_72] : memref<128x128xbf16, #tpu.memory_space<vmem>>, vector<2x128xbf16>
    %c14 = arith.constant 14 : index
    %c0_73 = arith.constant 0 : index
    %74 = vector.load %arg16[%c14, %c0_73] : memref<128x128xbf16, #tpu.memory_space<vmem>>, vector<2x128xbf16>
    %c26_74 = arith.constant 26 : index
    %c0_75 = arith.constant 0 : index
    %75 = vector.load %arg16[%c26_74, %c0_75] : memref<128x128xbf16, #tpu.memory_space<vmem>>, vector<2x128xbf16>
    %c28_76 = arith.constant 28 : index
    %c0_77 = arith.constant 0 : index
    %76 = vector.load %arg16[%c28_76, %c0_77] : memref<128x128xbf16, #tpu.memory_space<vmem>>, vector<2x128xbf16>
    %c30 = arith.constant 30 : index
    %c0_78 = arith.constant 0 : index
    %77 = vector.load %arg16[%c30, %c0_78] : memref<128x128xbf16, #tpu.memory_space<vmem>>, vector<2x128xbf16>
    %c42_79 = arith.constant 42 : index
    %c0_80 = arith.constant 0 : index
    %78 = vector.load %arg16[%c42_79, %c0_80] : memref<128x128xbf16, #tpu.memory_space<vmem>>, vector<2x128xbf16>
    %c44_81 = arith.constant 44 : index
    %c0_82 = arith.constant 0 : index
    %79 = vector.load %arg16[%c44_81, %c0_82] : memref<128x128xbf16, #tpu.memory_space<vmem>>, vector<2x128xbf16>
    %c46 = arith.constant 46 : index
    %c0_83 = arith.constant 0 : index
    %80 = vector.load %arg16[%c46, %c0_83] : memref<128x128xbf16, #tpu.memory_space<vmem>>, vector<2x128xbf16>
    %81 = tpu.concatenate %32, %32, %32, %32, %72, %73, %74, %32, %75, %76, %77, %32, %78, %79, %80, %32 in 1 : vector<2x128xbf16>, vector<2x128xbf16>, vector<2x128xbf16>, vector<2x128xbf16>, vector<2x128xbf16>, vector<2x128xbf16>, vector<2x128xbf16>, vector<2x128xbf16>, vector<2x128xbf16>, vector<2x128xbf16>, vector<2x128xbf16>, vector<2x128xbf16>, vector<2x128xbf16>, vector<2x128xbf16>, vector<2x128xbf16>, vector<2x128xbf16> -> vector<2x2048xbf16>
    %c6_84 = arith.constant 6 : index
    %c0_85 = arith.constant 0 : index
    %82 = vector.load %arg17[%c6_84, %c0_85] : memref<32x2048xbf16, #tpu.memory_space<vmem>>, vector<2x2048xbf16>
    tpu.vector_store %arg17[%c6_84, %c0_85], %81 {strides = array<i32>} : memref<32x2048xbf16, #tpu.memory_space<vmem>>, vector<2x2048xbf16>,
    %c16_86 = arith.constant 16 : index
    %c0_87 = arith.constant 0 : index
    %83 = vector.load %arg16[%c16_86, %c0_87] : memref<128x128xbf16, #tpu.memory_space<vmem>>, vector<2x128xbf16>
    %c18_88 = arith.constant 18 : index
    %c0_89 = arith.constant 0 : index
    %84 = vector.load %arg16[%c18_88, %c0_89] : memref<128x128xbf16, #tpu.memory_space<vmem>>, vector<2x128xbf16>
    %c20_90 = arith.constant 20 : index
    %c0_91 = arith.constant 0 : index
    %85 = vector.load %arg16[%c20_90, %c0_91] : memref<128x128xbf16, #tpu.memory_space<vmem>>, vector<2x128xbf16>
    %c32_92 = arith.constant 32 : index
    %c0_93 = arith.constant 0 : index
    %86 = vector.load %arg16[%c32_92, %c0_93] : memref<128x128xbf16, #tpu.memory_space<vmem>>, vector<2x128xbf16>
    %c34_94 = arith.constant 34 : index
    %c0_95 = arith.constant 0 : index
    %87 = vector.load %arg16[%c34_94, %c0_95] : memref<128x128xbf16, #tpu.memory_space<vmem>>, vector<2x128xbf16>
    %c36_96 = arith.constant 36 : index
    %c0_97 = arith.constant 0 : index
    %88 = vector.load %arg16[%c36_96, %c0_97] : memref<128x128xbf16, #tpu.memory_space<vmem>>, vector<2x128xbf16>
    %c48 = arith.constant 48 : index
    %c0_98 = arith.constant 0 : index
    %89 = vector.load %arg16[%c48, %c0_98] : memref<128x128xbf16, #tpu.memory_space<vmem>>, vector<2x128xbf16>
    %c50 = arith.constant 50 : index
    %c0_99 = arith.constant 0 : index
    %90 = vector.load %arg16[%c50, %c0_99] : memref<128x128xbf16, #tpu.memory_space<vmem>>, vector<2x128xbf16>
    %c52 = arith.constant 52 : index
    %c0_100 = arith.constant 0 : index
    %91 = vector.load %arg16[%c52, %c0_100] : memref<128x128xbf16, #tpu.memory_space<vmem>>, vector<2x128xbf16>
    %c64 = arith.constant 64 : index
    %c0_101 = arith.constant 0 : index
    %92 = vector.load %arg16[%c64, %c0_101] : memref<128x128xbf16, #tpu.memory_space<vmem>>, vector<2x128xbf16>
    %c66 = arith.constant 66 : index
    %c0_102 = arith.constant 0 : index
    %93 = vector.load %arg16[%c66, %c0_102] : memref<128x128xbf16, #tpu.memory_space<vmem>>, vector<2x128xbf16>
    %c68 = arith.constant 68 : index
    %c0_103 = arith.constant 0 : index
    %94 = vector.load %arg16[%c68, %c0_103] : memref<128x128xbf16, #tpu.memory_space<vmem>>, vector<2x128xbf16>
    %95 = tpu.concatenate %32, %83, %84, %85, %32, %86, %87, %88, %32, %89, %90, %91, %32, %92, %93, %94 in 1 : vector<2x128xbf16>, vector<2x128xbf16>, vector<2x128xbf16>, vector<2x128xbf16>, vector<2x128xbf16>, vector<2x128xbf16>, vector<2x128xbf16>, vector<2x128xbf16>, vector<2x128xbf16>, vector<2x128xbf16>, vector<2x128xbf16>, vector<2x128xbf16>, vector<2x128xbf16>, vector<2x128xbf16>, vector<2x128xbf16>, vector<2x128xbf16> -> vector<2x2048xbf16>
    %c8_104 = arith.constant 8 : index
    %c0_105 = arith.constant 0 : index
    %96 = vector.load %arg17[%c8_104, %c0_105] : memref<32x2048xbf16, #tpu.memory_space<vmem>>, vector<2x2048xbf16>
    tpu.vector_store %arg17[%c8_104, %c0_105], %95 {strides = array<i32>} : memref<32x2048xbf16, #tpu.memory_space<vmem>>, vector<2x2048xbf16>,
    %c18_106 = arith.constant 18 : index
    %c0_107 = arith.constant 0 : index
    %97 = vector.load %arg16[%c18_106, %c0_107] : memref<128x128xbf16, #tpu.memory_space<vmem>>, vector<2x128xbf16>
    %c20_108 = arith.constant 20 : index
    %c0_109 = arith.constant 0 : index
    %98 = vector.load %arg16[%c20_108, %c0_109] : memref<128x128xbf16, #tpu.memory_space<vmem>>, vector<2x128xbf16>
    %c22_110 = arith.constant 22 : index
    %c0_111 = arith.constant 0 : index
    %99 = vector.load %arg16[%c22_110, %c0_111] : memref<128x128xbf16, #tpu.memory_space<vmem>>, vector<2x128xbf16>
    %c24_112 = arith.constant 24 : index
    %c0_113 = arith.constant 0 : index
    %100 = vector.load %arg16[%c24_112, %c0_113] : memref<128x128xbf16, #tpu.memory_space<vmem>>, vector<2x128xbf16>
    %c34_114 = arith.constant 34 : index
    %c0_115 = arith.constant 0 : index
    %101 = vector.load %arg16[%c34_114, %c0_115] : memref<128x128xbf16, #tpu.memory_space<vmem>>, vector<2x128xbf16>
    %c36_116 = arith.constant 36 : index
    %c0_117 = arith.constant 0 : index
    %102 = vector.load %arg16[%c36_116, %c0_117] : memref<128x128xbf16, #tpu.memory_space<vmem>>, vector<2x128xbf16>
    %c38_118 = arith.constant 38 : index
    %c0_119 = arith.constant 0 : index
    %103 = vector.load %arg16[%c38_118, %c0_119] : memref<128x128xbf16, #tpu.memory_space<vmem>>, vector<2x128xbf16>
    %c40_120 = arith.constant 40 : index
    %c0_121 = arith.constant 0 : index
    %104 = vector.load %arg16[%c40_120, %c0_121] : memref<128x128xbf16, #tpu.memory_space<vmem>>, vector<2x128xbf16>
    %c50_122 = arith.constant 50 : index
    %c0_123 = arith.constant 0 : index
    %105 = vector.load %arg16[%c50_122, %c0_123] : memref<128x128xbf16, #tpu.memory_space<vmem>>, vector<2x128xbf16>
    %c52_124 = arith.constant 52 : index
    %c0_125 = arith.constant 0 : index
    %106 = vector.load %arg16[%c52_124, %c0_125] : memref<128x128xbf16, #tpu.memory_space<vmem>>, vector<2x128xbf16>
    %c54 = arith.constant 54 : index
    %c0_126 = arith.constant 0 : index
    %107 = vector.load %arg16[%c54, %c0_126] : memref<128x128xbf16, #tpu.memory_space<vmem>>, vector<2x128xbf16>
    %c56 = arith.constant 56 : index
    %c0_127 = arith.constant 0 : index
    %108 = vector.load %arg16[%c56, %c0_127] : memref<128x128xbf16, #tpu.memory_space<vmem>>, vector<2x128xbf16>
    %c66_128 = arith.constant 66 : index
    %c0_129 = arith.constant 0 : index
    %109 = vector.load %arg16[%c66_128, %c0_129] : memref<128x128xbf16, #tpu.memory_space<vmem>>, vector<2x128xbf16>
    %c68_130 = arith.constant 68 : index
    %c0_131 = arith.constant 0 : index
    %110 = vector.load %arg16[%c68_130, %c0_131] : memref<128x128xbf16, #tpu.memory_space<vmem>>, vector<2x128xbf16>
    %c70 = arith.constant 70 : index
    %c0_132 = arith.constant 0 : index
    %111 = vector.load %arg16[%c70, %c0_132] : memref<128x128xbf16, #tpu.memory_space<vmem>>, vector<2x128xbf16>
    %c72 = arith.constant 72 : index
    %c0_133 = arith.constant 0 : index
    %112 = vector.load %arg16[%c72, %c0_133] : memref<128x128xbf16, #tpu.memory_space<vmem>>, vector<2x128xbf16>
    %113 = tpu.concatenate %97, %98, %99, %100, %101, %102, %103, %104, %105, %106, %107, %108, %109, %110, %111, %112 in 1 : vector<2x128xbf16>, vector<2x128xbf16>, vector<2x128xbf16>, vector<2x128xbf16>, vector<2x128xbf16>, vector<2x128xbf16>, vector<2x128xbf16>, vector<2x128xbf16>, vector<2x128xbf16>, vector<2x128xbf16>, vector<2x128xbf16>, vector<2x128xbf16>, vector<2x128xbf16>, vector<2x128xbf16>, vector<2x128xbf16>, vector<2x128xbf16> -> vector<2x2048xbf16>
    %c10_134 = arith.constant 10 : index
    %c0_135 = arith.constant 0 : index
    %114 = vector.load %arg17[%c10_134, %c0_135] : memref<32x2048xbf16, #tpu.memory_space<vmem>>, vector<2x2048xbf16>
    tpu.vector_store %arg17[%c10_134, %c0_135], %113 {strides = array<i32>} : memref<32x2048xbf16, #tpu.memory_space<vmem>>, vector<2x2048xbf16>,
    %c22_136 = arith.constant 22 : index
    %c0_137 = arith.constant 0 : index
    %115 = vector.load %arg16[%c22_136, %c0_137] : memref<128x128xbf16, #tpu.memory_space<vmem>>, vector<2x128xbf16>
    %c24_138 = arith.constant 24 : index
    %c0_139 = arith.constant 0 : index
    %116 = vector.load %arg16[%c24_138, %c0_139] : memref<128x128xbf16, #tpu.memory_space<vmem>>, vector<2x128xbf16>
    %c26_140 = arith.constant 26 : index
    %c0_141 = arith.constant 0 : index
    %117 = vector.load %arg16[%c26_140, %c0_141] : memref<128x128xbf16, #tpu.memory_space<vmem>>, vector<2x128xbf16>
    %c28_142 = arith.constant 28 : index
    %c0_143 = arith.constant 0 : index
    %118 = vector.load %arg16[%c28_142, %c0_143] : memref<128x128xbf16, #tpu.memory_space<vmem>>, vector<2x128xbf16>
    %c38_144 = arith.constant 38 : index
    %c0_145 = arith.constant 0 : index
    %119 = vector.load %arg16[%c38_144, %c0_145] : memref<128x128xbf16, #tpu.memory_space<vmem>>, vector<2x128xbf16>
    %c40_146 = arith.constant 40 : index
    %c0_147 = arith.constant 0 : index
    %120 = vector.load %arg16[%c40_146, %c0_147] : memref<128x128xbf16, #tpu.memory_space<vmem>>, vector<2x128xbf16>
    %c42_148 = arith.constant 42 : index
    %c0_149 = arith.constant 0 : index
    %121 = vector.load %arg16[%c42_148, %c0_149] : memref<128x128xbf16, #tpu.memory_space<vmem>>, vector<2x128xbf16>
    %c44_150 = arith.constant 44 : index
    %c0_151 = arith.constant 0 : index
    %122 = vector.load %arg16[%c44_150, %c0_151] : memref<128x128xbf16, #tpu.memory_space<vmem>>, vector<2x128xbf16>
    %c54_152 = arith.constant 54 : index
    %c0_153 = arith.constant 0 : index
    %123 = vector.load %arg16[%c54_152, %c0_153] : memref<128x128xbf16, #tpu.memory_space<vmem>>, vector<2x128xbf16>
    %c56_154 = arith.constant 56 : index
    %c0_155 = arith.constant 0 : index
    %124 = vector.load %arg16[%c56_154, %c0_155] : memref<128x128xbf16, #tpu.memory_space<vmem>>, vector<2x128xbf16>
    %c58 = arith.constant 58 : index
    %c0_156 = arith.constant 0 : index
    %125 = vector.load %arg16[%c58, %c0_156] : memref<128x128xbf16, #tpu.memory_space<vmem>>, vector<2x128xbf16>
    %c60 = arith.constant 60 : index
    %c0_157 = arith.constant 0 : index
    %126 = vector.load %arg16[%c60, %c0_157] : memref<128x128xbf16, #tpu.memory_space<vmem>>, vector<2x128xbf16>
    %c70_158 = arith.constant 70 : index
    %c0_159 = arith.constant 0 : index
    %127 = vector.load %arg16[%c70_158, %c0_159] : memref<128x128xbf16, #tpu.memory_space<vmem>>, vector<2x128xbf16>
    %c72_160 = arith.constant 72 : index
    %c0_161 = arith.constant 0 : index
    %128 = vector.load %arg16[%c72_160, %c0_161] : memref<128x128xbf16, #tpu.memory_space<vmem>>, vector<2x128xbf16>
    %c74 = arith.constant 74 : index
    %c0_162 = arith.constant 0 : index
    %129 = vector.load %arg16[%c74, %c0_162] : memref<128x128xbf16, #tpu.memory_space<vmem>>, vector<2x128xbf16>
    %c76 = arith.constant 76 : index
    %c0_163 = arith.constant 0 : index
    %130 = vector.load %arg16[%c76, %c0_163] : memref<128x128xbf16, #tpu.memory_space<vmem>>, vector<2x128xbf16>
    %131 = tpu.concatenate %115, %116, %117, %118, %119, %120, %121, %122, %123, %124, %125, %126, %127, %128, %129, %130 in 1 : vector<2x128xbf16>, vector<2x128xbf16>, vector<2x128xbf16>, vector<2x128xbf16>, vector<2x128xbf16>, vector<2x128xbf16>, vector<2x128xbf16>, vector<2x128xbf16>, vector<2x128xbf16>, vector<2x128xbf16>, vector<2x128xbf16>, vector<2x128xbf16>, vector<2x128xbf16>, vector<2x128xbf16>, vector<2x128xbf16>, vector<2x128xbf16> -> vector<2x2048xbf16>
    %c12_164 = arith.constant 12 : index
    %c0_165 = arith.constant 0 : index
    %132 = vector.load %arg17[%c12_164, %c0_165] : memref<32x2048xbf16, #tpu.memory_space<vmem>>, vector<2x2048xbf16>
    tpu.vector_store %arg17[%c12_164, %c0_165], %131 {strides = array<i32>} : memref<32x2048xbf16, #tpu.memory_space<vmem>>, vector<2x2048xbf16>,
    %c26_166 = arith.constant 26 : index
    %c0_167 = arith.constant 0 : index
    %133 = vector.load %arg16[%c26_166, %c0_167] : memref<128x128xbf16, #tpu.memory_space<vmem>>, vector<2x128xbf16>
    %c28_168 = arith.constant 28 : index
    %c0_169 = arith.constant 0 : index
    %134 = vector.load %arg16[%c28_168, %c0_169] : memref<128x128xbf16, #tpu.memory_space<vmem>>, vector<2x128xbf16>
    %c30_170 = arith.constant 30 : index
    %c0_171 = arith.constant 0 : index
    %135 = vector.load %arg16[%c30_170, %c0_171] : memref<128x128xbf16, #tpu.memory_space<vmem>>, vector<2x128xbf16>
    %c42_172 = arith.constant 42 : index
    %c0_173 = arith.constant 0 : index
    %136 = vector.load %arg16[%c42_172, %c0_173] : memref<128x128xbf16, #tpu.memory_space<vmem>>, vector<2x128xbf16>
    %c44_174 = arith.constant 44 : index
    %c0_175 = arith.constant 0 : index
    %137 = vector.load %arg16[%c44_174, %c0_175] : memref<128x128xbf16, #tpu.memory_space<vmem>>, vector<2x128xbf16>
    %c46_176 = arith.constant 46 : index
    %c0_177 = arith.constant 0 : index
    %138 = vector.load %arg16[%c46_176, %c0_177] : memref<128x128xbf16, #tpu.memory_space<vmem>>, vector<2x128xbf16>
    %c58_178 = arith.constant 58 : index
    %c0_179 = arith.constant 0 : index
    %139 = vector.load %arg16[%c58_178, %c0_179] : memref<128x128xbf16, #tpu.memory_space<vmem>>, vector<2x128xbf16>
    %c60_180 = arith.constant 60 : index
    %c0_181 = arith.constant 0 : index
    %140 = vector.load %arg16[%c60_180, %c0_181] : memref<128x128xbf16, #tpu.memory_space<vmem>>, vector<2x128xbf16>
    %c62 = arith.constant 62 : index
    %c0_182 = arith.constant 0 : index
    %141 = vector.load %arg16[%c62, %c0_182] : memref<128x128xbf16, #tpu.memory_space<vmem>>, vector<2x128xbf16>
    %c74_183 = arith.constant 74 : index
    %c0_184 = arith.constant 0 : index
    %142 = vector.load %arg16[%c74_183, %c0_184] : memref<128x128xbf16, #tpu.memory_space<vmem>>, vector<2x128xbf16>
    %c76_185 = arith.constant 76 : index
    %c0_186 = arith.constant 0 : index
    %143 = vector.load %arg16[%c76_185, %c0_186] : memref<128x128xbf16, #tpu.memory_space<vmem>>, vector<2x128xbf16>
    %c78 = arith.constant 78 : index
    %c0_187 = arith.constant 0 : index
    %144 = vector.load %arg16[%c78, %c0_187] : memref<128x128xbf16, #tpu.memory_space<vmem>>, vector<2x128xbf16>
    %145 = tpu.concatenate %133, %134, %135, %32, %136, %137, %138, %32, %139, %140, %141, %32, %142, %143, %144, %32 in 1 : vector<2x128xbf16>, vector<2x128xbf16>, vector<2x128xbf16>, vector<2x128xbf16>, vector<2x128xbf16>, vector<2x128xbf16>, vector<2x128xbf16>, vector<2x128xbf16>, vector<2x128xbf16>, vector<2x128xbf16>, vector<2x128xbf16>, vector<2x128xbf16>, vector<2x128xbf16>, vector<2x128xbf16>, vector<2x128xbf16>, vector<2x128xbf16> -> vector<2x2048xbf16>
    %c14_188 = arith.constant 14 : index
    %c0_189 = arith.constant 0 : index
    %146 = vector.load %arg17[%c14_188, %c0_189] : memref<32x2048xbf16, #tpu.memory_space<vmem>>, vector<2x2048xbf16>
    tpu.vector_store %arg17[%c14_188, %c0_189], %145 {strides = array<i32>} : memref<32x2048xbf16, #tpu.memory_space<vmem>>, vector<2x2048xbf16>,
    %c48_190 = arith.constant 48 : index
    %c0_191 = arith.constant 0 : index
    %147 = vector.load %arg16[%c48_190, %c0_191] : memref<128x128xbf16, #tpu.memory_space<vmem>>, vector<2x128xbf16>
    %c50_192 = arith.constant 50 : index
    %c0_193 = arith.constant 0 : index
    %148 = vector.load %arg16[%c50_192, %c0_193] : memref<128x128xbf16, #tpu.memory_space<vmem>>, vector<2x128xbf16>
    %c52_194 = arith.constant 52 : index
    %c0_195 = arith.constant 0 : index
    %149 = vector.load %arg16[%c52_194, %c0_195] : memref<128x128xbf16, #tpu.memory_space<vmem>>, vector<2x128xbf16>
    %c64_196 = arith.constant 64 : index
    %c0_197 = arith.constant 0 : index
    %150 = vector.load %arg16[%c64_196, %c0_197] : memref<128x128xbf16, #tpu.memory_space<vmem>>, vector<2x128xbf16>
    %c66_198 = arith.constant 66 : index
    %c0_199 = arith.constant 0 : index
    %151 = vector.load %arg16[%c66_198, %c0_199] : memref<128x128xbf16, #tpu.memory_space<vmem>>, vector<2x128xbf16>
    %c68_200 = arith.constant 68 : index
    %c0_201 = arith.constant 0 : index
    %152 = vector.load %arg16[%c68_200, %c0_201] : memref<128x128xbf16, #tpu.memory_space<vmem>>, vector<2x128xbf16>
    %c80 = arith.constant 80 : index
    %c0_202 = arith.constant 0 : index
    %153 = vector.load %arg16[%c80, %c0_202] : memref<128x128xbf16, #tpu.memory_space<vmem>>, vector<2x128xbf16>
    %c82 = arith.constant 82 : index
    %c0_203 = arith.constant 0 : index
    %154 = vector.load %arg16[%c82, %c0_203] : memref<128x128xbf16, #tpu.memory_space<vmem>>, vector<2x128xbf16>
    %c84 = arith.constant 84 : index
    %c0_204 = arith.constant 0 : index
    %155 = vector.load %arg16[%c84, %c0_204] : memref<128x128xbf16, #tpu.memory_space<vmem>>, vector<2x128xbf16>
    %c96 = arith.constant 96 : index
    %c0_205 = arith.constant 0 : index
    %156 = vector.load %arg16[%c96, %c0_205] : memref<128x128xbf16, #tpu.memory_space<vmem>>, vector<2x128xbf16>
    %c98 = arith.constant 98 : index
    %c0_206 = arith.constant 0 : index
    %157 = vector.load %arg16[%c98, %c0_206] : memref<128x128xbf16, #tpu.memory_space<vmem>>, vector<2x128xbf16>
    %c100 = arith.constant 100 : index
    %c0_207 = arith.constant 0 : index
    %158 = vector.load %arg16[%c100, %c0_207] : memref<128x128xbf16, #tpu.memory_space<vmem>>, vector<2x128xbf16>
    %159 = tpu.concatenate %32, %147, %148, %149, %32, %150, %151, %152, %32, %153, %154, %155, %32, %156, %157, %158 in 1 : vector<2x128xbf16>, vector<2x128xbf16>, vector<2x128xbf16>, vector<2x128xbf16>, vector<2x128xbf16>, vector<2x128xbf16>, vector<2x128xbf16>, vector<2x128xbf16>, vector<2x128xbf16>, vector<2x128xbf16>, vector<2x128xbf16>, vector<2x128xbf16>, vector<2x128xbf16>, vector<2x128xbf16>, vector<2x128xbf16>, vector<2x128xbf16> -> vector<2x2048xbf16>
    %c16_208 = arith.constant 16 : index
    %c0_209 = arith.constant 0 : index
    %160 = vector.load %arg17[%c16_208, %c0_209] : memref<32x2048xbf16, #tpu.memory_space<vmem>>, vector<2x2048xbf16>
    tpu.vector_store %arg17[%c16_208, %c0_209], %159 {strides = array<i32>} : memref<32x2048xbf16, #tpu.memory_space<vmem>>, vector<2x2048xbf16>,
    %c50_210 = arith.constant 50 : index
    %c0_211 = arith.constant 0 : index
    %161 = vector.load %arg16[%c50_210, %c0_211] : memref<128x128xbf16, #tpu.memory_space<vmem>>, vector<2x128xbf16>
    %c52_212 = arith.constant 52 : index
    %c0_213 = arith.constant 0 : index
    %162 = vector.load %arg16[%c52_212, %c0_213] : memref<128x128xbf16, #tpu.memory_space<vmem>>, vector<2x128xbf16>
    %c54_214 = arith.constant 54 : index
    %c0_215 = arith.constant 0 : index
    %163 = vector.load %arg16[%c54_214, %c0_215] : memref<128x128xbf16, #tpu.memory_space<vmem>>, vector<2x128xbf16>
    %c56_216 = arith.constant 56 : index
    %c0_217 = arith.constant 0 : index
    %164 = vector.load %arg16[%c56_216, %c0_217] : memref<128x128xbf16, #tpu.memory_space<vmem>>, vector<2x128xbf16>
    %c66_218 = arith.constant 66 : index
    %c0_219 = arith.constant 0 : index
    %165 = vector.load %arg16[%c66_218, %c0_219] : memref<128x128xbf16, #tpu.memory_space<vmem>>, vector<2x128xbf16>
    %c68_220 = arith.constant 68 : index
    %c0_221 = arith.constant 0 : index
    %166 = vector.load %arg16[%c68_220, %c0_221] : memref<128x128xbf16, #tpu.memory_space<vmem>>, vector<2x128xbf16>
    %c70_222 = arith.constant 70 : index
    %c0_223 = arith.constant 0 : index
    %167 = vector.load %arg16[%c70_222, %c0_223] : memref<128x128xbf16, #tpu.memory_space<vmem>>, vector<2x128xbf16>
    %c72_224 = arith.constant 72 : index
    %c0_225 = arith.constant 0 : index
    %168 = vector.load %arg16[%c72_224, %c0_225] : memref<128x128xbf16, #tpu.memory_space<vmem>>, vector<2x128xbf16>
    %c82_226 = arith.constant 82 : index
    %c0_227 = arith.constant 0 : index
    %169 = vector.load %arg16[%c82_226, %c0_227] : memref<128x128xbf16, #tpu.memory_space<vmem>>, vector<2x128xbf16>
    %c84_228 = arith.constant 84 : index
    %c0_229 = arith.constant 0 : index
    %170 = vector.load %arg16[%c84_228, %c0_229] : memref<128x128xbf16, #tpu.memory_space<vmem>>, vector<2x128xbf16>
    %c86 = arith.constant 86 : index
    %c0_230 = arith.constant 0 : index
    %171 = vector.load %arg16[%c86, %c0_230] : memref<128x128xbf16, #tpu.memory_space<vmem>>, vector<2x128xbf16>
    %c88 = arith.constant 88 : index
    %c0_231 = arith.constant 0 : index
    %172 = vector.load %arg16[%c88, %c0_231] : memref<128x128xbf16, #tpu.memory_space<vmem>>, vector<2x128xbf16>
    %c98_232 = arith.constant 98 : index
    %c0_233 = arith.constant 0 : index
    %173 = vector.load %arg16[%c98_232, %c0_233] : memref<128x128xbf16, #tpu.memory_space<vmem>>, vector<2x128xbf16>
    %c100_234 = arith.constant 100 : index
    %c0_235 = arith.constant 0 : index
    %174 = vector.load %arg16[%c100_234, %c0_235] : memref<128x128xbf16, #tpu.memory_space<vmem>>, vector<2x128xbf16>
    %c102 = arith.constant 102 : index
    %c0_236 = arith.constant 0 : index
    %175 = vector.load %arg16[%c102, %c0_236] : memref<128x128xbf16, #tpu.memory_space<vmem>>, vector<2x128xbf16>
    %c104 = arith.constant 104 : index
    %c0_237 = arith.constant 0 : index
    %176 = vector.load %arg16[%c104, %c0_237] : memref<128x128xbf16, #tpu.memory_space<vmem>>, vector<2x128xbf16>
    %177 = tpu.concatenate %161, %162, %163, %164, %165, %166, %167, %168, %169, %170, %171, %172, %173, %174, %175, %176 in 1 : vector<2x128xbf16>, vector<2x128xbf16>, vector<2x128xbf16>, vector<2x128xbf16>, vector<2x128xbf16>, vector<2x128xbf16>, vector<2x128xbf16>, vector<2x128xbf16>, vector<2x128xbf16>, vector<2x128xbf16>, vector<2x128xbf16>, vector<2x128xbf16>, vector<2x128xbf16>, vector<2x128xbf16>, vector<2x128xbf16>, vector<2x128xbf16> -> vector<2x2048xbf16>
    %c18_238 = arith.constant 18 : index
    %c0_239 = arith.constant 0 : index
    %178 = vector.load %arg17[%c18_238, %c0_239] : memref<32x2048xbf16, #tpu.memory_space<vmem>>, vector<2x2048xbf16>
    tpu.vector_store %arg17[%c18_238, %c0_239], %177 {strides = array<i32>} : memref<32x2048xbf16, #tpu.memory_space<vmem>>, vector<2x2048xbf16>,
    %c54_240 = arith.constant 54 : index
    %c0_241 = arith.constant 0 : index
    %179 = vector.load %arg16[%c54_240, %c0_241] : memref<128x128xbf16, #tpu.memory_space<vmem>>, vector<2x128xbf16>
    %c56_242 = arith.constant 56 : index
    %c0_243 = arith.constant 0 : index
    %180 = vector.load %arg16[%c56_242, %c0_243] : memref<128x128xbf16, #tpu.memory_space<vmem>>, vector<2x128xbf16>
    %c58_244 = arith.constant 58 : index
    %c0_245 = arith.constant 0 : index
    %181 = vector.load %arg16[%c58_244, %c0_245] : memref<128x128xbf16, #tpu.memory_space<vmem>>, vector<2x128xbf16>
    %c60_246 = arith.constant 60 : index
    %c0_247 = arith.constant 0 : index
    %182 = vector.load %arg16[%c60_246, %c0_247] : memref<128x128xbf16, #tpu.memory_space<vmem>>, vector<2x128xbf16>
    %c70_248 = arith.constant 70 : index
    %c0_249 = arith.constant 0 : index
    %183 = vector.load %arg16[%c70_248, %c0_249] : memref<128x128xbf16, #tpu.memory_space<vmem>>, vector<2x128xbf16>
    %c72_250 = arith.constant 72 : index
    %c0_251 = arith.constant 0 : index
    %184 = vector.load %arg16[%c72_250, %c0_251] : memref<128x128xbf16, #tpu.memory_space<vmem>>, vector<2x128xbf16>
    %c74_252 = arith.constant 74 : index
    %c0_253 = arith.constant 0 : index
    %185 = vector.load %arg16[%c74_252, %c0_253] : memref<128x128xbf16, #tpu.memory_space<vmem>>, vector<2x128xbf16>
    %c76_254 = arith.constant 76 : index
    %c0_255 = arith.constant 0 : index
    %186 = vector.load %arg16[%c76_254, %c0_255] : memref<128x128xbf16, #tpu.memory_space<vmem>>, vector<2x128xbf16>
    %c86_256 = arith.constant 86 : index
    %c0_257 = arith.constant 0 : index
    %187 = vector.load %arg16[%c86_256, %c0_257] : memref<128x128xbf16, #tpu.memory_space<vmem>>, vector<2x128xbf16>
    %c88_258 = arith.constant 88 : index
    %c0_259 = arith.constant 0 : index
    %188 = vector.load %arg16[%c88_258, %c0_259] : memref<128x128xbf16, #tpu.memory_space<vmem>>, vector<2x128xbf16>
    %c90 = arith.constant 90 : index
    %c0_260 = arith.constant 0 : index
    %189 = vector.load %arg16[%c90, %c0_260] : memref<128x128xbf16, #tpu.memory_space<vmem>>, vector<2x128xbf16>
    %c92 = arith.constant 92 : index
    %c0_261 = arith.constant 0 : index
    %190 = vector.load %arg16[%c92, %c0_261] : memref<128x128xbf16, #tpu.memory_space<vmem>>, vector<2x128xbf16>
    %c102_262 = arith.constant 102 : index
    %c0_263 = arith.constant 0 : index
    %191 = vector.load %arg16[%c102_262, %c0_263] : memref<128x128xbf16, #tpu.memory_space<vmem>>, vector<2x128xbf16>
    %c104_264 = arith.constant 104 : index
    %c0_265 = arith.constant 0 : index
    %192 = vector.load %arg16[%c104_264, %c0_265] : memref<128x128xbf16, #tpu.memory_space<vmem>>, vector<2x128xbf16>
    %c106 = arith.constant 106 : index
    %c0_266 = arith.constant 0 : index
    %193 = vector.load %arg16[%c106, %c0_266] : memref<128x128xbf16, #tpu.memory_space<vmem>>, vector<2x128xbf16>
    %c108 = arith.constant 108 : index
    %c0_267 = arith.constant 0 : index
    %194 = vector.load %arg16[%c108, %c0_267] : memref<128x128xbf16, #tpu.memory_space<vmem>>, vector<2x128xbf16>
    %195 = tpu.concatenate %179, %180, %181, %182, %183, %184, %185, %186, %187, %188, %189, %190, %191, %192, %193, %194 in 1 : vector<2x128xbf16>, vector<2x128xbf16>, vector<2x128xbf16>, vector<2x128xbf16>, vector<2x128xbf16>, vector<2x128xbf16>, vector<2x128xbf16>, vector<2x128xbf16>, vector<2x128xbf16>, vector<2x128xbf16>, vector<2x128xbf16>, vector<2x128xbf16>, vector<2x128xbf16>, vector<2x128xbf16>, vector<2x128xbf16>, vector<2x128xbf16> -> vector<2x2048xbf16>
    %c20_268 = arith.constant 20 : index
    %c0_269 = arith.constant 0 : index
    %196 = vector.load %arg17[%c20_268, %c0_269] : memref<32x2048xbf16, #tpu.memory_space<vmem>>, vector<2x2048xbf16>
    tpu.vector_store %arg17[%c20_268, %c0_269], %195 {strides = array<i32>} : memref<32x2048xbf16, #tpu.memory_space<vmem>>, vector<2x2048xbf16>,
    %c58_270 = arith.constant 58 : index
    %c0_271 = arith.constant 0 : index
    %197 = vector.load %arg16[%c58_270, %c0_271] : memref<128x128xbf16, #tpu.memory_space<vmem>>, vector<2x128xbf16>
    %c60_272 = arith.constant 60 : index
    %c0_273 = arith.constant 0 : index
    %198 = vector.load %arg16[%c60_272, %c0_273] : memref<128x128xbf16, #tpu.memory_space<vmem>>, vector<2x128xbf16>
    %c62_274 = arith.constant 62 : index
    %c0_275 = arith.constant 0 : index
    %199 = vector.load %arg16[%c62_274, %c0_275] : memref<128x128xbf16, #tpu.memory_space<vmem>>, vector<2x128xbf16>
    %c74_276 = arith.constant 74 : index
    %c0_277 = arith.constant 0 : index
    %200 = vector.load %arg16[%c74_276, %c0_277] : memref<128x128xbf16, #tpu.memory_space<vmem>>, vector<2x128xbf16>
    %c76_278 = arith.constant 76 : index
    %c0_279 = arith.constant 0 : index
    %201 = vector.load %arg16[%c76_278, %c0_279] : memref<128x128xbf16, #tpu.memory_space<vmem>>, vector<2x128xbf16>
    %c78_280 = arith.constant 78 : index
    %c0_281 = arith.constant 0 : index
    %202 = vector.load %arg16[%c78_280, %c0_281] : memref<128x128xbf16, #tpu.memory_space<vmem>>, vector<2x128xbf16>
    %c90_282 = arith.constant 90 : index
    %c0_283 = arith.constant 0 : index
    %203 = vector.load %arg16[%c90_282, %c0_283] : memref<128x128xbf16, #tpu.memory_space<vmem>>, vector<2x128xbf16>
    %c92_284 = arith.constant 92 : index
    %c0_285 = arith.constant 0 : index
    %204 = vector.load %arg16[%c92_284, %c0_285] : memref<128x128xbf16, #tpu.memory_space<vmem>>, vector<2x128xbf16>
    %c94 = arith.constant 94 : index
    %c0_286 = arith.constant 0 : index
    %205 = vector.load %arg16[%c94, %c0_286] : memref<128x128xbf16, #tpu.memory_space<vmem>>, vector<2x128xbf16>
    %c106_287 = arith.constant 106 : index
    %c0_288 = arith.constant 0 : index
    %206 = vector.load %arg16[%c106_287, %c0_288] : memref<128x128xbf16, #tpu.memory_space<vmem>>, vector<2x128xbf16>
    %c108_289 = arith.constant 108 : index
    %c0_290 = arith.constant 0 : index
    %207 = vector.load %arg16[%c108_289, %c0_290] : memref<128x128xbf16, #tpu.memory_space<vmem>>, vector<2x128xbf16>
    %c110 = arith.constant 110 : index
    %c0_291 = arith.constant 0 : index
    %208 = vector.load %arg16[%c110, %c0_291] : memref<128x128xbf16, #tpu.memory_space<vmem>>, vector<2x128xbf16>
    %209 = tpu.concatenate %197, %198, %199, %32, %200, %201, %202, %32, %203, %204, %205, %32, %206, %207, %208, %32 in 1 : vector<2x128xbf16>, vector<2x128xbf16>, vector<2x128xbf16>, vector<2x128xbf16>, vector<2x128xbf16>, vector<2x128xbf16>, vector<2x128xbf16>, vector<2x128xbf16>, vector<2x128xbf16>, vector<2x128xbf16>, vector<2x128xbf16>, vector<2x128xbf16>, vector<2x128xbf16>, vector<2x128xbf16>, vector<2x128xbf16>, vector<2x128xbf16> -> vector<2x2048xbf16>
    %c22_292 = arith.constant 22 : index
    %c0_293 = arith.constant 0 : index
    %210 = vector.load %arg17[%c22_292, %c0_293] : memref<32x2048xbf16, #tpu.memory_space<vmem>>, vector<2x2048xbf16>
    tpu.vector_store %arg17[%c22_292, %c0_293], %209 {strides = array<i32>} : memref<32x2048xbf16, #tpu.memory_space<vmem>>, vector<2x2048xbf16>,
    %c80_294 = arith.constant 80 : index
    %c0_295 = arith.constant 0 : index
    %211 = vector.load %arg16[%c80_294, %c0_295] : memref<128x128xbf16, #tpu.memory_space<vmem>>, vector<2x128xbf16>
    %c82_296 = arith.constant 82 : index
    %c0_297 = arith.constant 0 : index
    %212 = vector.load %arg16[%c82_296, %c0_297] : memref<128x128xbf16, #tpu.memory_space<vmem>>, vector<2x128xbf16>
    %c84_298 = arith.constant 84 : index
    %c0_299 = arith.constant 0 : index
    %213 = vector.load %arg16[%c84_298, %c0_299] : memref<128x128xbf16, #tpu.memory_space<vmem>>, vector<2x128xbf16>
    %c96_300 = arith.constant 96 : index
    %c0_301 = arith.constant 0 : index
    %214 = vector.load %arg16[%c96_300, %c0_301] : memref<128x128xbf16, #tpu.memory_space<vmem>>, vector<2x128xbf16>
    %c98_302 = arith.constant 98 : index
    %c0_303 = arith.constant 0 : index
    %215 = vector.load %arg16[%c98_302, %c0_303] : memref<128x128xbf16, #tpu.memory_space<vmem>>, vector<2x128xbf16>
    %c100_304 = arith.constant 100 : index
    %c0_305 = arith.constant 0 : index
    %216 = vector.load %arg16[%c100_304, %c0_305] : memref<128x128xbf16, #tpu.memory_space<vmem>>, vector<2x128xbf16>
    %c112 = arith.constant 112 : index
    %c0_306 = arith.constant 0 : index
    %217 = vector.load %arg16[%c112, %c0_306] : memref<128x128xbf16, #tpu.memory_space<vmem>>, vector<2x128xbf16>
    %c114 = arith.constant 114 : index
    %c0_307 = arith.constant 0 : index
    %218 = vector.load %arg16[%c114, %c0_307] : memref<128x128xbf16, #tpu.memory_space<vmem>>, vector<2x128xbf16>
    %c116 = arith.constant 116 : index
    %c0_308 = arith.constant 0 : index
    %219 = vector.load %arg16[%c116, %c0_308] : memref<128x128xbf16, #tpu.memory_space<vmem>>, vector<2x128xbf16>
    %220 = tpu.concatenate %32, %211, %212, %213, %32, %214, %215, %216, %32, %217, %218, %219, %32, %32, %32, %32 in 1 : vector<2x128xbf16>, vector<2x128xbf16>, vector<2x128xbf16>, vector<2x128xbf16>, vector<2x128xbf16>, vector<2x128xbf16>, vector<2x128xbf16>, vector<2x128xbf16>, vector<2x128xbf16>, vector<2x128xbf16>, vector<2x128xbf16>, vector<2x128xbf16>, vector<2x128xbf16>, vector<2x128xbf16>, vector<2x128xbf16>, vector<2x128xbf16> -> vector<2x2048xbf16>
    %c24_309 = arith.constant 24 : index
    %c0_310 = arith.constant 0 : index
    %221 = vector.load %arg17[%c24_309, %c0_310] : memref<32x2048xbf16, #tpu.memory_space<vmem>>, vector<2x2048xbf16>
    tpu.vector_store %arg17[%c24_309, %c0_310], %220 {strides = array<i32>} : memref<32x2048xbf16, #tpu.memory_space<vmem>>, vector<2x2048xbf16>,
    %c82_311 = arith.constant 82 : index
    %c0_312 = arith.constant 0 : index
    %222 = vector.load %arg16[%c82_311, %c0_312] : memref<128x128xbf16, #tpu.memory_space<vmem>>, vector<2x128xbf16>
    %c84_313 = arith.constant 84 : index
    %c0_314 = arith.constant 0 : index
    %223 = vector.load %arg16[%c84_313, %c0_314] : memref<128x128xbf16, #tpu.memory_space<vmem>>, vector<2x128xbf16>
    %c86_315 = arith.constant 86 : index
    %c0_316 = arith.constant 0 : index
    %224 = vector.load %arg16[%c86_315, %c0_316] : memref<128x128xbf16, #tpu.memory_space<vmem>>, vector<2x128xbf16>
    %c88_317 = arith.constant 88 : index
    %c0_318 = arith.constant 0 : index
    %225 = vector.load %arg16[%c88_317, %c0_318] : memref<128x128xbf16, #tpu.memory_space<vmem>>, vector<2x128xbf16>
    %c98_319 = arith.constant 98 : index
    %c0_320 = arith.constant 0 : index
    %226 = vector.load %arg16[%c98_319, %c0_320] : memref<128x128xbf16, #tpu.memory_space<vmem>>, vector<2x128xbf16>
    %c100_321 = arith.constant 100 : index
    %c0_322 = arith.constant 0 : index
    %227 = vector.load %arg16[%c100_321, %c0_322] : memref<128x128xbf16, #tpu.memory_space<vmem>>, vector<2x128xbf16>
    %c102_323 = arith.constant 102 : index
    %c0_324 = arith.constant 0 : index
    %228 = vector.load %arg16[%c102_323, %c0_324] : memref<128x128xbf16, #tpu.memory_space<vmem>>, vector<2x128xbf16>
    %c104_325 = arith.constant 104 : index
    %c0_326 = arith.constant 0 : index
    %229 = vector.load %arg16[%c104_325, %c0_326] : memref<128x128xbf16, #tpu.memory_space<vmem>>, vector<2x128xbf16>
    %c114_327 = arith.constant 114 : index
    %c0_328 = arith.constant 0 : index
    %230 = vector.load %arg16[%c114_327, %c0_328] : memref<128x128xbf16, #tpu.memory_space<vmem>>, vector<2x128xbf16>
    %c116_329 = arith.constant 116 : index
    %c0_330 = arith.constant 0 : index
    %231 = vector.load %arg16[%c116_329, %c0_330] : memref<128x128xbf16, #tpu.memory_space<vmem>>, vector<2x128xbf16>
    %c118 = arith.constant 118 : index
    %c0_331 = arith.constant 0 : index
    %232 = vector.load %arg16[%c118, %c0_331] : memref<128x128xbf16, #tpu.memory_space<vmem>>, vector<2x128xbf16>
    %c120 = arith.constant 120 : index
    %c0_332 = arith.constant 0 : index
    %233 = vector.load %arg16[%c120, %c0_332] : memref<128x128xbf16, #tpu.memory_space<vmem>>, vector<2x128xbf16>
    %234 = tpu.concatenate %222, %223, %224, %225, %226, %227, %228, %229, %230, %231, %232, %233, %32, %32, %32, %32 in 1 : vector<2x128xbf16>, vector<2x128xbf16>, vector<2x128xbf16>, vector<2x128xbf16>, vector<2x128xbf16>, vector<2x128xbf16>, vector<2x128xbf16>, vector<2x128xbf16>, vector<2x128xbf16>, vector<2x128xbf16>, vector<2x128xbf16>, vector<2x128xbf16>, vector<2x128xbf16>, vector<2x128xbf16>, vector<2x128xbf16>, vector<2x128xbf16> -> vector<2x2048xbf16>
    %c26_333 = arith.constant 26 : index
    %c0_334 = arith.constant 0 : index
    %235 = vector.load %arg17[%c26_333, %c0_334] : memref<32x2048xbf16, #tpu.memory_space<vmem>>, vector<2x2048xbf16>
    tpu.vector_store %arg17[%c26_333, %c0_334], %234 {strides = array<i32>} : memref<32x2048xbf16, #tpu.memory_space<vmem>>, vector<2x2048xbf16>,
    %c86_335 = arith.constant 86 : index
    %c0_336 = arith.constant 0 : index
    %236 = vector.load %arg16[%c86_335, %c0_336] : memref<128x128xbf16, #tpu.memory_space<vmem>>, vector<2x128xbf16>
    %c88_337 = arith.constant 88 : index
    %c0_338 = arith.constant 0 : index
    %237 = vector.load %arg16[%c88_337, %c0_338] : memref<128x128xbf16, #tpu.memory_space<vmem>>, vector<2x128xbf16>
    %c90_339 = arith.constant 90 : index
    %c0_340 = arith.constant 0 : index
    %238 = vector.load %arg16[%c90_339, %c0_340] : memref<128x128xbf16, #tpu.memory_space<vmem>>, vector<2x128xbf16>
    %c92_341 = arith.constant 92 : index
    %c0_342 = arith.constant 0 : index
    %239 = vector.load %arg16[%c92_341, %c0_342] : memref<128x128xbf16, #tpu.memory_space<vmem>>, vector<2x128xbf16>
    %c102_343 = arith.constant 102 : index
    %c0_344 = arith.constant 0 : index
    %240 = vector.load %arg16[%c102_343, %c0_344] : memref<128x128xbf16, #tpu.memory_space<vmem>>, vector<2x128xbf16>
    %c104_345 = arith.constant 104 : index
    %c0_346 = arith.constant 0 : index
    %241 = vector.load %arg16[%c104_345, %c0_346] : memref<128x128xbf16, #tpu.memory_space<vmem>>, vector<2x128xbf16>
    %c106_347 = arith.constant 106 : index
    %c0_348 = arith.constant 0 : index
    %242 = vector.load %arg16[%c106_347, %c0_348] : memref<128x128xbf16, #tpu.memory_space<vmem>>, vector<2x128xbf16>
    %c108_349 = arith.constant 108 : index
    %c0_350 = arith.constant 0 : index
    %243 = vector.load %arg16[%c108_349, %c0_350] : memref<128x128xbf16, #tpu.memory_space<vmem>>, vector<2x128xbf16>
    %c118_351 = arith.constant 118 : index
    %c0_352 = arith.constant 0 : index
    %244 = vector.load %arg16[%c118_351, %c0_352] : memref<128x128xbf16, #tpu.memory_space<vmem>>, vector<2x128xbf16>
    %c120_353 = arith.constant 120 : index
    %c0_354 = arith.constant 0 : index
    %245 = vector.load %arg16[%c120_353, %c0_354] : memref<128x128xbf16, #tpu.memory_space<vmem>>, vector<2x128xbf16>
    %c122 = arith.constant 122 : index
    %c0_355 = arith.constant 0 : index
    %246 = vector.load %arg16[%c122, %c0_355] : memref<128x128xbf16, #tpu.memory_space<vmem>>, vector<2x128xbf16>
    %c124 = arith.constant 124 : index
    %c0_356 = arith.constant 0 : index
    %247 = vector.load %arg16[%c124, %c0_356] : memref<128x128xbf16, #tpu.memory_space<vmem>>, vector<2x128xbf16>
    %248 = tpu.concatenate %236, %237, %238, %239, %240, %241, %242, %243, %244, %245, %246, %247, %32, %32, %32, %32 in 1 : vector<2x128xbf16>, vector<2x128xbf16>, vector<2x128xbf16>, vector<2x128xbf16>, vector<2x128xbf16>, vector<2x128xbf16>, vector<2x128xbf16>, vector<2x128xbf16>, vector<2x128xbf16>, vector<2x128xbf16>, vector<2x128xbf16>, vector<2x128xbf16>, vector<2x128xbf16>, vector<2x128xbf16>, vector<2x128xbf16>, vector<2x128xbf16> -> vector<2x2048xbf16>
    %c28_357 = arith.constant 28 : index
    %c0_358 = arith.constant 0 : index
    %249 = vector.load %arg17[%c28_357, %c0_358] : memref<32x2048xbf16, #tpu.memory_space<vmem>>, vector<2x2048xbf16>
    tpu.vector_store %arg17[%c28_357, %c0_358], %248 {strides = array<i32>} : memref<32x2048xbf16, #tpu.memory_space<vmem>>, vector<2x2048xbf16>,
    %c90_359 = arith.constant 90 : index
    %c0_360 = arith.constant 0 : index
    %250 = vector.load %arg16[%c90_359, %c0_360] : memref<128x128xbf16, #tpu.memory_space<vmem>>, vector<2x128xbf16>
    %c92_361 = arith.constant 92 : index
    %c0_362 = arith.constant 0 : index
    %251 = vector.load %arg16[%c92_361, %c0_362] : memref<128x128xbf16, #tpu.memory_space<vmem>>, vector<2x128xbf16>
    %c94_363 = arith.constant 94 : index
    %c0_364 = arith.constant 0 : index
    %252 = vector.load %arg16[%c94_363, %c0_364] : memref<128x128xbf16, #tpu.memory_space<vmem>>, vector<2x128xbf16>
    %c106_365 = arith.constant 106 : index
    %c0_366 = arith.constant 0 : index
    %253 = vector.load %arg16[%c106_365, %c0_366] : memref<128x128xbf16, #tpu.memory_space<vmem>>, vector<2x128xbf16>
    %c108_367 = arith.constant 108 : index
    %c0_368 = arith.constant 0 : index
    %254 = vector.load %arg16[%c108_367, %c0_368] : memref<128x128xbf16, #tpu.memory_space<vmem>>, vector<2x128xbf16>
    %c110_369 = arith.constant 110 : index
    %c0_370 = arith.constant 0 : index
    %255 = vector.load %arg16[%c110_369, %c0_370] : memref<128x128xbf16, #tpu.memory_space<vmem>>, vector<2x128xbf16>
    %c122_371 = arith.constant 122 : index
    %c0_372 = arith.constant 0 : index
    %256 = vector.load %arg16[%c122_371, %c0_372] : memref<128x128xbf16, #tpu.memory_space<vmem>>, vector<2x128xbf16>
    %c124_373 = arith.constant 124 : index
    %c0_374 = arith.constant 0 : index
    %257 = vector.load %arg16[%c124_373, %c0_374] : memref<128x128xbf16, #tpu.memory_space<vmem>>, vector<2x128xbf16>
    %c126 = arith.constant 126 : index
    %c0_375 = arith.constant 0 : index
    %258 = vector.load %arg16[%c126, %c0_375] : memref<128x128xbf16, #tpu.memory_space<vmem>>, vector<2x128xbf16>
    %259 = tpu.concatenate %250, %251, %252, %32, %253, %254, %255, %32, %256, %257, %258, %32, %32, %32, %32, %32 in 1 : vector<2x128xbf16>, vector<2x128xbf16>, vector<2x128xbf16>, vector<2x128xbf16>, vector<2x128xbf16>, vector<2x128xbf16>, vector<2x128xbf16>, vector<2x128xbf16>, vector<2x128xbf16>, vector<2x128xbf16>, vector<2x128xbf16>, vector<2x128xbf16>, vector<2x128xbf16>, vector<2x128xbf16>, vector<2x128xbf16>, vector<2x128xbf16> -> vector<2x2048xbf16>
    %c30_376 = arith.constant 30 : index
    %c0_377 = arith.constant 0 : index
    %260 = vector.load %arg17[%c30_376, %c0_377] : memref<32x2048xbf16, #tpu.memory_space<vmem>>, vector<2x2048xbf16>
    tpu.vector_store %arg17[%c30_376, %c0_377], %259 {strides = array<i32>} : memref<32x2048xbf16, #tpu.memory_space<vmem>>, vector<2x2048xbf16>,
    %c0_378 = arith.constant 0 : index
    %c0_379 = arith.constant 0 : index
    %261 = vector.load %arg17[%c0_378, %c0_379] : memref<32x2048xbf16, #tpu.memory_space<vmem>>, vector<32x2048xbf16>
    %c0_380 = arith.constant 0 : index
    %c0_381 = arith.constant 0 : index
    %262 = vector.load %arg4[%c0_380, %c0_381] : memref<2048x128xbf16, #tpu.memory_space<vmem>>, vector<2048x128xbf16>
    %cst_382 = arith.constant dense<0.000000e+00> : vector<32x128xf32>
    %263 = tpu.matmul %261, %262, %cst_382 {dimension_numbers = #tpu.dot_dimension_numbers<[1], [0], [0], [1], [0, 0, 1, 1], [], []>} : vector<32x2048xbf16>, vector<2048x128xbf16>, vector<32x128xf32> -> vector<32x128xf32>
    %c0_383 = arith.constant 0 : index
    %c0_384 = arith.constant 0 : index
    %264 = vector.load %arg5[%c0_383, %c0_384] : memref<1x128xf32, #tpu.memory_space<vmem>>, vector<1x128xf32>
    %c0_385 = arith.constant 0 : index
    %c0_386 = arith.constant 0 : index
    %265 = vector.load %arg6[%c0_385, %c0_386] : memref<1x128xf32, #tpu.memory_space<vmem>>, vector<1x128xf32>
    %cst_387 = arith.constant dense<0.000000e+00> : vector<128xf32>
    %266 = vector.multi_reduction <add>, %263, %cst_387 [0] : vector<32x128xf32> to vector<128xf32>
    %267 = vector.shape_cast %266 : vector<128xf32> to vector<1x128xf32>
    %cst_388 = arith.constant 3.125000e-02 : f32
    %268 = vector.broadcast %cst_388 : f32 to vector<1x128xf32>
    %269 = arith.mulf %267, %268 : vector<1x128xf32>
    %270 = arith.mulf %263, %263 : vector<32x128xf32>
    %cst_389 = arith.constant dense<0.000000e+00> : vector<128xf32>
    %271 = vector.multi_reduction <add>, %270, %cst_389 [0] : vector<32x128xf32> to vector<128xf32>
    %272 = vector.shape_cast %271 : vector<128xf32> to vector<1x128xf32>
    %cst_390 = arith.constant 3.125000e-02 : f32
    %273 = vector.broadcast %cst_390 : f32 to vector<1x128xf32>
    %274 = arith.mulf %272, %273 : vector<1x128xf32>
    %275 = arith.mulf %269, %269 : vector<1x128xf32>
    %276 = arith.subf %274, %275 : vector<1x128xf32>
    %cst_391 = arith.constant 0.000000e+00 : f32
    %277 = vector.broadcast %cst_391 : f32 to vector<1x128xf32>
    %278 = arith.maximumf %276, %277 : vector<1x128xf32>
    %cst_392 = arith.constant 9.99999974E-6 : f32
    %279 = vector.broadcast %cst_392 : f32 to vector<1x128xf32>
    %280 = arith.addf %278, %279 : vector<1x128xf32>
    %281 = math.rsqrt %280 : vector<1x128xf32>
    %282 = arith.mulf %281, %264 : vector<1x128xf32>
    %283 = arith.mulf %269, %282 : vector<1x128xf32>
    %284 = arith.subf %265, %283 : vector<1x128xf32>
    %285 = vector.broadcast %282 : vector<1x128xf32> to vector<32x128xf32>
    %286 = arith.mulf %263, %285 : vector<32x128xf32>
    %287 = vector.broadcast %284 : vector<1x128xf32> to vector<32x128xf32>
    %288 = arith.addf %286, %287 : vector<32x128xf32>
    %cst_393 = arith.constant 0.000000e+00 : f32
    %289 = vector.broadcast %cst_393 : f32 to vector<32x128xf32>
    %290 = arith.maximumf %288, %289 : vector<32x128xf32>
    %291 = arith.truncf %290 : vector<32x128xf32> to vector<32x128xbf16>
    %c0_394 = arith.constant 0 : index
    %c0_395 = arith.constant 0 : index
    %292 = vector.load %arg18[%c0_394, %c0_395] : memref<32x128xbf16, #tpu.memory_space<vmem>>, vector<32x128xbf16>
    tpu.vector_store %arg18[%c0_394, %c0_395], %291 {strides = array<i32>} : memref<32x128xbf16, #tpu.memory_space<vmem>>, vector<32x128xbf16>,
    %cst_396 = arith.constant 0.000000e+00 : bf16
    %293 = vector.broadcast %cst_396 : bf16 to vector<2x128xbf16>
    %c0_397 = arith.constant 0 : index
    %c0_398 = arith.constant 0 : index
    %294 = vector.load %arg18[%c0_397, %c0_398] : memref<32x128xbf16, #tpu.memory_space<vmem>>, vector<2x128xbf16>
    %c2_399 = arith.constant 2 : index
    %c0_400 = arith.constant 0 : index
    %295 = vector.load %arg18[%c2_399, %c0_400] : memref<32x128xbf16, #tpu.memory_space<vmem>>, vector<2x128xbf16>
    %c4_401 = arith.constant 4 : index
    %c0_402 = arith.constant 0 : index
    %296 = vector.load %arg18[%c4_401, %c0_402] : memref<32x128xbf16, #tpu.memory_space<vmem>>, vector<2x128xbf16>
    %c8_403 = arith.constant 8 : index
    %c0_404 = arith.constant 0 : index
    %297 = vector.load %arg18[%c8_403, %c0_404] : memref<32x128xbf16, #tpu.memory_space<vmem>>, vector<2x128xbf16>
    %c10_405 = arith.constant 10 : index
    %c0_406 = arith.constant 0 : index
    %298 = vector.load %arg18[%c10_405, %c0_406] : memref<32x128xbf16, #tpu.memory_space<vmem>>, vector<2x128xbf16>
    %c12_407 = arith.constant 12 : index
    %c0_408 = arith.constant 0 : index
    %299 = vector.load %arg18[%c12_407, %c0_408] : memref<32x128xbf16, #tpu.memory_space<vmem>>, vector<2x128xbf16>
    %c16_409 = arith.constant 16 : index
    %c0_410 = arith.constant 0 : index
    %300 = vector.load %arg18[%c16_409, %c0_410] : memref<32x128xbf16, #tpu.memory_space<vmem>>, vector<2x128xbf16>
    %c18_411 = arith.constant 18 : index
    %c0_412 = arith.constant 0 : index
    %301 = vector.load %arg18[%c18_411, %c0_412] : memref<32x128xbf16, #tpu.memory_space<vmem>>, vector<2x128xbf16>
    %c20_413 = arith.constant 20 : index
    %c0_414 = arith.constant 0 : index
    %302 = vector.load %arg18[%c20_413, %c0_414] : memref<32x128xbf16, #tpu.memory_space<vmem>>, vector<2x128xbf16>
    %303 = tpu.concatenate %293, %293, %293, %293, %293, %294, %295, %296, %293, %297, %298, %299, %293, %300, %301, %302 in 1 : vector<2x128xbf16>, vector<2x128xbf16>, vector<2x128xbf16>, vector<2x128xbf16>, vector<2x128xbf16>, vector<2x128xbf16>, vector<2x128xbf16>, vector<2x128xbf16>, vector<2x128xbf16>, vector<2x128xbf16>, vector<2x128xbf16>, vector<2x128xbf16>, vector<2x128xbf16>, vector<2x128xbf16>, vector<2x128xbf16>, vector<2x128xbf16> -> vector<2x2048xbf16>
    %c0_415 = arith.constant 0 : index
    %c0_416 = arith.constant 0 : index
    %304 = vector.load %arg19[%c0_415, %c0_416] : memref<8x2048xbf16, #tpu.memory_space<vmem>>, vector<2x2048xbf16>
    tpu.vector_store %arg19[%c0_415, %c0_416], %303 {strides = array<i32>} : memref<8x2048xbf16, #tpu.memory_space<vmem>>, vector<2x2048xbf16>,
    %c2_417 = arith.constant 2 : index
    %c0_418 = arith.constant 0 : index
    %305 = vector.load %arg18[%c2_417, %c0_418] : memref<32x128xbf16, #tpu.memory_space<vmem>>, vector<2x128xbf16>
    %c4_419 = arith.constant 4 : index
    %c0_420 = arith.constant 0 : index
    %306 = vector.load %arg18[%c4_419, %c0_420] : memref<32x128xbf16, #tpu.memory_space<vmem>>, vector<2x128xbf16>
    %c6_421 = arith.constant 6 : index
    %c0_422 = arith.constant 0 : index
    %307 = vector.load %arg18[%c6_421, %c0_422] : memref<32x128xbf16, #tpu.memory_space<vmem>>, vector<2x128xbf16>
    %c10_423 = arith.constant 10 : index
    %c0_424 = arith.constant 0 : index
    %308 = vector.load %arg18[%c10_423, %c0_424] : memref<32x128xbf16, #tpu.memory_space<vmem>>, vector<2x128xbf16>
    %c12_425 = arith.constant 12 : index
    %c0_426 = arith.constant 0 : index
    %309 = vector.load %arg18[%c12_425, %c0_426] : memref<32x128xbf16, #tpu.memory_space<vmem>>, vector<2x128xbf16>
    %c14_427 = arith.constant 14 : index
    %c0_428 = arith.constant 0 : index
    %310 = vector.load %arg18[%c14_427, %c0_428] : memref<32x128xbf16, #tpu.memory_space<vmem>>, vector<2x128xbf16>
    %c18_429 = arith.constant 18 : index
    %c0_430 = arith.constant 0 : index
    %311 = vector.load %arg18[%c18_429, %c0_430] : memref<32x128xbf16, #tpu.memory_space<vmem>>, vector<2x128xbf16>
    %c20_431 = arith.constant 20 : index
    %c0_432 = arith.constant 0 : index
    %312 = vector.load %arg18[%c20_431, %c0_432] : memref<32x128xbf16, #tpu.memory_space<vmem>>, vector<2x128xbf16>
    %c22_433 = arith.constant 22 : index
    %c0_434 = arith.constant 0 : index
    %313 = vector.load %arg18[%c22_433, %c0_434] : memref<32x128xbf16, #tpu.memory_space<vmem>>, vector<2x128xbf16>
    %314 = tpu.concatenate %293, %293, %293, %293, %305, %306, %307, %293, %308, %309, %310, %293, %311, %312, %313, %293 in 1 : vector<2x128xbf16>, vector<2x128xbf16>, vector<2x128xbf16>, vector<2x128xbf16>, vector<2x128xbf16>, vector<2x128xbf16>, vector<2x128xbf16>, vector<2x128xbf16>, vector<2x128xbf16>, vector<2x128xbf16>, vector<2x128xbf16>, vector<2x128xbf16>, vector<2x128xbf16>, vector<2x128xbf16>, vector<2x128xbf16>, vector<2x128xbf16> -> vector<2x2048xbf16>
    %c2_435 = arith.constant 2 : index
    %c0_436 = arith.constant 0 : index
    %315 = vector.load %arg19[%c2_435, %c0_436] : memref<8x2048xbf16, #tpu.memory_space<vmem>>, vector<2x2048xbf16>
    tpu.vector_store %arg19[%c2_435, %c0_436], %314 {strides = array<i32>} : memref<8x2048xbf16, #tpu.memory_space<vmem>>, vector<2x2048xbf16>,
    %c8_437 = arith.constant 8 : index
    %c0_438 = arith.constant 0 : index
    %316 = vector.load %arg18[%c8_437, %c0_438] : memref<32x128xbf16, #tpu.memory_space<vmem>>, vector<2x128xbf16>
    %c10_439 = arith.constant 10 : index
    %c0_440 = arith.constant 0 : index
    %317 = vector.load %arg18[%c10_439, %c0_440] : memref<32x128xbf16, #tpu.memory_space<vmem>>, vector<2x128xbf16>
    %c12_441 = arith.constant 12 : index
    %c0_442 = arith.constant 0 : index
    %318 = vector.load %arg18[%c12_441, %c0_442] : memref<32x128xbf16, #tpu.memory_space<vmem>>, vector<2x128xbf16>
    %c16_443 = arith.constant 16 : index
    %c0_444 = arith.constant 0 : index
    %319 = vector.load %arg18[%c16_443, %c0_444] : memref<32x128xbf16, #tpu.memory_space<vmem>>, vector<2x128xbf16>
    %c18_445 = arith.constant 18 : index
    %c0_446 = arith.constant 0 : index
    %320 = vector.load %arg18[%c18_445, %c0_446] : memref<32x128xbf16, #tpu.memory_space<vmem>>, vector<2x128xbf16>
    %c20_447 = arith.constant 20 : index
    %c0_448 = arith.constant 0 : index
    %321 = vector.load %arg18[%c20_447, %c0_448] : memref<32x128xbf16, #tpu.memory_space<vmem>>, vector<2x128xbf16>
    %c24_449 = arith.constant 24 : index
    %c0_450 = arith.constant 0 : index
    %322 = vector.load %arg18[%c24_449, %c0_450] : memref<32x128xbf16, #tpu.memory_space<vmem>>, vector<2x128xbf16>
    %c26_451 = arith.constant 26 : index
    %c0_452 = arith.constant 0 : index
    %323 = vector.load %arg18[%c26_451, %c0_452] : memref<32x128xbf16, #tpu.memory_space<vmem>>, vector<2x128xbf16>
    %c28_453 = arith.constant 28 : index
    %c0_454 = arith.constant 0 : index
    %324 = vector.load %arg18[%c28_453, %c0_454] : memref<32x128xbf16, #tpu.memory_space<vmem>>, vector<2x128xbf16>
    %325 = tpu.concatenate %293, %316, %317, %318, %293, %319, %320, %321, %293, %322, %323, %324, %293, %293, %293, %293 in 1 : vector<2x128xbf16>, vector<2x128xbf16>, vector<2x128xbf16>, vector<2x128xbf16>, vector<2x128xbf16>, vector<2x128xbf16>, vector<2x128xbf16>, vector<2x128xbf16>, vector<2x128xbf16>, vector<2x128xbf16>, vector<2x128xbf16>, vector<2x128xbf16>, vector<2x128xbf16>, vector<2x128xbf16>, vector<2x128xbf16>, vector<2x128xbf16> -> vector<2x2048xbf16>
    %c4_455 = arith.constant 4 : index
    %c0_456 = arith.constant 0 : index
    %326 = vector.load %arg19[%c4_455, %c0_456] : memref<8x2048xbf16, #tpu.memory_space<vmem>>, vector<2x2048xbf16>
    tpu.vector_store %arg19[%c4_455, %c0_456], %325 {strides = array<i32>} : memref<8x2048xbf16, #tpu.memory_space<vmem>>, vector<2x2048xbf16>,
    %c10_457 = arith.constant 10 : index
    %c0_458 = arith.constant 0 : index
    %327 = vector.load %arg18[%c10_457, %c0_458] : memref<32x128xbf16, #tpu.memory_space<vmem>>, vector<2x128xbf16>
    %c12_459 = arith.constant 12 : index
    %c0_460 = arith.constant 0 : index
    %328 = vector.load %arg18[%c12_459, %c0_460] : memref<32x128xbf16, #tpu.memory_space<vmem>>, vector<2x128xbf16>
    %c14_461 = arith.constant 14 : index
    %c0_462 = arith.constant 0 : index
    %329 = vector.load %arg18[%c14_461, %c0_462] : memref<32x128xbf16, #tpu.memory_space<vmem>>, vector<2x128xbf16>
    %c18_463 = arith.constant 18 : index
    %c0_464 = arith.constant 0 : index
    %330 = vector.load %arg18[%c18_463, %c0_464] : memref<32x128xbf16, #tpu.memory_space<vmem>>, vector<2x128xbf16>
    %c20_465 = arith.constant 20 : index
    %c0_466 = arith.constant 0 : index
    %331 = vector.load %arg18[%c20_465, %c0_466] : memref<32x128xbf16, #tpu.memory_space<vmem>>, vector<2x128xbf16>
    %c22_467 = arith.constant 22 : index
    %c0_468 = arith.constant 0 : index
    %332 = vector.load %arg18[%c22_467, %c0_468] : memref<32x128xbf16, #tpu.memory_space<vmem>>, vector<2x128xbf16>
    %c26_469 = arith.constant 26 : index
    %c0_470 = arith.constant 0 : index
    %333 = vector.load %arg18[%c26_469, %c0_470] : memref<32x128xbf16, #tpu.memory_space<vmem>>, vector<2x128xbf16>
    %c28_471 = arith.constant 28 : index
    %c0_472 = arith.constant 0 : index
    %334 = vector.load %arg18[%c28_471, %c0_472] : memref<32x128xbf16, #tpu.memory_space<vmem>>, vector<2x128xbf16>
    %c30_473 = arith.constant 30 : index
    %c0_474 = arith.constant 0 : index
    %335 = vector.load %arg18[%c30_473, %c0_474] : memref<32x128xbf16, #tpu.memory_space<vmem>>, vector<2x128xbf16>
    %336 = tpu.concatenate %327, %328, %329, %293, %330, %331, %332, %293, %333, %334, %335, %293, %293, %293, %293, %293 in 1 : vector<2x128xbf16>, vector<2x128xbf16>, vector<2x128xbf16>, vector<2x128xbf16>, vector<2x128xbf16>, vector<2x128xbf16>, vector<2x128xbf16>, vector<2x128xbf16>, vector<2x128xbf16>, vector<2x128xbf16>, vector<2x128xbf16>, vector<2x128xbf16>, vector<2x128xbf16>, vector<2x128xbf16>, vector<2x128xbf16>, vector<2x128xbf16> -> vector<2x2048xbf16>
    %c6_475 = arith.constant 6 : index
    %c0_476 = arith.constant 0 : index
    %337 = vector.load %arg19[%c6_475, %c0_476] : memref<8x2048xbf16, #tpu.memory_space<vmem>>, vector<2x2048xbf16>
    tpu.vector_store %arg19[%c6_475, %c0_476], %336 {strides = array<i32>} : memref<8x2048xbf16, #tpu.memory_space<vmem>>, vector<2x2048xbf16>,
    %c0_477 = arith.constant 0 : index
    %c0_478 = arith.constant 0 : index
    %338 = vector.load %arg19[%c0_477, %c0_478] : memref<8x2048xbf16, #tpu.memory_space<vmem>>, vector<8x2048xbf16>
    %c0_479 = arith.constant 0 : index
    %c0_480 = arith.constant 0 : index
    %339 = vector.load %arg7[%c0_479, %c0_480] : memref<2048x128xbf16, #tpu.memory_space<vmem>>, vector<2048x128xbf16>
    %cst_481 = arith.constant dense<0.000000e+00> : vector<8x128xf32>
    %340 = tpu.matmul %338, %339, %cst_481 {dimension_numbers = #tpu.dot_dimension_numbers<[1], [0], [0], [1], [0, 0, 1, 1], [], []>} : vector<8x2048xbf16>, vector<2048x128xbf16>, vector<8x128xf32> -> vector<8x128xf32>
    %c0_482 = arith.constant 0 : index
    %c0_483 = arith.constant 0 : index
    %341 = vector.load %arg8[%c0_482, %c0_483] : memref<1x128xf32, #tpu.memory_space<vmem>>, vector<1x128xf32>
    %c0_484 = arith.constant 0 : index
    %c0_485 = arith.constant 0 : index
    %342 = vector.load %arg9[%c0_484, %c0_485] : memref<1x128xf32, #tpu.memory_space<vmem>>, vector<1x128xf32>
    %cst_486 = arith.constant dense<0.000000e+00> : vector<128xf32>
    %343 = vector.multi_reduction <add>, %340, %cst_486 [0] : vector<8x128xf32> to vector<128xf32>
    %344 = vector.shape_cast %343 : vector<128xf32> to vector<1x128xf32>
    %cst_487 = arith.constant 1.250000e-01 : f32
    %345 = vector.broadcast %cst_487 : f32 to vector<1x128xf32>
    %346 = arith.mulf %344, %345 : vector<1x128xf32>
    %347 = arith.mulf %340, %340 : vector<8x128xf32>
    %cst_488 = arith.constant dense<0.000000e+00> : vector<128xf32>
    %348 = vector.multi_reduction <add>, %347, %cst_488 [0] : vector<8x128xf32> to vector<128xf32>
    %349 = vector.shape_cast %348 : vector<128xf32> to vector<1x128xf32>
    %cst_489 = arith.constant 1.250000e-01 : f32
    %350 = vector.broadcast %cst_489 : f32 to vector<1x128xf32>
    %351 = arith.mulf %349, %350 : vector<1x128xf32>
    %352 = arith.mulf %346, %346 : vector<1x128xf32>
    %353 = arith.subf %351, %352 : vector<1x128xf32>
    %cst_490 = arith.constant 0.000000e+00 : f32
    %354 = vector.broadcast %cst_490 : f32 to vector<1x128xf32>
    %355 = arith.maximumf %353, %354 : vector<1x128xf32>
    %cst_491 = arith.constant 9.99999974E-6 : f32
    %356 = vector.broadcast %cst_491 : f32 to vector<1x128xf32>
    %357 = arith.addf %355, %356 : vector<1x128xf32>
    %358 = math.rsqrt %357 : vector<1x128xf32>
    %359 = arith.mulf %358, %341 : vector<1x128xf32>
    %360 = arith.mulf %346, %359 : vector<1x128xf32>
    %361 = arith.subf %342, %360 : vector<1x128xf32>
    %362 = vector.broadcast %359 : vector<1x128xf32> to vector<8x128xf32>
    %363 = arith.mulf %340, %362 : vector<8x128xf32>
    %364 = vector.broadcast %361 : vector<1x128xf32> to vector<8x128xf32>
    %365 = arith.addf %363, %364 : vector<8x128xf32>
    %cst_492 = arith.constant 0.000000e+00 : f32
    %366 = vector.broadcast %cst_492 : f32 to vector<8x128xf32>
    %367 = arith.maximumf %365, %366 : vector<8x128xf32>
    %368 = arith.truncf %367 : vector<8x128xf32> to vector<8x128xbf16>
    %c0_493 = arith.constant 0 : index
    %c0_494 = arith.constant 0 : index
    %369 = vector.load %arg20[%c0_493, %c0_494] : memref<8x128xbf16, #tpu.memory_space<vmem>>, vector<8x128xbf16>
    tpu.vector_store %arg20[%c0_493, %c0_494], %368 {strides = array<i32>} : memref<8x128xbf16, #tpu.memory_space<vmem>>, vector<8x128xbf16>,
    %c0_495 = arith.constant 0 : index
    %c0_496 = arith.constant 0 : index
    %370 = vector.load %arg20[%c0_495, %c0_496] : memref<8x128xbf16, #tpu.memory_space<vmem>>, vector<2x128xbf16>
    %c2_497 = arith.constant 2 : index
    %c0_498 = arith.constant 0 : index
    %371 = vector.load %arg20[%c2_497, %c0_498] : memref<8x128xbf16, #tpu.memory_space<vmem>>, vector<2x128xbf16>
    %c4_499 = arith.constant 4 : index
    %c0_500 = arith.constant 0 : index
    %372 = vector.load %arg20[%c4_499, %c0_500] : memref<8x128xbf16, #tpu.memory_space<vmem>>, vector<2x128xbf16>
    %c6_501 = arith.constant 6 : index
    %c0_502 = arith.constant 0 : index
    %373 = vector.load %arg20[%c6_501, %c0_502] : memref<8x128xbf16, #tpu.memory_space<vmem>>, vector<2x128xbf16>
    %374 = tpu.concatenate %370, %371, %372, %373 in 1 : vector<2x128xbf16>, vector<2x128xbf16>, vector<2x128xbf16>, vector<2x128xbf16> -> vector<2x512xbf16>
    %c0_503 = arith.constant 0 : index
    %c0_504 = arith.constant 0 : index
    %375 = vector.load %arg10[%c0_503, %c0_504] : memref<512x128xbf16, #tpu.memory_space<vmem>>, vector<512x128xbf16>
    %cst_505 = arith.constant dense<0.000000e+00> : vector<2x128xf32>
    %376 = tpu.matmul %374, %375, %cst_505 {dimension_numbers = #tpu.dot_dimension_numbers<[1], [0], [0], [1], [0, 0, 1, 1], [], []>} : vector<2x512xbf16>, vector<512x128xbf16>, vector<2x128xf32> -> vector<2x128xf32>
    %c0_506 = arith.constant 0 : index
    %c0_507 = arith.constant 0 : index
    %377 = vector.load %arg11[%c0_506, %c0_507] : memref<1x128xf32, #tpu.memory_space<vmem>>, vector<1x128xf32>
    %c0_508 = arith.constant 0 : index
    %c0_509 = arith.constant 0 : index
    %378 = vector.load %arg12[%c0_508, %c0_509] : memref<1x128xf32, #tpu.memory_space<vmem>>, vector<1x128xf32>
    %cst_510 = arith.constant dense<0.000000e+00> : vector<128xf32>
    %379 = vector.multi_reduction <add>, %376, %cst_510 [0] : vector<2x128xf32> to vector<128xf32>
    %380 = vector.shape_cast %379 : vector<128xf32> to vector<1x128xf32>
    %cst_511 = arith.constant 5.000000e-01 : f32
    %381 = vector.broadcast %cst_511 : f32 to vector<1x128xf32>
    %382 = arith.mulf %380, %381 : vector<1x128xf32>
    %383 = arith.mulf %376, %376 : vector<2x128xf32>
    %cst_512 = arith.constant dense<0.000000e+00> : vector<128xf32>
    %384 = vector.multi_reduction <add>, %383, %cst_512 [0] : vector<2x128xf32> to vector<128xf32>
    %385 = vector.shape_cast %384 : vector<128xf32> to vector<1x128xf32>
    %cst_513 = arith.constant 5.000000e-01 : f32
    %386 = vector.broadcast %cst_513 : f32 to vector<1x128xf32>
    %387 = arith.mulf %385, %386 : vector<1x128xf32>
    %388 = arith.mulf %382, %382 : vector<1x128xf32>
    %389 = arith.subf %387, %388 : vector<1x128xf32>
    %cst_514 = arith.constant 0.000000e+00 : f32
    %390 = vector.broadcast %cst_514 : f32 to vector<1x128xf32>
    %391 = arith.maximumf %389, %390 : vector<1x128xf32>
    %cst_515 = arith.constant 9.99999974E-6 : f32
    %392 = vector.broadcast %cst_515 : f32 to vector<1x128xf32>
    %393 = arith.addf %391, %392 : vector<1x128xf32>
    %394 = math.rsqrt %393 : vector<1x128xf32>
    %395 = arith.mulf %394, %377 : vector<1x128xf32>
    %396 = arith.mulf %382, %395 : vector<1x128xf32>
    %397 = arith.subf %378, %396 : vector<1x128xf32>
    %398 = vector.broadcast %395 : vector<1x128xf32> to vector<2x128xf32>
    %399 = arith.mulf %376, %398 : vector<2x128xf32>
    %400 = vector.broadcast %397 : vector<1x128xf32> to vector<2x128xf32>
    %401 = arith.addf %399, %400 : vector<2x128xf32>
    %cst_516 = arith.constant 0.000000e+00 : f32
    %402 = vector.broadcast %cst_516 : f32 to vector<2x128xf32>
    %403 = arith.maximumf %401, %402 : vector<2x128xf32>
    %404 = arith.truncf %403 : vector<2x128xf32> to vector<2x128xbf16>
    %c0_517 = arith.constant 0 : index
    %c0_518 = arith.constant 0 : index
    %405 = vector.load %arg13[%c0_517, %c0_518] : memref<128x128xbf16, #tpu.memory_space<vmem>>, vector<128x128xbf16>
    %cst_519 = arith.constant dense<0.000000e+00> : vector<2x128xf32>
    %406 = tpu.matmul %404, %405, %cst_519 {dimension_numbers = #tpu.dot_dimension_numbers<[1], [0], [0], [1], [0, 0, 1, 1], [], []>} : vector<2x128xbf16>, vector<128x128xbf16>, vector<2x128xf32> -> vector<2x128xf32>
    %c0_520 = arith.constant 0 : index
    %c0_521 = arith.constant 0 : index
    %407 = vector.load %arg14[%c0_520, %c0_521] : memref<1x128xf32, #tpu.memory_space<vmem>>, vector<1x128xf32>
    %408 = vector.broadcast %407 : vector<1x128xf32> to vector<2x128xf32>
    %409 = arith.addf %406, %408 : vector<2x128xf32>
    %c0_522 = arith.constant 0 : index
    %c0_523 = arith.constant 0 : index
    %410 = vector.load %arg15[%c0_522, %c0_523] : memref<2x128xf32, #tpu.memory_space<vmem>>, vector<2x128xf32>
    tpu.vector_store %arg15[%c0_522, %c0_523], %409 {strides = array<i32>} : memref<2x128xf32, #tpu.memory_space<vmem>>, vector<2x128xf32>,
    return
  }
}

</mosaic_0001>

<bundles_post_ra>
// kernel: cifar10_encoder_forward.2
= control target key start
LH: loop header
LB: loop body
LE: loop exit
PB: predicated region body
PF: predicated region fallthrough
CT: control target
= control target key end

     0   :  { %s3077_s1 = inlined_call_operand.vmem [shape: bf16[128,128], index: 1, kind: input, shape index: {}]   ;;  %s3078_s0 = inlined_call_operand.vmem [shape: bf16[512,128], index: 0, kind: input, shape index: {}]   ;;  %s3079_s2 = inlined_call_operand.vmem [shape: f32[1,128], index: 2, kind: input, shape index: {}]   ;;  %s3080_s3 = inlined_call_operand.vmem [shape: f32[1,128], index: 3, kind: input, shape index: {}]   ;;  %s3081_s4 = inlined_call_operand.vmem [shape: bf16[512,128], index: 4, kind: output, shape index: {}]  }
   0x1   :  { %v1862_v0 = vld [vmem:[%s3077_s1] sm:$0xff]   ;;  %v1863_v1 = vld [vmem:[%s3077_s1 + $0x8] sm:$0xff]   ;;  %v1864_v2 = vld [vmem:[%s3077_s1 + $0x10] sm:$0xff]  }
   0x2   :  { %1766 = vmatprep.subr.bf16.mxu0 %v1862_v0  ;;  %1846 = vmatprep.subr.bf16.mxu1 %v1862_v0  ;;  %v1865_v3 = vld [vmem:[%s3077_s1 + $0x18] sm:$0xff]   ;;  %v1870_v4 = vld [vmem:[%s3078_s0] sm:$0xff]   ;;  %v1867_v6 = vld [vmem:[%s3077_s1 + $0x28] sm:$0xff]  }
   0x3   :  { %1767 = vmatpush3.bf16.msra.mxu0 %v1862_v0  ;;  %1854 = vmatpush3.bf16.msra.mxu1 %v1862_v0  ;;  %v1866_v5 = vld [vmem:[%s3077_s1 + $0x20] sm:$0xff]   ;;  %v1868_v7 = vld [vmem:[%s3077_s1 + $0x30] sm:$0xff]   ;;  %v1869_v8 = vld [vmem:[%s3077_s1 + $0x38] sm:$0xff]  }
   0x4   :  { %1768 = vmatprep.subr.bf16.mxu0 %v1863_v1  ;;  %1847 = vmatprep.subr.bf16.mxu1 %v1863_v1  ;;  %v1886_v9 = vld [vmem:[%s3078_s0 + $0x80] sm:$0xff]   ;;  %v1871_v10 = vld [vmem:[%s3078_s0 + $0x8] sm:$0xff]   ;;  %v1872_v11 = vld [vmem:[%s3078_s0 + $0x10] sm:$0xff]  }
   0x5   :  { %1782 = vmatprep.mubr.bf16.mxu0 %v1870_v4  ;;  %1814 = vmatprep.mubr.bf16.mxu1 %v1886_v9  ;;  %v1887_v12 = vld [vmem:[%s3078_s0 + $0x88] sm:$0xff]   ;;  %v1888_v13 = vld [vmem:[%s3078_s0 + $0x90] sm:$0xff]   ;;  %v1873_v14 = vld [vmem:[%s3078_s0 + $0x18] sm:$0xff]  }
   0x6   :  { %v1874_v15 = vld [vmem:[%s3078_s0 + $0x20] sm:$0xff]   ;;  %v1889_v16 = vld [vmem:[%s3078_s0 + $0x98] sm:$0xff]   ;;  %v1875_v18 = vld [vmem:[%s3078_s0 + $0x28] sm:$0xff]  }
   0x7   :  { %1769 = vmatpush3.bf16.msra.mxu0 %v1863_v1  ;;  %1855 = vmatpush3.bf16.msra.mxu1 %v1863_v1  ;;  %v1890_v17 = vld [vmem:[%s3078_s0 + $0xa0] sm:$0xff]   ;;  %v1891_v19 = vld [vmem:[%s3078_s0 + $0xa8] sm:$0xff]   ;;  %v1876_v20 = vld [vmem:[%s3078_s0 + $0x30] sm:$0xff]  }
   0x8   :  { %1770 = vmatprep.subr.bf16.mxu0 %v1864_v2  ;;  %1848 = vmatprep.subr.bf16.mxu1 %v1864_v2  ;;  %v1892_v21 = vld [vmem:[%s3078_s0 + $0xb0] sm:$0xff]   ;;  %v1877_v22 = vld [vmem:[%s3078_s0 + $0x38] sm:$0xff]   ;;  %v1878_v24 = vld [vmem:[%s3078_s0 + $0x40] sm:$0xff]  }
   0x9   :  { %v1893_v23 = vld [vmem:[%s3078_s0 + $0xb8] sm:$0xff]   ;;  %v1894_v25 = vld [vmem:[%s3078_s0 + $0xc0] sm:$0xff]   ;;  %v1879_v26 = vld [vmem:[%s3078_s0 + $0x48] sm:$0xff]  }
   0xa   :  { %v1895_v27 = vld [vmem:[%s3078_s0 + $0xc8] sm:$0xff]   ;;  %v1880_v28 = vld [vmem:[%s3078_s0 + $0x50] sm:$0xff]   ;;  %v1881_v30 = vld [vmem:[%s3078_s0 + $0x58] sm:$0xff]  }
   0xb   :  { %1771 = vmatpush3.bf16.msra.mxu0 %v1864_v2  ;;  %1856 = vmatpush3.bf16.msra.mxu1 %v1864_v2  ;;  %v1896_v29 = vld [vmem:[%s3078_s0 + $0xd0] sm:$0xff]   ;;  %v1897_v31 = vld [vmem:[%s3078_s0 + $0xd8] sm:$0xff]   ;;  %v1882_v32 = vld [vmem:[%s3078_s0 + $0x60] sm:$0xff]  }
   0xc   :  { %1772 = vmatprep.subr.bf16.mxu0 %v1865_v3  ;;  %1849 = vmatprep.subr.bf16.mxu1 %v1865_v3  ;;  %v1898_v33 = vld [vmem:[%s3078_s0 + $0xe0] sm:$0xff]   ;;  %v1883_v34 = vld [vmem:[%s3078_s0 + $0x68] sm:$0xff]   ;;  %v1884_v36 = vld [vmem:[%s3078_s0 + $0x70] sm:$0xff]  }
   0xd   :  { %v1899_v35 = vld [vmem:[%s3078_s0 + $0xe8] sm:$0xff]   ;;  %v1900_v37 = vld [vmem:[%s3078_s0 + $0xf0] sm:$0xff]   ;;  %v1885_v38 = vld [vmem:[%s3078_s0 + $0x78] sm:$0xff]  }
   0xe   :  { %v1901_v39 = vld [vmem:[%s3078_s0 + $0xf8] sm:$0xff]  }
   0xf   :  { %1773 = vmatpush3.bf16.msra.mxu0 %v1865_v3  ;;  %1857 = vmatpush3.bf16.msra.mxu1 %v1865_v3 }
  0x10   :  { %1774 = vmatprep.subr.bf16.mxu0 %v1866_v5  ;;  %1850 = vmatprep.subr.bf16.mxu1 %v1866_v5 }
  0x13   :  { %1775 = vmatpush3.bf16.msra.mxu0 %v1866_v5  ;;  %1858 = vmatpush3.bf16.msra.mxu1 %v1866_v5 }
  0x14   :  { %1776 = vmatprep.subr.bf16.mxu0 %v1867_v6  ;;  %1851 = vmatprep.subr.bf16.mxu1 %v1867_v6 }
  0x17   :  { %1777 = vmatpush3.bf16.msra.mxu0 %v1867_v6  ;;  %1859 = vmatpush3.bf16.msra.mxu1 %v1867_v6 }
  0x18   :  { %1778 = vmatprep.subr.bf16.mxu0 %v1868_v7  ;;  %1852 = vmatprep.subr.bf16.mxu1 %v1868_v7 }
  0x1b   :  { %1779 = vmatpush3.bf16.msra.mxu0 %v1868_v7  ;;  %1860 = vmatpush3.bf16.msra.mxu1 %v1868_v7 }
  0x1c   :  { %1780 = vmatprep.subr.bf16.mxu0 %v1869_v8  ;;  %1853 = vmatprep.subr.bf16.mxu1 %v1869_v8 }
  0x1f   :  { %1781 = vmatpush3.bf16.msra.mxu0 %v1869_v8  ;;  %1861 = vmatpush3.bf16.msra.mxu1 %v1869_v8 }
  0x22   :  { %1783 = vmatmul.mubr.bf16.vlgmr.msra.gmra.mrb[0].mxu0 %v1871_v10  ;;  %1815 = vmatmul.mubr.bf16.vlgmr.msra.gmra.mrb[0].mxu1 %v1887_v12 }
  0x23   :  { %1786 = vmatprep.mubr.bf16.mxu0 %v1872_v11  ;;  %1818 = vmatprep.mubr.bf16.mxu1 %v1888_v13 }
  0x2a   :  { %1787 = vmatmul.mubr.bf16.gmra.mrb[4].mxu0 %v1873_v14  ;;  %1819 = vmatmul.mubr.bf16.gmra.mrb[4].mxu1 %v1889_v16 }
  0x2b   :  { %1790 = vmatprep.mubr.bf16.mxu0 %v1874_v15  ;;  %1822 = vmatprep.mubr.bf16.mxu1 %v1890_v17 }
  0x32   :  { %1791 = vmatmul.mubr.bf16.gmra.mrb[8].mxu0 %v1875_v18  ;;  %1823 = vmatmul.mubr.bf16.gmra.mrb[8].mxu1 %v1891_v19 }
  0x33   :  { %1794 = vmatprep.mubr.bf16.mxu0 %v1876_v20  ;;  %1826 = vmatprep.mubr.bf16.mxu1 %v1892_v21 }
  0x3a   :  { %1795 = vmatmul.mubr.bf16.gmra.mrb[12].mxu0 %v1877_v22  ;;  %1827 = vmatmul.mubr.bf16.gmra.mrb[12].mxu1 %v1893_v23 }
  0x3b   :  { %1798 = vmatprep.mubr.bf16.mxu0 %v1878_v24  ;;  %1830 = vmatprep.mubr.bf16.mxu1 %v1894_v25 }
  0x42   :  { %1799 = vmatmul.mubr.bf16.gmra.mrb[16].mxu0 %v1879_v26  ;;  %1831 = vmatmul.mubr.bf16.gmra.mrb[16].mxu1 %v1895_v27 }
  0x43   :  { %1802 = vmatprep.mubr.bf16.mxu0 %v1880_v28  ;;  %1834 = vmatprep.mubr.bf16.mxu1 %v1896_v29 }
  0x4a   :  { %1803 = vmatmul.mubr.bf16.gmra.mrb[20].mxu0 %v1881_v30  ;;  %1835 = vmatmul.mubr.bf16.gmra.mrb[20].mxu1 %v1897_v31 }
  0x4b   :  { %1806 = vmatprep.mubr.bf16.mxu0 %v1882_v32  ;;  %1838 = vmatprep.mubr.bf16.mxu1 %v1898_v33 }
  0x52   :  { %1807 = vmatmul.mubr.bf16.gmra.mrb[24].mxu0 %v1883_v34  ;;  %1839 = vmatmul.mubr.bf16.gmra.mrb[24].mxu1 %v1899_v35 }
  0x53   :  { %1810 = vmatprep.mubr.bf16.mxu0 %v1884_v36  ;;  %1842 = vmatprep.mubr.bf16.mxu1 %v1900_v37 }
  0x5a   :  { %1811 = vmatmul.mubr.bf16.gmra.mrb[28].mxu0 %v1885_v38  ;;  %1843 = vmatmul.mubr.bf16.gmra.mrb[28].mxu1 %v1901_v39 }
  0xf5   :  { %v2049_v40 = vpop.f32.mrb[0].mxu0  ;;  %v2051_v41 = vpop.f32.mrb[0].mxu1 }
  0xf6   :  { %v2053_v42 = vpop.f32.mrb[1].mxu0  ;;  %v2055_v43 = vpop.f32.mrb[1].mxu1  ;;  %v701_v51 = vmul.f32 %v2049_v40, %v2049_v40 }
  0xf7   :  { %v2057_v44 = vpop.f32.mrb[2].mxu0  ;;  %v2059_v45 = vpop.f32.mrb[2].mxu1  ;;  %v699_v48 = vmul.f32 %v2053_v42, %v2053_v42 }
  0xf8   :  { %v2061_v46 = vpop.f32.mrb[3].mxu0  ;;  %v2063_v47 = vpop.f32.mrb[3].mxu1  ;;  %v702_v54 = vmul.f32 %v2057_v44, %v2057_v44 }
  0xf9   :  { %v629_v49 = vadd.f32 %v2061_v46, %v2053_v42  ;;  %v700_v50 = vmul.f32 %v2061_v46, %v2061_v46 }
  0xfb   :  { %v630_v52 = vadd.f32 %v2049_v40, %v629_v49  ;;  %v763_v53 = vadd.f32 %v700_v50, %v699_v48 }
  0xfd   :  { %v764_v55 = vadd.f32 %v763_v53, %v701_v51  ;;  %v2076_v56 = vpop.f32.mrb[4].mxu0  ;;  %v631_v57 = vadd.f32 %v2057_v44, %v630_v52  ;;  %v2079_v58 = vpop.f32.mrb[4].mxu1 }
  0xfe   :  { %v2081_v59 = vpop.f32.mrb[5].mxu0  ;;  %v2083_v60 = vpop.f32.mrb[5].mxu1  ;;  %v705_v7 = vmul.f32 %v2076_v56, %v2076_v56 }
  0xff   :  { %v632_v61 = vadd.f32 %v631_v57, %v2081_v59  ;;  %v703_v62 = vmul.f32 %v2081_v59, %v2081_v59  ;;  %v765_v63 = vadd.f32 %v764_v55, %v702_v54  ;;  %v2088_v0 = vpop.f32.mrb[6].mxu0  ;;  %v2090_v1 = vpop.f32.mrb[6].mxu1 }
 0x100   :  { %v2092_v2 = vpop.f32.mrb[7].mxu0  ;;  %v2094_v3 = vpop.f32.mrb[7].mxu1  ;;  %v706_v10 = vmul.f32 %v2088_v0, %v2088_v0 }
 0x101   :  { %v766_v4 = vadd.f32 %v765_v63, %v703_v62  ;;  %v633_v5 = vadd.f32 %v632_v61, %v2092_v2  ;;  %v704_v6 = vmul.f32 %v2092_v2, %v2092_v2 }
 0x103   :  { %v634_v8 = vadd.f32 %v2076_v56, %v633_v5  ;;  %v767_v9 = vadd.f32 %v766_v4, %v704_v6 }
 0x105   :  { %v768_v11 = vadd.f32 %v767_v9, %v705_v7  ;;  %v2104_v12 = vpop.f32.mrb[8].mxu0  ;;  %v635_v13 = vadd.f32 %v2088_v0, %v634_v8  ;;  %v2107_v14 = vpop.f32.mrb[8].mxu1 }
 0x106   :  { %v2109_v15 = vpop.f32.mrb[9].mxu0  ;;  %v2111_v16 = vpop.f32.mrb[9].mxu1  ;;  %v709_v27 = vmul.f32 %v2104_v12, %v2104_v12 }
 0x107   :  { %v636_v17 = vadd.f32 %v635_v13, %v2109_v15  ;;  %v707_v18 = vmul.f32 %v2109_v15, %v2109_v15  ;;  %v769_v19 = vadd.f32 %v768_v11, %v706_v10  ;;  %v2116_v20 = vpop.f32.mrb[10].mxu0  ;;  %v2118_v21 = vpop.f32.mrb[10].mxu1 }
 0x108   :  { %v2120_v22 = vpop.f32.mrb[11].mxu0  ;;  %v2122_v23 = vpop.f32.mrb[11].mxu1  ;;  %v710_v30 = vmul.f32 %v2116_v20, %v2116_v20 }
 0x109   :  { %v770_v24 = vadd.f32 %v769_v19, %v707_v18  ;;  %v637_v25 = vadd.f32 %v636_v17, %v2120_v22  ;;  %v708_v26 = vmul.f32 %v2120_v22, %v2120_v22 }
 0x10b   :  { %v638_v28 = vadd.f32 %v2104_v12, %v637_v25  ;;  %v771_v29 = vadd.f32 %v770_v24, %v708_v26 }
 0x10d   :  { %v772_v31 = vadd.f32 %v771_v29, %v709_v27  ;;  %v2132_v32 = vpop.f32.mrb[12].mxu0  ;;  %v639_v33 = vadd.f32 %v2116_v20, %v638_v28  ;;  %v2135_v34 = vpop.f32.mrb[12].mxu1 }
 0x10e   :  { %v2137_v35 = vpop.f32.mrb[13].mxu0  ;;  %v2139_v36 = vpop.f32.mrb[13].mxu1  ;;  %v713_v55 = vmul.f32 %v2132_v32, %v2132_v32 }
 0x10f   :  { %v640_v37 = vadd.f32 %v639_v33, %v2137_v35  ;;  %v711_v38 = vmul.f32 %v2137_v35, %v2137_v35  ;;  %v773_v39 = vadd.f32 %v772_v31, %v710_v30  ;;  %v2144_v48 = vpop.f32.mrb[14].mxu0  ;;  %v2146_v49 = vpop.f32.mrb[14].mxu1 }
 0x110   :  { %3112 = vst [vmem:[#allocation2_spill] sm:$0xff] %v2144_v48  ;;  %v2148_v50 = vpop.f32.mrb[15].mxu0  ;;  %v2150_v51 = vpop.f32.mrb[15].mxu1  ;;  %v714_v62 = vmul.f32 %v2144_v48, %v2144_v48 }
 0x111   :  { %v774_v52 = vadd.f32 %v773_v39, %v711_v38  ;;  %v641_v53 = vadd.f32 %v640_v37, %v2148_v50  ;;  %v712_v54 = vmul.f32 %v2148_v50, %v2148_v50 }
 0x113   :  { %v642_v57 = vadd.f32 %v2132_v32, %v641_v53  ;;  %v775_v61 = vadd.f32 %v774_v52, %v712_v54 }
 0x115   :  { %v776_v63 = vadd.f32 %v775_v61, %v713_v55  ;;  %v2160_v4 = vpop.f32.mrb[16].mxu0  ;;  %v643_v5 = vadd.f32 %v2144_v48, %v642_v57  ;;  %v2163_v6 = vpop.f32.mrb[16].mxu1  ;;  %v732_v48 = vmul.f32 %v2063_v47, %v2063_v47 }
 0x116   :  { %3113 = vst [vmem:[#allocation3_spill] sm:$0xff] %v2160_v4  ;;  %v2165_v7 = vpop.f32.mrb[17].mxu0  ;;  %v2167_v8 = vpop.f32.mrb[17].mxu1  ;;  %v717_v27 = vmul.f32 %v2160_v4, %v2160_v4 }
 0x117   :  { %3114 = vst [vmem:[#allocation4_spill] sm:$0xff] %v2165_v7  ;;  %v644_v9 = vadd.f32 %v643_v5, %v2165_v7  ;;  %v715_v10 = vmul.f32 %v2165_v7, %v2165_v7  ;;  %v777_v11 = vadd.f32 %v776_v63, %v714_v62  ;;  %v2172_v13 = vpop.f32.mrb[18].mxu0  ;;  %v2174_v17 = vpop.f32.mrb[18].mxu1 }
 0x118   :  { %3115 = vst [vmem:[#allocation5_spill] sm:$0xff] %v2172_v13  ;;  %v2176_v18 = vpop.f32.mrb[19].mxu0  ;;  %v2178_v19 = vpop.f32.mrb[19].mxu1  ;;  %v718_v30 = vmul.f32 %v2172_v13, %v2172_v13 }
 0x119   :  { %3116 = vst [vmem:[#allocation6_spill] sm:$0xff] %v2176_v18  ;;  %v778_v24 = vadd.f32 %v777_v11, %v715_v10  ;;  %v645_v25 = vadd.f32 %v644_v9, %v2176_v18  ;;  %v716_v26 = vmul.f32 %v2176_v18, %v2176_v18 }
 0x11b   :  { %v646_v28 = vadd.f32 %v2160_v4, %v645_v25  ;;  %v779_v29 = vadd.f32 %v778_v24, %v716_v26 }
 0x11d   :  { %v780_v31 = vadd.f32 %v779_v29, %v717_v27  ;;  %v2188_v33 = vpop.f32.mrb[20].mxu0  ;;  %v647_v37 = vadd.f32 %v2172_v13, %v646_v28  ;;  %v2191_v38 = vpop.f32.mrb[20].mxu1 }
 0x11e   :  { %3117 = vst [vmem:[#allocation7_spill] sm:$0xff] %v2188_v33  ;;  %3118 = vst [vmem:[#allocation8_spill] sm:$0xff] %v2191_v38  ;;  %v2193_v39 = vpop.f32.mrb[21].mxu0  ;;  %v2195_v52 = vpop.f32.mrb[21].mxu1  ;;  %v721_v11 = vmul.f32 %v2188_v33, %v2188_v33 }
 0x11f   :  { %3119 = vst [vmem:[#allocation9_spill] sm:$0xff] %v2193_v39  ;;  %v648_v53 = vadd.f32 %v647_v37, %v2193_v39  ;;  %v719_v54 = vmul.f32 %v2193_v39, %v2193_v39  ;;  %v781_v55 = vadd.f32 %v780_v31, %v718_v30  ;;  %v2200_v57 = vpop.f32.mrb[22].mxu0  ;;  %v2202_v61 = vpop.f32.mrb[22].mxu1 }
 0x120   :  { %3120 = vst [vmem:[#allocation10_spill] sm:$0xff] %v2200_v57  ;;  %3121 = vst [vmem:[#allocation11_spill] sm:$0xff] %v2202_v61  ;;  %v2204_v62 = vpop.f32.mrb[23].mxu0  ;;  %v2206_v63 = vpop.f32.mrb[23].mxu1  ;;  %v722_v26 = vmul.f32 %v2200_v57, %v2200_v57 }
 0x121   :  { %3122 = vst [vmem:[#allocation12_spill] sm:$0xff] %v2204_v62  ;;  %v782_v5 = vadd.f32 %v781_v55, %v719_v54  ;;  %v649_v9 = vadd.f32 %v648_v53, %v2204_v62  ;;  %v720_v10 = vmul.f32 %v2204_v62, %v2204_v62 }
 0x123   :  { %v650_v24 = vadd.f32 %v2188_v33, %v649_v9  ;;  %v783_v25 = vadd.f32 %v782_v5, %v720_v10 }
 0x125   :  { %v784_v27 = vadd.f32 %v783_v25, %v721_v11  ;;  %v2216_v28 = vpop.f32.mrb[24].mxu0  ;;  %v651_v29 = vadd.f32 %v2200_v57, %v650_v24  ;;  %v2219_v30 = vpop.f32.mrb[24].mxu1 }
 0x126   :  { %3123 = vst [vmem:[#allocation13_spill] sm:$0xff] %v2216_v28  ;;  %3124 = vst [vmem:[#allocation14_spill] sm:$0xff] %v2219_v30  ;;  %v2221_v31 = vpop.f32.mrb[25].mxu0  ;;  %v2223_v37 = vpop.f32.mrb[25].mxu1 }
 0x127   :  { %3125 = vst [vmem:[#allocation15_spill] sm:$0xff] %v2221_v31  ;;  %3126 = vst [vmem:[#allocation16_spill] sm:$0xff] %v2223_v37  ;;  %v652_v53 = vadd.f32 %v651_v29, %v2221_v31  ;;  %v723_v54 = vmul.f32 %v2221_v31, %v2221_v31  ;;  %v785_v55 = vadd.f32 %v784_v27, %v722_v26  ;;  %v2228_v5 = vpop.f32.mrb[26].mxu0  ;;  %v2230_v9 = vpop.f32.mrb[26].mxu1 }
 0x128   :  { %3127 = vst [vmem:[#allocation17_spill] sm:$0xff] %v2228_v5  ;;  %3128 = vst [vmem:[#allocation18_spill] sm:$0xff] %v2230_v9  ;;  %v2232_v10 = vpop.f32.mrb[27].mxu0  ;;  %v2234_v11 = vpop.f32.mrb[27].mxu1  ;;  %v725_v29 = vmul.f32 %v2216_v28, %v2216_v28  ;;  %v726_v27 = vmul.f32 %v2228_v5, %v2228_v5 }
 0x129   :  { %3129 = vst [vmem:[#allocation19_spill] sm:$0xff] %v2232_v10  ;;  %3130 = vst [vmem:[#allocation20_spill] sm:$0xff] %v2234_v11  ;;  %v786_v24 = vadd.f32 %v785_v55, %v723_v54  ;;  %v653_v25 = vadd.f32 %v652_v53, %v2232_v10  ;;  %v724_v57 = vmul.f32 %v2232_v10, %v2232_v10 }
 0x12b   :  { %v654_v31 = vadd.f32 %v2216_v28, %v653_v25  ;;  %v787_v26 = vadd.f32 %v786_v24, %v724_v57 }
 0x12d   :  { %v788_v33 = vadd.f32 %v787_v26, %v725_v29  ;;  %v2244_v62 = vpop.f32.mrb[28].mxu0  ;;  %v655_v39 = vadd.f32 %v2228_v5, %v654_v31  ;;  %v2247_v54 = vpop.f32.mrb[28].mxu1 }
 0x12e   :  { %3131 = vst [vmem:[#allocation21_spill] sm:$0xff] %v2247_v54  ;;  %v2249_v53 = vpop.f32.mrb[29].mxu0  ;;  %v2251_v55 = vpop.f32.mrb[29].mxu1 }
 0x12f   :  { %3132 = vst [vmem:[#allocation22_spill] sm:$0xff] %v2249_v53  ;;  %3133 = vst [vmem:[#allocation23_spill] sm:$0xff] %v2251_v55  ;;  %v656_v10 = vadd.f32 %v655_v39, %v2249_v53  ;;  %v727_v25 = vmul.f32 %v2249_v53, %v2249_v53  ;;  %v789_v57 = vadd.f32 %v788_v33, %v726_v27  ;;  %v2256_v24 = vpop.f32.mrb[30].mxu0  ;;  %v2258_v28 = vpop.f32.mrb[30].mxu1 }
 0x130   :  { %v2260_v29 = vpop.f32.mrb[31].mxu0  ;;  %v2262_v26 = vpop.f32.mrb[31].mxu1  ;;  %v729_v39 = vmul.f32 %v2244_v62, %v2244_v62  ;;  %v730_v27 = vmul.f32 %v2256_v24, %v2256_v24 }
 0x131   :  { %3134 = vst [vmem:[#allocation24_spill] sm:$0xff] %v2260_v29  ;;  %3135 = vst [vmem:[#allocation25_spill] sm:$0xff] %v2262_v26  ;;  %v790_v31 = vadd.f32 %v789_v57, %v727_v25  ;;  %v657_v5 = vadd.f32 %v656_v10, %v2260_v29  ;;  %v728_v13 = vmul.f32 %v2260_v29, %v2260_v29 }
 0x132   :  { %v731_v25 = vmul.f32 %v2055_v43, %v2055_v43 }
 0x133   :  { %v658_v53 = vadd.f32 %v2244_v62, %v657_v5  ;;  %v791_v33 = vadd.f32 %v790_v31, %v728_v13  ;;  %v733_v13 = vmul.f32 %v2051_v41, %v2051_v41 }
 0x135   :  { %v792_v4 = vadd.f32 %v791_v33, %v729_v39  ;;  %v659_v18 = vadd.f32 %v2256_v24, %v658_v53  ;;  %v734_v53 = vmul.f32 %v2059_v45, %v2059_v45 }
 0x137   :  { %v660_v10 = vadd.f32 %v659_v18, %v2055_v43  ;;  %v793_v57 = vadd.f32 %v792_v4, %v730_v27  ;;  %v735_v4 = vmul.f32 %v2083_v60, %v2083_v60 }
 0x139   :  { %v794_v7 = vadd.f32 %v793_v57, %v731_v25  ;;  %v661_v29 = vadd.f32 %v660_v10, %v2063_v47  ;;  %v736_v57 = vmul.f32 %v2094_v3, %v2094_v3 }
 0x13b   :  { %v662_v5 = vadd.f32 %v2051_v41, %v661_v29  ;;  %v795_v31 = vadd.f32 %v794_v7, %v732_v48  ;;  %v737_v48 = vmul.f32 %v2079_v58, %v2079_v58 }
 0x13d   :  { %v796_v39 = vadd.f32 %v795_v31, %v733_v13  ;;  %v663_v33 = vadd.f32 %v2059_v45, %v662_v5  ;;  %v738_v13 = vmul.f32 %v2090_v1, %v2090_v1 }
 0x13f   :  { %v664_v18 = vadd.f32 %v663_v33, %v2083_v60  ;;  %v797_v27 = vadd.f32 %v796_v39, %v734_v53  ;;  %v739_v53 = vmul.f32 %v2111_v16, %v2111_v16 }
 0x141   :  { %v798_v25 = vadd.f32 %v797_v27, %v735_v4  ;;  %v665_v10 = vadd.f32 %v664_v18, %v2094_v3  ;;  %v740_v27 = vmul.f32 %v2122_v23, %v2122_v23 }
 0x143   :  { %v666_v7 = vadd.f32 %v2079_v58, %v665_v10  ;;  %v799_v29 = vadd.f32 %v798_v25, %v736_v57  ;;  %v741_v25 = vmul.f32 %v2107_v14, %v2107_v14 }
 0x145   :  { %v800_v5 = vadd.f32 %v799_v29, %v737_v48  ;;  %v667_v31 = vadd.f32 %v2090_v1, %v666_v7  ;;  %v742_v48 = vmul.f32 %v2118_v21, %v2118_v21 }
 0x147   :  { %v668_v39 = vadd.f32 %v667_v31, %v2111_v16  ;;  %v801_v33 = vadd.f32 %v800_v5, %v738_v13  ;;  %v743_v13 = vmul.f32 %v2139_v36, %v2139_v36 }
 0x149   :  { %v802_v4 = vadd.f32 %v801_v33, %v739_v53  ;;  %v669_v18 = vadd.f32 %v668_v39, %v2122_v23  ;;  %v744_v33 = vmul.f32 %v2150_v51, %v2150_v51 }
 0x14b   :  { %v670_v10 = vadd.f32 %v2107_v14, %v669_v18  ;;  %v803_v57 = vadd.f32 %v802_v4, %v740_v27  ;;  %v745_v4 = vmul.f32 %v2135_v34, %v2135_v34 }
 0x14d   :  { %v804_v7 = vadd.f32 %v803_v57, %v741_v25  ;;  %v671_v29 = vadd.f32 %v2118_v21, %v670_v10  ;;  %v746_v25 = vmul.f32 %v2146_v49, %v2146_v49 }
 0x14f   :  { %v672_v5 = vadd.f32 %v671_v29, %v2139_v36  ;;  %v805_v31 = vadd.f32 %v804_v7, %v742_v48  ;;  %v747_v48 = vmul.f32 %v2167_v8, %v2167_v8 }
 0x151   :  { %v806_v53 = vadd.f32 %v805_v31, %v743_v13  ;;  %v673_v39 = vadd.f32 %v672_v5, %v2150_v51  ;;  %v748_v31 = vmul.f32 %v2178_v19, %v2178_v19 }
 0x153   :  { %v674_v18 = vadd.f32 %v2135_v34, %v673_v39  ;;  %v807_v27 = vadd.f32 %v806_v53, %v744_v33  ;;  %v749_v53 = vmul.f32 %v2163_v6, %v2163_v6 }
 0x155   :  { %v808_v10 = vadd.f32 %v807_v27, %v745_v4  ;;  %v675_v57 = vadd.f32 %v2146_v49, %v674_v18  ;;  %v750_v4 = vmul.f32 %v2174_v17, %v2174_v17 }
 0x157   :  { %v676_v7 = vadd.f32 %v675_v57, %v2167_v8  ;;  %v809_v29 = vadd.f32 %v808_v10, %v746_v25  ;;  %v751_v25 = vmul.f32 %v2195_v52, %v2195_v52 }
 0x159   :  { %v810_v13 = vadd.f32 %v809_v29, %v747_v48  ;;  %v677_v5 = vadd.f32 %v676_v7, %v2178_v19  ;;  %v752_v29 = vmul.f32 %v2206_v63, %v2206_v63 }
 0x15b   :  { %v678_v39 = vadd.f32 %v2163_v6, %v677_v5  ;;  %v811_v33 = vadd.f32 %v810_v13, %v748_v31  ;;  %v753_v13 = vmul.f32 %v2191_v38, %v2191_v38 }
 0x15d   :  { %v812_v18 = vadd.f32 %v811_v33, %v749_v53  ;;  %v679_v27 = vadd.f32 %v2174_v17, %v678_v39  ;;  %v754_v53 = vmul.f32 %v2202_v61, %v2202_v61 }
 0x15f   :  { %v680_v10 = vadd.f32 %v679_v27, %v2195_v52  ;;  %v813_v57 = vadd.f32 %v812_v18, %v750_v4  ;;  %v755_v4 = vmul.f32 %v2223_v37, %v2223_v37 }
 0x161   :  { %v814_v48 = vadd.f32 %v813_v57, %v751_v25  ;;  %v681_v7 = vadd.f32 %v680_v10, %v2206_v63  ;;  %v756_v57 = vmul.f32 %v2234_v11, %v2234_v11 }
 0x163   :  { %v682_v5 = vadd.f32 %v2191_v38, %v681_v7  ;;  %v815_v31 = vadd.f32 %v814_v48, %v752_v29  ;;  %v757_v48 = vmul.f32 %v2219_v30, %v2219_v30 }
 0x165   :  { %v816_v39 = vadd.f32 %v815_v31, %v753_v13  ;;  %v683_v33 = vadd.f32 %v2202_v61, %v682_v5  ;;  %v758_v13 = vmul.f32 %v2230_v9, %v2230_v9 }
 0x167   :  { %v684_v18 = vadd.f32 %v683_v33, %v2223_v37  ;;  %v817_v27 = vadd.f32 %v816_v39, %v754_v53  ;;  %v759_v53 = vmul.f32 %v2251_v55, %v2251_v55 }
 0x169   :  { %v818_v25 = vadd.f32 %v817_v27, %v755_v4  ;;  %v685_v10 = vadd.f32 %v684_v18, %v2234_v11  ;;  %v760_v27 = vmul.f32 %v2262_v26, %v2262_v26 }
 0x16b   :  { %v686_v7 = vadd.f32 %v2219_v30, %v685_v10  ;;  %v819_v29 = vadd.f32 %v818_v25, %v756_v57  ;;  %v761_v25 = vmul.f32 %v2247_v54, %v2247_v54 }
 0x16d   :  { %v820_v5 = vadd.f32 %v819_v29, %v757_v48  ;;  %v687_v31 = vadd.f32 %v2230_v9, %v686_v7  ;;  %v762_v48 = vmul.f32 %v2258_v28, %v2258_v28 }
 0x16f   :  { %v688_v39 = vadd.f32 %v687_v31, %v2251_v55  ;;  %v821_v33 = vadd.f32 %v820_v5, %v758_v13 }
 0x171   :  { %v822_v4 = vadd.f32 %v821_v33, %v759_v53  ;;  %v689_v18 = vadd.f32 %v688_v39, %v2262_v26 }
 0x173   :  { %v690_v10 = vadd.f32 %v2247_v54, %v689_v18  ;;  %v823_v57 = vadd.f32 %v822_v4, %v760_v27 }
 0x175   :  { %v691_v7 = vadd.f32 %v2258_v28, %v690_v10  ;;  %v824_v29 = vadd.f32 %v823_v57, %v761_v25  ;;  %v841_v25 = vlaneseq }
 0x177   :  { %v692_v31 = vrot.slane %v691_v7, 4  ;;  %v825_v13 = vadd.f32 %v824_v29, %v762_v48  ;;  %v2369_v57 = vshrl.u32 %v841_v25, 7  ;;  %v627_v48 = vld [vmem:[%s3079_s2] sm:$0x1]  ;;  %v3143_v25 = vld [vmem:[#allocation7_spill] sm:$0xff] }
 0x179   :  { %v693_v5 = vadd.f32 %v692_v31, %v691_v7  ;;  %v826_v53 = vrot.slane %v825_v13, 4  ;;  %v3106_v7 = vsub.s32 0, %v2369_v57 }
 0x17b   :  { %v694_v39 = vrot.slane %v693_v5, 2  ;;  %v827_v33 = vadd.f32 %v826_v53, %v825_v13  ;;  %v3136_v13 = vld [vmem:[#allocation2_spill] sm:$0xff] }
 0x17c   :  { %v3138_v53 = vld [vmem:[#allocation6_spill] sm:$0xff] }
 0x17d   :  { %v695_v55 = vadd.f32 %v694_v39, %v693_v5  ;;  %v828_v26 = vrot.slane %v827_v33, 2  ;;  %v3137_v5 = vld [vmem:[#allocation4_spill] sm:$0xff]  ;;  %v3139_v39 = vld [vmem:[#allocation3_spill] sm:$0xff] }
 0x17f   :  { %v696_v9 = vrot.slane %v695_v55, 1  ;;  %v829_v30 = vadd.f32 %v828_v26, %v827_v33  ;;  %v3140_v33 = vld [vmem:[#allocation5_spill] sm:$0xff] }
 0x181   :  { %v697_v11 = vadd.f32 %v696_v9, %v695_v55  ;;  %v830_v37 = vrot.slane %v829_v30, 1 }
 0x183   :  { %v698_v18 = vmul.f32 0.001953125, %v697_v11  ;;  %v831_v4 = vadd.f32 %v830_v37, %v829_v30  ;;  %v2378_v30 = vld [vmem:[%s3080_s3] sm:$0x1] }
 0x185   :  { %v832_v27 = vmul.f32 0.001953125, %v831_v4  ;;  %v833_v54 = vmul.f32 %v698_v18, %v698_v18 }
 0x187   :  { %v834_v61 = vsub.f32 %v832_v27, %v833_v54  ;;  %v3142_v27 = vld [vmem:[#allocation12_spill] sm:$0xff] }
 0x189   :  { %v835_v38 = vmax.f32 %v834_v61, 0.0  ;;  %v3149_v61 = vld [vmem:[#allocation22_spill] sm:$0xff] }
 0x18b   :  { %v836_v10 = vadd.f32 1e-05, %v835_v38 }
 0x18d   :  { %1902 = vrsqrt.f32 %v836_v10 }
 0x197   :  { %v1903_v26 = vpop.eup %1902 }
 0x198   :  { %v838_v9 = vmul.f32 %v1903_v26, %v627_v48  ;;  %v3144_v26 = vld [vmem:[#allocation10_spill] sm:$0xff] }
 0x19a   :  { %v2380_v37 = vmul.f32 %v838_v9, %v698_v18  ;;  %v2384_v38 = vrot.slane %v838_v9, %v3106_v7  ;;  %v3141_v18 = vld [vmem:[#allocation9_spill] sm:$0xff]  ;;  %v3150_v7 = vld [vmem:[#allocation24_spill] sm:$0xff] }
 0x19c   :  { %v2390_v11 = vmul.f32 %v2384_v38, %v2053_v42  ;;  %v2394_v54 = vmul.f32 %v2384_v38, %v2061_v46  ;;  %v2398_v55 = vmul.f32 %v2049_v40, %v2384_v38  ;;  %v2402_v29 = vmul.f32 %v2057_v44, %v2384_v38 }
 0x19d   :  { %v2406_v31 = vmul.f32 %v2384_v38, %v2081_v59  ;;  %v2410_v42 = vmul.f32 %v2384_v38, %v2092_v2  ;;  %v2414_v46 = vmul.f32 %v2076_v56, %v2384_v38  ;;  %v2418_v40 = vmul.f32 %v2088_v0, %v2384_v38 }
 0x19e   :  { %v2422_v44 = vmul.f32 %v2384_v38, %v2109_v15  ;;  %v2426_v59 = vmul.f32 %v2384_v38, %v2120_v22  ;;  %v2430_v2 = vmul.f32 %v2104_v12, %v2384_v38  ;;  %v2434_v56 = vmul.f32 %v2116_v20, %v2384_v38 }
 0x19f   :  { %v2438_v0 = vmul.f32 %v2384_v38, %v2137_v35  ;;  %v2442_v15 = vmul.f32 %v2384_v38, %v2148_v50  ;;  %v2446_v22 = vmul.f32 %v2132_v32, %v2384_v38  ;;  %v2450_v12 = vmul.f32 %v3136_v13, %v2384_v38  ;;  %v3145_v13 = vld [vmem:[#allocation15_spill] sm:$0xff] }
 0x1a0   :  { %v2454_v20 = vmul.f32 %v2384_v38, %v3137_v5  ;;  %v2458_v35 = vmul.f32 %v2384_v38, %v3138_v53  ;;  %v2462_v50 = vmul.f32 %v3139_v39, %v2384_v38  ;;  %v2466_v32 = vmul.f32 %v3140_v33, %v2384_v38  ;;  %v3146_v53 = vld [vmem:[#allocation19_spill] sm:$0xff]  ;;  %v3147_v33 = vld [vmem:[#allocation13_spill] sm:$0xff] }
 0x1a1   :  { %v2470_v4 = vmul.f32 %v2384_v38, %v3141_v18  ;;  %v2474_v10 = vmul.f32 %v2384_v38, %v3142_v27  ;;  %v2478_v48 = vmul.f32 %v3143_v25, %v2384_v38  ;;  %v2482_v9 = vmul.f32 %v3144_v26, %v2384_v38  ;;  %v3148_v27 = vld [vmem:[#allocation17_spill] sm:$0xff] }
 0x1a2   :  { %v2486_v5 = vmul.f32 %v2384_v38, %v3145_v13  ;;  %v2490_v39 = vmul.f32 %v2384_v38, %v3146_v53  ;;  %v2494_v18 = vmul.f32 %v3147_v33, %v2384_v38  ;;  %v2498_v25 = vmul.f32 %v3148_v27, %v2384_v38 }
 0x1a3   :  { %v2502_v26 = vmul.f32 %v2384_v38, %v3149_v61  ;;  %v2506_v13 = vmul.f32 %v2384_v38, %v3150_v7  ;;  %v2510_v53 = vmul.f32 %v2244_v62, %v2384_v38  ;;  %v2514_v33 = vmul.f32 %v2256_v24, %v2384_v38 }
 0x1a4   :  { %v2518_v27 = vmul.f32 %v2384_v38, %v2055_v43  ;;  %v2522_v61 = vmul.f32 %v2384_v38, %v2063_v47  ;;  %v2526_v7 = vmul.f32 %v2051_v41, %v2384_v38  ;;  %v2530_v62 = vmul.f32 %v2059_v45, %v2384_v38 }
 0x1a5   :  { %v2534_v24 = vmul.f32 %v2384_v38, %v2083_v60  ;;  %v2538_v43 = vmul.f32 %v2384_v38, %v2094_v3  ;;  %v2542_v47 = vmul.f32 %v2079_v58, %v2384_v38  ;;  %v2546_v41 = vmul.f32 %v2090_v1, %v2384_v38 }
 0x1a6   :  { %v2550_v45 = vmul.f32 %v2384_v38, %v2111_v16  ;;  %v2554_v60 = vmul.f32 %v2384_v38, %v2122_v23  ;;  %v2558_v3 = vmul.f32 %v2107_v14, %v2384_v38  ;;  %v2562_v58 = vmul.f32 %v2118_v21, %v2384_v38 }
 0x1a7   :  { %v2566_v1 = vmul.f32 %v2384_v38, %v2139_v36  ;;  %v2570_v16 = vmul.f32 %v2384_v38, %v2150_v51  ;;  %v2574_v23 = vmul.f32 %v2135_v34, %v2384_v38  ;;  %v2578_v14 = vmul.f32 %v2146_v49, %v2384_v38 }
 0x1a8   :  { %v2582_v21 = vmul.f32 %v2384_v38, %v2167_v8  ;;  %v2586_v36 = vmul.f32 %v2384_v38, %v2178_v19  ;;  %v2590_v51 = vmul.f32 %v2163_v6, %v2384_v38  ;;  %v2594_v34 = vmul.f32 %v2174_v17, %v2384_v38 }
 0x1a9   :  { %v2598_v49 = vmul.f32 %v2384_v38, %v2195_v52  ;;  %v2602_v8 = vmul.f32 %v2384_v38, %v2206_v63 }
 0x1aa   :  { %3151 = vst [vmem:[#allocation2_spill] sm:$0xff] %v2582_v21  ;;  %3152 = vst [vmem:[#allocation4_spill] sm:$0xff] %v2586_v36  ;;  %v3157_v21 = vld [vmem:[#allocation8_spill] sm:$0xff]  ;;  %v3159_v36 = vld [vmem:[#allocation11_spill] sm:$0xff] }
 0x1ab   :  { %3153 = vst [vmem:[#allocation6_spill] sm:$0xff] %v2590_v51  ;;  %3154 = vst [vmem:[#allocation3_spill] sm:$0xff] %v2594_v34  ;;  %v2606_v19 = vmul.f32 %v3157_v21, %v2384_v38  ;;  %v2610_v6 = vmul.f32 %v3159_v36, %v2384_v38  ;;  %v3161_v51 = vld [vmem:[#allocation16_spill] sm:$0xff] }
 0x1ac   :  { %3155 = vst [vmem:[#allocation5_spill] sm:$0xff] %v2598_v49  ;;  %3156 = vst [vmem:[#allocation9_spill] sm:$0xff] %v2602_v8  ;;  %v2614_v17 = vmul.f32 %v2384_v38, %v3161_v51  ;;  %v3163_v34 = vld [vmem:[#allocation20_spill] sm:$0xff]  ;;  %v3164_v49 = vld [vmem:[#allocation14_spill] sm:$0xff] }
 0x1ad   :  { %3158 = vst [vmem:[#allocation12_spill] sm:$0xff] %v2606_v19  ;;  %3160 = vst [vmem:[#allocation7_spill] sm:$0xff] %v2610_v6  ;;  %v2618_v52 = vmul.f32 %v2384_v38, %v3163_v34  ;;  %v2622_v63 = vmul.f32 %v3164_v49, %v2384_v38  ;;  %v3166_v8 = vld [vmem:[#allocation18_spill] sm:$0xff]  ;;  %v3168_v19 = vld [vmem:[#allocation23_spill] sm:$0xff]  ;;  %v2642_v49 = vmul.f32 %v2258_v28, %v2384_v38 }
 0x1ae   :  { %3162 = vst [vmem:[#allocation10_spill] sm:$0xff] %v2614_v17  ;;  %v2626_v21 = vmul.f32 %v3166_v8, %v2384_v38  ;;  %v2630_v36 = vmul.f32 %v2384_v38, %v3168_v19  ;;  %v3169_v6 = vld [vmem:[#allocation25_spill] sm:$0xff]  ;;  %v3172_v8 = vsub.f32 %v2378_v30, %v2380_v37 }
 0x1af   :  { %3165 = vst [vmem:[#allocation15_spill] sm:$0xff] %v2622_v63  ;;  %v2634_v51 = vmul.f32 %v2384_v38, %v3169_v6  ;;  %v3170_v17 = vld [vmem:[#allocation21_spill] sm:$0xff]  ;;  %v3171_v63 = vsub.s32 0, %v2369_v57 }
 0x1b0   :  { %3167 = vst [vmem:[#allocation19_spill] sm:$0xff] %v2626_v21  ;;  %v2638_v34 = vmul.f32 %v3170_v17, %v2384_v38 }
 0x1b1   :  { %v2649_v21 = vrot.slane %v3172_v8, %v3171_v63 }
 0x1b2   :  { %v3185_v63 = vld [vmem:[#allocation3_spill] sm:$0xff] }
 0x1b3   :  { %v2653_v19 = vadd.f32 %v2649_v21, %v2390_v11  ;;  %v2657_v6 = vadd.f32 %v2649_v21, %v2394_v54  ;;  %v2661_v17 = vadd.f32 %v2649_v21, %v2398_v55  ;;  %v2665_v28 = vadd.f32 %v2649_v21, %v2402_v29  ;;  %v3186_v8 = vld [vmem:[#allocation5_spill] sm:$0xff] }
 0x1b4   :  { %v2669_v57 = vadd.f32 %v2649_v21, %v2406_v31  ;;  %v2673_v30 = vadd.f32 %v2649_v21, %v2410_v42  ;;  %v2677_v37 = vadd.f32 %v2649_v21, %v2414_v46  ;;  %v2681_v38 = vadd.f32 %v2649_v21, %v2418_v40 }
 0x1b5   :  { %3173 = vst [vmem:[#allocation13_spill] sm:$0xff] %v2653_v19  ;;  %3174 = vst [vmem:[#allocation17_spill] sm:$0xff] %v2657_v6  ;;  %v2685_v11 = vadd.f32 %v2649_v21, %v2422_v44  ;;  %v2689_v54 = vadd.f32 %v2649_v21, %v2426_v59  ;;  %v2693_v55 = vadd.f32 %v2649_v21, %v2430_v2 }
 0x1b6   :  { %3175 = vst [vmem:[#allocation22_spill] sm:$0xff] %v2661_v17  ;;  %3176 = vst [vmem:[#allocation24_spill] sm:$0xff] %v2665_v28  ;;  %v2697_v29 = vadd.f32 %v2649_v21, %v2434_v56  ;;  %v2701_v31 = vadd.f32 %v2649_v21, %v2438_v0  ;;  %v2705_v42 = vadd.f32 %v2649_v21, %v2442_v15 }
 0x1b7   :  { %3177 = vst [vmem:[#allocation8_spill] sm:$0xff] %v2669_v57  ;;  %v2709_v46 = vadd.f32 %v2649_v21, %v2446_v22  ;;  %v2713_v40 = vadd.f32 %v2649_v21, %v2450_v12  ;;  %v2717_v44 = vadd.f32 %v2649_v21, %v2454_v20  ;;  %v2721_v59 = vadd.f32 %v2649_v21, %v2458_v35 }
 0x1b8   :  { %v2725_v2 = vadd.f32 %v2649_v21, %v2462_v50  ;;  %v2729_v56 = vadd.f32 %v2649_v21, %v2466_v32  ;;  %v2733_v0 = vadd.f32 %v2649_v21, %v2470_v4  ;;  %v2737_v15 = vadd.f32 %v2649_v21, %v2474_v10 }
 0x1b9   :  { %v2741_v22 = vadd.f32 %v2649_v21, %v2478_v48  ;;  %v2745_v12 = vadd.f32 %v2649_v21, %v2482_v9  ;;  %v2749_v20 = vadd.f32 %v2649_v21, %v2486_v5  ;;  %v2753_v35 = vadd.f32 %v2649_v21, %v2490_v39 }
 0x1ba   :  { %v2757_v50 = vadd.f32 %v2649_v21, %v2494_v18  ;;  %v2761_v32 = vadd.f32 %v2649_v21, %v2498_v25  ;;  %v2765_v4 = vadd.f32 %v2649_v21, %v2502_v26  ;;  %v2769_v10 = vadd.f32 %v2649_v21, %v2506_v13 }
 0x1bb   :  { %v2773_v48 = vadd.f32 %v2649_v21, %v2510_v53  ;;  %v2777_v9 = vadd.f32 %v2649_v21, %v2514_v33  ;;  %v2781_v5 = vadd.f32 %v2649_v21, %v2518_v27  ;;  %v2785_v39 = vadd.f32 %v2649_v21, %v2522_v61 }
 0x1bc   :  { %v2789_v18 = vadd.f32 %v2649_v21, %v2526_v7  ;;  %v2793_v25 = vadd.f32 %v2649_v21, %v2530_v62  ;;  %v2797_v26 = vadd.f32 %v2649_v21, %v2534_v24  ;;  %v2801_v13 = vadd.f32 %v2649_v21, %v2538_v43 }
 0x1bd   :  { %v2805_v53 = vadd.f32 %v2649_v21, %v2542_v47  ;;  %v2809_v33 = vadd.f32 %v2649_v21, %v2546_v41  ;;  %v2813_v27 = vadd.f32 %v2649_v21, %v2550_v45  ;;  %v2817_v61 = vadd.f32 %v2649_v21, %v2554_v60  ;;  %v3179_v45 = vld [vmem:[#allocation2_spill] sm:$0xff] }
 0x1be   :  { %v2821_v7 = vadd.f32 %v2649_v21, %v2558_v3  ;;  %v2825_v62 = vadd.f32 %v2649_v21, %v2562_v58  ;;  %v2829_v24 = vadd.f32 %v2649_v21, %v2566_v1  ;;  %v2833_v43 = vadd.f32 %v2649_v21, %v2570_v16  ;;  %v3181_v3 = vld [vmem:[#allocation4_spill] sm:$0xff]  ;;  %v3183_v1 = vld [vmem:[#allocation6_spill] sm:$0xff] }
 0x1bf   :  { %v2837_v47 = vadd.f32 %v2649_v21, %v2574_v23  ;;  %v2841_v41 = vadd.f32 %v2649_v21, %v2578_v14  ;;  %v2845_v60 = vadd.f32 %v2649_v21, %v3179_v45  ;;  %v2849_v58 = vadd.f32 %v2649_v21, %v3181_v3 }
 0x1c0   :  { %v2853_v16 = vadd.f32 %v2649_v21, %v3183_v1  ;;  %v2857_v23 = vadd.f32 %v2649_v21, %v3185_v63  ;;  %v2861_v14 = vadd.f32 %v2649_v21, %v3186_v8  ;;  %v2881_v8 = vadd.f32 %v2649_v21, %v2618_v52 }
 0x1c1   :  { %3178 = vst [vmem:[#allocation11_spill] sm:$0xff] %v2841_v41  ;;  %3180 = vst [vmem:[#allocation16_spill] sm:$0xff] %v2845_v60  ;;  %v3188_v41 = vld [vmem:[#allocation9_spill] sm:$0xff]  ;;  %v3190_v60 = vld [vmem:[#allocation12_spill] sm:$0xff]  ;;  %v2901_v52 = vadd.f32 %v2649_v21, %v2638_v34  ;;  %v986_v34 = vmax.f32 %v2681_v38, 0.0  ;;  %v996_v38 = vmax.f32 %v2721_v59, 0.0 }
 0x1c2   :  { %3182 = vst [vmem:[#allocation20_spill] sm:$0xff] %v2849_v58  ;;  %3184 = vst [vmem:[#allocation14_spill] sm:$0xff] %v2853_v16  ;;  %v2865_v45 = vadd.f32 %v2649_v21, %v3188_v41  ;;  %v2869_v3 = vadd.f32 %v2649_v21, %v3190_v60  ;;  %v3191_v58 = vld [vmem:[#allocation7_spill] sm:$0xff]  ;;  %v3192_v16 = vld [vmem:[#allocation10_spill] sm:$0xff]  ;;  %v1006_v59 = vmax.f32 %v2761_v32, 0.0  ;;  %v1016_v32 = vmax.f32 %v2801_v13, 0.0 }
 0x1c3   :  { %3187 = vst [vmem:[#allocation18_spill] sm:$0xff] %v2861_v14  ;;  %v2873_v1 = vadd.f32 %v2649_v21, %v3191_v58  ;;  %v2877_v63 = vadd.f32 %v2649_v21, %v3192_v16  ;;  %v3193_v14 = vld [vmem:[#allocation15_spill] sm:$0xff]  ;;  %v2893_v58 = vadd.f32 %v2649_v21, %v2630_v36  ;;  %v2897_v16 = vadd.f32 %v2649_v21, %v2634_v51 }
 0x1c4   :  { %3189 = vst [vmem:[#allocation23_spill] sm:$0xff] %v2865_v45  ;;  %v2885_v41 = vadd.f32 %v2649_v21, %v3193_v14  ;;  %v3195_v45 = vld [vmem:[#allocation19_spill] sm:$0xff]  ;;  %3199 = vst [vmem:[#allocation6_spill] sm:$0xff] %v2901_v52  ;;  %v2905_v14 = vadd.f32 %v2649_v21, %v2642_v49  ;;  %v984_v51 = vmax.f32 %v2673_v30, 0.0  ;;  %v987_v52 = vmax.f32 %v2685_v11, 0.0 }
 0x1c5   :  { %v2889_v60 = vadd.f32 %v2649_v21, %v3195_v45  ;;  %3197 = vst [vmem:[#allocation2_spill] sm:$0xff] %v2893_v58  ;;  %3198 = vst [vmem:[#allocation4_spill] sm:$0xff] %v2897_v16  ;;  %v985_v16 = vmax.f32 %v2677_v37, 0.0  ;;  %v988_v21 = vmax.f32 %v2689_v54, 0.0  ;;  %v989_v49 = vmax.f32 %v2693_v55, 0.0 }
 0x1c6   :  { %3194 = vst [vmem:[#allocation25_spill] sm:$0xff] %v2885_v41  ;;  %3200 = vst [vmem:[#allocation3_spill] sm:$0xff] %v2905_v14  ;;  %v990_v45 = vmax.f32 %v2697_v29, 0.0  ;;  %v992_v36 = vmax.f32 %v2705_v42, 0.0  ;;  %v993_v58 = vmax.f32 %v2709_v46, 0.0  ;;  %v994_v30 = vmax.f32 %v2713_v40, 0.0 }
 0x1c7   :  { %3196 = vst [vmem:[#allocation21_spill] sm:$0xff] %v2889_v60  ;;  %v991_v60 = vmax.f32 %v2701_v31, 0.0  ;;  %v995_v37 = vmax.f32 %v2717_v44, 0.0  ;;  %v997_v11 = vmax.f32 %v2725_v2, 0.0  ;;  %v998_v54 = vmax.f32 %v2729_v56, 0.0 }
 0x1c8   :  { %v999_v55 = vmax.f32 %v2733_v0, 0.0  ;;  %v1000_v29 = vmax.f32 %v2737_v15, 0.0  ;;  %v1001_v31 = vmax.f32 %v2741_v22, 0.0  ;;  %v1002_v42 = vmax.f32 %v2745_v12, 0.0  ;;  %v3201_v41 = vld [vmem:[#allocation11_spill] sm:$0xff]  ;;  %v3202_v57 = vld [vmem:[#allocation16_spill] sm:$0xff] }
 0x1c9   :  { %v1003_v46 = vmax.f32 %v2749_v20, 0.0  ;;  %v1004_v40 = vmax.f32 %v2753_v35, 0.0  ;;  %v1005_v44 = vmax.f32 %v2757_v50, 0.0  ;;  %v1007_v2 = vmax.f32 %v2765_v4, 0.0  ;;  %v3203_v28 = vld [vmem:[#allocation20_spill] sm:$0xff]  ;;  %v3204_v17 = vld [vmem:[#allocation14_spill] sm:$0xff] }
 0x1ca   :  { %v1008_v56 = vmax.f32 %v2769_v10, 0.0  ;;  %v1009_v0 = vmax.f32 %v2773_v48, 0.0  ;;  %v1010_v15 = vmax.f32 %v2777_v9, 0.0  ;;  %v1011_v22 = vmax.f32 %v2781_v5, 0.0  ;;  %v3205_v6 = vld [vmem:[#allocation18_spill] sm:$0xff] }
 0x1cb   :  { %v1012_v12 = vmax.f32 %v2785_v39, 0.0  ;;  %v1013_v20 = vmax.f32 %v2789_v18, 0.0  ;;  %v1014_v35 = vmax.f32 %v2793_v25, 0.0  ;;  %v1015_v50 = vmax.f32 %v2797_v26, 0.0  ;;  %v3206_v19 = vld [vmem:[#allocation23_spill] sm:$0xff] }
 0x1cc   :  { %v1017_v4 = vmax.f32 %v2805_v53, 0.0  ;;  %v1018_v10 = vmax.f32 %v2809_v33, 0.0  ;;  %v1019_v48 = vmax.f32 %v2813_v27, 0.0  ;;  %v1020_v9 = vmax.f32 %v2817_v61, 0.0 }
 0x1cd   :  { %v1021_v5 = vmax.f32 %v2821_v7, 0.0  ;;  %v1022_v39 = vmax.f32 %v2825_v62, 0.0  ;;  %v1023_v18 = vmax.f32 %v2829_v24, 0.0  ;;  %v1024_v25 = vmax.f32 %v2833_v43, 0.0  ;;  %v3207_v14 = vld [vmem:[#allocation25_spill] sm:$0xff] }
 0x1ce   :  { %v1025_v26 = vmax.f32 %v2837_v47, 0.0  ;;  %v1026_v13 = vmax.f32 %v3201_v41, 0.0  ;;  %v1027_v53 = vmax.f32 %v3202_v57, 0.0  ;;  %v1028_v33 = vmax.f32 %v3203_v28, 0.0  ;;  %v3208_v28 = vld [vmem:[#allocation21_spill] sm:$0xff] }
 0x1cf   :  { %v1029_v27 = vmax.f32 %v3204_v17, 0.0  ;;  %v1030_v61 = vmax.f32 %v2857_v23, 0.0  ;;  %v1031_v7 = vmax.f32 %v3205_v6, 0.0  ;;  %v1032_v62 = vmax.f32 %v3206_v19, 0.0  ;;  %v3209_v23 = vld [vmem:[#allocation2_spill] sm:$0xff]  ;;  %v3210_v19 = vld [vmem:[#allocation4_spill] sm:$0xff] }
 0x1d0   :  { %v1033_v24 = vmax.f32 %v2869_v3, 0.0  ;;  %v1034_v43 = vmax.f32 %v2873_v1, 0.0  ;;  %v1035_v47 = vmax.f32 %v2877_v63, 0.0  ;;  %v1036_v41 = vmax.f32 %v2881_v8, 0.0  ;;  %v3211_v1 = vld [vmem:[#allocation6_spill] sm:$0xff]  ;;  %v3212_v8 = vld [vmem:[#allocation3_spill] sm:$0xff] }
 0x1d1   :  { %v1037_v57 = vmax.f32 %v3207_v14, 0.0  ;;  %v1038_v17 = vmax.f32 %v3208_v28, 0.0  ;;  %v1039_v6 = vmax.f32 %v3209_v23, 0.0  ;;  %v1040_v3 = vmax.f32 %v3210_v19, 0.0  ;;  %v3213_v28 = vld [vmem:[#allocation13_spill] sm:$0xff] }
 0x1d2   :  { %v1041_v63 = vmax.f32 %v3211_v1, 0.0  ;;  %v1042_v14 = vmax.f32 %v3212_v8, 0.0  ;;  %v3214_v23 = vmax.f32 %v3213_v28, 0.0  ;;  %v3215_v19 = vld [vmem:[#allocation17_spill] sm:$0xff]  ;;  %v3217_v28 = vld [vmem:[#allocation22_spill] sm:$0xff] }
 0x1d3   :  { %v3216_v1 = vmax.f32 %v3215_v19, 0.0  ;;  %v3218_v19 = vmax.f32 %v3217_v28, 0.0 }
 0x1d5   :  { %v1538_v8 = vpack.c.bf16 %v3216_v1, %v3214_v23  ;;  %v3219_v1 = vld [vmem:[#allocation24_spill] sm:$0xff] }
 0x1d6   :  { %v3220_v23 = vmax.f32 %v3219_v1, 0.0  ;;  %v3221_v1 = vld [vmem:[#allocation8_spill] sm:$0xff] }
 0x1d7   :  { %1539 = vst [vmem:[%s3081_s4] sm:$0xff] %v1538_v8  }
 0x1d8   :  { %v1543_v28 = vpack.c.bf16 %v3220_v23, %v3218_v19  ;;  %v3222_v19 = vmax.f32 %v3221_v1, 0.0  ;;  %v1553_v1 = vpack.c.bf16 %v986_v34, %v985_v16  ;;  %v1568_v16 = vpack.c.bf16 %v992_v36, %v991_v60 }
 0x1d9   :  { %v1573_v34 = vpack.c.bf16 %v994_v30, %v993_v58  ;;  %v1588_v60 = vpack.c.bf16 %v1000_v29, %v999_v55  ;;  %v1593_v58 = vpack.c.bf16 %v1002_v42, %v1001_v31  ;;  %v1598_v36 = vpack.c.bf16 %v1004_v40, %v1003_v46 }
 0x1da   :  { %v1548_v23 = vpack.c.bf16 %v984_v51, %v3222_v19  ;;  %v1558_v19 = vpack.c.bf16 %v988_v21, %v987_v52  ;;  %v1563_v51 = vpack.c.bf16 %v990_v45, %v989_v49  ;;  %1695 = vst [vmem:[%s3081_s4 + $0x8] sm:$0xff] %v1543_v28   ;;  %1697 = vst [vmem:[%s3081_s4 + $0x18] sm:$0xff] %v1553_v1  }
 0x1db   :  { %v1578_v52 = vpack.c.bf16 %v996_v38, %v995_v37  ;;  %v1583_v45 = vpack.c.bf16 %v998_v54, %v997_v11  ;;  %1700 = vst [vmem:[%s3081_s4 + $0x30] sm:$0xff] %v1568_v16   ;;  %1701 = vst [vmem:[%s3081_s4 + $0x38] sm:$0xff] %v1573_v34   ;;  %v1603_v21 = vpack.c.bf16 %v1006_v59, %v1005_v44 }
 0x1dc   :  { %1696 = vst [vmem:[%s3081_s4 + $0x10] sm:$0xff] %v1548_v23   ;;  %1698 = vst [vmem:[%s3081_s4 + $0x20] sm:$0xff] %v1558_v19   ;;  %v1608_v49 = vpack.c.bf16 %v1008_v56, %v1007_v2  ;;  %v1613_v30 = vpack.c.bf16 %v1010_v15, %v1009_v0  ;;  %v1618_v37 = vpack.c.bf16 %v1012_v12, %v1011_v22 }
 0x1dd   :  { %1699 = vst [vmem:[%s3081_s4 + $0x28] sm:$0xff] %v1563_v51   ;;  %1702 = vst [vmem:[%s3081_s4 + $0x40] sm:$0xff] %v1578_v52   ;;  %v1623_v38 = vpack.c.bf16 %v1014_v35, %v1013_v20  ;;  %v1628_v11 = vpack.c.bf16 %v1016_v32, %v1015_v50  ;;  %v1633_v54 = vpack.c.bf16 %v1018_v10, %v1017_v4 }
 0x1de   :  { %1703 = vst [vmem:[%s3081_s4 + $0x48] sm:$0xff] %v1583_v45   ;;  %1704 = vst [vmem:[%s3081_s4 + $0x50] sm:$0xff] %v1588_v60   ;;  %v1638_v55 = vpack.c.bf16 %v1020_v9, %v1019_v48  ;;  %v1643_v29 = vpack.c.bf16 %v1022_v39, %v1021_v5  ;;  %v1648_v31 = vpack.c.bf16 %v1024_v25, %v1023_v18 }
 0x1df   :  { %1705 = vst [vmem:[%s3081_s4 + $0x58] sm:$0xff] %v1593_v58   ;;  %1706 = vst [vmem:[%s3081_s4 + $0x60] sm:$0xff] %v1598_v36   ;;  %v1653_v42 = vpack.c.bf16 %v1026_v13, %v1025_v26  ;;  %v1658_v46 = vpack.c.bf16 %v1028_v33, %v1027_v53  ;;  %v1663_v40 = vpack.c.bf16 %v1030_v61, %v1029_v27 }
 0x1e0   :  { %1707 = vst [vmem:[%s3081_s4 + $0x68] sm:$0xff] %v1603_v21   ;;  %1708 = vst [vmem:[%s3081_s4 + $0x70] sm:$0xff] %v1608_v49   ;;  %v1668_v44 = vpack.c.bf16 %v1032_v62, %v1031_v7  ;;  %v1673_v59 = vpack.c.bf16 %v1034_v43, %v1033_v24  ;;  %v1678_v2 = vpack.c.bf16 %v1036_v41, %v1035_v47 }
 0x1e1   :  { %1709 = vst [vmem:[%s3081_s4 + $0x78] sm:$0xff] %v1613_v30   ;;  %1710 = vst [vmem:[%s3081_s4 + $0x80] sm:$0xff] %v1618_v37   ;;  %v1683_v56 = vpack.c.bf16 %v1038_v17, %v1037_v57  ;;  %v1688_v0 = vpack.c.bf16 %v1040_v3, %v1039_v6  ;;  %v1693_v15 = vpack.c.bf16 %v1042_v14, %v1041_v63 }
 0x1e2   :  { %1711 = vst [vmem:[%s3081_s4 + $0x88] sm:$0xff] %v1623_v38   ;;  %1712 = vst [vmem:[%s3081_s4 + $0x90] sm:$0xff] %v1628_v11  }
 0x1e3   :  { %1713 = vst [vmem:[%s3081_s4 + $0x98] sm:$0xff] %v1633_v54   ;;  %1714 = vst [vmem:[%s3081_s4 + $0xa0] sm:$0xff] %v1638_v55  }
 0x1e4   :  { %1715 = vst [vmem:[%s3081_s4 + $0xa8] sm:$0xff] %v1643_v29   ;;  %1716 = vst [vmem:[%s3081_s4 + $0xb0] sm:$0xff] %v1648_v31  }
 0x1e5   :  { %1717 = vst [vmem:[%s3081_s4 + $0xb8] sm:$0xff] %v1653_v42   ;;  %1718 = vst [vmem:[%s3081_s4 + $0xc0] sm:$0xff] %v1658_v46  }
 0x1e6   :  { %1719 = vst [vmem:[%s3081_s4 + $0xc8] sm:$0xff] %v1663_v40   ;;  %1720 = vst [vmem:[%s3081_s4 + $0xd0] sm:$0xff] %v1668_v44  }
 0x1e7   :  { %1721 = vst [vmem:[%s3081_s4 + $0xd8] sm:$0xff] %v1673_v59   ;;  %1722 = vst [vmem:[%s3081_s4 + $0xe0] sm:$0xff] %v1678_v2  }
 0x1e8   :  { %1723 = vst [vmem:[%s3081_s4 + $0xe8] sm:$0xff] %v1683_v56   ;;  %1724 = vst [vmem:[%s3081_s4 + $0xf0] sm:$0xff] %v1688_v0  }
 0x1e9   :  { %1725 = vst [vmem:[%s3081_s4 + $0xf8] sm:$0xff] %v1693_v15  }

// kernel: cifar10_encoder_forward.3
= control target key start
LH: loop header
LB: loop body
LE: loop exit
PB: predicated region body
PF: predicated region fallthrough
CT: control target
= control target key end

     0   :  { %vm9783_vm0 = vmmov 0   ;;  %vm7465_vm1 = vcmask 1041408   ;;  %s11886_s1 = inlined_call_operand.vmem [shape: bf16[2048,128], index: 1, kind: input, shape index: {}]   ;;  %s11887_s0 = inlined_call_operand.vmem [shape: bf16[128,2048], index: 0, kind: input, shape index: {}]   ;;  %s11888_s4 = inlined_call_operand.vmem [shape: bf16[2048,128], index: 4, kind: input, shape index: {}]   ;;  %s11889_s2 = inlined_call_operand.vmem [shape: f32[1,128], index: 2, kind: input, shape index: {}]   ;;  %s11890_s3 = inlined_call_operand.vmem [shape: f32[1,128], index: 3, kind: input, shape index: {}]   ;;  %s11891_s7 = inlined_call_operand.vmem [shape: bf16[2048,128], index: 7, kind: input, shape index: {}]   ;;  %s11892_s5 = inlined_call_operand.vmem [shape: f32[1,128], index: 5, kind: input, shape index: {}]   ;;  %s11893_s6 = inlined_call_operand.vmem [shape: f32[1,128], index: 6, kind: input, shape index: {}]   ;;  %s11894_s10 = inlined_call_operand.vmem [shape: bf16[512,128], index: 10, kind: input, shape index: {}]   ;;  %s11895_s8 = inlined_call_operand.vmem [shape: f32[1,128], index: 8, kind: input, shape index: {}]   ;;  %s11896_s9 = inlined_call_operand.vmem [shape: f32[1,128], index: 9, kind: input, shape index: {}]   ;;  %s11897_s13 = inlined_call_operand.vmem [shape: bf16[128,128], index: 13, kind: input, shape index: {}]   ;;  %s11898_s11 = inlined_call_operand.vmem [shape: f32[1,128], index: 11, kind: input, shape index: {}]   ;;  %s11899_s12 = inlined_call_operand.vmem [shape: f32[1,128], index: 12, kind: input, shape index: {}]   ;;  %s11900_s14 = inlined_call_operand.vmem [shape: f32[1,128], index: 14, kind: input, shape index: {}]   ;;  %s11901_s15 = inlined_call_operand.vmem [shape: f32[2,128], index: 15, kind: output, shape index: {}]  }
   0x1   :  { %v9330_v0 = vld [vmem:[%s11886_s1 + $0x40] sm:$0xff]   ;;  %v9334_v4 = vld [vmem:[%s11886_s1 + $0x48] sm:$0xff]   ;;  %v9338_v8 = vld [vmem:[%s11886_s1 + $0x50] sm:$0xff]  }
   0x2   :  { %v9331_v1 = vld [vmem:[%s11886_s1 + $0xc0] sm:$0xff]   ;;  %8342 = vmatprep.subr.bf16.mxu0 %v9330_v0  ;;  %v9335_v5 = vld [vmem:[%s11886_s1 + $0xc8] sm:$0xff]   ;;  %v9339_v9 = vld [vmem:[%s11886_s1 + $0xd0] sm:$0xff]  }
   0x3   :  { %v9332_v2 = vld [vmem:[%s11886_s1] sm:$0xff]   ;;  %8406 = vmatprep.subr.bf16.mxu1 %v9331_v1  ;;  %v9336_v6 = vld [vmem:[%s11886_s1 + $0x8] sm:$0xff]   ;;  %v9340_v10 = vld [vmem:[%s11886_s1 + $0x10] sm:$0xff]  }
   0x4   :  { %v9333_v3 = vld [vmem:[%s11886_s1 + $0x80] sm:$0xff]   ;;  %8343 = vmatpush3.bf16.msra.mxu0 %v9332_v2  ;;  %v9337_v7 = vld [vmem:[%s11886_s1 + $0x88] sm:$0xff]   ;;  %v9341_v11 = vld [vmem:[%s11886_s1 + $0x90] sm:$0xff]  }
   0x5   :  { %8407 = vmatpush3.bf16.msra.mxu1 %v9333_v3  ;;  %8344 = vmatprep.subr.bf16.mxu0 %v9334_v4  ;;  %v9342_v12 = vld [vmem:[%s11886_s1 + $0x58] sm:$0xff]   ;;  %v9346_v16 = vld [vmem:[%s11886_s1 + $0x60] sm:$0xff]   ;;  %v9350_v20 = vld [vmem:[%s11886_s1 + $0x68] sm:$0xff]  }
   0x6   :  { %8408 = vmatprep.subr.bf16.mxu1 %v9335_v5  ;;  %v9343_v13 = vld [vmem:[%s11886_s1 + $0xd8] sm:$0xff]   ;;  %v9347_v17 = vld [vmem:[%s11886_s1 + $0xe0] sm:$0xff]   ;;  %v9351_v21 = vld [vmem:[%s11886_s1 + $0xe8] sm:$0xff]  }
   0x7   :  { %v9344_v14 = vld [vmem:[%s11886_s1 + $0x18] sm:$0xff]   ;;  %v9348_v18 = vld [vmem:[%s11886_s1 + $0x20] sm:$0xff]   ;;  %v9352_v22 = vld [vmem:[%s11886_s1 + $0x28] sm:$0xff]  }
   0x8   :  { %8345 = vmatpush3.bf16.msra.mxu0 %v9336_v6  ;;  %v9345_v15 = vld [vmem:[%s11886_s1 + $0x98] sm:$0xff]   ;;  %v9349_v19 = vld [vmem:[%s11886_s1 + $0xa0] sm:$0xff]   ;;  %v9353_v23 = vld [vmem:[%s11886_s1 + $0xa8] sm:$0xff]  }
   0x9   :  { %8409 = vmatpush3.bf16.msra.mxu1 %v9337_v7  ;;  %8346 = vmatprep.subr.bf16.mxu0 %v9338_v8  ;;  %v9354_v24 = vld [vmem:[%s11886_s1 + $0x70] sm:$0xff]   ;;  %v9358_v28 = vld [vmem:[%s11886_s1 + $0x78] sm:$0xff]   ;;  %v51_v32 = vld [vmem:[%s11887_s0] sm:$0xff] }
   0xa   :  { %8410 = vmatprep.subr.bf16.mxu1 %v9339_v9  ;;  %v9355_v25 = vld [vmem:[%s11886_s1 + $0xf0] sm:$0xff]   ;;  %v9359_v29 = vld [vmem:[%s11886_s1 + $0xf8] sm:$0xff]   ;;  %v59_v33 = vld [vmem:[%s11887_s0 + $0x40] sm:$0xff] }
   0xb   :  { %v9356_v26 = vld [vmem:[%s11886_s1 + $0x30] sm:$0xff]   ;;  %v9360_v30 = vld [vmem:[%s11886_s1 + $0x38] sm:$0xff]   ;;  %v52_v34 = vld [vmem:[%s11887_s0 + $0x8] sm:$0xff]  ;;  %v7621_v35 = vcombine.low %v51_v32, %v59_v33  ;;  %v7622_v36 = vcombine.high %v51_v32, %v59_v33 }
   0xc   :  { %8347 = vmatpush3.bf16.msra.mxu0 %v9340_v10  ;;  %v9357_v27 = vld [vmem:[%s11886_s1 + $0xb0] sm:$0xff]   ;;  %v9361_v31 = vld [vmem:[%s11886_s1 + $0xb8] sm:$0xff]   ;;  %v60_v37 = vld [vmem:[%s11887_s0 + $0x48] sm:$0xff] }
   0xd   :  { %8411 = vmatpush3.bf16.msra.mxu1 %v9341_v11  ;;  %8348 = vmatprep.subr.bf16.mxu0 %v9342_v12  ;;  %v7623_v38 = vcombine.low %v52_v34, %v60_v37  ;;  %v7624_v39 = vcombine.high %v52_v34, %v60_v37  ;;  %v9362_v40 = vld [vmem:[%s11886_s1 + $0x140] sm:$0xff]   ;;  %v68_v47 = vld [vmem:[%s11887_s0 + $0x88] sm:$0xff]  ;;  %v9370_v62 = vld [vmem:[%s11886_s1 + $0x150] sm:$0xff]  }
   0xe   :  { %8412 = vmatprep.subr.bf16.mxu1 %v9343_v13  ;;  %1875 = vmatprep.mubr.bf16.mxu0 %v7622_v36  ;;  %v9363_v41 = vld [vmem:[%s11886_s1 + $0x100] sm:$0xff]   ;;  %v76_v48 = vld [vmem:[%s11887_s0 + $0xc8] sm:$0xff]  ;;  %v9371_v63 = vld [vmem:[%s11886_s1 + $0x110] sm:$0xff]  }
   0xf   :  { %1972 = vmatprep.mubr.bf16.mxu1 %v7624_v39  ;;  %v9364_v42 = vld [vmem:[%s11886_s1 + $0x1c0] sm:$0xff]   ;;  %v7640_v49 = vcombine.high %v68_v47, %v76_v48  ;;  %v9366_v50 = vld [vmem:[%s11886_s1 + $0x148] sm:$0xff]   ;;  %v7639_v53 = vcombine.low %v68_v47, %v76_v48  ;;  %v9372_v0 = vld [vmem:[%s11886_s1 + $0x1d0] sm:$0xff]  }
  0x10   :  { %8349 = vmatpush3.bf16.msra.mxu0 %v9344_v14  ;;  %v9365_v43 = vld [vmem:[%s11886_s1 + $0x180] sm:$0xff]   ;;  %v9367_v52 = vld [vmem:[%s11886_s1 + $0x108] sm:$0xff]   ;;  %v9373_v1 = vld [vmem:[%s11886_s1 + $0x190] sm:$0xff]  }
  0x11   :  { %8413 = vmatpush3.bf16.msra.mxu1 %v9345_v15  ;;  %8350 = vmatprep.subr.bf16.mxu0 %v9346_v16  ;;  %v67_v44 = vld [vmem:[%s11887_s0 + $0x80] sm:$0xff]  ;;  %v9368_v54 = vld [vmem:[%s11886_s1 + $0x1c8] sm:$0xff]   ;;  %v9374_v10 = vld [vmem:[%s11886_s1 + $0x158] sm:$0xff]  }
  0x12   :  { %8414 = vmatprep.subr.bf16.mxu1 %v9347_v17  ;;  %v75_v45 = vld [vmem:[%s11887_s0 + $0xc0] sm:$0xff]  ;;  %v9369_v55 = vld [vmem:[%s11886_s1 + $0x188] sm:$0xff]   ;;  %v9375_v11 = vld [vmem:[%s11886_s1 + $0x118] sm:$0xff]  }
  0x13   :  { %v7638_v46 = vcombine.high %v67_v44, %v75_v45  ;;  %v7637_v51 = vcombine.low %v67_v44, %v75_v45  ;;  %v83_v56 = vld [vmem:[%s11887_s0 + $0x100] sm:$0xff]  ;;  %v84_v58 = vld [vmem:[%s11887_s0 + $0x108] sm:$0xff]  ;;  %v9376_v12 = vld [vmem:[%s11886_s1 + $0x1d8] sm:$0xff]  }
  0x14   :  { %8351 = vmatpush3.bf16.msra.mxu0 %v9348_v18  ;;  %v91_v57 = vld [vmem:[%s11887_s0 + $0x140] sm:$0xff]  ;;  %v92_v59 = vld [vmem:[%s11887_s0 + $0x148] sm:$0xff]  ;;  %v9377_v13 = vld [vmem:[%s11886_s1 + $0x198] sm:$0xff]  }
  0x15   :  { %8415 = vmatpush3.bf16.msra.mxu1 %v9349_v19  ;;  %8352 = vmatprep.subr.bf16.mxu0 %v9350_v20  ;;  %v7654_v60 = vcombine.high %v83_v56, %v91_v57  ;;  %v7656_v61 = vcombine.high %v84_v58, %v92_v59  ;;  %v7653_v2 = vcombine.low %v83_v56, %v91_v57  ;;  %v99_v3 = vld [vmem:[%s11887_s0 + $0x180] sm:$0xff]  ;;  %v100_v5 = vld [vmem:[%s11887_s0 + $0x188] sm:$0xff]  ;;  %v9387_v39 = vld [vmem:[%s11886_s1 + $0x130] sm:$0xff]  }
  0x16   :  { %8416 = vmatprep.subr.bf16.mxu1 %v9351_v21  ;;  %v107_v4 = vld [vmem:[%s11887_s0 + $0x1c0] sm:$0xff]  ;;  %v7655_v6 = vcombine.low %v84_v58, %v92_v59  ;;  %v108_v8 = vld [vmem:[%s11887_s0 + $0x1c8] sm:$0xff]  ;;  %v9391_v48 = vld [vmem:[%s11886_s1 + $0x138] sm:$0xff]  }
  0x17   :  { %v7670_v7 = vcombine.high %v99_v3, %v107_v4  ;;  %v7672_v9 = vcombine.high %v100_v5, %v108_v8  ;;  %v115_v14 = vld [vmem:[%s11887_s0 + $0x200] sm:$0xff]  ;;  %v116_v16 = vld [vmem:[%s11887_s0 + $0x208] sm:$0xff]  ;;  %v7669_v19 = vcombine.low %v99_v3, %v107_v4  ;;  %v7671_v21 = vcombine.low %v100_v5, %v108_v8  ;;  %v62_v3 = vld [vmem:[%s11887_s0 + $0x58] sm:$0xff] }
  0x18   :  { %8353 = vmatpush3.bf16.msra.mxu0 %v9352_v22  ;;  %v123_v15 = vld [vmem:[%s11887_s0 + $0x240] sm:$0xff]  ;;  %v124_v17 = vld [vmem:[%s11887_s0 + $0x248] sm:$0xff]  ;;  %v69_v8 = vld [vmem:[%s11887_s0 + $0x90] sm:$0xff] }
  0x19   :  { %8417 = vmatpush3.bf16.msra.mxu1 %v9353_v23  ;;  %8354 = vmatprep.subr.bf16.mxu0 %v9354_v24  ;;  %v9378_v18 = vld [vmem:[%s11886_s1 + $0x160] sm:$0xff]   ;;  %v7686_v22 = vcombine.high %v115_v14, %v123_v15  ;;  %v7688_v24 = vcombine.high %v116_v16, %v124_v17  ;;  %v9384_v32 = vld [vmem:[%s11886_s1 + $0x1e8] sm:$0xff]   ;;  %v7685_v34 = vcombine.low %v115_v14, %v123_v15 }
  0x1a   :  { %8418 = vmatprep.subr.bf16.mxu1 %v9355_v25  ;;  %v9379_v20 = vld [vmem:[%s11886_s1 + $0x120] sm:$0xff]   ;;  %v9385_v33 = vld [vmem:[%s11886_s1 + $0x1a8] sm:$0xff]  }
  0x1b   :  { %v9380_v23 = vld [vmem:[%s11886_s1 + $0x1e0] sm:$0xff]   ;;  %v148_v44 = vld [vmem:[%s11887_s0 + $0x308] sm:$0xff] }
  0x1c   :  { %8355 = vmatpush3.bf16.msra.mxu0 %v9356_v26  ;;  %v9381_v25 = vld [vmem:[%s11886_s1 + $0x1a0] sm:$0xff]   ;;  %v156_v45 = vld [vmem:[%s11887_s0 + $0x348] sm:$0xff] }
  0x1d   :  { %8419 = vmatpush3.bf16.msra.mxu1 %v9357_v27  ;;  %8356 = vmatprep.subr.bf16.mxu0 %v9358_v28  ;;  %v131_v26 = vld [vmem:[%s11887_s0 + $0x280] sm:$0xff]  ;;  %v9382_v28 = vld [vmem:[%s11886_s1 + $0x168] sm:$0xff]  }
  0x1e   :  { %8420 = vmatprep.subr.bf16.mxu1 %v9359_v29  ;;  %v139_v27 = vld [vmem:[%s11887_s0 + $0x2c0] sm:$0xff]  ;;  %v132_v29 = vld [vmem:[%s11887_s0 + $0x288] sm:$0xff] }
  0x1f   :  { %v7702_v36 = vcombine.high %v131_v26, %v139_v27  ;;  %v7701_v47 = vcombine.low %v131_v26, %v139_v27  ;;  %v9394_v56 = vld [vmem:[%s11886_s1 + $0x240] sm:$0xff]   ;;  %v164_v57 = vld [vmem:[%s11887_s0 + $0x388] sm:$0xff]  ;;  %v9402_v26 = vld [vmem:[%s11886_s1 + $0x250] sm:$0xff]  }
  0x20   :  { %8357 = vmatpush3.bf16.msra.mxu0 %v9360_v30  ;;  %v140_v30 = vld [vmem:[%s11887_s0 + $0x2c8] sm:$0xff]  ;;  %v9396_v58 = vld [vmem:[%s11886_s1 + $0x2c0] sm:$0xff]   ;;  %v9404_v27 = vld [vmem:[%s11886_s1 + $0x2d0] sm:$0xff]  }
  0x21   :  { %8421 = vmatpush3.bf16.msra.mxu1 %v9361_v31  ;;  %8470 = vmatprep.subr.bf16.mxu0 %v9362_v40  ;;  %v9383_v31 = vld [vmem:[%s11886_s1 + $0x128] sm:$0xff]   ;;  %v7704_v37 = vcombine.high %v132_v29, %v140_v30  ;;  %v9388_v40 = vld [vmem:[%s11886_s1 + $0x1f0] sm:$0xff]   ;;  %v9397_v15 = vld [vmem:[%s11886_s1 + $0x280] sm:$0xff]  }
  0x22   :  { %8534 = vmatprep.subr.bf16.mxu1 %v9364_v42  ;;  %v155_v42 = vld [vmem:[%s11887_s0 + $0x340] sm:$0xff]  ;;  %v172_v59 = vld [vmem:[%s11887_s0 + $0x3c8] sm:$0xff] }
  0x23   :  { %1876 = vmatmul.mubr.bf16.vlgmr.msra.gmra.mrb[0].mxu0 %v7621_v35  ;;  %v7687_v35 = vcombine.low %v116_v16, %v124_v17  ;;  %v7735_v5 = vcombine.low %v164_v57, %v172_v59  ;;  %v9398_v17 = vld [vmem:[%s11886_s1 + $0x248] sm:$0xff]  }
  0x24   :  { %1973 = vmatmul.mubr.bf16.vlgmr.msra.gmra.mrb[0].mxu1 %v7623_v38  ;;  %8471 = vmatpush3.bf16.msra.mxu0 %v9363_v41  ;;  %v9386_v38 = vld [vmem:[%s11886_s1 + $0x170] sm:$0xff]   ;;  %v147_v41 = vld [vmem:[%s11887_s0 + $0x300] sm:$0xff] }
  0x25   :  { %8535 = vmatpush3.bf16.msra.mxu1 %v9365_v43  ;;  %1883 = vmatprep.mubr.bf16.mxu0 %v7638_v46  ;;  %v9389_v43 = vld [vmem:[%s11886_s1 + $0x1b0] sm:$0xff]   ;;  %v9390_v46 = vld [vmem:[%s11886_s1 + $0x178] sm:$0xff]  }
  0x26   :  { %1980 = vmatprep.mubr.bf16.mxu1 %v7640_v49  ;;  %8472 = vmatprep.subr.bf16.mxu0 %v9366_v50  ;;  %v7703_v49 = vcombine.low %v132_v29, %v140_v30  ;;  %v7718_v50 = vcombine.high %v147_v41, %v155_v42 }
  0x27   :  { %8536 = vmatprep.subr.bf16.mxu1 %v9368_v54  ;;  %v163_v54 = vld [vmem:[%s11887_s0 + $0x380] sm:$0xff] }
  0x28   :  { %8473 = vmatpush3.bf16.msra.mxu0 %v9367_v52  ;;  %v7720_v52 = vcombine.high %v148_v44, %v156_v45 }
  0x29   :  { %8537 = vmatpush3.bf16.msra.mxu1 %v9369_v55  ;;  %8474 = vmatprep.subr.bf16.mxu0 %v9370_v62  ;;  %v171_v55 = vld [vmem:[%s11887_s0 + $0x3c0] sm:$0xff] }
  0x2a   :  { %8538 = vmatprep.subr.bf16.mxu1 %v9372_v0  ;;  %v7734_v62 = vcombine.high %v163_v54, %v171_v55  ;;  %v53_v0 = vld [vmem:[%s11887_s0 + $0x10] sm:$0xff]  ;;  %v7733_v4 = vcombine.low %v163_v54, %v171_v55  ;;  %v118_v54 = vld [vmem:[%s11887_s0 + $0x218] sm:$0xff] }
  0x2b   :  { %1884 = vmatmul.mubr.bf16.gmra.mrb[4].mxu0 %v7637_v51  ;;  %v9392_v51 = vld [vmem:[%s11886_s1 + $0x1f8] sm:$0xff]  }
  0x2c   :  { %1981 = vmatmul.mubr.bf16.gmra.mrb[4].mxu1 %v7639_v53  ;;  %1891 = vmatprep.mubr.bf16.mxu0 %v7654_v60  ;;  %v9393_v53 = vld [vmem:[%s11886_s1 + $0x1b8] sm:$0xff]   ;;  %v7717_v60 = vcombine.low %v147_v41, %v155_v42  ;;  %v9410_v42 = vld [vmem:[%s11886_s1 + $0x260] sm:$0xff]  }
  0x2d   :  { %1988 = vmatprep.mubr.bf16.mxu1 %v7656_v61  ;;  %8475 = vmatpush3.bf16.msra.mxu0 %v9371_v63  ;;  %v7719_v61 = vcombine.low %v148_v44, %v156_v45  ;;  %v7736_v63 = vcombine.high %v164_v57, %v172_v59  ;;  %v9409_v41 = vld [vmem:[%s11886_s1 + $0x298] sm:$0xff]   ;;  %v9412_v44 = vld [vmem:[%s11886_s1 + $0x2e0] sm:$0xff]   ;;  %v9417_v57 = vld [vmem:[%s11886_s1 + $0x2a8] sm:$0xff]  }
  0x2e   :  { %8539 = vmatpush3.bf16.msra.mxu1 %v9373_v1  ;;  %8476 = vmatprep.subr.bf16.mxu0 %v9374_v10  ;;  %v61_v1 = vld [vmem:[%s11887_s0 + $0x50] sm:$0xff]  ;;  %v126_v55 = vld [vmem:[%s11887_s0 + $0x258] sm:$0xff] }
  0x2f   :  { %8540 = vmatprep.subr.bf16.mxu1 %v9376_v12  ;;  %v7625_v10 = vcombine.low %v53_v0, %v61_v1  ;;  %v70_v12 = vld [vmem:[%s11887_s0 + $0x98] sm:$0xff] }
  0x31   :  { %8477 = vmatpush3.bf16.msra.mxu0 %v9375_v11  ;;  %v9395_v11 = vld [vmem:[%s11886_s1 + $0x200] sm:$0xff]  }
  0x32   :  { %8541 = vmatpush3.bf16.msra.mxu1 %v9377_v13  ;;  %8478 = vmatprep.subr.bf16.mxu0 %v9378_v18  ;;  %v78_v13 = vld [vmem:[%s11887_s0 + $0xd8] sm:$0xff] }
  0x33   :  { %1892 = vmatmul.mubr.bf16.gmra.mrb[8].mxu0 %v7653_v2  ;;  %8542 = vmatprep.subr.bf16.mxu1 %v9380_v23  ;;  %v54_v2 = vld [vmem:[%s11887_s0 + $0x18] sm:$0xff]  ;;  %v7644_v18 = vcombine.high %v70_v12, %v78_v13  ;;  %v93_v23 = vld [vmem:[%s11887_s0 + $0x150] sm:$0xff]  ;;  %v7643_v29 = vcombine.low %v70_v12, %v78_v13  ;;  %v9428_v12 = vld [vmem:[%s11886_s1 + $0x3c0] sm:$0xff]   ;;  %v7691_v13 = vcombine.low %v118_v54, %v126_v55 }
  0x34   :  { %1989 = vmatmul.mubr.bf16.gmra.mrb[8].mxu1 %v7655_v6  ;;  %1899 = vmatprep.mubr.bf16.mxu0 %v7670_v7  ;;  %v7626_v6 = vcombine.high %v53_v0, %v61_v1  ;;  %v7628_v7 = vcombine.high %v54_v2, %v62_v3  ;;  %v7627_v14 = vcombine.low %v54_v2, %v62_v3  ;;  %v9419_v0 = vld [vmem:[%s11886_s1 + $0x230] sm:$0xff]   ;;  %v9422_v2 = vld [vmem:[%s11886_s1 + $0x278] sm:$0xff]  }
  0x35   :  { %1996 = vmatprep.mubr.bf16.mxu1 %v7672_v9  ;;  %8479 = vmatpush3.bf16.msra.mxu0 %v9379_v20  ;;  %v77_v9 = vld [vmem:[%s11887_s0 + $0xd0] sm:$0xff]  ;;  %v9400_v20 = vld [vmem:[%s11886_s1 + $0x2c8] sm:$0xff]  }
  0x36   :  { %8543 = vmatpush3.bf16.msra.mxu1 %v9381_v25  ;;  %8480 = vmatprep.subr.bf16.mxu0 %v9382_v28  ;;  %v7642_v16 = vcombine.high %v69_v8, %v77_v9  ;;  %v94_v25 = vld [vmem:[%s11887_s0 + $0x158] sm:$0xff]  ;;  %v7641_v28 = vcombine.low %v69_v8, %v77_v9  ;;  %v9421_v1 = vld [vmem:[%s11886_s1 + $0x2b0] sm:$0xff]  }
  0x37   :  { %8544 = vmatprep.subr.bf16.mxu1 %v9384_v32  ;;  %v9403_v32 = vld [vmem:[%s11886_s1 + $0x210] sm:$0xff]   ;;  %v9423_v8 = vld [vmem:[%s11886_s1 + $0x238] sm:$0xff]  }
  0x38   :  { %v133_v3 = vld [vmem:[%s11887_s0 + $0x290] sm:$0xff]  ;;  %v9425_v9 = vld [vmem:[%s11886_s1 + $0x2b8] sm:$0xff]  }
  0x39   :  { %8481 = vmatpush3.bf16.msra.mxu0 %v9383_v31 }
  0x3a   :  { %8545 = vmatpush3.bf16.msra.mxu1 %v9385_v33  ;;  %8482 = vmatprep.subr.bf16.mxu0 %v9386_v38  ;;  %v9405_v33 = vld [vmem:[%s11886_s1 + $0x290] sm:$0xff]   ;;  %v102_v38 = vld [vmem:[%s11887_s0 + $0x198] sm:$0xff] }
  0x3b   :  { %1900 = vmatmul.mubr.bf16.gmra.mrb[12].mxu0 %v7669_v19  ;;  %8546 = vmatprep.subr.bf16.mxu1 %v9388_v40  ;;  %v9399_v19 = vld [vmem:[%s11886_s1 + $0x208] sm:$0xff]   ;;  %v9407_v40 = vld [vmem:[%s11886_s1 + $0x218] sm:$0xff]  }
  0x3c   :  { %1997 = vmatmul.mubr.bf16.gmra.mrb[12].mxu1 %v7671_v21  ;;  %1907 = vmatprep.mubr.bf16.mxu0 %v7686_v22  ;;  %v9401_v21 = vld [vmem:[%s11886_s1 + $0x288] sm:$0xff]   ;;  %v85_v22 = vld [vmem:[%s11887_s0 + $0x110] sm:$0xff] }
  0x3d   :  { %2004 = vmatprep.mubr.bf16.mxu1 %v7688_v24  ;;  %8483 = vmatpush3.bf16.msra.mxu0 %v9387_v39  ;;  %v86_v24 = vld [vmem:[%s11887_s0 + $0x118] sm:$0xff]  ;;  %v7658_v30 = vcombine.high %v85_v22, %v93_v23 }
  0x3e   :  { %8547 = vmatpush3.bf16.msra.mxu1 %v9389_v43  ;;  %8484 = vmatprep.subr.bf16.mxu0 %v9390_v46  ;;  %v7660_v31 = vcombine.high %v86_v24, %v94_v25  ;;  %v110_v39 = vld [vmem:[%s11887_s0 + $0x1d8] sm:$0xff]  ;;  %v7657_v43 = vcombine.low %v85_v22, %v93_v23  ;;  %v7659_v45 = vcombine.low %v86_v24, %v94_v25  ;;  %v165_v24 = vld [vmem:[%s11887_s0 + $0x390] sm:$0xff] }
  0x3f   :  { %8548 = vmatprep.subr.bf16.mxu1 %v9392_v51  ;;  %v117_v51 = vld [vmem:[%s11887_s0 + $0x210] sm:$0xff] }
  0x40   :  { %v173_v25 = vld [vmem:[%s11887_s0 + $0x3d0] sm:$0xff] }
  0x41   :  { %8485 = vmatpush3.bf16.msra.mxu0 %v9391_v48  ;;  %v7676_v48 = vcombine.high %v102_v38, %v110_v39 }
  0x42   :  { %8549 = vmatpush3.bf16.msra.mxu1 %v9393_v53  ;;  %8598 = vmatprep.subr.bf16.mxu0 %v9394_v56  ;;  %v125_v53 = vld [vmem:[%s11887_s0 + $0x250] sm:$0xff]  ;;  %v9415_v56 = vld [vmem:[%s11886_s1 + $0x228] sm:$0xff]  }
  0x43   :  { %1908 = vmatmul.mubr.bf16.gmra.mrb[16].mxu0 %v7685_v34  ;;  %8662 = vmatprep.subr.bf16.mxu1 %v9396_v58  ;;  %v9406_v34 = vld [vmem:[%s11886_s1 + $0x258] sm:$0xff]   ;;  %v9418_v58 = vld [vmem:[%s11886_s1 + $0x270] sm:$0xff]  }
  0x44   :  { %2005 = vmatmul.mubr.bf16.gmra.mrb[16].mxu1 %v7687_v35  ;;  %1915 = vmatprep.mubr.bf16.mxu0 %v7702_v36  ;;  %v101_v35 = vld [vmem:[%s11887_s0 + $0x190] sm:$0xff] }
  0x45   :  { %2012 = vmatprep.mubr.bf16.mxu1 %v7704_v37  ;;  %v109_v36 = vld [vmem:[%s11887_s0 + $0x1d0] sm:$0xff]  ;;  %v9408_v37 = vld [vmem:[%s11886_s1 + $0x2d8] sm:$0xff]  }
  0x46   :  { %v7674_v46 = vcombine.high %v101_v35, %v109_v36  ;;  %v7673_v59 = vcombine.low %v101_v35, %v109_v36  ;;  %v64_v35 = vld [vmem:[%s11887_s0 + $0x68] sm:$0xff]  ;;  %v7737_v36 = vcombine.low %v165_v24, %v173_v25 }
  0x4b   :  { %1916 = vmatmul.mubr.bf16.gmra.mrb[20].mxu0 %v7701_v47  ;;  %v9411_v47 = vld [vmem:[%s11886_s1 + $0x220] sm:$0xff]  }
  0x4c   :  { %2013 = vmatmul.mubr.bf16.gmra.mrb[20].mxu1 %v7703_v49  ;;  %1923 = vmatprep.mubr.bf16.mxu0 %v7718_v50  ;;  %v9413_v49 = vld [vmem:[%s11886_s1 + $0x2a0] sm:$0xff]   ;;  %v9414_v50 = vld [vmem:[%s11886_s1 + $0x268] sm:$0xff]  }
  0x4d   :  { %2020 = vmatprep.mubr.bf16.mxu1 %v7720_v52  ;;  %v9416_v52 = vld [vmem:[%s11886_s1 + $0x2e8] sm:$0xff]  }
  0x53   :  { %1924 = vmatmul.mubr.bf16.gmra.mrb[24].mxu0 %v7717_v60  ;;  %v9420_v60 = vld [vmem:[%s11886_s1 + $0x2f0] sm:$0xff]  }
  0x54   :  { %2021 = vmatmul.mubr.bf16.gmra.mrb[24].mxu1 %v7719_v61  ;;  %1931 = vmatprep.mubr.bf16.mxu0 %v7734_v62  ;;  %v7675_v61 = vcombine.low %v102_v38, %v110_v39  ;;  %v7690_v62 = vcombine.high %v117_v51, %v125_v53 }
  0x55   :  { %2028 = vmatprep.mubr.bf16.mxu1 %v7736_v63  ;;  %v7692_v63 = vcombine.high %v118_v54, %v126_v55  ;;  %v87_v54 = vld [vmem:[%s11887_s0 + $0x120] sm:$0xff] }
  0x56   :  { %v95_v55 = vld [vmem:[%s11887_s0 + $0x160] sm:$0xff] }
  0x5b   :  { %1932 = vmatmul.mubr.bf16.gmra.mrb[28].mxu0 %v7733_v4  ;;  %v141_v4 = vld [vmem:[%s11887_s0 + $0x2d0] sm:$0xff] }
  0x5c   :  { %2029 = vmatmul.mubr.bf16.gmra.mrb[28].mxu1 %v7735_v5  ;;  %2069 = vmatprep.mubr.bf16.mxu0 %v7626_v6  ;;  %v9424_v5 = vld [vmem:[%s11886_s1 + $0x2f8] sm:$0xff]  }
  0x5d   :  { %2166 = vmatprep.mubr.bf16.mxu1 %v7628_v7  ;;  %v134_v6 = vld [vmem:[%s11887_s0 + $0x298] sm:$0xff] }
  0x5e   :  { %v142_v7 = vld [vmem:[%s11887_s0 + $0x2d8] sm:$0xff] }
  0x63   :  { %2070 = vmatmul.mubr.bf16.vlgmr.msra.gmra.mrb[32].mxu0 %v7625_v10  ;;  %v9426_v10 = vld [vmem:[%s11886_s1 + $0x340] sm:$0xff]  }
  0x64   :  { %2167 = vmatmul.mubr.bf16.vlgmr.msra.gmra.mrb[32].mxu1 %v7627_v14  ;;  %8599 = vmatpush3.bf16.msra.mxu0 %v9395_v11  ;;  %v7689_v11 = vcombine.low %v117_v51, %v125_v53  ;;  %v7706_v14 = vcombine.high %v133_v3, %v141_v4  ;;  %v9432_v51 = vld [vmem:[%s11886_s1 + $0x3c8] sm:$0xff]  }
  0x65   :  { %8663 = vmatpush3.bf16.msra.mxu1 %v9397_v15  ;;  %2077 = vmatprep.mubr.bf16.mxu0 %v7642_v16  ;;  %v7708_v15 = vcombine.high %v134_v6, %v142_v7  ;;  %v149_v16 = vld [vmem:[%s11887_s0 + $0x310] sm:$0xff]  ;;  %v9433_v53 = vld [vmem:[%s11886_s1 + $0x388] sm:$0xff]  }
  0x66   :  { %2174 = vmatprep.mubr.bf16.mxu1 %v7644_v18  ;;  %8600 = vmatprep.subr.bf16.mxu0 %v9398_v17  ;;  %v157_v17 = vld [vmem:[%s11887_s0 + $0x350] sm:$0xff]  ;;  %v150_v18 = vld [vmem:[%s11887_s0 + $0x318] sm:$0xff] }
  0x67   :  { %8664 = vmatprep.subr.bf16.mxu1 %v9400_v20  ;;  %v7705_v20 = vcombine.low %v133_v3, %v141_v4  ;;  %v7722_v22 = vcombine.high %v149_v16, %v157_v17  ;;  %v9440_v3 = vld [vmem:[%s11886_s1 + $0x3d8] sm:$0xff]   ;;  %v103_v4 = vld [vmem:[%s11887_s0 + $0x1a0] sm:$0xff] }
  0x68   :  { %8601 = vmatpush3.bf16.msra.mxu0 %v9399_v19  ;;  %v158_v19 = vld [vmem:[%s11887_s0 + $0x358] sm:$0xff] }
  0x69   :  { %8665 = vmatpush3.bf16.msra.mxu1 %v9401_v21  ;;  %8602 = vmatprep.subr.bf16.mxu0 %v9402_v26  ;;  %v7707_v21 = vcombine.low %v134_v6, %v142_v7  ;;  %v7724_v23 = vcombine.high %v150_v18, %v158_v19  ;;  %v166_v26 = vld [vmem:[%s11887_s0 + $0x398] sm:$0xff]  ;;  %v104_v6 = vld [vmem:[%s11887_s0 + $0x1a8] sm:$0xff] }
  0x6a   :  { %8666 = vmatprep.subr.bf16.mxu1 %v9404_v27  ;;  %v174_v27 = vld [vmem:[%s11887_s0 + $0x3d8] sm:$0xff] }
  0x6b   :  { %2078 = vmatmul.mubr.bf16.gmra.mrb[36].mxu0 %v7641_v28  ;;  %v7721_v28 = vcombine.low %v149_v16, %v157_v17  ;;  %v9439_v7 = vld [vmem:[%s11886_s1 + $0x318] sm:$0xff]   ;;  %v9443_v16 = vld [vmem:[%s11886_s1 + $0x320] sm:$0xff]  }
  0x6c   :  { %2175 = vmatmul.mubr.bf16.gmra.mrb[36].mxu1 %v7643_v29  ;;  %2085 = vmatprep.mubr.bf16.mxu0 %v7658_v30  ;;  %v7723_v29 = vcombine.low %v150_v18, %v158_v19  ;;  %v7738_v30 = vcombine.high %v165_v24, %v173_v25  ;;  %v9445_v17 = vld [vmem:[%s11886_s1 + $0x3a0] sm:$0xff]   ;;  %v9446_v18 = vld [vmem:[%s11886_s1 + $0x368] sm:$0xff]  }
  0x6d   :  { %2182 = vmatprep.mubr.bf16.mxu1 %v7660_v31  ;;  %8603 = vmatpush3.bf16.msra.mxu0 %v9403_v32  ;;  %v7740_v31 = vcombine.high %v166_v26, %v174_v27  ;;  %v55_v32 = vld [vmem:[%s11887_s0 + $0x20] sm:$0xff]  ;;  %v9448_v19 = vld [vmem:[%s11886_s1 + $0x3e8] sm:$0xff]  }
  0x6e   :  { %8667 = vmatpush3.bf16.msra.mxu1 %v9405_v33  ;;  %8604 = vmatprep.subr.bf16.mxu0 %v9406_v34  ;;  %v63_v33 = vld [vmem:[%s11887_s0 + $0x60] sm:$0xff]  ;;  %v56_v34 = vld [vmem:[%s11887_s0 + $0x28] sm:$0xff] }
  0x6f   :  { %8668 = vmatprep.subr.bf16.mxu1 %v9408_v37  ;;  %v7739_v37 = vcombine.low %v166_v26, %v174_v27  ;;  %v7630_v38 = vcombine.high %v55_v32, %v63_v33  ;;  %v7632_v39 = vcombine.high %v56_v34, %v64_v35  ;;  %v128_v24 = vld [vmem:[%s11887_s0 + $0x268] sm:$0xff]  ;;  %v9450_v26 = vld [vmem:[%s11886_s1 + $0x370] sm:$0xff]  }
  0x70   :  { %v9449_v25 = vld [vmem:[%s11886_s1 + $0x3a8] sm:$0xff]  }
  0x71   :  { %8605 = vmatpush3.bf16.msra.mxu0 %v9407_v40  ;;  %v71_v40 = vld [vmem:[%s11887_s0 + $0xa0] sm:$0xff] }
  0x72   :  { %8669 = vmatpush3.bf16.msra.mxu1 %v9409_v41  ;;  %8606 = vmatprep.subr.bf16.mxu0 %v9410_v42  ;;  %v79_v41 = vld [vmem:[%s11887_s0 + $0xe0] sm:$0xff]  ;;  %v7629_v42 = vcombine.low %v55_v32, %v63_v33  ;;  %v9451_v32 = vld [vmem:[%s11886_s1 + $0x330] sm:$0xff]  }
  0x73   :  { %2086 = vmatmul.mubr.bf16.gmra.mrb[40].mxu0 %v7657_v43  ;;  %8670 = vmatprep.subr.bf16.mxu1 %v9412_v44  ;;  %v72_v43 = vld [vmem:[%s11887_s0 + $0xa8] sm:$0xff]  ;;  %v9453_v33 = vld [vmem:[%s11886_s1 + $0x3b0] sm:$0xff]  }
  0x74   :  { %2183 = vmatmul.mubr.bf16.gmra.mrb[40].mxu1 %v7659_v45  ;;  %2093 = vmatprep.mubr.bf16.mxu0 %v7674_v46  ;;  %v80_v44 = vld [vmem:[%s11887_s0 + $0xe8] sm:$0xff]  ;;  %v7631_v45 = vcombine.low %v56_v34, %v64_v35  ;;  %v9427_v46 = vld [vmem:[%s11886_s1 + $0x300] sm:$0xff]   ;;  %v9454_v34 = vld [vmem:[%s11886_s1 + $0x378] sm:$0xff]  }
  0x75   :  { %2190 = vmatprep.mubr.bf16.mxu1 %v7676_v48  ;;  %8607 = vmatpush3.bf16.msra.mxu0 %v9411_v47  ;;  %v9429_v47 = vld [vmem:[%s11886_s1 + $0x380] sm:$0xff]   ;;  %v7646_v48 = vcombine.high %v71_v40, %v79_v41  ;;  %v9456_v35 = vld [vmem:[%s11886_s1 + $0x3f8] sm:$0xff]  }
  0x76   :  { %8671 = vmatpush3.bf16.msra.mxu1 %v9413_v49  ;;  %8608 = vmatprep.subr.bf16.mxu0 %v9414_v50  ;;  %v7648_v49 = vcombine.high %v72_v43, %v80_v44  ;;  %v9430_v50 = vld [vmem:[%s11886_s1 + $0x348] sm:$0xff]  }
  0x77   :  { %8672 = vmatprep.subr.bf16.mxu1 %v9416_v52  ;;  %v9431_v52 = vld [vmem:[%s11886_s1 + $0x308] sm:$0xff]  }
  0x79   :  { %8609 = vmatpush3.bf16.msra.mxu0 %v9415_v56  ;;  %v9434_v56 = vld [vmem:[%s11886_s1 + $0x350] sm:$0xff]  }
  0x7a   :  { %8673 = vmatpush3.bf16.msra.mxu1 %v9417_v57  ;;  %8610 = vmatprep.subr.bf16.mxu0 %v9418_v58  ;;  %v88_v57 = vld [vmem:[%s11887_s0 + $0x128] sm:$0xff] }
  0x7b   :  { %2094 = vmatmul.mubr.bf16.gmra.mrb[44].mxu0 %v7673_v59  ;;  %8674 = vmatprep.subr.bf16.mxu1 %v9420_v60  ;;  %v96_v58 = vld [vmem:[%s11887_s0 + $0x168] sm:$0xff]  ;;  %v9436_v59 = vld [vmem:[%s11886_s1 + $0x3d0] sm:$0xff]   ;;  %v7645_v60 = vcombine.low %v71_v40, %v79_v41  ;;  %v9457_v41 = vld [vmem:[%s11886_s1 + $0x3b8] sm:$0xff]  }
  0x7c   :  { %2191 = vmatmul.mubr.bf16.gmra.mrb[44].mxu1 %v7675_v61  ;;  %2101 = vmatprep.mubr.bf16.mxu0 %v7690_v62  ;;  %v7647_v61 = vcombine.low %v72_v43, %v80_v44  ;;  %v7662_v62 = vcombine.high %v87_v54, %v95_v55  ;;  %v144_v40 = vld [vmem:[%s11887_s0 + $0x2e8] sm:$0xff] }
  0x7d   :  { %2198 = vmatprep.mubr.bf16.mxu1 %v7692_v63  ;;  %8611 = vmatpush3.bf16.msra.mxu0 %v9419_v0  ;;  %v7664_v63 = vcombine.high %v88_v57, %v96_v58  ;;  %v9435_v0 = vld [vmem:[%s11886_s1 + $0x310] sm:$0xff]  }
  0x7e   :  { %8675 = vmatpush3.bf16.msra.mxu1 %v9421_v1  ;;  %8612 = vmatprep.subr.bf16.mxu0 %v9422_v2  ;;  %v9437_v1 = vld [vmem:[%s11886_s1 + $0x390] sm:$0xff]   ;;  %v9438_v2 = vld [vmem:[%s11886_s1 + $0x358] sm:$0xff]  }
  0x7f   :  { %8676 = vmatprep.subr.bf16.mxu1 %v9424_v5  ;;  %v111_v5 = vld [vmem:[%s11887_s0 + $0x1e0] sm:$0xff] }
  0x80   :  { %v7677_v27 = vcombine.low %v103_v4, %v111_v5 }
  0x81   :  { %8613 = vmatpush3.bf16.msra.mxu0 %v9423_v8  ;;  %v112_v8 = vld [vmem:[%s11887_s0 + $0x1e8] sm:$0xff] }
  0x82   :  { %8677 = vmatpush3.bf16.msra.mxu1 %v9425_v9  ;;  %8726 = vmatprep.subr.bf16.mxu0 %v9426_v10  ;;  %v9441_v9 = vld [vmem:[%s11886_s1 + $0x398] sm:$0xff]   ;;  %v9442_v10 = vld [vmem:[%s11886_s1 + $0x360] sm:$0xff]  }
  0x83   :  { %2102 = vmatmul.mubr.bf16.gmra.mrb[48].mxu0 %v7689_v11  ;;  %8790 = vmatprep.subr.bf16.mxu1 %v9428_v12  ;;  %v7661_v11 = vcombine.low %v87_v54, %v95_v55  ;;  %v9444_v12 = vld [vmem:[%s11886_s1 + $0x3e0] sm:$0xff]  }
  0x84   :  { %2199 = vmatmul.mubr.bf16.gmra.mrb[48].mxu1 %v7691_v13  ;;  %2109 = vmatprep.mubr.bf16.mxu0 %v7706_v14  ;;  %v7663_v13 = vcombine.low %v88_v57, %v96_v58  ;;  %v7678_v14 = vcombine.high %v103_v4, %v111_v5  ;;  %v167_v54 = vld [vmem:[%s11887_s0 + $0x3a0] sm:$0xff]  ;;  %v176_v57 = vld [vmem:[%s11887_s0 + $0x3e8] sm:$0xff] }
  0x85   :  { %2206 = vmatprep.mubr.bf16.mxu1 %v7708_v15  ;;  %v7680_v15 = vcombine.high %v104_v6, %v112_v8  ;;  %v175_v55 = vld [vmem:[%s11887_s0 + $0x3e0] sm:$0xff] }
  0x8b   :  { %2110 = vmatmul.mubr.bf16.gmra.mrb[52].mxu0 %v7705_v20  ;;  %v119_v20 = vld [vmem:[%s11887_s0 + $0x220] sm:$0xff] }
  0x8c   :  { %2207 = vmatmul.mubr.bf16.gmra.mrb[52].mxu1 %v7707_v21  ;;  %2117 = vmatprep.mubr.bf16.mxu0 %v7722_v22  ;;  %v127_v21 = vld [vmem:[%s11887_s0 + $0x260] sm:$0xff]  ;;  %v120_v22 = vld [vmem:[%s11887_s0 + $0x228] sm:$0xff] }
  0x8d   :  { %2214 = vmatprep.mubr.bf16.mxu1 %v7724_v23  ;;  %v9447_v23 = vld [vmem:[%s11886_s1 + $0x328] sm:$0xff]   ;;  %v7695_v43 = vcombine.low %v120_v22, %v128_v24 }
  0x93   :  { %2118 = vmatmul.mubr.bf16.gmra.mrb[56].mxu0 %v7721_v28  ;;  %v9452_v28 = vld [vmem:[%s11886_s1 + $0x3f0] sm:$0xff]  }
  0x94   :  { %2215 = vmatmul.mubr.bf16.gmra.mrb[56].mxu1 %v7723_v29  ;;  %2125 = vmatprep.mubr.bf16.mxu0 %v7738_v30  ;;  %v7679_v29 = vcombine.low %v104_v6, %v112_v8  ;;  %v7694_v30 = vcombine.high %v119_v20, %v127_v21  ;;  %v73_v6 = vld [vmem:[%s11887_s0 + $0xb0] sm:$0xff]  ;;  %v74_v8 = vld [vmem:[%s11887_s0 + $0xb8] sm:$0xff] }
  0x95   :  { %2222 = vmatprep.mubr.bf16.mxu1 %v7740_v31  ;;  %v7696_v31 = vcombine.high %v120_v22, %v128_v24  ;;  %v105_v22 = vld [vmem:[%s11887_s0 + $0x1b0] sm:$0xff]  ;;  %v106_v24 = vld [vmem:[%s11887_s0 + $0x1b8] sm:$0xff] }
  0x9b   :  { %2126 = vmatmul.mubr.bf16.gmra.mrb[60].mxu0 %v7737_v36  ;;  %v135_v36 = vld [vmem:[%s11887_s0 + $0x2a0] sm:$0xff] }
  0x9c   :  { %2223 = vmatmul.mubr.bf16.gmra.mrb[60].mxu1 %v7739_v37  ;;  %2263 = vmatprep.mubr.bf16.mxu0 %v7630_v38  ;;  %v143_v37 = vld [vmem:[%s11887_s0 + $0x2e0] sm:$0xff]  ;;  %v9455_v38 = vld [vmem:[%s11886_s1 + $0x338] sm:$0xff]  }
  0x9d   :  { %2360 = vmatprep.mubr.bf16.mxu1 %v7632_v39  ;;  %v136_v39 = vld [vmem:[%s11887_s0 + $0x2a8] sm:$0xff]  ;;  %v7710_v44 = vcombine.high %v135_v36, %v143_v37 }
  0xa3   :  { %2264 = vmatmul.mubr.bf16.vlgmr.msra.gmra.mrb[64].mxu0 %v7629_v42  ;;  %v7693_v42 = vcombine.low %v119_v20, %v127_v21 }
  0xa4   :  { %2361 = vmatmul.mubr.bf16.vlgmr.msra.gmra.mrb[64].mxu1 %v7631_v45  ;;  %8727 = vmatpush3.bf16.msra.mxu0 %v9427_v46  ;;  %v7712_v45 = vcombine.high %v136_v39, %v144_v40  ;;  %v151_v46 = vld [vmem:[%s11887_s0 + $0x320] sm:$0xff] }
  0xa5   :  { %8791 = vmatpush3.bf16.msra.mxu1 %v9429_v47  ;;  %2271 = vmatprep.mubr.bf16.mxu0 %v7646_v48  ;;  %v159_v47 = vld [vmem:[%s11887_s0 + $0x360] sm:$0xff]  ;;  %v152_v48 = vld [vmem:[%s11887_s0 + $0x328] sm:$0xff] }
  0xa6   :  { %2368 = vmatprep.mubr.bf16.mxu1 %v7648_v49  ;;  %8728 = vmatprep.subr.bf16.mxu0 %v9430_v50  ;;  %v160_v49 = vld [vmem:[%s11887_s0 + $0x368] sm:$0xff]  ;;  %v7709_v50 = vcombine.low %v135_v36, %v143_v37  ;;  %v7725_v58 = vcombine.low %v151_v46, %v159_v47 }
  0xa7   :  { %8792 = vmatprep.subr.bf16.mxu1 %v9432_v51  ;;  %v7711_v51 = vcombine.low %v136_v39, %v144_v40 }
  0xa8   :  { %8729 = vmatpush3.bf16.msra.mxu0 %v9431_v52  ;;  %v7726_v52 = vcombine.high %v151_v46, %v159_v47 }
  0xa9   :  { %8793 = vmatpush3.bf16.msra.mxu1 %v9433_v53  ;;  %8730 = vmatprep.subr.bf16.mxu0 %v9434_v56  ;;  %v7728_v53 = vcombine.high %v152_v48, %v160_v49  ;;  %v168_v56 = vld [vmem:[%s11887_s0 + $0x3a8] sm:$0xff] }
  0xaa   :  { %8794 = vmatprep.subr.bf16.mxu1 %v9436_v59  ;;  %v7727_v59 = vcombine.low %v152_v48, %v160_v49 }
  0xab   :  { %2272 = vmatmul.mubr.bf16.gmra.mrb[68].mxu0 %v7645_v60  ;;  %v7742_v60 = vcombine.high %v167_v54, %v175_v55 }
  0xac   :  { %2369 = vmatmul.mubr.bf16.gmra.mrb[68].mxu1 %v7647_v61  ;;  %2279 = vmatprep.mubr.bf16.mxu0 %v7662_v62  ;;  %v7744_v61 = vcombine.high %v168_v56, %v176_v57  ;;  %v57_v62 = vld [vmem:[%s11887_s0 + $0x30] sm:$0xff] }
  0xad   :  { %2376 = vmatprep.mubr.bf16.mxu1 %v7664_v63  ;;  %8731 = vmatpush3.bf16.msra.mxu0 %v9435_v0  ;;  %v65_v63 = vld [vmem:[%s11887_s0 + $0x70] sm:$0xff]  ;;  %v58_v0 = vld [vmem:[%s11887_s0 + $0x38] sm:$0xff] }
  0xae   :  { %8795 = vmatpush3.bf16.msra.mxu1 %v9437_v1  ;;  %8732 = vmatprep.subr.bf16.mxu0 %v9438_v2  ;;  %v66_v1 = vld [vmem:[%s11887_s0 + $0x78] sm:$0xff]  ;;  %v7741_v2 = vcombine.low %v167_v54, %v175_v55  ;;  %v7634_v4 = vcombine.high %v57_v62, %v65_v63 }
  0xaf   :  { %8796 = vmatprep.subr.bf16.mxu1 %v9440_v3  ;;  %v7743_v3 = vcombine.low %v168_v56, %v176_v57  ;;  %v7636_v5 = vcombine.high %v58_v0, %v66_v1  ;;  %v138_v55 = vld [vmem:[%s11887_s0 + $0x2b8] sm:$0xff] }
  0xb0   :  { %v146_v56 = vld [vmem:[%s11887_s0 + $0x2f8] sm:$0xff] }
  0xb1   :  { %8733 = vmatpush3.bf16.msra.mxu0 %v9439_v7  ;;  %v81_v7 = vld [vmem:[%s11887_s0 + $0xf0] sm:$0xff] }
  0xb2   :  { %8797 = vmatpush3.bf16.msra.mxu1 %v9441_v9  ;;  %8734 = vmatprep.subr.bf16.mxu0 %v9442_v10  ;;  %v82_v9 = vld [vmem:[%s11887_s0 + $0xf8] sm:$0xff]  ;;  %v7633_v10 = vcombine.low %v57_v62, %v65_v63 }
  0xb3   :  { %2280 = vmatmul.mubr.bf16.gmra.mrb[72].mxu0 %v7661_v11  ;;  %8798 = vmatprep.subr.bf16.mxu1 %v9444_v12  ;;  %v7635_v11 = vcombine.low %v58_v0, %v66_v1  ;;  %v7650_v12 = vcombine.high %v73_v6, %v81_v7 }
  0xb4   :  { %2377 = vmatmul.mubr.bf16.gmra.mrb[72].mxu1 %v7663_v13  ;;  %2287 = vmatprep.mubr.bf16.mxu0 %v7678_v14  ;;  %v7652_v13 = vcombine.high %v74_v8, %v82_v9  ;;  %v89_v14 = vld [vmem:[%s11887_s0 + $0x130] sm:$0xff] }
  0xb5   :  { %2384 = vmatprep.mubr.bf16.mxu1 %v7680_v15  ;;  %8735 = vmatpush3.bf16.msra.mxu0 %v9443_v16  ;;  %v97_v15 = vld [vmem:[%s11887_s0 + $0x170] sm:$0xff]  ;;  %v90_v16 = vld [vmem:[%s11887_s0 + $0x138] sm:$0xff] }
  0xb6   :  { %8799 = vmatpush3.bf16.msra.mxu1 %v9445_v17  ;;  %8736 = vmatprep.subr.bf16.mxu0 %v9446_v18  ;;  %v98_v17 = vld [vmem:[%s11887_s0 + $0x178] sm:$0xff]  ;;  %v7649_v18 = vcombine.low %v73_v6, %v81_v7  ;;  %v7666_v20 = vcombine.high %v89_v14, %v97_v15 }
  0xb7   :  { %8800 = vmatprep.subr.bf16.mxu1 %v9448_v19  ;;  %v7651_v19 = vcombine.low %v74_v8, %v82_v9  ;;  %v7668_v21 = vcombine.high %v90_v16, %v98_v17 }
  0xb9   :  { %8737 = vmatpush3.bf16.msra.mxu0 %v9447_v23  ;;  %v113_v23 = vld [vmem:[%s11887_s0 + $0x1f0] sm:$0xff] }
  0xba   :  { %8801 = vmatpush3.bf16.msra.mxu1 %v9449_v25  ;;  %8738 = vmatprep.subr.bf16.mxu0 %v9450_v26  ;;  %v114_v25 = vld [vmem:[%s11887_s0 + $0x1f8] sm:$0xff]  ;;  %v7665_v26 = vcombine.low %v89_v14, %v97_v15  ;;  %v7681_v37 = vcombine.low %v105_v22, %v113_v23 }
  0xbb   :  { %2288 = vmatmul.mubr.bf16.gmra.mrb[76].mxu0 %v7677_v27  ;;  %8802 = vmatprep.subr.bf16.mxu1 %v9452_v28  ;;  %v7667_v27 = vcombine.low %v90_v16, %v98_v17  ;;  %v7682_v28 = vcombine.high %v105_v22, %v113_v23  ;;  %v162_v14 = vld [vmem:[%s11887_s0 + $0x378] sm:$0xff] }
  0xbc   :  { %2385 = vmatmul.mubr.bf16.gmra.mrb[76].mxu1 %v7679_v29  ;;  %2295 = vmatprep.mubr.bf16.mxu0 %v7694_v30  ;;  %v7684_v29 = vcombine.high %v106_v24, %v114_v25  ;;  %v121_v30 = vld [vmem:[%s11887_s0 + $0x230] sm:$0xff] }
  0xbd   :  { %2392 = vmatprep.mubr.bf16.mxu1 %v7696_v31  ;;  %8739 = vmatpush3.bf16.msra.mxu0 %v9451_v32  ;;  %v129_v31 = vld [vmem:[%s11887_s0 + $0x270] sm:$0xff] }
  0xbe   :  { %8803 = vmatpush3.bf16.msra.mxu1 %v9453_v33  ;;  %8740 = vmatprep.subr.bf16.mxu0 %v9454_v34  ;;  %v122_v33 = vld [vmem:[%s11887_s0 + $0x238] sm:$0xff] }
  0xbf   :  { %8804 = vmatprep.subr.bf16.mxu1 %v9456_v35  ;;  %v130_v34 = vld [vmem:[%s11887_s0 + $0x278] sm:$0xff] }
  0xc0   :  { %v7700_v46 = vcombine.high %v122_v33, %v130_v34  ;;  %v7699_v63 = vcombine.low %v122_v33, %v130_v34  ;;  %v177_v33 = vld [vmem:[%s11887_s0 + $0x3f0] sm:$0xff] }
  0xc1   :  { %8741 = vmatpush3.bf16.msra.mxu0 %v9455_v38 }
  0xc2   :  { %8805 = vmatpush3.bf16.msra.mxu1 %v9457_v41  ;;  %v7683_v41 = vcombine.low %v106_v24, %v114_v25 }
  0xc3   :  { %2296 = vmatmul.mubr.bf16.gmra.mrb[80].mxu0 %v7693_v42  ;;  %v7698_v42 = vcombine.high %v121_v30, %v129_v31 }
  0xc4   :  { %2393 = vmatmul.mubr.bf16.gmra.mrb[80].mxu1 %v7695_v43  ;;  %2303 = vmatprep.mubr.bf16.mxu0 %v7710_v44 }
  0xc5   :  { %2400 = vmatprep.mubr.bf16.mxu1 %v7712_v45 }
  0xcb   :  { %2304 = vmatmul.mubr.bf16.gmra.mrb[84].mxu0 %v7709_v50 }
  0xcc   :  { %2401 = vmatmul.mubr.bf16.gmra.mrb[84].mxu1 %v7711_v51  ;;  %2311 = vmatprep.mubr.bf16.mxu0 %v7726_v52  ;;  %v137_v52 = vld [vmem:[%s11887_s0 + $0x2b0] sm:$0xff] }
  0xcd   :  { %2408 = vmatprep.mubr.bf16.mxu1 %v7728_v53  ;;  %v145_v53 = vld [vmem:[%s11887_s0 + $0x2f0] sm:$0xff] }
  0xce   :  { %v7714_v0 = vcombine.high %v137_v52, %v145_v53  ;;  %v7713_v17 = vcombine.low %v137_v52, %v145_v53 }
  0xd3   :  { %2312 = vmatmul.mubr.bf16.gmra.mrb[88].mxu0 %v7725_v58 }
  0xd4   :  { %2409 = vmatmul.mubr.bf16.gmra.mrb[88].mxu1 %v7727_v59  ;;  %2319 = vmatprep.mubr.bf16.mxu0 %v7742_v60  ;;  %v7697_v59 = vcombine.low %v121_v30, %v129_v31 }
  0xd5   :  { %2416 = vmatprep.mubr.bf16.mxu1 %v7744_v61 }
  0xdb   :  { %2320 = vmatmul.mubr.bf16.gmra.mrb[92].mxu0 %v7741_v2 }
  0xdc   :  { %2417 = vmatmul.mubr.bf16.gmra.mrb[92].mxu1 %v7743_v3  ;;  %2457 = vmatprep.mubr.bf16.mxu0 %v7634_v4  ;;  %v7716_v4 = vcombine.high %v138_v55, %v146_v56 }
  0xdd   :  { %2554 = vmatprep.mubr.bf16.mxu1 %v7636_v5 }
  0xe3   :  { %2458 = vmatmul.mubr.bf16.vlgmr.msra.gmra.mrb[96].mxu0 %v7633_v10  ;;  %v153_v10 = vld [vmem:[%s11887_s0 + $0x330] sm:$0xff] }
  0xe4   :  { %2555 = vmatmul.mubr.bf16.vlgmr.msra.gmra.mrb[96].mxu1 %v7635_v11  ;;  %2465 = vmatprep.mubr.bf16.mxu0 %v7650_v12  ;;  %v161_v11 = vld [vmem:[%s11887_s0 + $0x370] sm:$0xff] }
  0xe5   :  { %2562 = vmatprep.mubr.bf16.mxu1 %v7652_v13  ;;  %v154_v13 = vld [vmem:[%s11887_s0 + $0x338] sm:$0xff]  ;;  %v7730_v22 = vcombine.high %v153_v10, %v161_v11 }
  0xeb   :  { %2466 = vmatmul.mubr.bf16.gmra.mrb[100].mxu0 %v7649_v18 }
  0xec   :  { %2563 = vmatmul.mubr.bf16.gmra.mrb[100].mxu1 %v7651_v19  ;;  %2473 = vmatprep.mubr.bf16.mxu0 %v7666_v20 }
  0xed   :  { %2570 = vmatprep.mubr.bf16.mxu1 %v7668_v21  ;;  %v7715_v21 = vcombine.low %v138_v55, %v146_v56 }
  0xf3   :  { %2474 = vmatmul.mubr.bf16.gmra.mrb[104].mxu0 %v7665_v26  ;;  %v7732_v26 = vcombine.high %v154_v13, %v162_v14 }
  0xf4   :  { %2571 = vmatmul.mubr.bf16.gmra.mrb[104].mxu1 %v7667_v27  ;;  %2481 = vmatprep.mubr.bf16.mxu0 %v7682_v28 }
  0xf5   :  { %2578 = vmatprep.mubr.bf16.mxu1 %v7684_v29 }
  0xf6   :  { %v8358_v32 = vpop.f32.mrb[0].mxu0 }
  0xf7   :  { %v8422_v35 = vpop.f32.mrb[0].mxu1  ;;  %v8359_v36 = vpop.f32.mrb[1].mxu0 }
  0xf8   :  { %v8360_v38 = vadd.f32 %v8359_v36, %v8358_v32  ;;  %v8423_v39 = vpop.f32.mrb[1].mxu1  ;;  %v8361_v40 = vpop.f32.mrb[2].mxu0  ;;  %v169_v32 = vld [vmem:[%s11887_s0 + $0x3b0] sm:$0xff]  ;;  %v178_v36 = vld [vmem:[%s11887_s0 + $0x3f8] sm:$0xff] }
  0xf9   :  { %v8424_v43 = vadd.f32 %v8423_v39, %v8422_v35  ;;  %v8425_v44 = vpop.f32.mrb[2].mxu1  ;;  %v8362_v45 = vpop.f32.mrb[3].mxu0  ;;  %v170_v35 = vld [vmem:[%s11887_s0 + $0x3b8] sm:$0xff]  ;;  %v7729_v39 = vcombine.low %v153_v10, %v161_v11 }
  0xfa   :  { %v8363_v47 = vadd.f32 %v8362_v45, %v8361_v40  ;;  %v8426_v48 = vpop.f32.mrb[3].mxu1 }
  0xfb   :  { %v10596_v49 = vadd.f32 %v8424_v43, %v8360_v38  ;;  %v8427_v50 = vadd.f32 %v8426_v48, %v8425_v44  ;;  %2482 = vmatmul.mubr.bf16.gmra.mrb[108].mxu0 %v7681_v37  ;;  %v7731_v43 = vcombine.low %v154_v13, %v162_v14  ;;  %v7746_v44 = vcombine.high %v169_v32, %v177_v33 }
  0xfc   :  { %2579 = vmatmul.mubr.bf16.gmra.mrb[108].mxu1 %v7683_v41  ;;  %2489 = vmatprep.mubr.bf16.mxu0 %v7698_v42  ;;  %v7748_v48 = vcombine.high %v170_v35, %v178_v36 }
  0xfd   :  { %v10598_v51 = vadd.f32 %v8427_v50, %v8363_v47  ;;  %2586 = vmatprep.mubr.bf16.mxu1 %v7700_v46 }
  0xfe   :  { %v8364_v54 = vpop.f32.mrb[4].mxu0 }
  0xff   :  { %v8428_v57 = vpop.f32.mrb[4].mxu1  ;;  %v8365_v58 = vpop.f32.mrb[5].mxu0 }
 0x100   :  { %v8366_v60 = vadd.f32 %v8365_v58, %v8364_v54  ;;  %v8429_v61 = vpop.f32.mrb[5].mxu1  ;;  %v8367_v62 = vpop.f32.mrb[6].mxu0 }
 0x101   :  { %v8430_v1 = vadd.f32 %v8429_v61, %v8428_v57  ;;  %v8431_v2 = vpop.f32.mrb[6].mxu1  ;;  %v8368_v3 = vpop.f32.mrb[7].mxu0 }
 0x102   :  { %v8369_v5 = vadd.f32 %v8368_v3, %v8367_v62  ;;  %v8432_v6 = vpop.f32.mrb[7].mxu1 }
 0x103   :  { %v10612_v7 = vadd.f32 %v8430_v1, %v8366_v60  ;;  %v8433_v8 = vadd.f32 %v8432_v6, %v8431_v2  ;;  %2490 = vmatmul.mubr.bf16.gmra.mrb[112].mxu0 %v7697_v59  ;;  %v7745_v59 = vcombine.low %v169_v32, %v177_v33 }
 0x104   :  { %2587 = vmatmul.mubr.bf16.gmra.mrb[112].mxu1 %v7699_v63  ;;  %2497 = vmatprep.mubr.bf16.mxu0 %v7714_v0  ;;  %v7747_v63 = vcombine.low %v170_v35, %v178_v36 }
 0x105   :  { %v10614_v9 = vadd.f32 %v8433_v8, %v8369_v5  ;;  %2594 = vmatprep.mubr.bf16.mxu1 %v7716_v4 }
 0x106   :  { %v8370_v12 = vpop.f32.mrb[8].mxu0 }
 0x107   :  { %v8434_v15 = vpop.f32.mrb[8].mxu1  ;;  %v8371_v16 = vpop.f32.mrb[9].mxu0 }
 0x108   :  { %v8372_v18 = vadd.f32 %v8371_v16, %v8370_v12  ;;  %v8435_v19 = vpop.f32.mrb[9].mxu1  ;;  %v8373_v20 = vpop.f32.mrb[10].mxu0 }
 0x109   :  { %v8436_v23 = vadd.f32 %v8435_v19, %v8434_v15  ;;  %v8437_v24 = vpop.f32.mrb[10].mxu1  ;;  %v8374_v25 = vpop.f32.mrb[11].mxu0 }
 0x10a   :  { %v8375_v27 = vadd.f32 %v8374_v25, %v8373_v20  ;;  %v8438_v28 = vpop.f32.mrb[11].mxu1 }
 0x10b   :  { %v10628_v29 = vadd.f32 %v8436_v23, %v8372_v18  ;;  %v8439_v30 = vadd.f32 %v8438_v28, %v8437_v24  ;;  %2498 = vmatmul.mubr.bf16.gmra.mrb[116].mxu0 %v7713_v17 }
 0x10c   :  { %2595 = vmatmul.mubr.bf16.gmra.mrb[116].mxu1 %v7715_v21  ;;  %2505 = vmatprep.mubr.bf16.mxu0 %v7730_v22 }
 0x10d   :  { %v10630_v31 = vadd.f32 %v8439_v30, %v8375_v27  ;;  %2602 = vmatprep.mubr.bf16.mxu1 %v7732_v26 }
 0x10e   :  { %v8376_v34 = vpop.f32.mrb[12].mxu0 }
 0x10f   :  { %v8440_v37 = vpop.f32.mrb[12].mxu1  ;;  %v8377_v38 = vpop.f32.mrb[13].mxu0 }
 0x110   :  { %v8378_v40 = vadd.f32 %v8377_v38, %v8376_v34  ;;  %v8441_v41 = vpop.f32.mrb[13].mxu1  ;;  %v8379_v42 = vpop.f32.mrb[14].mxu0 }
 0x111   :  { %v8442_v45 = vadd.f32 %v8441_v41, %v8440_v37  ;;  %v8443_v46 = vpop.f32.mrb[14].mxu1  ;;  %v8380_v47 = vpop.f32.mrb[15].mxu0 }
 0x112   :  { %v8381_v50 = vadd.f32 %v8380_v47, %v8379_v42  ;;  %v8444_v52 = vpop.f32.mrb[15].mxu1 }
 0x113   :  { %v10644_v53 = vadd.f32 %v8442_v45, %v8378_v40  ;;  %v8445_v54 = vadd.f32 %v8444_v52, %v8443_v46  ;;  %2506 = vmatmul.mubr.bf16.gmra.mrb[120].mxu0 %v7729_v39 }
 0x114   :  { %2603 = vmatmul.mubr.bf16.gmra.mrb[120].mxu1 %v7731_v43  ;;  %2513 = vmatprep.mubr.bf16.mxu0 %v7746_v44 }
 0x115   :  { %v10646_v55 = vadd.f32 %v8445_v54, %v8381_v50  ;;  %2610 = vmatprep.mubr.bf16.mxu1 %v7748_v48 }
 0x116   :  { %v8382_v56 = vpop.f32.mrb[16].mxu0 }
 0x117   :  { %v8446_v57 = vpop.f32.mrb[16].mxu1  ;;  %v8383_v58 = vpop.f32.mrb[17].mxu0 }
 0x118   :  { %v8384_v60 = vadd.f32 %v8383_v58, %v8382_v56  ;;  %v8447_v61 = vpop.f32.mrb[17].mxu1  ;;  %v8385_v62 = vpop.f32.mrb[18].mxu0 }
 0x119   :  { %v8448_v0 = vadd.f32 %v8447_v61, %v8446_v57  ;;  %v8449_v1 = vpop.f32.mrb[18].mxu1  ;;  %v8386_v2 = vpop.f32.mrb[19].mxu0 }
 0x11a   :  { %v8387_v3 = vadd.f32 %v8386_v2, %v8385_v62  ;;  %v8450_v4 = vpop.f32.mrb[19].mxu1 }
 0x11b   :  { %v10648_v5 = vadd.f32 %v8448_v0, %v8384_v60  ;;  %v8451_v6 = vadd.f32 %v8450_v4, %v8449_v1  ;;  %2514 = vmatmul.mubr.bf16.gmra.mrb[124].mxu0 %v7745_v59 }
 0x11c   :  { %2611 = vmatmul.mubr.bf16.gmra.mrb[124].mxu1 %v7747_v63 }
 0x11d   :  { %v10650_v8 = vadd.f32 %v8451_v6, %v8387_v3 }
 0x11e   :  { %v8388_v10 = vpop.f32.mrb[20].mxu0 }
 0x11f   :  { %v8452_v11 = vpop.f32.mrb[20].mxu1  ;;  %v8389_v12 = vpop.f32.mrb[21].mxu0 }
 0x120   :  { %v8390_v13 = vadd.f32 %v8389_v12, %v8388_v10  ;;  %v8453_v14 = vpop.f32.mrb[21].mxu1  ;;  %v8391_v15 = vpop.f32.mrb[22].mxu0 }
 0x121   :  { %v8454_v16 = vadd.f32 %v8453_v14, %v8452_v11  ;;  %v8455_v17 = vpop.f32.mrb[22].mxu1  ;;  %v8392_v18 = vpop.f32.mrb[23].mxu0 }
 0x122   :  { %v8393_v19 = vadd.f32 %v8392_v18, %v8391_v15  ;;  %v8456_v20 = vpop.f32.mrb[23].mxu1 }
 0x123   :  { %v10652_v21 = vadd.f32 %v8454_v16, %v8390_v13  ;;  %v8457_v22 = vadd.f32 %v8456_v20, %v8455_v17 }
 0x125   :  { %v10654_v23 = vadd.f32 %v8457_v22, %v8393_v19 }
 0x126   :  { %v8394_v24 = vpop.f32.mrb[24].mxu0 }
 0x127   :  { %v8458_v25 = vpop.f32.mrb[24].mxu1  ;;  %v8395_v26 = vpop.f32.mrb[25].mxu0 }
 0x128   :  { %v8396_v27 = vadd.f32 %v8395_v26, %v8394_v24  ;;  %v8459_v28 = vpop.f32.mrb[25].mxu1  ;;  %v8397_v30 = vpop.f32.mrb[26].mxu0 }
 0x129   :  { %v8460_v32 = vadd.f32 %v8459_v28, %v8458_v25  ;;  %v8461_v33 = vpop.f32.mrb[26].mxu1  ;;  %v8398_v34 = vpop.f32.mrb[27].mxu0 }
 0x12a   :  { %v8399_v35 = vadd.f32 %v8398_v34, %v8397_v30  ;;  %v8462_v36 = vpop.f32.mrb[27].mxu1 }
 0x12b   :  { %v10656_v37 = vadd.f32 %v8460_v32, %v8396_v27  ;;  %v8463_v38 = vadd.f32 %v8462_v36, %v8461_v33 }
 0x12d   :  { %v10658_v39 = vadd.f32 %v8463_v38, %v8399_v35 }
 0x12e   :  { %v8400_v40 = vpop.f32.mrb[28].mxu0 }
 0x12f   :  { %v8464_v41 = vpop.f32.mrb[28].mxu1  ;;  %v8401_v42 = vpop.f32.mrb[29].mxu0 }
 0x130   :  { %v8402_v43 = vadd.f32 %v8401_v42, %v8400_v40  ;;  %v8465_v44 = vpop.f32.mrb[29].mxu1  ;;  %v8403_v45 = vpop.f32.mrb[30].mxu0 }
 0x131   :  { %v8466_v46 = vadd.f32 %v8465_v44, %v8464_v41  ;;  %v8467_v47 = vpop.f32.mrb[30].mxu1  ;;  %v8404_v48 = vpop.f32.mrb[31].mxu0 }
 0x132   :  { %v8405_v50 = vadd.f32 %v8404_v48, %v8403_v45  ;;  %v8468_v52 = vpop.f32.mrb[31].mxu1 }
 0x133   :  { %v10660_v54 = vadd.f32 %v8466_v46, %v8402_v43  ;;  %v8469_v56 = vadd.f32 %v8468_v52, %v8467_v47 }
 0x135   :  { %v10662_v57 = vadd.f32 %v8469_v56, %v8405_v50 }
 0x136   :  { %v8486_v58 = vpop.f32.mrb[32].mxu0 }
 0x137   :  { %v8550_v59 = vpop.f32.mrb[32].mxu1  ;;  %v8487_v60 = vpop.f32.mrb[33].mxu0 }
 0x138   :  { %v8488_v61 = vadd.f32 %v8487_v60, %v8486_v58  ;;  %v8551_v62 = vpop.f32.mrb[33].mxu1  ;;  %v8489_v63 = vpop.f32.mrb[34].mxu0 }
 0x139   :  { %v8552_v0 = vadd.f32 %v8551_v62, %v8550_v59  ;;  %v8553_v1 = vpop.f32.mrb[34].mxu1  ;;  %v8490_v2 = vpop.f32.mrb[35].mxu0 }
 0x13a   :  { %v2072_v3 = vadd.f32 %v8488_v61, %v10596_v49  ;;  %v8491_v4 = vadd.f32 %v8490_v2, %v8489_v63  ;;  %v8554_v6 = vpop.f32.mrb[35].mxu1 }
 0x13b   :  { %v8555_v10 = vadd.f32 %v8554_v6, %v8553_v1 }
 0x13c   :  { %v10665_v11 = vadd.f32 %v8552_v0, %v2072_v3  ;;  %v2075_v12 = vadd.f32 %v8491_v4, %v10598_v51 }
 0x13e   :  { %v10668_v13 = vadd.f32 %v8555_v10, %v2075_v12  ;;  %v8492_v14 = vpop.f32.mrb[36].mxu0 }
 0x13f   :  { %v8556_v15 = vpop.f32.mrb[36].mxu1  ;;  %v8493_v16 = vpop.f32.mrb[37].mxu0 }
 0x140   :  { %v8494_v17 = vadd.f32 %v8493_v16, %v8492_v14  ;;  %v8557_v18 = vpop.f32.mrb[37].mxu1  ;;  %v8495_v19 = vpop.f32.mrb[38].mxu0 }
 0x141   :  { %v8558_v20 = vadd.f32 %v8557_v18, %v8556_v15  ;;  %v8559_v22 = vpop.f32.mrb[38].mxu1  ;;  %v8496_v24 = vpop.f32.mrb[39].mxu0 }
 0x142   :  { %v2080_v49 = vadd.f32 %v8494_v17, %v10612_v7  ;;  %v8497_v25 = vadd.f32 %v8496_v24, %v8495_v19  ;;  %v8560_v26 = vpop.f32.mrb[39].mxu1 }
 0x143   :  { %v8561_v27 = vadd.f32 %v8560_v26, %v8559_v22 }
 0x144   :  { %v10671_v28 = vadd.f32 %v8558_v20, %v2080_v49  ;;  %v2083_v51 = vadd.f32 %v8497_v25, %v10614_v9 }
 0x146   :  { %v10674_v30 = vadd.f32 %v8561_v27, %v2083_v51  ;;  %v8498_v32 = vpop.f32.mrb[40].mxu0 }
 0x147   :  { %v8562_v33 = vpop.f32.mrb[40].mxu1  ;;  %v8499_v34 = vpop.f32.mrb[41].mxu0 }
 0x148   :  { %v8500_v35 = vadd.f32 %v8499_v34, %v8498_v32  ;;  %v8563_v36 = vpop.f32.mrb[41].mxu1  ;;  %v8501_v38 = vpop.f32.mrb[42].mxu0 }
 0x149   :  { %v8564_v40 = vadd.f32 %v8563_v36, %v8562_v33  ;;  %v8565_v41 = vpop.f32.mrb[42].mxu1  ;;  %v8502_v42 = vpop.f32.mrb[43].mxu0 }
 0x14a   :  { %v2088_v7 = vadd.f32 %v8500_v35, %v10628_v29  ;;  %v8503_v43 = vadd.f32 %v8502_v42, %v8501_v38  ;;  %v8566_v44 = vpop.f32.mrb[43].mxu1 }
 0x14b   :  { %v8567_v45 = vadd.f32 %v8566_v44, %v8565_v41 }
 0x14c   :  { %v10677_v46 = vadd.f32 %v8564_v40, %v2088_v7  ;;  %v2091_v9 = vadd.f32 %v8503_v43, %v10630_v31 }
 0x14e   :  { %v10680_v47 = vadd.f32 %v8567_v45, %v2091_v9  ;;  %v8504_v48 = vpop.f32.mrb[44].mxu0 }
 0x14f   :  { %v8568_v50 = vpop.f32.mrb[44].mxu1  ;;  %v8505_v52 = vpop.f32.mrb[45].mxu0 }
 0x150   :  { %v8506_v56 = vadd.f32 %v8505_v52, %v8504_v48  ;;  %v8569_v58 = vpop.f32.mrb[45].mxu1  ;;  %v8507_v59 = vpop.f32.mrb[46].mxu0 }
 0x151   :  { %v8570_v60 = vadd.f32 %v8569_v58, %v8568_v50  ;;  %v8571_v61 = vpop.f32.mrb[46].mxu1  ;;  %v8508_v62 = vpop.f32.mrb[47].mxu0 }
 0x152   :  { %v2096_v29 = vadd.f32 %v8506_v56, %v10644_v53  ;;  %v8509_v63 = vadd.f32 %v8508_v62, %v8507_v59  ;;  %v8572_v0 = vpop.f32.mrb[47].mxu1 }
 0x153   :  { %v8573_v1 = vadd.f32 %v8572_v0, %v8571_v61 }
 0x154   :  { %v10683_v2 = vadd.f32 %v8570_v60, %v2096_v29  ;;  %v2099_v31 = vadd.f32 %v8509_v63, %v10646_v55 }
 0x156   :  { %v10686_v3 = vadd.f32 %v8573_v1, %v2099_v31  ;;  %v8510_v4 = vpop.f32.mrb[48].mxu0 }
 0x157   :  { %v8574_v6 = vpop.f32.mrb[48].mxu1  ;;  %v8511_v10 = vpop.f32.mrb[49].mxu0 }
 0x158   :  { %v8512_v12 = vadd.f32 %v8511_v10, %v8510_v4  ;;  %v8575_v14 = vpop.f32.mrb[49].mxu1  ;;  %v8513_v15 = vpop.f32.mrb[50].mxu0 }
 0x159   :  { %v8576_v16 = vadd.f32 %v8575_v14, %v8574_v6  ;;  %v8577_v17 = vpop.f32.mrb[50].mxu1  ;;  %v8514_v18 = vpop.f32.mrb[51].mxu0 }
 0x15a   :  { %v2104_v53 = vadd.f32 %v8512_v12, %v10648_v5  ;;  %v8515_v19 = vadd.f32 %v8514_v18, %v8513_v15  ;;  %v8578_v20 = vpop.f32.mrb[51].mxu1 }
 0x15b   :  { %v8579_v22 = vadd.f32 %v8578_v20, %v8577_v17 }
 0x15c   :  { %v10689_v24 = vadd.f32 %v8576_v16, %v2104_v53  ;;  %v2107_v55 = vadd.f32 %v8515_v19, %v10650_v8 }
 0x15e   :  { %v10692_v49 = vadd.f32 %v8579_v22, %v2107_v55  ;;  %v8516_v25 = vpop.f32.mrb[52].mxu0 }
 0x15f   :  { %v8580_v26 = vpop.f32.mrb[52].mxu1  ;;  %v8517_v27 = vpop.f32.mrb[53].mxu0 }
 0x160   :  { %v8518_v51 = vadd.f32 %v8517_v27, %v8516_v25  ;;  %v8581_v32 = vpop.f32.mrb[53].mxu1  ;;  %v8519_v33 = vpop.f32.mrb[54].mxu0 }
 0x161   :  { %v8582_v34 = vadd.f32 %v8581_v32, %v8580_v26  ;;  %v8583_v35 = vpop.f32.mrb[54].mxu1  ;;  %v8520_v36 = vpop.f32.mrb[55].mxu0 }
 0x162   :  { %v2112_v5 = vadd.f32 %v8518_v51, %v10652_v21  ;;  %v8521_v38 = vadd.f32 %v8520_v36, %v8519_v33  ;;  %v8584_v40 = vpop.f32.mrb[55].mxu1 }
 0x163   :  { %v8585_v41 = vadd.f32 %v8584_v40, %v8583_v35 }
 0x164   :  { %v10695_v42 = vadd.f32 %v8582_v34, %v2112_v5  ;;  %v2115_v8 = vadd.f32 %v8521_v38, %v10654_v23 }
 0x166   :  { %v10698_v7 = vadd.f32 %v8585_v41, %v2115_v8  ;;  %v8522_v43 = vpop.f32.mrb[56].mxu0 }
 0x167   :  { %v8586_v44 = vpop.f32.mrb[56].mxu1  ;;  %v8523_v45 = vpop.f32.mrb[57].mxu0 }
 0x168   :  { %v8524_v9 = vadd.f32 %v8523_v45, %v8522_v43  ;;  %v8587_v48 = vpop.f32.mrb[57].mxu1  ;;  %v8525_v50 = vpop.f32.mrb[58].mxu0 }
 0x169   :  { %v8588_v52 = vadd.f32 %v8587_v48, %v8586_v44  ;;  %v8589_v56 = vpop.f32.mrb[58].mxu1  ;;  %v8526_v58 = vpop.f32.mrb[59].mxu0 }
 0x16a   :  { %v2120_v21 = vadd.f32 %v8524_v9, %v10656_v37  ;;  %v8527_v59 = vadd.f32 %v8526_v58, %v8525_v50  ;;  %v8590_v60 = vpop.f32.mrb[59].mxu1 }
 0x16b   :  { %v8591_v61 = vadd.f32 %v8590_v60, %v8589_v56 }
 0x16c   :  { %v10701_v62 = vadd.f32 %v8588_v52, %v2120_v21  ;;  %v2123_v23 = vadd.f32 %v8527_v59, %v10658_v39 }
 0x16e   :  { %v10704_v29 = vadd.f32 %v8591_v61, %v2123_v23  ;;  %v8528_v63 = vpop.f32.mrb[60].mxu0 }
 0x16f   :  { %v8592_v0 = vpop.f32.mrb[60].mxu1  ;;  %v8529_v1 = vpop.f32.mrb[61].mxu0 }
 0x170   :  { %v8530_v31 = vadd.f32 %v8529_v1, %v8528_v63  ;;  %v8593_v4 = vpop.f32.mrb[61].mxu1  ;;  %v8531_v6 = vpop.f32.mrb[62].mxu0 }
 0x171   :  { %v8594_v10 = vadd.f32 %v8593_v4, %v8592_v0  ;;  %v8595_v12 = vpop.f32.mrb[62].mxu1  ;;  %v8532_v14 = vpop.f32.mrb[63].mxu0 }
 0x172   :  { %v2128_v37 = vadd.f32 %v8530_v31, %v10660_v54  ;;  %v8533_v15 = vadd.f32 %v8532_v14, %v8531_v6  ;;  %v8596_v16 = vpop.f32.mrb[63].mxu1 }
 0x173   :  { %v8597_v17 = vadd.f32 %v8596_v16, %v8595_v12 }
 0x174   :  { %v10707_v18 = vadd.f32 %v8594_v10, %v2128_v37  ;;  %v2131_v39 = vadd.f32 %v8533_v15, %v10662_v57 }
 0x176   :  { %v10710_v53 = vadd.f32 %v8597_v17, %v2131_v39  ;;  %v8614_v19 = vpop.f32.mrb[64].mxu0 }
 0x177   :  { %v8678_v20 = vpop.f32.mrb[64].mxu1  ;;  %v8615_v22 = vpop.f32.mrb[65].mxu0 }
 0x178   :  { %v8616_v55 = vadd.f32 %v8615_v22, %v8614_v19  ;;  %v8679_v25 = vpop.f32.mrb[65].mxu1  ;;  %v8617_v26 = vpop.f32.mrb[66].mxu0 }
 0x179   :  { %v8680_v27 = vadd.f32 %v8679_v25, %v8678_v20  ;;  %v8681_v51 = vpop.f32.mrb[66].mxu1  ;;  %v8618_v32 = vpop.f32.mrb[67].mxu0 }
 0x17a   :  { %v2266_v54 = vadd.f32 %v8616_v55, %v10665_v11  ;;  %v8619_v33 = vadd.f32 %v8618_v32, %v8617_v26  ;;  %v8682_v34 = vpop.f32.mrb[67].mxu1 }
 0x17b   :  { %v8683_v35 = vadd.f32 %v8682_v34, %v8681_v51 }
 0x17c   :  { %v10713_v36 = vadd.f32 %v8680_v27, %v2266_v54  ;;  %v2269_v57 = vadd.f32 %v8619_v33, %v10668_v13 }
 0x17e   :  { %v10716_v5 = vadd.f32 %v8683_v35, %v2269_v57  ;;  %v8620_v38 = vpop.f32.mrb[68].mxu0 }
 0x17f   :  { %v8684_v40 = vpop.f32.mrb[68].mxu1  ;;  %v8621_v41 = vpop.f32.mrb[69].mxu0 }
 0x180   :  { %v8622_v8 = vadd.f32 %v8621_v41, %v8620_v38  ;;  %v8685_v43 = vpop.f32.mrb[69].mxu1  ;;  %v8623_v44 = vpop.f32.mrb[70].mxu0 }
 0x181   :  { %v8686_v45 = vadd.f32 %v8685_v43, %v8684_v40  ;;  %v8687_v9 = vpop.f32.mrb[70].mxu1  ;;  %v8624_v48 = vpop.f32.mrb[71].mxu0 }
 0x182   :  { %v2274_v11 = vadd.f32 %v8622_v8, %v10671_v28  ;;  %v8625_v50 = vadd.f32 %v8624_v48, %v8623_v44  ;;  %v8688_v52 = vpop.f32.mrb[71].mxu1 }
 0x183   :  { %v8689_v56 = vadd.f32 %v8688_v52, %v8687_v9 }
 0x184   :  { %v10719_v58 = vadd.f32 %v8686_v45, %v2274_v11  ;;  %v2277_v13 = vadd.f32 %v8625_v50, %v10674_v30  ;;  %v9459_v50 = vld [vmem:[%s11888_s4] sm:$0xff]  }
 0x186   :  { %v10722_v21 = vadd.f32 %v8689_v56, %v2277_v13  ;;  %v8626_v59 = vpop.f32.mrb[72].mxu0  ;;  %v9461_v13 = vld [vmem:[%s11888_s4 + $0x80] sm:$0xff]  }
 0x187   :  { %v8690_v60 = vpop.f32.mrb[72].mxu1  ;;  %v8627_v61 = vpop.f32.mrb[73].mxu0 }
 0x188   :  { %v8628_v23 = vadd.f32 %v8627_v61, %v8626_v59  ;;  %v8691_v63 = vpop.f32.mrb[73].mxu1  ;;  %v8629_v0 = vpop.f32.mrb[74].mxu0  ;;  %v9463_v61 = vld [vmem:[%s11888_s4 + $0x8] sm:$0xff]  }
 0x189   :  { %v8692_v1 = vadd.f32 %v8691_v63, %v8690_v60  ;;  %v8693_v31 = vpop.f32.mrb[74].mxu1  ;;  %v8630_v4 = vpop.f32.mrb[75].mxu0 }
 0x18a   :  { %v2282_v28 = vadd.f32 %v8628_v23, %v10677_v46  ;;  %v8631_v6 = vadd.f32 %v8630_v4, %v8629_v0  ;;  %v8694_v10 = vpop.f32.mrb[75].mxu1 }
 0x18b   :  { %v8695_v12 = vadd.f32 %v8694_v10, %v8693_v31 }
 0x18c   :  { %v10725_v14 = vadd.f32 %v8692_v1, %v2282_v28  ;;  %v2285_v30 = vadd.f32 %v8631_v6, %v10680_v47  ;;  %v9464_v28 = vld [vmem:[%s11888_s4 + $0xc8] sm:$0xff]  }
 0x18d   :  { %v9465_v6 = vld [vmem:[%s11888_s4 + $0x88] sm:$0xff]  }
 0x18e   :  { %v10728_v37 = vadd.f32 %v8695_v12, %v2285_v30  ;;  %v8632_v15 = vpop.f32.mrb[76].mxu0 }
 0x18f   :  { %v8696_v16 = vpop.f32.mrb[76].mxu1  ;;  %v8633_v17 = vpop.f32.mrb[77].mxu0 }
 0x190   :  { %v8634_v39 = vadd.f32 %v8633_v17, %v8632_v15  ;;  %v8697_v19 = vpop.f32.mrb[77].mxu1  ;;  %v8635_v20 = vpop.f32.mrb[78].mxu0  ;;  %v9466_v15 = vld [vmem:[%s11888_s4 + $0x50] sm:$0xff]  }
 0x191   :  { %v8698_v22 = vadd.f32 %v8697_v19, %v8696_v16  ;;  %v8699_v55 = vpop.f32.mrb[78].mxu1  ;;  %v8636_v25 = vpop.f32.mrb[79].mxu0  ;;  %v9467_v19 = vld [vmem:[%s11888_s4 + $0x10] sm:$0xff]  }
 0x192   :  { %v2290_v46 = vadd.f32 %v8634_v39, %v10683_v2  ;;  %v8637_v26 = vadd.f32 %v8636_v25, %v8635_v20  ;;  %v8700_v27 = vpop.f32.mrb[79].mxu1 }
 0x193   :  { %v8701_v51 = vadd.f32 %v8700_v27, %v8699_v55  ;;  %v9469_v55 = vld [vmem:[%s11888_s4 + $0x90] sm:$0xff]  }
 0x194   :  { %v10731_v32 = vadd.f32 %v8698_v22, %v2290_v46  ;;  %v2293_v47 = vadd.f32 %v8637_v26, %v10686_v3  ;;  %v9458_v3 = vld [vmem:[%s11888_s4 + $0x40] sm:$0xff]   ;;  %v9470_v46 = vld [vmem:[%s11888_s4 + $0x58] sm:$0xff]  }
 0x195   :  { %8854 = vmatprep.subr.bf16.mxu0 %v9458_v3  ;;  %v9471_v26 = vld [vmem:[%s11888_s4 + $0x18] sm:$0xff]  }
 0x196   :  { %v10734_v54 = vadd.f32 %v8701_v51, %v2293_v47  ;;  %v8638_v33 = vpop.f32.mrb[80].mxu0  ;;  %8855 = vmatpush3.bf16.msra.mxu0 %v9459_v50 }
 0x197   :  { %v8702_v34 = vpop.f32.mrb[80].mxu1  ;;  %v8639_v35 = vpop.f32.mrb[81].mxu0 }
 0x198   :  { %v8640_v57 = vadd.f32 %v8639_v35, %v8638_v33  ;;  %v8703_v38 = vpop.f32.mrb[81].mxu1  ;;  %v8641_v40 = vpop.f32.mrb[82].mxu0 }
 0x199   :  { %v8704_v41 = vadd.f32 %v8703_v38, %v8702_v34  ;;  %v8705_v8 = vpop.f32.mrb[82].mxu1  ;;  %v8642_v43 = vpop.f32.mrb[83].mxu0 }
 0x19a   :  { %v2298_v2 = vadd.f32 %v8640_v57, %v10689_v24  ;;  %v8643_v44 = vadd.f32 %v8642_v43, %v8641_v40  ;;  %v8706_v45 = vpop.f32.mrb[83].mxu1  ;;  %v9460_v24 = vld [vmem:[%s11888_s4 + $0xc0] sm:$0xff]   ;;  %v9473_v43 = vld [vmem:[%s11888_s4 + $0x98] sm:$0xff]  }
 0x19b   :  { %v8707_v9 = vadd.f32 %v8706_v45, %v8705_v8  ;;  %8882 = vmatprep.subr.bf16.mxu1 %v9460_v24  ;;  %v9781_v45 = vmov 0   ;;  %v9476_v24 = vld [vmem:[%s11888_s4 + $0xe0] sm:$0xff]  }
 0x19c   :  { %v10740_v48 = vadd.f32 %v8704_v41, %v2298_v2  ;;  %v2301_v11 = vadd.f32 %v8643_v44, %v10692_v49  ;;  %v9462_v49 = vld [vmem:[%s11888_s4 + $0x48] sm:$0xff]   ;;  %8883 = vmatpush3.bf16.msra.mxu1 %v9461_v13  ;;  %v9472_v41 = vld [vmem:[%s11888_s4 + $0xd8] sm:$0xff]   ;;  %2791 = vst [vmem:[#allocation3 + $0x8] sm:$0x1] %v9781_v45  ;;  %2790 = vst [vmem:[#allocation3] sm:$0x1] %v9781_v45 }
 0x19d   :  { %8856 = vmatprep.subr.bf16.mxu0 %v9462_v49  ;;  %8884 = vmatprep.subr.bf16.mxu1 %v9464_v28  ;;  %2792 = vst [vmem:[#allocation3 + $0x10] sm:$0x1] %v9781_v45  ;;  %2793 = vst [vmem:[#allocation3 + $0x18] sm:$0x1] %v9781_v45  ;;  %v2921_v3 = vrot.slane %v9781_v45, 6 }
 0x19e   :  { %v10749_v52 = vadd.f32 %v8707_v9, %v2301_v11  ;;  %v8644_v56 = vpop.f32.mrb[84].mxu0  ;;  %8857 = vmatpush3.bf16.msra.mxu0 %v9463_v61  ;;  %v2843_v9 = vrot.slane %v9781_v45, 7  ;;  %2794 = vst [vmem:[#allocation3 + $0x20] sm:$0x1] %v9781_v45  ;;  %2798 = vst [vmem:[#allocation3 + $0x40] sm:$0x1] %v9781_v45 }
 0x19f   :  { %v8708_v59 = vpop.f32.mrb[84].mxu1  ;;  %v8645_v60 = vpop.f32.mrb[85].mxu0  ;;  %8858 = vmatprep.subr.bf16.mxu0 %v9466_v15  ;;  %2802 = vst [vmem:[#allocation3 + $0x60] sm:$0x1] %v9781_v45  ;;  %3392 = vst [vmem:[#allocation3 + $0x80] sm:$0x1] %v9781_v45 }
 0x1a0   :  { %v8646_v23 = vadd.f32 %v8645_v60, %v8644_v56  ;;  %v8709_v63 = vpop.f32.mrb[85].mxu1  ;;  %v8647_v0 = vpop.f32.mrb[86].mxu0  ;;  %8885 = vmatpush3.bf16.msra.mxu1 %v9465_v6  ;;  %3396 = vst [vmem:[#allocation3 + $0xa0] sm:$0x1] %v9781_v45  ;;  %3400 = vst [vmem:[#allocation3 + $0xc0] sm:$0x1] %v9781_v45 }
 0x1a1   :  { %v8710_v1 = vadd.f32 %v8709_v63, %v8708_v59  ;;  %v8711_v31 = vpop.f32.mrb[86].mxu1  ;;  %v8648_v4 = vpop.f32.mrb[87].mxu0  ;;  %3404 = vst [vmem:[#allocation3 + $0xe0] sm:$0x1] %v9781_v45  ;;  %2870 = vst [vmem:[#allocation3 + $0x8] sm:$0x2] %v2843_v9 }
 0x1a2   :  { %v2306_v10 = vadd.f32 %v8646_v23, %v10695_v42  ;;  %v8649_v12 = vadd.f32 %v8648_v4, %v8647_v0  ;;  %v8712_v30 = vpop.f32.mrb[87].mxu1  ;;  %v9468_v42 = vld [vmem:[%s11888_s4 + $0xd0] sm:$0xff]   ;;  %8859 = vmatpush3.bf16.msra.mxu0 %v9467_v19  ;;  %2869 = vst [vmem:[#allocation3] sm:$0x2] %v2843_v9  ;;  %2871 = vst [vmem:[#allocation3 + $0x10] sm:$0x2] %v2843_v9 }
 0x1a3   :  { %v8713_v16 = vadd.f32 %v8712_v30, %v8711_v31  ;;  %8886 = vmatprep.subr.bf16.mxu1 %v9468_v42  ;;  %8860 = vmatprep.subr.bf16.mxu0 %v9470_v46  ;;  %2872 = vst [vmem:[#allocation3 + $0x18] sm:$0x2] %v2843_v9  ;;  %v9477_v59 = vld [vmem:[%s11888_s4 + $0xa0] sm:$0xff]   ;;  %v9478_v60 = vld [vmem:[%s11888_s4 + $0x68] sm:$0xff]   ;;  %2950 = vst [vmem:[#allocation3 + $0x18] sm:$0x84] %v2921_v3  }
 0x1a4   :  { %v10770_v17 = vadd.f32 %v8710_v1, %v2306_v10  ;;  %v2309_v39 = vadd.f32 %v8649_v12, %v10698_v7  ;;  %8887 = vmatpush3.bf16.msra.mxu1 %v9469_v55  ;;  %2948 = vst [vmem:[#allocation3 + $0x8] ss:$52 sps:$4 sm:$0x84] %v2921_v3   ;;  %2947 = vst [vmem:[#allocation3] ss:$92 sps:$4 sm:$0x84] %v2921_v3  }
 0x1a5   :  { %8888 = vmatprep.subr.bf16.mxu1 %v9472_v41  ;;  %2949 = vst [vmem:[#allocation3 + $0x10] ss:$108 sps:$4 sm:$0x84] %v2921_v3   ;;  %3891 = vst [vmem:[#allocation3 + $0x98] sm:$0x80] %v2921_v3  ;;  %v9479_v31 = vld [vmem:[%s11888_s4 + $0x28] sm:$0xff]  }
 0x1a6   :  { %v10779_v20 = vadd.f32 %v8713_v16, %v2309_v39  ;;  %v8650_v22 = vpop.f32.mrb[88].mxu0  ;;  %8861 = vmatpush3.bf16.msra.mxu0 %v9471_v26  ;;  %3895 = vst [vmem:[#allocation3 + $0xb8] sm:$0x80] %v2921_v3  ;;  %3899 = vst [vmem:[#allocation3 + $0xd8] sm:$0x80] %v2921_v3  ;;  %v9480_v4 = vld [vmem:[%s11888_s4 + $0xe8] sm:$0xff]  }
 0x1a7   :  { %v8714_v25 = vpop.f32.mrb[88].mxu1  ;;  %v8651_v7 = vpop.f32.mrb[89].mxu0  ;;  %3900 = vst [vmem:[#allocation3 + $0xe0] sm:$0x80] %v2921_v3  ;;  %3901 = vst [vmem:[#allocation3 + $0xe8] sm:$0x80] %v2921_v3 }
 0x1a8   :  { %v8652_v27 = vadd.f32 %v8651_v7, %v8650_v22  ;;  %v8715_v51 = vpop.f32.mrb[89].mxu1  ;;  %v8653_v47 = vpop.f32.mrb[90].mxu0  ;;  %8889 = vmatpush3.bf16.msra.mxu1 %v9473_v43  ;;  %3902 = vst [vmem:[#allocation3 + $0xf0] sm:$0x80] %v2921_v3  ;;  %3903 = vst [vmem:[#allocation3 + $0xf8] sm:$0x80] %v2921_v3 }
 0x1a9   :  { %v8716_v33 = vadd.f32 %v8715_v51, %v8714_v25  ;;  %v8717_v34 = vpop.f32.mrb[90].mxu1  ;;  %v8654_v35 = vpop.f32.mrb[91].mxu0  ;;  %8890 = vmatprep.subr.bf16.mxu1 %v9476_v24  ;;  %v9481_v12 = vld [vmem:[%s11888_s4 + $0xa8] sm:$0xff]   ;;  %v9482_v39 = vld [vmem:[%s11888_s4 + $0x70] sm:$0xff]   ;;  %v2990_v19 = vrot.slane %v9781_v45, 5  ;;  %v3058_v42 = vrot.slane %v9781_v45, 4 }
 0x1aa   :  { %v2314_v57 = vadd.f32 %v8652_v27, %v10701_v62  ;;  %v8655_v38 = vadd.f32 %v8654_v35, %v8653_v47  ;;  %v8718_v40 = vpop.f32.mrb[91].mxu1  ;;  %v9474_v62 = vld [vmem:[%s11888_s4 + $0x60] sm:$0xff]   ;;  %v9485_v46 = vld [vmem:[%s11888_s4 + $0xb0] sm:$0xff]   ;;  %v9486_v26 = vld [vmem:[%s11888_s4 + $0x78] sm:$0xff]  }
 0x1ab   :  { %v8719_v8 = vadd.f32 %v8718_v40, %v8717_v34  ;;  %8862 = vmatprep.subr.bf16.mxu0 %v9474_v62  ;;  %3011 = vst [vmem:[#allocation3 + $0x8] ss:$220 sps:$4 sm:$0x48] %v2990_v19   ;;  %3010 = vst [vmem:[#allocation3] ss:$236 sps:$4 sm:$0x48] %v2990_v19  }
 0x1ac   :  { %v10797_v2 = vadd.f32 %v8716_v33, %v2314_v57  ;;  %v2317_v44 = vadd.f32 %v8655_v38, %v10704_v29  ;;  %v9475_v29 = vld [vmem:[%s11888_s4 + $0x20] sm:$0xff]   ;;  %8891 = vmatpush3.bf16.msra.mxu1 %v9477_v59  ;;  %3012 = vst [vmem:[#allocation3 + $0x10] ss:$228 sps:$4 sm:$0x48] %v2990_v19   ;;  %3017 = vst [vmem:[#allocation3 + $0x38] sm:$0x8] %v2990_v19 }
 0x1ad   :  { %8863 = vmatpush3.bf16.msra.mxu0 %v9475_v29  ;;  %8892 = vmatprep.subr.bf16.mxu1 %v9480_v4  ;;  %3013 = vst [vmem:[#allocation3 + $0x18] ss:$228 sps:$4 sm:$0x48] %v2990_v19   ;;  %3021 = vst [vmem:[#allocation3 + $0x58] sm:$0x8] %v2990_v19  ;;  %v9487_v41 = vld [vmem:[%s11888_s4 + $0x38] sm:$0xff]  }
 0x1ae   :  { %v10819_v11 = vadd.f32 %v8719_v8, %v2317_v44  ;;  %v8656_v50 = vpop.f32.mrb[92].mxu0  ;;  %8864 = vmatprep.subr.bf16.mxu0 %v9478_v60  ;;  %3025 = vst [vmem:[#allocation3 + $0x78] sm:$0x8] %v2990_v19  ;;  %3084 = vst [vmem:[#allocation3] sm:$0x10] %v3058_v42  ;;  %v9488_v43 = vld [vmem:[%s11888_s4 + $0xf8] sm:$0xff]  }
 0x1af   :  { %v8720_v56 = vpop.f32.mrb[92].mxu1  ;;  %v8657_v13 = vpop.f32.mrb[93].mxu0  ;;  %3088 = vst [vmem:[#allocation3 + $0x20] sm:$0x10] %v3058_v42  ;;  %3092 = vst [vmem:[#allocation3 + $0x40] sm:$0x10] %v3058_v42 }
 0x1b0   :  { %v8658_v49 = vadd.f32 %v8657_v13, %v8656_v50  ;;  %v8721_v61 = vpop.f32.mrb[93].mxu1  ;;  %v8659_v23 = vpop.f32.mrb[94].mxu0  ;;  %8893 = vmatpush3.bf16.msra.mxu1 %v9481_v12  ;;  %3096 = vst [vmem:[#allocation3 + $0x60] sm:$0x10] %v3058_v42  ;;  %3684 = vst [vmem:[#allocation3 + $0x80] sm:$0x10] %v3058_v42 }
 0x1b1   :  { %v8722_v63 = vadd.f32 %v8721_v61, %v8720_v56  ;;  %v8723_v0 = vpop.f32.mrb[94].mxu1  ;;  %v8660_v1 = vpop.f32.mrb[95].mxu0  ;;  %8865 = vmatpush3.bf16.msra.mxu0 %v9479_v31  ;;  %3688 = vst [vmem:[#allocation3 + $0xa0] sm:$0x10] %v3058_v42  ;;  %3692 = vst [vmem:[#allocation3 + $0xc0] sm:$0x10] %v3058_v42 }
 0x1b2   :  { %v2322_v28 = vadd.f32 %v8658_v49, %v10707_v18  ;;  %v8661_v6 = vadd.f32 %v8660_v1, %v8659_v23  ;;  %v8724_v10 = vpop.f32.mrb[95].mxu1  ;;  %v9483_v18 = vld [vmem:[%s11888_s4 + $0x30] sm:$0xff]   ;;  %8866 = vmatprep.subr.bf16.mxu0 %v9482_v39  ;;  %3696 = vst [vmem:[#allocation3 + $0xe0] sm:$0x30] %v3058_v42   ;;  %3697 = vst [vmem:[#allocation3 + $0xe8] sm:$0x30] %v3058_v42  }
 0x1b3   :  { %v8725_v30 = vadd.f32 %v8724_v10, %v8723_v0  ;;  %3698 = vst [vmem:[#allocation3 + $0xf0] sm:$0x30] %v3058_v42   ;;  %3699 = vst [vmem:[#allocation3 + $0xf8] sm:$0x30] %v3058_v42   ;;  %v9490_v9 = vld [vmem:[%s11888_s4 + $0x140] sm:$0xff]   ;;  %v3603_v29 = vrot.slane %v9781_v45, 2 }
 0x1b4   :  { %v10840_v15 = vadd.f32 %v8722_v63, %v2322_v28  ;;  %v2325_v16 = vadd.f32 %v8661_v6, %v10710_v53  ;;  %v9484_v53 = vld [vmem:[%s11888_s4 + $0xf0] sm:$0xff]  }
 0x1b5   :  { %8867 = vmatpush3.bf16.msra.mxu0 %v9483_v18  ;;  %8894 = vmatprep.subr.bf16.mxu1 %v9484_v53  ;;  %3629 = vst [vmem:[#allocation3 + $0x98] sm:$0x8] %v3603_v29  ;;  %3633 = vst [vmem:[#allocation3 + $0xb8] sm:$0x8] %v3603_v29 }
 0x1b6   :  { %v10851_v22 = vadd.f32 %v8725_v30, %v2325_v16  ;;  %v8742_v55 = vpop.f32.mrb[96].mxu0  ;;  %8895 = vmatpush3.bf16.msra.mxu1 %v9485_v46  ;;  %8868 = vmatprep.subr.bf16.mxu0 %v9486_v26  ;;  %3637 = vst [vmem:[#allocation3 + $0xd8] sm:$0x8] %v3603_v29  ;;  %3641 = vst [vmem:[#allocation3 + $0xf8] sm:$0x8] %v3603_v29 }
 0x1b7   :  { %v8806_v25 = vpop.f32.mrb[96].mxu1  ;;  %v8743_v7 = vpop.f32.mrb[97].mxu0  ;;  %8896 = vmatprep.subr.bf16.mxu1 %v9488_v43 }
 0x1b8   :  { %v8744_v27 = vadd.f32 %v8743_v7, %v8742_v55  ;;  %v8807_v51 = vpop.f32.mrb[97].mxu1  ;;  %v8745_v47 = vpop.f32.mrb[98].mxu0 }
 0x1b9   :  { %v8808_v33 = vadd.f32 %v8807_v51, %v8806_v25  ;;  %v8809_v34 = vpop.f32.mrb[98].mxu1  ;;  %v8746_v35 = vpop.f32.mrb[99].mxu0  ;;  %8869 = vmatpush3.bf16.msra.mxu0 %v9487_v41 }
 0x1ba   :  { %v2460_v57 = vadd.f32 %v8744_v27, %v10713_v36  ;;  %v8747_v38 = vadd.f32 %v8746_v35, %v8745_v47  ;;  %v8810_v40 = vpop.f32.mrb[99].mxu1  ;;  %v9489_v36 = vld [vmem:[%s11888_s4 + $0xb8] sm:$0xff]   ;;  %8910 = vmatprep.subr.bf16.mxu0 %v9490_v9 }
 0x1bb   :  { %v8811_v8 = vadd.f32 %v8810_v40, %v8809_v34  ;;  %8897 = vmatpush3.bf16.msra.mxu1 %v9489_v36 }
 0x1bc   :  { %v10869_v44 = vadd.f32 %v8808_v33, %v2460_v57  ;;  %v2463_v62 = vadd.f32 %v8747_v38, %v10716_v5  ;;  %v9491_v5 = vld [vmem:[%s11888_s4 + $0x1c0] sm:$0xff]  }
 0x1bd   :  { %8938 = vmatprep.subr.bf16.mxu1 %v9491_v5 }
 0x1be   :  { %v10879_v3 = vadd.f32 %v8811_v8, %v2463_v62  ;;  %v8748_v50 = vpop.f32.mrb[100].mxu0  ;;  %v2643_v39 = vmul.f32 %v10869_v44, %v10869_v44 }
 0x1bf   :  { %v8812_v24 = vpop.f32.mrb[100].mxu1  ;;  %v8749_v56 = vpop.f32.mrb[101].mxu0 }
 0x1c0   :  { %v8750_v13 = vadd.f32 %v8749_v56, %v8748_v50  ;;  %v8813_v59 = vpop.f32.mrb[101].mxu1  ;;  %v8751_v60 = vpop.f32.mrb[102].mxu0  ;;  %v2644_v6 = vmul.f32 %v10879_v3, %v10879_v3 }
 0x1c1   :  { %v8814_v49 = vadd.f32 %v8813_v59, %v8812_v24  ;;  %v8815_v61 = vpop.f32.mrb[102].mxu1  ;;  %v8752_v23 = vpop.f32.mrb[103].mxu0 }
 0x1c2   :  { %v2468_v63 = vadd.f32 %v8750_v13, %v10719_v58  ;;  %v8753_v0 = vadd.f32 %v8752_v23, %v8751_v60  ;;  %v8816_v1 = vpop.f32.mrb[103].mxu1  ;;  %v2621_v58 = vadd.f32 %v10879_v3, %v10869_v44  ;;  %v2659_v7 = vadd.f32 %v2644_v6, %v2643_v39 }
 0x1c3   :  { %v8817_v31 = vadd.f32 %v8816_v1, %v8815_v61 }
 0x1c4   :  { %v10885_v4 = vadd.f32 %v8814_v49, %v2468_v63  ;;  %v2471_v28 = vadd.f32 %v8753_v0, %v10722_v21 }
 0x1c6   :  { %v10890_v10 = vadd.f32 %v8817_v31, %v2471_v28  ;;  %v8754_v12 = vpop.f32.mrb[104].mxu0  ;;  %v2645_v19 = vmul.f32 %v10885_v4, %v10885_v4  ;;  %v2622_v46 = vadd.f32 %v2621_v58, %v10885_v4 }
 0x1c7   :  { %v8818_v30 = vpop.f32.mrb[104].mxu1  ;;  %v8755_v16 = vpop.f32.mrb[105].mxu0 }
 0x1c8   :  { %v8756_v18 = vadd.f32 %v8755_v16, %v8754_v12  ;;  %v8819_v42 = vpop.f32.mrb[105].mxu1  ;;  %v8757_v21 = vpop.f32.mrb[106].mxu0  ;;  %v2660_v33 = vadd.f32 %v2659_v7, %v2645_v19  ;;  %v2646_v34 = vmul.f32 %v10890_v10, %v10890_v10  ;;  %v2623_v38 = vadd.f32 %v2622_v46, %v10890_v10 }
 0x1c9   :  { %v8820_v55 = vadd.f32 %v8819_v42, %v8818_v30  ;;  %v8821_v53 = vpop.f32.mrb[106].mxu1  ;;  %v8758_v25 = vpop.f32.mrb[107].mxu0 }
 0x1ca   :  { %v2476_v26 = vadd.f32 %v8756_v18, %v10725_v14  ;;  %v8759_v27 = vadd.f32 %v8758_v25, %v8757_v21  ;;  %v8822_v51 = vpop.f32.mrb[107].mxu1  ;;  %v2661_v62 = vadd.f32 %v2660_v33, %v2646_v34 }
 0x1cb   :  { %v8823_v47 = vadd.f32 %v8822_v51, %v8821_v53 }
 0x1cc   :  { %v10902_v35 = vadd.f32 %v8820_v55, %v2476_v26  ;;  %v2479_v57 = vadd.f32 %v8759_v27, %v10728_v37 }
 0x1ce   :  { %v2647_v40 = vmul.f32 %v10902_v35, %v10902_v35  ;;  %v10908_v41 = vadd.f32 %v8823_v47, %v2479_v57  ;;  %v8760_v8 = vpop.f32.mrb[108].mxu0  ;;  %v2624_v36 = vadd.f32 %v2623_v38, %v10902_v35 }
 0x1cf   :  { %v8824_v14 = vpop.f32.mrb[108].mxu1  ;;  %v8761_v43 = vpop.f32.mrb[109].mxu0 }
 0x1d0   :  { %v8762_v9 = vadd.f32 %v8761_v43, %v8760_v8  ;;  %v8825_v29 = vpop.f32.mrb[109].mxu1  ;;  %v8763_v50 = vpop.f32.mrb[110].mxu0  ;;  %v2662_v37 = vadd.f32 %v2661_v62, %v2647_v40  ;;  %v2648_v13 = vmul.f32 %v10908_v41, %v10908_v41  ;;  %v2625_v23 = vadd.f32 %v2624_v36, %v10908_v41 }
 0x1d1   :  { %v8826_v5 = vadd.f32 %v8825_v29, %v8824_v14  ;;  %v8827_v24 = vpop.f32.mrb[110].mxu1  ;;  %v8764_v56 = vpop.f32.mrb[111].mxu0 }
 0x1d2   :  { %v2484_v59 = vadd.f32 %v8762_v9, %v10731_v32  ;;  %v8765_v60 = vadd.f32 %v8764_v56, %v8763_v50  ;;  %v8828_v49 = vpop.f32.mrb[111].mxu1  ;;  %v2663_v1 = vadd.f32 %v2662_v37, %v2648_v13 }
 0x1d3   :  { %v8829_v61 = vadd.f32 %v8828_v49, %v8827_v24 }
 0x1d4   :  { %v10915_v63 = vadd.f32 %v8826_v5, %v2484_v59  ;;  %v2487_v0 = vadd.f32 %v8765_v60, %v10734_v54 }
 0x1d6   :  { %v2626_v31 = vadd.f32 %v2625_v23, %v10915_v63  ;;  %v2649_v28 = vmul.f32 %v10915_v63, %v10915_v63  ;;  %v10921_v6 = vadd.f32 %v8829_v61, %v2487_v0  ;;  %v8766_v12 = vpop.f32.mrb[112].mxu0 }
 0x1d7   :  { %v8830_v30 = vpop.f32.mrb[112].mxu1  ;;  %v8767_v32 = vpop.f32.mrb[113].mxu0 }
 0x1d8   :  { %v2664_v16 = vadd.f32 %v2663_v1, %v2649_v28  ;;  %v2627_v39 = vadd.f32 %v2626_v31, %v10921_v6  ;;  %v2650_v58 = vmul.f32 %v10921_v6, %v10921_v6  ;;  %v8768_v19 = vadd.f32 %v8767_v32, %v8766_v12  ;;  %v8831_v18 = vpop.f32.mrb[113].mxu1  ;;  %v8769_v54 = vpop.f32.mrb[114].mxu0 }
 0x1d9   :  { %v8832_v42 = vadd.f32 %v8831_v18, %v8830_v30  ;;  %v8833_v21 = vpop.f32.mrb[114].mxu1  ;;  %v8770_v55 = vpop.f32.mrb[115].mxu0 }
 0x1da   :  { %v2665_v53 = vadd.f32 %v2664_v16, %v2650_v58  ;;  %v2492_v25 = vadd.f32 %v8768_v19, %v10740_v48  ;;  %v8771_v7 = vadd.f32 %v8770_v55, %v8769_v54  ;;  %v8834_v46 = vpop.f32.mrb[115].mxu1 }
 0x1db   :  { %v8835_v26 = vadd.f32 %v8834_v46, %v8833_v21 }
 0x1dc   :  { %v10927_v27 = vadd.f32 %v8832_v42, %v2492_v25  ;;  %v2495_v51 = vadd.f32 %v8771_v7, %v10749_v52 }
 0x1de   :  { %v2628_v47 = vadd.f32 %v2627_v39, %v10927_v27  ;;  %v2651_v33 = vmul.f32 %v10927_v27, %v10927_v27  ;;  %v10933_v34 = vadd.f32 %v8835_v26, %v2495_v51  ;;  %v8772_v57 = vpop.f32.mrb[116].mxu0 }
 0x1df   :  { %v8836_v38 = vpop.f32.mrb[116].mxu1  ;;  %v8773_v40 = vpop.f32.mrb[117].mxu0 }
 0x1e0   :  { %v2666_v8 = vadd.f32 %v2665_v53, %v2651_v33  ;;  %v2629_v48 = vadd.f32 %v2628_v47, %v10933_v34  ;;  %v2652_v14 = vmul.f32 %v10933_v34, %v10933_v34  ;;  %v8774_v43 = vadd.f32 %v8773_v40, %v8772_v57  ;;  %v8837_v62 = vpop.f32.mrb[117].mxu1  ;;  %v8775_v36 = vpop.f32.mrb[118].mxu0 }
 0x1e1   :  { %v8838_v52 = vadd.f32 %v8837_v62, %v8836_v38  ;;  %v8839_v9 = vpop.f32.mrb[118].mxu1  ;;  %v8776_v29 = vpop.f32.mrb[119].mxu0 }
 0x1e2   :  { %v2667_v50 = vadd.f32 %v2666_v8, %v2652_v14  ;;  %v2500_v5 = vadd.f32 %v8774_v43, %v10770_v17  ;;  %v8777_v24 = vadd.f32 %v8776_v29, %v8775_v36  ;;  %v8840_v56 = vpop.f32.mrb[119].mxu1 }
 0x1e3   :  { %v8841_v37 = vadd.f32 %v8840_v56, %v8839_v9 }
 0x1e4   :  { %v10939_v13 = vadd.f32 %v8838_v52, %v2500_v5  ;;  %v2503_v59 = vadd.f32 %v8777_v24, %v10779_v20 }
 0x1e6   :  { %v2630_v60 = vadd.f32 %v2629_v48, %v10939_v13  ;;  %v2653_v49 = vmul.f32 %v10939_v13, %v10939_v13  ;;  %v10945_v61 = vadd.f32 %v8841_v37, %v2503_v59  ;;  %v8778_v23 = vpop.f32.mrb[120].mxu0 }
 0x1e7   :  { %v8842_v0 = vpop.f32.mrb[120].mxu1  ;;  %v8779_v1 = vpop.f32.mrb[121].mxu0 }
 0x1e8   :  { %v2668_v31 = vadd.f32 %v2667_v50, %v2653_v49  ;;  %v2631_v17 = vadd.f32 %v2630_v60, %v10945_v61  ;;  %v2654_v28 = vmul.f32 %v10945_v61, %v10945_v61  ;;  %v8780_v12 = vadd.f32 %v8779_v1, %v8778_v23  ;;  %v8843_v30 = vpop.f32.mrb[121].mxu1  ;;  %v8781_v32 = vpop.f32.mrb[122].mxu0 }
 0x1e9   :  { %v8844_v20 = vadd.f32 %v8843_v30, %v8842_v0  ;;  %v8845_v16 = vpop.f32.mrb[122].mxu1  ;;  %v8782_v39 = vpop.f32.mrb[123].mxu0 }
 0x1ea   :  { %v2669_v58 = vadd.f32 %v2668_v31, %v2654_v28  ;;  %v2508_v19 = vadd.f32 %v8780_v12, %v10797_v2  ;;  %v8783_v18 = vadd.f32 %v8782_v39, %v8781_v32  ;;  %v8846_v54 = vpop.f32.mrb[123].mxu1 }
 0x1eb   :  { %v8847_v42 = vadd.f32 %v8846_v54, %v8845_v16  ;;  %v2689_v54 = vlaneseq }
 0x1ec   :  { %v10951_v21 = vadd.f32 %v8844_v20, %v2508_v19  ;;  %v2511_v55 = vadd.f32 %v8783_v18, %v10819_v11 }
 0x1ee   :  { %v2632_v53 = vadd.f32 %v2631_v17, %v10951_v21  ;;  %v2655_v25 = vmul.f32 %v10951_v21, %v10951_v21  ;;  %v10957_v7 = vadd.f32 %v8847_v42, %v2511_v55  ;;  %v8784_v46 = vpop.f32.mrb[124].mxu0  ;;  %v2690_v42 = vshrl.u32 %v2689_v54, 7  ;;  %v2619_v55 = vld [vmem:[%s11889_s2] sm:$0x1] }
 0x1ef   :  { %v8848_v26 = vpop.f32.mrb[124].mxu1  ;;  %v8785_v51 = vpop.f32.mrb[125].mxu0 }
 0x1f0   :  { %v2670_v47 = vadd.f32 %v2669_v58, %v2655_v25  ;;  %v2633_v2 = vadd.f32 %v2632_v53, %v10957_v7  ;;  %v2656_v33 = vmul.f32 %v10957_v7, %v10957_v7  ;;  %v8786_v57 = vadd.f32 %v8785_v51, %v8784_v46  ;;  %v8849_v38 = vpop.f32.mrb[125].mxu1  ;;  %v8787_v40 = vpop.f32.mrb[126].mxu0 }
 0x1f1   :  { %v8850_v11 = vadd.f32 %v8849_v38, %v8848_v26  ;;  %v8851_v8 = vpop.f32.mrb[126].mxu1  ;;  %v8788_v48 = vpop.f32.mrb[127].mxu0  ;;  %v10967_v53 = vsub.s32 0, %v2690_v42  ;;  %v2620_v26 = vld [vmem:[%s11890_s3] sm:$0x1] }
 0x1f2   :  { %v2671_v14 = vadd.f32 %v2670_v47, %v2656_v33  ;;  %v2516_v43 = vadd.f32 %v8786_v57, %v10840_v15  ;;  %v8789_v62 = vadd.f32 %v8788_v48, %v8787_v40  ;;  %v8852_v36 = vpop.f32.mrb[127].mxu1 }
 0x1f3   :  { %v8853_v52 = vadd.f32 %v8852_v36, %v8851_v8 }
 0x1f4   :  { %v2613_v9 = vadd.f32 %v8850_v11, %v2516_v43  ;;  %v2519_v29 = vadd.f32 %v8789_v62, %v10851_v22 }
 0x1f6   :  { %v2634_v50 = vadd.f32 %v2633_v2, %v2613_v9  ;;  %v2657_v5 = vmul.f32 %v2613_v9, %v2613_v9  ;;  %v2616_v24 = vadd.f32 %v8853_v52, %v2519_v29 }
 0x1f8   :  { %v2672_v56 = vadd.f32 %v2671_v14, %v2657_v5  ;;  %v2635_v37 = vadd.f32 %v2634_v50, %v2616_v24  ;;  %v2658_v59 = vmul.f32 %v2616_v24, %v2616_v24 }
 0x1fa   :  { %v2636_v60 = vrot.slane %v2635_v37, 4  ;;  %v2673_v49 = vadd.f32 %v2672_v56, %v2658_v59 }
 0x1fc   :  { %v2637_v23 = vadd.f32 %v2636_v60, %v2635_v37  ;;  %v2674_v0 = vrot.slane %v2673_v49, 4 }
 0x1fe   :  { %v2638_v1 = vrot.slane %v2637_v23, 2  ;;  %v2675_v31 = vadd.f32 %v2674_v0, %v2673_v49 }
 0x200   :  { %v2639_v17 = vadd.f32 %v2638_v1, %v2637_v23  ;;  %v2676_v15 = vrot.slane %v2675_v31, 2 }
 0x202   :  { %v2640_v28 = vrot.slane %v2639_v17, 1  ;;  %v2677_v12 = vadd.f32 %v2676_v15, %v2675_v31 }
 0x204   :  { %v2641_v30 = vadd.f32 %v2640_v28, %v2639_v17  ;;  %v2678_v32 = vrot.slane %v2677_v12, 1 }
 0x206   :  { %v2642_v20 = vmul.f32 0.0078125, %v2641_v30  ;;  %v2679_v22 = vadd.f32 %v2678_v32, %v2677_v12 }
 0x208   :  { %v2680_v16 = vmul.f32 0.0078125, %v2679_v22  ;;  %v2681_v39 = vmul.f32 %v2642_v20, %v2642_v20 }
 0x20a   :  { %v2682_v58 = vsub.f32 %v2680_v16, %v2681_v39 }
 0x20c   :  { %v2683_v19 = vmax.f32 %v2682_v58, 0.0 }
 0x20e   :  { %v2684_v18 = vadd.f32 1e-05, %v2683_v19 }
 0x210   :  { %9773 = vrsqrt.f32 %v2684_v18 }
 0x21a   :  { %v9774_v25 = vpop.eup %9773 }
 0x21b   :  { %v2686_v46 = vmul.f32 %v9774_v25, %v2619_v55 }
 0x21d   :  { %v2687_v51 = vmul.f32 %v2686_v46, %v2642_v20  ;;  %v2692_v47 = vrot.slane %v2686_v46, %v10967_v53 }
 0x21f   :  { %v2688_v2 = vsub.f32 %v2620_v26, %v2687_v51  ;;  %v2707_v33 = vmul.f32 %v2692_v47, %v2613_v9  ;;  %v2708_v57 = vmul.f32 %v2692_v47, %v2616_v24  ;;  %v2695_v38 = vmul.f32 %v2692_v47, %v10885_v4 }
 0x220   :  { %v2696_v40 = vmul.f32 %v2692_v47, %v10890_v10  ;;  %v2699_v11 = vmul.f32 %v2692_v47, %v10915_v63  ;;  %v2700_v8 = vmul.f32 %v2692_v47, %v10921_v6  ;;  %v2703_v48 = vmul.f32 %v2692_v47, %v10939_v13 }
 0x221   :  { %v2713_v14 = vrot.slane %v2688_v2, %v10967_v53  ;;  %v2704_v43 = vmul.f32 %v2692_v47, %v10945_v61  ;;  %v2693_v62 = vmul.f32 %v2692_v47, %v10869_v44  ;;  %v2694_v36 = vmul.f32 %v2692_v47, %v10879_v3 }
 0x222   :  { %v2697_v52 = vmul.f32 %v2692_v47, %v10902_v35  ;;  %v2698_v4 = vmul.f32 %v2692_v47, %v10908_v41  ;;  %v2701_v10 = vmul.f32 %v2692_v47, %v10927_v27  ;;  %v2702_v63 = vmul.f32 %v2692_v47, %v10933_v34 }
 0x223   :  { %v2729_v9 = vadd.f32 %v2713_v14, %v2707_v33  ;;  %v2730_v6 = vadd.f32 %v2713_v14, %v2708_v57  ;;  %v2717_v29 = vadd.f32 %v2713_v14, %v2695_v38  ;;  %v2718_v13 = vadd.f32 %v2713_v14, %v2696_v40 }
 0x224   :  { %v2721_v50 = vadd.f32 %v2713_v14, %v2699_v11  ;;  %v2722_v5 = vadd.f32 %v2713_v14, %v2700_v8  ;;  %v2725_v24 = vadd.f32 %v2713_v14, %v2703_v48  ;;  %v2726_v61 = vadd.f32 %v2713_v14, %v2704_v43 }
 0x225   :  { %v2745_v56 = vmax.f32 %v2729_v9, 0.0  ;;  %v2746_v44 = vmax.f32 %v2730_v6, 0.0  ;;  %v2733_v37 = vmax.f32 %v2717_v29, 0.0  ;;  %v2734_v3 = vmax.f32 %v2718_v13, 0.0 }
 0x226   :  { %v2737_v59 = vmax.f32 %v2721_v50, 0.0  ;;  %v2738_v35 = vmax.f32 %v2722_v5, 0.0  ;;  %v2741_v60 = vmax.f32 %v2725_v24, 0.0  ;;  %v2742_v41 = vmax.f32 %v2726_v61, 0.0 }
 0x227   :  { %v2754_v49 = vpack.c.bf16 %v2746_v44, %v2745_v56  ;;  %v2748_v27 = vpack.c.bf16 %v2734_v3, %v2733_v37  ;;  %v2715_v23 = vadd.f32 %v2713_v14, %v2693_v62  ;;  %v2716_v34 = vadd.f32 %v2713_v14, %v2694_v36 }
 0x228   :  { %v2750_v0 = vpack.c.bf16 %v2738_v35, %v2737_v59  ;;  %v2752_v1 = vpack.c.bf16 %v2742_v41, %v2741_v60  ;;  %v2719_v31 = vadd.f32 %v2713_v14, %v2697_v52  ;;  %v2720_v17 = vadd.f32 %v2713_v14, %v2698_v4  ;;  %v9492_v41 = vld [vmem:[%s11888_s4 + $0x100] sm:$0xff]  }
 0x229   :  { %2762 = vst [vmem:[#allocation2 + $0x38] sm:$0xff] %v2754_v49  ;;  %2756 = vst [vmem:[#allocation2 + $0x8] sm:$0xff] %v2748_v27  ;;  %v2731_v15 = vmax.f32 %v2715_v23, 0.0  ;;  %v2732_v28 = vmax.f32 %v2716_v34, 0.0  ;;  %v2705_v12 = vmul.f32 %v2692_v47, %v10951_v21  ;;  %v2706_v30 = vmul.f32 %v2692_v47, %v10957_v7 }
 0x22a   :  { %2758 = vst [vmem:[#allocation2 + $0x18] sm:$0xff] %v2750_v0  ;;  %2760 = vst [vmem:[#allocation2 + $0x28] sm:$0xff] %v2752_v1  ;;  %v2735_v32 = vmax.f32 %v2719_v31, 0.0  ;;  %v2736_v20 = vmax.f32 %v2720_v17, 0.0  ;;  %v2723_v22 = vadd.f32 %v2713_v14, %v2701_v10  ;;  %v2724_v16 = vadd.f32 %v2713_v14, %v2702_v63 }
 0x22b   :  { %v2747_v39 = vpack.c.bf16 %v2732_v28, %v2731_v15  ;;  %v2727_v58 = vadd.f32 %v2713_v14, %v2705_v12  ;;  %v2728_v19 = vadd.f32 %v2713_v14, %v2706_v30  ;;  %v9494_v15 = vld [vmem:[%s11888_s4 + $0x148] sm:$0xff]   ;;  %v9493_v12 = vld [vmem:[%s11888_s4 + $0x180] sm:$0xff]  }
 0x22c   :  { %v2749_v18 = vpack.c.bf16 %v2736_v20, %v2735_v32  ;;  %v2739_v54 = vmax.f32 %v2723_v22, 0.0  ;;  %v2740_v42 = vmax.f32 %v2724_v16, 0.0 }
 0x22d   :  { %2755 = vst [vmem:[#allocation2] sm:$0xff] %v2747_v39  ;;  %v2743_v55 = vmax.f32 %v2727_v58, 0.0  ;;  %v2744_v25 = vmax.f32 %v2728_v19, 0.0  ;;  %v9495_v19 = vld [vmem:[%s11888_s4 + $0x1c8] sm:$0xff]  }
 0x22e   :  { %2757 = vst [vmem:[#allocation2 + $0x10] sm:$0xff] %v2749_v18  ;;  %v2751_v46 = vpack.c.bf16 %v2740_v42, %v2739_v54 }
 0x22f   :  { %v2753_v21 = vpack.c.bf16 %v2744_v25, %v2743_v55  ;;  %v9496_v25 = vld [vmem:[%s11888_s4 + $0x108] sm:$0xff]  }
 0x230   :  { %v3026_v26 = vld [vmem:[#allocation2 + $0x8] sm:$0x1]  ;;  %v3101_v7 = vld [vmem:[#allocation2 + $0x8] sm:$0x4]  ;;  %v3193_v51 = vld [vmem:[#allocation2 + $0x8] sm:$0x10] }
 0x231   :  { %2759 = vst [vmem:[#allocation2 + $0x20] sm:$0xff] %v2751_v46  ;;  %v3059_v47 = vrot.slane %v3026_v26, 4  ;;  %v7918_v2 = vrot.slane %v3101_v7, 5  ;;  %v7930_v33 = vrot.slane %v3193_v51, 6  ;;  %v3285_v57 = vld [vmem:[#allocation2 + $0x8] sm:$0x40] }
 0x232   :  { %2761 = vst [vmem:[#allocation2 + $0x30] sm:$0xff] %v2753_v21  ;;  %v7942_v38 = vrot.slane %v3285_v57, 7  ;;  %v3028_v40 = vld [vmem:[#allocation2 + $0x8] sm:$0x4]  ;;  %v3103_v11 = vld [vmem:[#allocation2 + $0x8] sm:$0x10] }
 0x233   :  { %3085 = vst [vmem:[#allocation3 + $0x8] sm:$0x10] %v3059_v47  ;;  %3177 = vst [vmem:[#allocation3 + $0x8] sm:$0x20] %v7918_v2  ;;  %v7911_v8 = vrot.slane %v3028_v40, 6  ;;  %v7920_v48 = vrot.slane %v3103_v11, 7 }
 0x234   :  { %3269 = vst [vmem:[#allocation3 + $0x8] sm:$0x40] %v7930_v33  ;;  %v3195_v14 = vld [vmem:[#allocation2 + $0x8] sm:$0x40]  ;;  %v3100_v43 = vld [vmem:[#allocation2 + $0x8] sm:$0x2] }
 0x235   :  { %3341 = vst [vmem:[#allocation3 + $0x8] sm:$0x80] %v7942_v38  ;;  %3271 = vst [vmem:[#allocation3 + $0x18] sm:$0x40] %v3195_v14  ;;  %v3144_v62 = vrot.slane %v3100_v43, 4  ;;  %v9497_v51 = vld [vmem:[%s11888_s4 + $0x188] sm:$0xff]  }
 0x236   :  { %v3192_v36 = vld [vmem:[#allocation2 + $0x8] sm:$0x8]  ;;  %v3284_v52 = vld [vmem:[#allocation2 + $0x8] sm:$0x20]  ;;  %3087 = vst [vmem:[#allocation3 + $0x18] sm:$0x10] %v7911_v8 }
 0x237   :  { %3179 = vst [vmem:[#allocation3 + $0x18] sm:$0x20] %v7920_v48  ;;  %v3236_v4 = vrot.slane %v3192_v36, 5  ;;  %v3316_v10 = vrot.slane %v3284_v52, 6  ;;  %v3027_v63 = vld [vmem:[#allocation2 + $0x8] sm:$0x2] }
 0x238   :  { %v3102_v9 = vld [vmem:[#allocation2 + $0x8] sm:$0x8]  ;;  %3176 = vst [vmem:[#allocation3] sm:$0x20] %v3144_v62  ;;  %v7910_v6 = vrot.slane %v3027_v63, 5  ;;  %v9498_v47 = vld [vmem:[%s11888_s4 + $0x150] sm:$0xff]  }
 0x239   :  { %v7919_v29 = vrot.slane %v3102_v9, 6  ;;  %v3194_v13 = vld [vmem:[#allocation2 + $0x8] sm:$0x20]  ;;  %v3286_v50 = vld [vmem:[#allocation2 + $0x8] sm:$0x80]  ;;  %v9499_v38 = vld [vmem:[%s11888_s4 + $0x1d0] sm:$0xff]  }
 0x23a   :  { %3268 = vst [vmem:[#allocation3] sm:$0x40] %v3236_v4  ;;  %3340 = vst [vmem:[#allocation3] sm:$0x80] %v3316_v10  ;;  %v7931_v5 = vrot.slane %v3194_v13, 7  ;;  %v9500_v36 = vld [vmem:[%s11888_s4 + $0x110] sm:$0xff]  }
 0x23b   :  { %3342 = vst [vmem:[#allocation3 + $0x10] sm:$0x80] %v3286_v50  ;;  %v3356_v24 = vld [vmem:[#allocation2 + $0x18] sm:$0x1]  ;;  %v3409_v61 = vld [vmem:[#allocation2 + $0x18] sm:$0x4] }
 0x23c   :  { %3086 = vst [vmem:[#allocation3 + $0x10] sm:$0x10] %v7910_v6  ;;  %3178 = vst [vmem:[#allocation3 + $0x10] sm:$0x20] %v7919_v29  ;;  %v3425_v56 = vrot.slane %v3409_v61, 1  ;;  %v3905_v0 = vld [vmem:[#allocation3 + $0x8] sm:$0xff] }
 0x23d   :  { %3393 = vst [vmem:[#allocation3 + $0x88] sm:$0x1] %v3356_v24  ;;  %v3477_v44 = vld [vmem:[#allocation2 + $0x18] sm:$0x10]  ;;  %v3569_v37 = vld [vmem:[#allocation2 + $0x18] sm:$0x40]  ;;  %4992 = vmatprep.mubr.bf16.mxu0 %v3905_v0 }
 0x23e   :  { %3270 = vst [vmem:[#allocation3 + $0x10] sm:$0x40] %v7931_v5  ;;  %v7950_v3 = vrot.slane %v3477_v44, 2  ;;  %v7962_v59 = vrot.slane %v3569_v37, 3  ;;  %v3642_v35 = vld [vmem:[#allocation2 + $0x28] sm:$0x1] }
 0x23f   :  { %v3701_v60 = vld [vmem:[#allocation2 + $0x28] sm:$0x4]  ;;  %3461 = vst [vmem:[#allocation3 + $0x88] sm:$0x2] %v3425_v56  ;;  %v3666_v49 = vrot.slane %v3642_v35, 4  ;;  %v3907_v28 = vld [vmem:[#allocation3 + $0x18] sm:$0xff] }
 0x240   :  { %v7976_v27 = vrot.slane %v3701_v60, 5  ;;  %v3774_v23 = vld [vmem:[#allocation2 + $0x28] sm:$0x10]  ;;  %v3847_v34 = vld [vmem:[#allocation2 + $0x28] sm:$0x40]  ;;  %5041 = vmatprep.mubr.bf16.mxu1 %v3907_v28  ;;  %v9501_v50 = vld [vmem:[%s11888_s4 + $0x190] sm:$0xff]  }
 0x241   :  { %3553 = vst [vmem:[#allocation3 + $0x88] sm:$0x4] %v7950_v3  ;;  %3627 = vst [vmem:[#allocation3 + $0x88] sm:$0x8] %v7962_v59  ;;  %v7985_v1 = vrot.slane %v3774_v23, 6  ;;  %v7994_v31 = vrot.slane %v3847_v34, 7 }
 0x242   :  { %v3358_v17 = vld [vmem:[#allocation2 + $0x18] sm:$0x4]  ;;  %3685 = vst [vmem:[#allocation3 + $0x88] sm:$0x10] %v3666_v49  ;;  %3758 = vst [vmem:[#allocation3 + $0x88] sm:$0x20] %v7976_v27 }
 0x243   :  { %v3372_v30 = vrot.slane %v3358_v17, 2  ;;  %v3411_v32 = vld [vmem:[#allocation2 + $0x18] sm:$0x10]  ;;  %v3479_v20 = vld [vmem:[#allocation2 + $0x18] sm:$0x40]  ;;  %v3904_v18 = vld [vmem:[#allocation3] sm:$0xff] }
 0x244   :  { %3831 = vst [vmem:[#allocation3 + $0x88] sm:$0x40] %v7985_v1  ;;  %3889 = vst [vmem:[#allocation3 + $0x88] sm:$0x80] %v7994_v31  ;;  %v3431_v22 = vrot.slane %v3411_v32, 3  ;;  %v7952_v16 = vrot.slane %v3479_v20, 4  ;;  %4993 = vmatmul.mubr.bf16.vlgmr.msra.gmra.mrb[128].mxu0 %v3904_v18 }
 0x245   :  { %v3644_v39 = vld [vmem:[#allocation2 + $0x28] sm:$0x4]  ;;  %v3703_v58 = vld [vmem:[#allocation2 + $0x28] sm:$0x10]  ;;  %3395 = vst [vmem:[#allocation3 + $0x98] sm:$0x1] %v3372_v30  ;;  %8911 = vmatpush3.bf16.msra.mxu0 %v9492_v41 }
 0x246   :  { %v7971_v54 = vrot.slane %v3644_v39, 6  ;;  %v7978_v42 = vrot.slane %v3703_v58, 7  ;;  %v3776_v55 = vld [vmem:[#allocation2 + $0x28] sm:$0x40]  ;;  %3463 = vst [vmem:[#allocation3 + $0x98] sm:$0x2] %v3431_v22  ;;  %8912 = vmatprep.subr.bf16.mxu0 %v9494_v15 }
 0x247   :  { %3555 = vst [vmem:[#allocation3 + $0x98] sm:$0x4] %v7952_v16  ;;  %3833 = vst [vmem:[#allocation3 + $0x98] sm:$0x40] %v3776_v55  ;;  %v3408_v46 = vld [vmem:[#allocation2 + $0x18] sm:$0x2] }
 0x248   :  { %v3476_v21 = vld [vmem:[#allocation2 + $0x18] sm:$0x8]  ;;  %v3568_v26 = vld [vmem:[#allocation2 + $0x18] sm:$0x20]  ;;  %v3906_v7 = vld [vmem:[#allocation3 + $0x10] sm:$0xff] }
 0x249   :  { %3687 = vst [vmem:[#allocation3 + $0x98] sm:$0x10] %v7971_v54  ;;  %3760 = vst [vmem:[#allocation3 + $0x98] sm:$0x20] %v7978_v42  ;;  %v3520_v2 = vrot.slane %v3476_v21, 1  ;;  %v3600_v33 = vrot.slane %v3568_v26, 2  ;;  %5042 = vmatmul.mubr.bf16.vlgmr.msra.gmra.mrb[128].mxu1 %v3906_v7  ;;  %8913 = vmatpush3.bf16.msra.mxu0 %v9496_v25 }
 0x24a   :  { %3460 = vst [vmem:[#allocation3 + $0x80] sm:$0x2] %v3408_v46  ;;  %v3700_v57 = vld [vmem:[#allocation2 + $0x28] sm:$0x2]  ;;  %v3773_v11 = vld [vmem:[#allocation2 + $0x28] sm:$0x8]  ;;  %8939 = vmatpush3.bf16.msra.mxu1 %v9493_v12  ;;  %8914 = vmatprep.subr.bf16.mxu0 %v9498_v47 }
 0x24b   :  { %v3733_v40 = vrot.slane %v3700_v57, 4  ;;  %v3846_v8 = vld [vmem:[#allocation2 + $0x28] sm:$0x20]  ;;  %3552 = vst [vmem:[#allocation3 + $0x80] sm:$0x4] %v3520_v2  ;;  %v3806_v48 = vrot.slane %v3773_v11, 5  ;;  %8940 = vmatprep.subr.bf16.mxu1 %v9495_v19 }
 0x24c   :  { %3626 = vst [vmem:[#allocation3 + $0x80] sm:$0x8] %v3600_v33  ;;  %v3870_v14 = vrot.slane %v3846_v8, 6  ;;  %v3357_v43 = vld [vmem:[#allocation2 + $0x18] sm:$0x2]  ;;  %v3921_v9 = vld [vmem:[#allocation3 + $0x88] sm:$0xff] }
 0x24d   :  { %v3410_v62 = vld [vmem:[#allocation2 + $0x18] sm:$0x8]  ;;  %3757 = vst [vmem:[#allocation3 + $0x80] sm:$0x20] %v3733_v40  ;;  %v3369_v52 = vrot.slane %v3357_v43, 1  ;;  %5000 = vmatprep.mubr.bf16.mxu0 %v3921_v9  ;;  %8915 = vmatpush3.bf16.msra.mxu0 %v9500_v36  ;;  %v9506_v17 = vld [vmem:[%s11888_s4 + $0x160] sm:$0xff]  }
 0x24e   :  { %v3428_v4 = vrot.slane %v3410_v62, 2  ;;  %v3478_v10 = vld [vmem:[#allocation2 + $0x18] sm:$0x20]  ;;  %v3570_v63 = vld [vmem:[#allocation2 + $0x18] sm:$0x80]  ;;  %8941 = vmatpush3.bf16.msra.mxu1 %v9497_v51  ;;  %v9507_v32 = vld [vmem:[%s11888_s4 + $0x1e0] sm:$0xff]  }
 0x24f   :  { %3830 = vst [vmem:[#allocation3 + $0x80] sm:$0x40] %v3806_v48  ;;  %3888 = vst [vmem:[#allocation3 + $0x80] sm:$0x80] %v3870_v14  ;;  %v7951_v6 = vrot.slane %v3478_v10, 3  ;;  %v7963_v29 = vrot.slane %v3570_v63, 4  ;;  %8942 = vmatprep.subr.bf16.mxu1 %v9499_v38 }
 0x250   :  { %v3643_v13 = vld [vmem:[#allocation2 + $0x28] sm:$0x2]  ;;  %v9502_v5 = vld [vmem:[%s11888_s4 + $0x158] sm:$0xff]   ;;  %3394 = vst [vmem:[#allocation3 + $0x90] sm:$0x1] %v3369_v52  ;;  %v9508_v42 = vld [vmem:[%s11888_s4 + $0x120] sm:$0xff]  }
 0x251   :  { %3462 = vst [vmem:[#allocation3 + $0x90] sm:$0x2] %v3428_v4  ;;  %v7970_v24 = vrot.slane %v3643_v13, 5  ;;  %v3702_v61 = vld [vmem:[#allocation2 + $0x28] sm:$0x8]  ;;  %v9503_v44 = vld [vmem:[%s11888_s4 + $0x1d8] sm:$0xff]   ;;  %8916 = vmatprep.subr.bf16.mxu0 %v9502_v5 }
 0x252   :  { %v3775_v56 = vld [vmem:[#allocation2 + $0x28] sm:$0x20]  ;;  %3554 = vst [vmem:[#allocation3 + $0x90] sm:$0x4] %v7951_v6  ;;  %3628 = vst [vmem:[#allocation3 + $0x90] sm:$0x8] %v7963_v29  ;;  %8943 = vmatpush3.bf16.msra.mxu1 %v9501_v50 }
 0x253   :  { %v7977_v37 = vrot.slane %v3702_v61, 6  ;;  %v7986_v3 = vrot.slane %v3775_v56, 7  ;;  %v3848_v59 = vld [vmem:[#allocation2 + $0x28] sm:$0x80]  ;;  %v2763_v35 = vld [vmem:[#allocation2] sm:$0x1]  ;;  %8944 = vmatprep.subr.bf16.mxu1 %v9503_v44 }
 0x254   :  { %v3923_v60 = vld [vmem:[#allocation3 + $0x98] sm:$0xff]  ;;  %3686 = vst [vmem:[#allocation3 + $0x90] sm:$0x10] %v7970_v24  ;;  %3890 = vst [vmem:[#allocation3 + $0x90] sm:$0x80] %v3848_v59  ;;  %v9509_v21 = vld [vmem:[%s11888_s4 + $0x1a0] sm:$0xff]  }
 0x255   :  { %2795 = vst [vmem:[#allocation3 + $0x28] sm:$0x1] %v2763_v35  ;;  %v2807_v41 = vld [vmem:[#allocation2] sm:$0x4]  ;;  %v2886_v49 = vld [vmem:[#allocation2] sm:$0x10]  ;;  %5049 = vmatprep.mubr.bf16.mxu1 %v3923_v60 }
 0x256   :  { %v9504_v27 = vld [vmem:[%s11888_s4 + $0x118] sm:$0xff]   ;;  %3759 = vst [vmem:[#allocation3 + $0x90] sm:$0x20] %v7977_v37  ;;  %3832 = vst [vmem:[#allocation3 + $0x90] sm:$0x40] %v7986_v3  ;;  %v7878_v23 = vrot.slane %v2807_v41, 9 }
 0x257   :  { %v7890_v34 = vrot.slane %v2886_v49, 10  ;;  %v2964_v0 = vld [vmem:[#allocation2] sm:$0x40]  ;;  %v3029_v1 = vld [vmem:[#allocation2 + $0x10] sm:$0x1]  ;;  %v9505_v31 = vld [vmem:[%s11888_s4 + $0x198] sm:$0xff]   ;;  %8917 = vmatpush3.bf16.msra.mxu0 %v9504_v27 }
 0x258   :  { %v7902_v15 = vrot.slane %v2964_v0, 11  ;;  %v3062_v28 = vrot.slane %v3029_v1, 4  ;;  %v3105_v12 = vld [vmem:[#allocation2 + $0x10] sm:$0x4]  ;;  %v3197_v30 = vld [vmem:[#allocation2 + $0x10] sm:$0x10]  ;;  %8945 = vmatpush3.bf16.msra.mxu1 %v9505_v31  ;;  %8918 = vmatprep.subr.bf16.mxu0 %v9506_v17 }
 0x259   :  { %2874 = vst [vmem:[#allocation3 + $0x28] sm:$0x2] %v7878_v23  ;;  %2952 = vst [vmem:[#allocation3 + $0x28] sm:$0x4] %v7890_v34  ;;  %v7921_v20 = vrot.slane %v3105_v12, 5  ;;  %v7933_v22 = vrot.slane %v3197_v30, 6  ;;  %8946 = vmatprep.subr.bf16.mxu1 %v9507_v32 }
 0x25a   :  { %v3288_v16 = vld [vmem:[#allocation2 + $0x10] sm:$0x40]  ;;  %v2765_v39 = vld [vmem:[#allocation2] sm:$0x4]  ;;  %3015 = vst [vmem:[#allocation3 + $0x28] sm:$0x8] %v7902_v15 }
 0x25b   :  { %v3920_v58 = vld [vmem:[#allocation3 + $0x80] sm:$0xff]  ;;  %3089 = vst [vmem:[#allocation3 + $0x28] sm:$0x10] %v3062_v28  ;;  %v7944_v19 = vrot.slane %v3288_v16, 7  ;;  %v2776_v18 = vrot.slane %v2765_v39, 2  ;;  %v9510_v26 = vld [vmem:[%s11888_s4 + $0x168] sm:$0xff]   ;;  %8919 = vmatpush3.bf16.msra.mxu0 %v9508_v42 }
 0x25c   :  { %v2809_v54 = vld [vmem:[#allocation2] sm:$0x10]  ;;  %5001 = vmatmul.mubr.bf16.gmra.mrb[132].mxu0 %v3920_v58  ;;  %3181 = vst [vmem:[#allocation3 + $0x28] sm:$0x20] %v7921_v20  ;;  %3273 = vst [vmem:[#allocation3 + $0x28] sm:$0x40] %v7933_v22  ;;  %8947 = vmatpush3.bf16.msra.mxu1 %v9509_v21 }
 0x25d   :  { %v7880_v55 = vrot.slane %v2809_v54, 11  ;;  %v2888_v25 = vld [vmem:[#allocation2] sm:$0x40]  ;;  %v3031_v46 = vld [vmem:[#allocation2 + $0x10] sm:$0x4]  ;;  %v9511_v57 = vld [vmem:[%s11888_s4 + $0x1e8] sm:$0xff]   ;;  %8920 = vmatprep.subr.bf16.mxu0 %v9510_v26 }
 0x25e   :  { %3345 = vst [vmem:[#allocation3 + $0x28] sm:$0x80] %v7944_v19  ;;  %2797 = vst [vmem:[#allocation3 + $0x38] sm:$0x1] %v2776_v18  ;;  %v7892_v7 = vrot.slane %v2888_v25, 12  ;;  %v7913_v51 = vrot.slane %v3031_v46, 6  ;;  %8948 = vmatprep.subr.bf16.mxu1 %v9511_v57 }
 0x25f   :  { %v3107_v47 = vld [vmem:[#allocation2 + $0x10] sm:$0x10]  ;;  %v3199_v2 = vld [vmem:[#allocation2 + $0x10] sm:$0x40]  ;;  %2876 = vst [vmem:[#allocation3 + $0x38] sm:$0x2] %v7880_v55 }
 0x260   :  { %v7923_v33 = vrot.slane %v3107_v47, 7  ;;  %3275 = vst [vmem:[#allocation3 + $0x38] sm:$0x40] %v3199_v2  ;;  %v2806_v38 = vld [vmem:[#allocation2] sm:$0x2]  ;;  %v3922_v11 = vld [vmem:[#allocation3 + $0x90] sm:$0xff] }
 0x261   :  { %v2885_v40 = vld [vmem:[#allocation2] sm:$0x8]  ;;  %2954 = vst [vmem:[#allocation3 + $0x38] sm:$0x4] %v7892_v7  ;;  %3091 = vst [vmem:[#allocation3 + $0x38] sm:$0x10] %v7913_v51  ;;  %5050 = vmatmul.mubr.bf16.gmra.mrb[132].mxu1 %v3922_v11 }
 0x262   :  { %v9512_v8 = vld [vmem:[%s11888_s4 + $0x128] sm:$0xff]   ;;  %2873 = vst [vmem:[#allocation3 + $0x20] sm:$0x2] %v2806_v38  ;;  %v7889_v48 = vrot.slane %v2885_v40, 9  ;;  %v2963_v14 = vld [vmem:[#allocation2] sm:$0x20] }
 0x263   :  { %v3104_v43 = vld [vmem:[#allocation2 + $0x10] sm:$0x2]  ;;  %3183 = vst [vmem:[#allocation3 + $0x38] sm:$0x20] %v7923_v33  ;;  %v9513_v62 = vld [vmem:[%s11888_s4 + $0x1a8] sm:$0xff]   ;;  %v7901_v52 = vrot.slane %v2963_v14, 10  ;;  %8921 = vmatpush3.bf16.msra.mxu0 %v9512_v8 }
 0x264   :  { %v9514_v36 = vld [vmem:[%s11888_s4 + $0x170] sm:$0xff]   ;;  %v3148_v4 = vrot.slane %v3104_v43, 4  ;;  %2951 = vst [vmem:[#allocation3 + $0x20] sm:$0x4] %v7889_v48  ;;  %v2764_v13 = vld [vmem:[#allocation2] sm:$0x2]  ;;  %8949 = vmatpush3.bf16.msra.mxu1 %v9513_v62 }
 0x265   :  { %v3196_v10 = vld [vmem:[#allocation2 + $0x10] sm:$0x8]  ;;  %v3287_v63 = vld [vmem:[#allocation2 + $0x10] sm:$0x20]  ;;  %v2808_v50 = vld [vmem:[#allocation2] sm:$0x8]  ;;  %8922 = vmatprep.subr.bf16.mxu0 %v9514_v36 }
 0x266   :  { %v9515_v9 = vld [vmem:[%s11888_s4 + $0x1f0] sm:$0xff]   ;;  %v3240_v6 = vrot.slane %v3196_v10, 5  ;;  %v3319_v29 = vrot.slane %v3287_v63, 6  ;;  %3014 = vst [vmem:[#allocation3 + $0x20] sm:$0x8] %v7901_v52  ;;  %v2773_v5 = vrot.slane %v2764_v13, 1 }
 0x267   :  { %3180 = vst [vmem:[#allocation3 + $0x20] sm:$0x20] %v3148_v4  ;;  %v7879_v24 = vrot.slane %v2808_v50, 10  ;;  %v2887_v61 = vld [vmem:[#allocation2] sm:$0x20]  ;;  %v9516_v44 = vld [vmem:[%s11888_s4 + $0x130] sm:$0xff]   ;;  %8950 = vmatprep.subr.bf16.mxu1 %v9515_v9 }
 0x268   :  { %v2965_v56 = vld [vmem:[#allocation2] sm:$0x80]  ;;  %3272 = vst [vmem:[#allocation3 + $0x20] sm:$0x40] %v3240_v6  ;;  %3344 = vst [vmem:[#allocation3 + $0x20] sm:$0x80] %v3319_v29  ;;  %8923 = vmatpush3.bf16.msra.mxu0 %v9516_v44 }
 0x269   :  { %v7891_v37 = vrot.slane %v2887_v61, 11  ;;  %v7903_v3 = vrot.slane %v2965_v56, 12  ;;  %v3030_v59 = vld [vmem:[#allocation2 + $0x10] sm:$0x2]  ;;  %v3106_v35 = vld [vmem:[#allocation2 + $0x10] sm:$0x8] }
 0x26a   :  { %v3909_v60 = vld [vmem:[#allocation3 + $0x28] sm:$0xff]  ;;  %v9517_v41 = vld [vmem:[%s11888_s4 + $0x1b0] sm:$0xff]   ;;  %v9518_v49 = vld [vmem:[%s11888_s4 + $0x178] sm:$0xff]   ;;  %2796 = vst [vmem:[#allocation3 + $0x30] sm:$0x1] %v2773_v5  ;;  %v7912_v27 = vrot.slane %v3030_v59, 5 }
 0x26b   :  { %2875 = vst [vmem:[#allocation3 + $0x30] sm:$0x2] %v7879_v24  ;;  %v7922_v23 = vrot.slane %v3106_v35, 6  ;;  %v3198_v34 = vld [vmem:[#allocation2 + $0x10] sm:$0x20]  ;;  %5090 = vmatprep.mubr.bf16.mxu0 %v3909_v60  ;;  %v9519_v0 = vld [vmem:[%s11888_s4 + $0x1f8] sm:$0xff]   ;;  %8951 = vmatpush3.bf16.msra.mxu1 %v9517_v41 }
 0x26c   :  { %2953 = vst [vmem:[#allocation3 + $0x30] sm:$0x4] %v7891_v37  ;;  %3016 = vst [vmem:[#allocation3 + $0x30] sm:$0x8] %v7903_v3  ;;  %v7934_v1 = vrot.slane %v3198_v34, 7  ;;  %v3911_v30 = vld [vmem:[#allocation3 + $0x38] sm:$0xff]  ;;  %8924 = vmatprep.subr.bf16.mxu0 %v9518_v49  ;;  %8952 = vmatprep.subr.bf16.mxu1 %v9519_v0 }
 0x26d   :  { %v3289_v31 = vld [vmem:[#allocation2 + $0x10] sm:$0x80]  ;;  %v3359_v17 = vld [vmem:[#allocation2 + $0x20] sm:$0x1]  ;;  %3090 = vst [vmem:[#allocation3 + $0x30] sm:$0x10] %v7912_v27  ;;  %5139 = vmatprep.mubr.bf16.mxu1 %v3911_v30 }
 0x26e   :  { %3182 = vst [vmem:[#allocation3 + $0x30] sm:$0x20] %v7922_v23  ;;  %3346 = vst [vmem:[#allocation3 + $0x30] sm:$0x80] %v3289_v31  ;;  %v3413_v15 = vld [vmem:[#allocation2 + $0x20] sm:$0x4] }
 0x26f   :  { %3397 = vst [vmem:[#allocation3 + $0xa8] sm:$0x1] %v3359_v17  ;;  %v3481_v28 = vld [vmem:[#allocation2 + $0x20] sm:$0x10]  ;;  %v3572_v12 = vld [vmem:[#allocation2 + $0x20] sm:$0x40] }
 0x270   :  { %v9520_v32 = vld [vmem:[%s11888_s4 + $0x138] sm:$0xff]   ;;  %3274 = vst [vmem:[#allocation3 + $0x30] sm:$0x40] %v7934_v1  ;;  %v3434_v20 = vrot.slane %v3413_v15, 1  ;;  %v7953_v22 = vrot.slane %v3481_v28, 2  ;;  %v7964_v16 = vrot.slane %v3572_v12, 3 }
 0x271   :  { %v3645_v39 = vld [vmem:[#allocation2 + $0x30] sm:$0x1]  ;;  %v9521_v58 = vld [vmem:[%s11888_s4 + $0x1b8] sm:$0xff]   ;;  %v3705_v18 = vld [vmem:[#allocation2 + $0x30] sm:$0x4]  ;;  %8925 = vmatpush3.bf16.msra.mxu0 %v9520_v32 }
 0x272   :  { %v3669_v19 = vrot.slane %v3645_v39, 4  ;;  %v3778_v54 = vld [vmem:[#allocation2 + $0x30] sm:$0x10]  ;;  %3465 = vst [vmem:[#allocation3 + $0xa8] sm:$0x2] %v3434_v20  ;;  %v7979_v42 = vrot.slane %v3705_v18, 5  ;;  %8953 = vmatpush3.bf16.msra.mxu1 %v9521_v58 }
 0x273   :  { %3557 = vst [vmem:[#allocation3 + $0xa8] sm:$0x4] %v7953_v22  ;;  %3631 = vst [vmem:[#allocation3 + $0xa8] sm:$0x8] %v7964_v16  ;;  %v7988_v55 = vrot.slane %v3778_v54, 6  ;;  %v9522_v21 = vld [vmem:[%s11888_s4 + $0x240] sm:$0xff]  }
 0x274   :  { %v3850_v25 = vld [vmem:[#allocation2 + $0x30] sm:$0x40]  ;;  %v3361_v46 = vld [vmem:[#allocation2 + $0x20] sm:$0x4]  ;;  %3689 = vst [vmem:[#allocation3 + $0xa8] sm:$0x10] %v3669_v19  ;;  %8966 = vmatprep.subr.bf16.mxu0 %v9522_v21 }
 0x275   :  { %v9523_v26 = vld [vmem:[%s11888_s4 + $0x2c0] sm:$0xff]   ;;  %v7996_v7 = vrot.slane %v3850_v25, 7  ;;  %v3378_v51 = vrot.slane %v3361_v46, 2  ;;  %3762 = vst [vmem:[#allocation3 + $0xa8] sm:$0x20] %v7979_v42  ;;  %v9526_v43 = vld [vmem:[%s11888_s4 + $0x248] sm:$0xff]  }
 0x276   :  { %v3415_v47 = vld [vmem:[#allocation2 + $0x20] sm:$0x10]  ;;  %3835 = vst [vmem:[#allocation3 + $0xa8] sm:$0x40] %v7988_v55  ;;  %v3483_v33 = vld [vmem:[#allocation2 + $0x20] sm:$0x40]  ;;  %8994 = vmatprep.subr.bf16.mxu1 %v9523_v26 }
 0x277   :  { %v3440_v2 = vrot.slane %v3415_v47, 3  ;;  %v3647_v57 = vld [vmem:[#allocation2 + $0x30] sm:$0x4]  ;;  %v9524_v38 = vld [vmem:[%s11888_s4 + $0x200] sm:$0xff]   ;;  %3893 = vst [vmem:[#allocation3 + $0xa8] sm:$0x80] %v7996_v7 }
 0x278   :  { %3399 = vst [vmem:[#allocation3 + $0xb8] sm:$0x1] %v3378_v51  ;;  %v7955_v40 = vrot.slane %v3483_v33, 4  ;;  %v7973_v11 = vrot.slane %v3647_v57, 6  ;;  %v3707_v8 = vld [vmem:[#allocation2 + $0x30] sm:$0x10] }
 0x279   :  { %v3780_v48 = vld [vmem:[#allocation2 + $0x30] sm:$0x40]  ;;  %v9525_v14 = vld [vmem:[%s11888_s4 + $0x280] sm:$0xff]   ;;  %3467 = vst [vmem:[#allocation3 + $0xb8] sm:$0x2] %v3440_v2  ;;  %v7981_v36 = vrot.slane %v3707_v8, 7 }
 0x27a   :  { %v3908_v62 = vld [vmem:[#allocation3 + $0x20] sm:$0xff]  ;;  %3837 = vst [vmem:[#allocation3 + $0xb8] sm:$0x40] %v3780_v48  ;;  %v9527_v52 = vld [vmem:[%s11888_s4 + $0x2c8] sm:$0xff]   ;;  %v3910_v63 = vld [vmem:[#allocation3 + $0x30] sm:$0xff] }
 0x27b   :  { %v3412_v4 = vld [vmem:[#allocation2 + $0x20] sm:$0x2]  ;;  %v3480_v10 = vld [vmem:[#allocation2 + $0x20] sm:$0x8]  ;;  %3559 = vst [vmem:[#allocation3 + $0xb8] sm:$0x4] %v7955_v40  ;;  %5091 = vmatmul.mubr.bf16.vlgmr.msra.gmra.mrb[136].mxu0 %v3908_v62  ;;  %5140 = vmatmul.mubr.bf16.vlgmr.msra.gmra.mrb[136].mxu1 %v3910_v63 }
 0x27c   :  { %3691 = vst [vmem:[#allocation3 + $0xb8] sm:$0x10] %v7973_v11  ;;  %3464 = vst [vmem:[#allocation3 + $0xa0] sm:$0x2] %v3412_v4  ;;  %v3524_v9 = vrot.slane %v3480_v10, 1  ;;  %v9528_v13 = vld [vmem:[%s11888_s4 + $0x208] sm:$0xff]   ;;  %8967 = vmatpush3.bf16.msra.mxu0 %v9524_v38  ;;  %8995 = vmatpush3.bf16.msra.mxu1 %v9525_v14 }
 0x27d   :  { %v3571_v6 = vld [vmem:[#allocation2 + $0x20] sm:$0x20]  ;;  %v3704_v29 = vld [vmem:[#allocation2 + $0x30] sm:$0x2]  ;;  %3764 = vst [vmem:[#allocation3 + $0xb8] sm:$0x20] %v7981_v36  ;;  %8968 = vmatprep.subr.bf16.mxu0 %v9526_v43  ;;  %8996 = vmatprep.subr.bf16.mxu1 %v9527_v52 }
 0x27e   :  { %v3604_v50 = vrot.slane %v3571_v6, 2  ;;  %v3737_v5 = vrot.slane %v3704_v29, 4  ;;  %v3777_v24 = vld [vmem:[#allocation2 + $0x30] sm:$0x8]  ;;  %v3849_v61 = vld [vmem:[#allocation2 + $0x30] sm:$0x20] }
 0x27f   :  { %v9529_v56 = vld [vmem:[%s11888_s4 + $0x288] sm:$0xff]   ;;  %3556 = vst [vmem:[#allocation3 + $0xa0] sm:$0x4] %v3524_v9  ;;  %v3810_v44 = vrot.slane %v3777_v24, 5  ;;  %v3873_v37 = vrot.slane %v3849_v61, 6  ;;  %v9530_v35 = vld [vmem:[%s11888_s4 + $0x250] sm:$0xff]  }
 0x280   :  { %v3360_v3 = vld [vmem:[#allocation2 + $0x20] sm:$0x2]  ;;  %v3414_v59 = vld [vmem:[#allocation2 + $0x20] sm:$0x8]  ;;  %3630 = vst [vmem:[#allocation3 + $0xa0] sm:$0x8] %v3604_v50  ;;  %8969 = vmatpush3.bf16.msra.mxu0 %v9528_v13  ;;  %8997 = vmatpush3.bf16.msra.mxu1 %v9529_v56 }
 0x281   :  { %3761 = vst [vmem:[#allocation3 + $0xa0] sm:$0x20] %v3737_v5  ;;  %v3375_v60 = vrot.slane %v3360_v3, 1  ;;  %v3437_v41 = vrot.slane %v3414_v59, 2  ;;  %v3482_v49 = vld [vmem:[#allocation2 + $0x20] sm:$0x20]  ;;  %8970 = vmatprep.subr.bf16.mxu0 %v9530_v35 }
 0x282   :  { %v3573_v27 = vld [vmem:[#allocation2 + $0x20] sm:$0x80]  ;;  %v9531_v23 = vld [vmem:[%s11888_s4 + $0x2d0] sm:$0xff]   ;;  %3834 = vst [vmem:[#allocation3 + $0xa0] sm:$0x40] %v3810_v44  ;;  %v7954_v34 = vrot.slane %v3482_v49, 3 }
 0x283   :  { %3892 = vst [vmem:[#allocation3 + $0xa0] sm:$0x80] %v3873_v37  ;;  %v7965_v0 = vrot.slane %v3573_v27, 4  ;;  %v3646_v1 = vld [vmem:[#allocation2 + $0x30] sm:$0x2]  ;;  %v3925_v17 = vld [vmem:[#allocation3 + $0xa8] sm:$0xff]  ;;  %8998 = vmatprep.subr.bf16.mxu1 %v9531_v23 }
 0x284   :  { %v3706_v31 = vld [vmem:[#allocation2 + $0x30] sm:$0x8]  ;;  %3398 = vst [vmem:[#allocation3 + $0xb0] sm:$0x1] %v3375_v60  ;;  %3466 = vst [vmem:[#allocation3 + $0xb0] sm:$0x2] %v3437_v41  ;;  %5098 = vmatprep.mubr.bf16.mxu0 %v3925_v17 }
 0x285   :  { %v7972_v15 = vrot.slane %v3646_v1, 5  ;;  %v7980_v28 = vrot.slane %v3706_v31, 6  ;;  %v3779_v12 = vld [vmem:[#allocation2 + $0x30] sm:$0x20]  ;;  %3558 = vst [vmem:[#allocation3 + $0xb0] sm:$0x4] %v7954_v34 }
 0x286   :  { %v9532_v30 = vld [vmem:[%s11888_s4 + $0x210] sm:$0xff]   ;;  %3632 = vst [vmem:[#allocation3 + $0xb0] sm:$0x8] %v7965_v0  ;;  %v7989_v32 = vrot.slane %v3779_v12, 7  ;;  %v2766_v22 = vld [vmem:[#allocation2 + $0x8] sm:$0x1] }
 0x287   :  { %v3851_v20 = vld [vmem:[#allocation2 + $0x30] sm:$0x80]  ;;  %3690 = vst [vmem:[#allocation3 + $0xb0] sm:$0x10] %v7972_v15  ;;  %3763 = vst [vmem:[#allocation3 + $0xb0] sm:$0x20] %v7980_v28  ;;  %8971 = vmatpush3.bf16.msra.mxu0 %v9532_v30 }
 0x288   :  { %v9533_v16 = vld [vmem:[%s11888_s4 + $0x290] sm:$0xff]   ;;  %3894 = vst [vmem:[#allocation3 + $0xb0] sm:$0x80] %v3851_v20  ;;  %2799 = vst [vmem:[#allocation3 + $0x48] sm:$0x1] %v2766_v22  ;;  %v9534_v18 = vld [vmem:[%s11888_s4 + $0x258] sm:$0xff]  }
 0x289   :  { %v2811_v39 = vld [vmem:[#allocation2 + $0x8] sm:$0x4]  ;;  %v2890_v58 = vld [vmem:[#allocation2 + $0x8] sm:$0x10]  ;;  %v2967_v19 = vld [vmem:[#allocation2 + $0x8] sm:$0x40]  ;;  %8999 = vmatpush3.bf16.msra.mxu1 %v9533_v16  ;;  %8972 = vmatprep.subr.bf16.mxu0 %v9534_v18 }
 0x28a   :  { %v9535_v54 = vld [vmem:[%s11888_s4 + $0x2d8] sm:$0xff]   ;;  %3836 = vst [vmem:[#allocation3 + $0xb0] sm:$0x40] %v7989_v32  ;;  %v7882_v55 = vrot.slane %v2811_v39, 9  ;;  %v7894_v25 = vrot.slane %v2890_v58, 10  ;;  %v7905_v46 = vrot.slane %v2967_v19, 11 }
 0x28b   :  { %v3927_v42 = vld [vmem:[#allocation3 + $0xb8] sm:$0xff]  ;;  %v2768_v38 = vld [vmem:[#allocation2 + $0x8] sm:$0x4]  ;;  %v3924_v40 = vld [vmem:[#allocation3 + $0xa0] sm:$0xff]  ;;  %9000 = vmatprep.subr.bf16.mxu1 %v9535_v54 }
 0x28c   :  { %v3032_v21 = vld [vmem:[#allocation2 + $0x18] sm:$0x1]  ;;  %5147 = vmatprep.mubr.bf16.mxu1 %v3927_v42  ;;  %v3109_v7 = vld [vmem:[#allocation2 + $0x18] sm:$0x4]  ;;  %v3201_v51 = vld [vmem:[#allocation2 + $0x18] sm:$0x10]  ;;  %5099 = vmatmul.mubr.bf16.gmra.mrb[140].mxu0 %v3924_v40 }
 0x28d   :  { %v3065_v26 = vrot.slane %v3032_v21, 4  ;;  %v9536_v47 = vld [vmem:[%s11888_s4 + $0x218] sm:$0xff]   ;;  %2878 = vst [vmem:[#allocation3 + $0x48] sm:$0x2] %v7882_v55  ;;  %2956 = vst [vmem:[#allocation3 + $0x48] sm:$0x4] %v7894_v25 }
 0x28e   :  { %3019 = vst [vmem:[#allocation3 + $0x48] sm:$0x8] %v7905_v46  ;;  %v7924_v2 = vrot.slane %v3109_v7, 5  ;;  %v7936_v33 = vrot.slane %v3201_v51, 6  ;;  %v3291_v57 = vld [vmem:[#allocation2 + $0x18] sm:$0x40]  ;;  %8973 = vmatpush3.bf16.msra.mxu0 %v9536_v47 }
 0x28f   :  { %3093 = vst [vmem:[#allocation3 + $0x48] sm:$0x10] %v3065_v26  ;;  %v7946_v11 = vrot.slane %v3291_v57, 7  ;;  %v2782_v8 = vrot.slane %v2768_v38, 2  ;;  %v2813_v48 = vld [vmem:[#allocation2 + $0x8] sm:$0x10] }
 0x290   :  { %v9537_v14 = vld [vmem:[%s11888_s4 + $0x298] sm:$0xff]   ;;  %v9538_v43 = vld [vmem:[%s11888_s4 + $0x260] sm:$0xff]   ;;  %3185 = vst [vmem:[#allocation3 + $0x48] sm:$0x20] %v7924_v2  ;;  %3277 = vst [vmem:[#allocation3 + $0x48] sm:$0x40] %v7936_v33 }
 0x291   :  { %v7884_v62 = vrot.slane %v2813_v48, 11  ;;  %v2892_v36 = vld [vmem:[#allocation2 + $0x8] sm:$0x40]  ;;  %v3034_v52 = vld [vmem:[#allocation2 + $0x18] sm:$0x4]  ;;  %v9539_v4 = vld [vmem:[%s11888_s4 + $0x2e0] sm:$0xff]   ;;  %8974 = vmatprep.subr.bf16.mxu0 %v9538_v43  ;;  %9001 = vmatpush3.bf16.msra.mxu1 %v9537_v14 }
 0x292   :  { %3349 = vst [vmem:[#allocation3 + $0x48] sm:$0x80] %v7946_v11  ;;  %2801 = vst [vmem:[#allocation3 + $0x58] sm:$0x1] %v2782_v8  ;;  %v7896_v10 = vrot.slane %v2892_v36, 12  ;;  %v7915_v63 = vrot.slane %v3034_v52, 6  ;;  %9002 = vmatprep.subr.bf16.mxu1 %v9539_v4 }
 0x293   :  { %v3111_v9 = vld [vmem:[#allocation2 + $0x18] sm:$0x10]  ;;  %v3203_v6 = vld [vmem:[#allocation2 + $0x18] sm:$0x40]  ;;  %v9540_v29 = vld [vmem:[%s11888_s4 + $0x220] sm:$0xff]  }
 0x294   :  { %2880 = vst [vmem:[#allocation3 + $0x58] sm:$0x2] %v7884_v62  ;;  %v7926_v13 = vrot.slane %v3111_v9, 7  ;;  %3279 = vst [vmem:[#allocation3 + $0x58] sm:$0x40] %v3203_v6  ;;  %v9542_v50 = vld [vmem:[%s11888_s4 + $0x268] sm:$0xff]   ;;  %8975 = vmatpush3.bf16.msra.mxu0 %v9540_v29 }
 0x295   :  { %v2810_v5 = vld [vmem:[#allocation2 + $0x8] sm:$0x2]  ;;  %v2889_v24 = vld [vmem:[#allocation2 + $0x8] sm:$0x8]  ;;  %v3926_v61 = vld [vmem:[#allocation3 + $0xb0] sm:$0xff]  ;;  %8976 = vmatprep.subr.bf16.mxu0 %v9542_v50 }
 0x296   :  { %2958 = vst [vmem:[#allocation3 + $0x58] sm:$0x4] %v7896_v10  ;;  %3095 = vst [vmem:[#allocation3 + $0x58] sm:$0x10] %v7915_v63  ;;  %v9541_v56 = vld [vmem:[%s11888_s4 + $0x2a0] sm:$0xff]   ;;  %v7893_v44 = vrot.slane %v2889_v24, 9  ;;  %5148 = vmatmul.mubr.bf16.gmra.mrb[140].mxu1 %v3926_v61 }
 0x297   :  { %2877 = vst [vmem:[#allocation3 + $0x40] sm:$0x2] %v2810_v5  ;;  %v2966_v37 = vld [vmem:[#allocation2 + $0x8] sm:$0x20]  ;;  %v3108_v3 = vld [vmem:[#allocation2 + $0x18] sm:$0x2]  ;;  %9003 = vmatpush3.bf16.msra.mxu1 %v9541_v56 }
 0x298   :  { %3187 = vst [vmem:[#allocation3 + $0x58] sm:$0x20] %v7926_v13  ;;  %v9543_v59 = vld [vmem:[%s11888_s4 + $0x2e8] sm:$0xff]   ;;  %v7904_v35 = vrot.slane %v2966_v37, 10  ;;  %v3152_v60 = vrot.slane %v3108_v3, 4  ;;  %v9546_v31 = vld [vmem:[%s11888_s4 + $0x270] sm:$0xff]  }
 0x299   :  { %v3200_v41 = vld [vmem:[#allocation2 + $0x18] sm:$0x8]  ;;  %v3290_v49 = vld [vmem:[#allocation2 + $0x18] sm:$0x20]  ;;  %v9544_v27 = vld [vmem:[%s11888_s4 + $0x228] sm:$0xff]   ;;  %9004 = vmatprep.subr.bf16.mxu1 %v9543_v59 }
 0x29a   :  { %2955 = vst [vmem:[#allocation3 + $0x40] sm:$0x4] %v7893_v44  ;;  %v3244_v23 = vrot.slane %v3200_v41, 5  ;;  %v3322_v34 = vrot.slane %v3290_v49, 6  ;;  %v2767_v0 = vld [vmem:[#allocation2 + $0x8] sm:$0x2]  ;;  %8977 = vmatpush3.bf16.msra.mxu0 %v9544_v27 }
 0x29b   :  { %v2812_v1 = vld [vmem:[#allocation2 + $0x8] sm:$0x8]  ;;  %3018 = vst [vmem:[#allocation3 + $0x40] sm:$0x8] %v7904_v35  ;;  %3184 = vst [vmem:[#allocation3 + $0x40] sm:$0x20] %v3152_v60  ;;  %8978 = vmatprep.subr.bf16.mxu0 %v9546_v31 }
 0x29c   :  { %v2779_v17 = vrot.slane %v2767_v0, 1  ;;  %v7883_v15 = vrot.slane %v2812_v1, 10  ;;  %v2891_v28 = vld [vmem:[#allocation2 + $0x8] sm:$0x20]  ;;  %v2968_v12 = vld [vmem:[#allocation2 + $0x8] sm:$0x80] }
 0x29d   :  { %v9545_v30 = vld [vmem:[%s11888_s4 + $0x2a8] sm:$0xff]   ;;  %3276 = vst [vmem:[#allocation3 + $0x40] sm:$0x40] %v3244_v23  ;;  %3348 = vst [vmem:[#allocation3 + $0x40] sm:$0x80] %v3322_v34  ;;  %v7895_v32 = vrot.slane %v2891_v28, 11 }
 0x29e   :  { %v7906_v20 = vrot.slane %v2968_v12, 12  ;;  %v3033_v22 = vld [vmem:[#allocation2 + $0x18] sm:$0x2]  ;;  %v3110_v16 = vld [vmem:[#allocation2 + $0x18] sm:$0x8]  ;;  %v3913_v39 = vld [vmem:[#allocation3 + $0x48] sm:$0xff]  ;;  %9005 = vmatpush3.bf16.msra.mxu1 %v9545_v30 }
 0x29f   :  { %v9547_v58 = vld [vmem:[%s11888_s4 + $0x2f0] sm:$0xff]   ;;  %2800 = vst [vmem:[#allocation3 + $0x50] sm:$0x1] %v2779_v17  ;;  %2879 = vst [vmem:[#allocation3 + $0x50] sm:$0x2] %v7883_v15  ;;  %v7914_v19 = vrot.slane %v3033_v22, 5  ;;  %5188 = vmatprep.mubr.bf16.mxu0 %v3913_v39 }
 0x2a0   :  { %v7925_v18 = vrot.slane %v3110_v16, 6  ;;  %v3202_v54 = vld [vmem:[#allocation2 + $0x18] sm:$0x20]  ;;  %v9548_v42 = vld [vmem:[%s11888_s4 + $0x230] sm:$0xff]   ;;  %2957 = vst [vmem:[#allocation3 + $0x50] sm:$0x4] %v7895_v32  ;;  %9006 = vmatprep.subr.bf16.mxu1 %v9547_v58 }
 0x2a1   :  { %3020 = vst [vmem:[#allocation3 + $0x50] sm:$0x8] %v7906_v20  ;;  %v7937_v55 = vrot.slane %v3202_v54, 7  ;;  %v3292_v25 = vld [vmem:[#allocation2 + $0x18] sm:$0x80]  ;;  %v9549_v47 = vld [vmem:[%s11888_s4 + $0x2b0] sm:$0xff]   ;;  %8979 = vmatpush3.bf16.msra.mxu0 %v9548_v42 }
 0x2a2   :  { %v3362_v46 = vld [vmem:[#allocation2 + $0x28] sm:$0x1]  ;;  %3094 = vst [vmem:[#allocation3 + $0x50] sm:$0x10] %v7914_v19  ;;  %3186 = vst [vmem:[#allocation3 + $0x50] sm:$0x20] %v7925_v18  ;;  %9007 = vmatpush3.bf16.msra.mxu1 %v9549_v47 }
 0x2a3   :  { %3350 = vst [vmem:[#allocation3 + $0x50] sm:$0x80] %v3292_v25  ;;  %3401 = vst [vmem:[#allocation3 + $0xc8] sm:$0x1] %v3362_v46  ;;  %v3417_v21 = vld [vmem:[#allocation2 + $0x28] sm:$0x4] }
 0x2a4   :  { %v3485_v26 = vld [vmem:[#allocation2 + $0x28] sm:$0x10]  ;;  %v3575_v7 = vld [vmem:[#allocation2 + $0x28] sm:$0x40]  ;;  %v3915_v51 = vld [vmem:[#allocation3 + $0x58] sm:$0xff]  ;;  %v3443_v2 = vrot.slane %v3417_v21, 1 }
 0x2a5   :  { %3278 = vst [vmem:[#allocation3 + $0x50] sm:$0x40] %v7937_v55  ;;  %v7956_v33 = vrot.slane %v3485_v26, 2  ;;  %v7966_v57 = vrot.slane %v3575_v7, 3  ;;  %v3648_v38 = vld [vmem:[#allocation2 + $0x38] sm:$0x1]  ;;  %5237 = vmatprep.mubr.bf16.mxu1 %v3915_v51 }
 0x2a6   :  { %v9550_v40 = vld [vmem:[%s11888_s4 + $0x278] sm:$0xff]   ;;  %v3672_v11 = vrot.slane %v3648_v38, 4  ;;  %3469 = vst [vmem:[#allocation3 + $0xc8] sm:$0x2] %v3443_v2  ;;  %v3364_v36 = vld [vmem:[#allocation2 + $0x28] sm:$0x4] }
 0x2a7   :  { %v3709_v8 = vld [vmem:[#allocation2 + $0x38] sm:$0x4]  ;;  %v3782_v48 = vld [vmem:[#allocation2 + $0x38] sm:$0x10]  ;;  %3561 = vst [vmem:[#allocation3 + $0xc8] sm:$0x4] %v7956_v33  ;;  %8980 = vmatprep.subr.bf16.mxu0 %v9550_v40 }
 0x2a8   :  { %3635 = vst [vmem:[#allocation3 + $0xc8] sm:$0x8] %v7966_v57  ;;  %v7982_v14 = vrot.slane %v3709_v8, 5  ;;  %v7991_v43 = vrot.slane %v3782_v48, 6  ;;  %v3853_v62 = vld [vmem:[#allocation2 + $0x38] sm:$0x40] }
 0x2a9   :  { %v9551_v52 = vld [vmem:[%s11888_s4 + $0x2f8] sm:$0xff]   ;;  %3693 = vst [vmem:[#allocation3 + $0xc8] sm:$0x10] %v3672_v11  ;;  %v7998_v10 = vrot.slane %v3853_v62, 7  ;;  %v3384_v63 = vrot.slane %v3364_v36, 2  ;;  %v9554_v29 = vld [vmem:[%s11888_s4 + $0x340] sm:$0xff]  }
 0x2aa   :  { %v9552_v4 = vld [vmem:[%s11888_s4 + $0x238] sm:$0xff]   ;;  %v3419_v9 = vld [vmem:[#allocation2 + $0x28] sm:$0x10]  ;;  %3766 = vst [vmem:[#allocation3 + $0xc8] sm:$0x20] %v7982_v14  ;;  %v9555_v37 = vld [vmem:[%s11888_s4 + $0x3c0] sm:$0xff]   ;;  %9008 = vmatprep.subr.bf16.mxu1 %v9551_v52 }
 0x2ab   :  { %v9553_v6 = vld [vmem:[%s11888_s4 + $0x2b8] sm:$0xff]   ;;  %3839 = vst [vmem:[#allocation3 + $0xc8] sm:$0x40] %v7991_v43  ;;  %v3449_v13 = vrot.slane %v3419_v9, 3  ;;  %v3487_v50 = vld [vmem:[#allocation2 + $0x28] sm:$0x40]  ;;  %8981 = vmatpush3.bf16.msra.mxu0 %v9552_v4 }
 0x2ac   :  { %v3650_v5 = vld [vmem:[#allocation2 + $0x38] sm:$0x4]  ;;  %3897 = vst [vmem:[#allocation3 + $0xc8] sm:$0x80] %v7998_v10  ;;  %3403 = vst [vmem:[#allocation3 + $0xd8] sm:$0x1] %v3384_v63  ;;  %9022 = vmatprep.subr.bf16.mxu0 %v9554_v29  ;;  %9009 = vmatpush3.bf16.msra.mxu1 %v9553_v6 }
 0x2ad   :  { %v7958_v24 = vrot.slane %v3487_v50, 4  ;;  %v7975_v61 = vrot.slane %v3650_v5, 6  ;;  %v3711_v56 = vld [vmem:[#allocation2 + $0x38] sm:$0x10]  ;;  %v3784_v44 = vld [vmem:[#allocation2 + $0x38] sm:$0x40]  ;;  %9050 = vmatprep.subr.bf16.mxu1 %v9555_v37 }
 0x2ae   :  { %3471 = vst [vmem:[#allocation3 + $0xd8] sm:$0x2] %v3449_v13  ;;  %v7984_v3 = vrot.slane %v3711_v56, 7  ;;  %3841 = vst [vmem:[#allocation3 + $0xd8] sm:$0x40] %v3784_v44  ;;  %v9556_v60 = vld [vmem:[%s11888_s4 + $0x300] sm:$0xff]  }
 0x2af   :  { %v3416_v59 = vld [vmem:[#allocation2 + $0x28] sm:$0x2]  ;;  %v3484_v35 = vld [vmem:[#allocation2 + $0x28] sm:$0x8]  ;;  %3563 = vst [vmem:[#allocation3 + $0xd8] sm:$0x4] %v7958_v24 }
 0x2b0   :  { %3695 = vst [vmem:[#allocation3 + $0xd8] sm:$0x10] %v7975_v61  ;;  %3468 = vst [vmem:[#allocation3 + $0xc0] sm:$0x2] %v3416_v59  ;;  %v3528_v41 = vrot.slane %v3484_v35, 1  ;;  %v3912_v23 = vld [vmem:[#allocation3 + $0x40] sm:$0xff] }
 0x2b1   :  { %v3574_v49 = vld [vmem:[#allocation2 + $0x28] sm:$0x20]  ;;  %v3708_v27 = vld [vmem:[#allocation2 + $0x38] sm:$0x2]  ;;  %3768 = vst [vmem:[#allocation3 + $0xd8] sm:$0x20] %v7984_v3  ;;  %5189 = vmatmul.mubr.bf16.vlgmr.msra.gmra.mrb[144].mxu0 %v3912_v23 }
 0x2b2   :  { %v9557_v34 = vld [vmem:[%s11888_s4 + $0x380] sm:$0xff]   ;;  %v9558_v0 = vld [vmem:[%s11888_s4 + $0x348] sm:$0xff]   ;;  %v3607_v1 = vrot.slane %v3574_v49, 2  ;;  %v3741_v31 = vrot.slane %v3708_v27, 4  ;;  %v3781_v17 = vld [vmem:[#allocation2 + $0x38] sm:$0x8]  ;;  %9023 = vmatpush3.bf16.msra.mxu0 %v9556_v60 }
 0x2b3   :  { %v3852_v15 = vld [vmem:[#allocation2 + $0x38] sm:$0x20]  ;;  %v9559_v28 = vld [vmem:[%s11888_s4 + $0x3c8] sm:$0xff]   ;;  %3560 = vst [vmem:[#allocation3 + $0xc0] sm:$0x4] %v3528_v41  ;;  %v3814_v12 = vrot.slane %v3781_v17, 5  ;;  %9024 = vmatprep.subr.bf16.mxu0 %v9558_v0 }
 0x2b4   :  { %v3876_v30 = vrot.slane %v3852_v15, 6  ;;  %v3363_v32 = vld [vmem:[#allocation2 + $0x28] sm:$0x2]  ;;  %v3418_v20 = vld [vmem:[#allocation2 + $0x28] sm:$0x8]  ;;  %v9562_v25 = vld [vmem:[%s11888_s4 + $0x350] sm:$0xff]  }
 0x2b5   :  { %v9560_v22 = vld [vmem:[%s11888_s4 + $0x308] sm:$0xff]   ;;  %3634 = vst [vmem:[#allocation3 + $0xc0] sm:$0x8] %v3607_v1  ;;  %3765 = vst [vmem:[#allocation3 + $0xc0] sm:$0x20] %v3741_v31  ;;  %v3381_v16 = vrot.slane %v3363_v32, 1 }
 0x2b6   :  { %v3446_v39 = vrot.slane %v3418_v20, 2  ;;  %v3486_v58 = vld [vmem:[#allocation2 + $0x28] sm:$0x20]  ;;  %v3576_v19 = vld [vmem:[#allocation2 + $0x28] sm:$0x80]  ;;  %v3914_v46 = vld [vmem:[#allocation3 + $0x50] sm:$0xff]  ;;  %9025 = vmatpush3.bf16.msra.mxu0 %v9560_v22 }
 0x2b7   :  { %3838 = vst [vmem:[#allocation3 + $0xc0] sm:$0x40] %v3814_v12  ;;  %3896 = vst [vmem:[#allocation3 + $0xc0] sm:$0x80] %v3876_v30  ;;  %v7957_v18 = vrot.slane %v3486_v58, 3  ;;  %v7967_v54 = vrot.slane %v3576_v19, 4  ;;  %5238 = vmatmul.mubr.bf16.vlgmr.msra.gmra.mrb[144].mxu1 %v3914_v46  ;;  %9026 = vmatprep.subr.bf16.mxu0 %v9562_v25 }
 0x2b8   :  { %v3649_v42 = vld [vmem:[#allocation2 + $0x38] sm:$0x2]  ;;  %v3710_v55 = vld [vmem:[#allocation2 + $0x38] sm:$0x8]  ;;  %v3929_v21 = vld [vmem:[#allocation3 + $0xc8] sm:$0xff]  ;;  %9051 = vmatpush3.bf16.msra.mxu1 %v9557_v34 }
 0x2b9   :  { %v9561_v26 = vld [vmem:[%s11888_s4 + $0x388] sm:$0xff]   ;;  %3402 = vst [vmem:[#allocation3 + $0xd0] sm:$0x1] %v3381_v16  ;;  %3470 = vst [vmem:[#allocation3 + $0xd0] sm:$0x2] %v3446_v39  ;;  %v7974_v7 = vrot.slane %v3649_v42, 5  ;;  %5196 = vmatprep.mubr.bf16.mxu0 %v3929_v21  ;;  %9052 = vmatprep.subr.bf16.mxu1 %v9559_v28 }
 0x2ba   :  { %v7983_v51 = vrot.slane %v3710_v55, 6  ;;  %v3783_v47 = vld [vmem:[#allocation2 + $0x38] sm:$0x20]  ;;  %3562 = vst [vmem:[#allocation3 + $0xd0] sm:$0x4] %v7957_v18  ;;  %v9563_v57 = vld [vmem:[%s11888_s4 + $0x3d0] sm:$0xff]  }
 0x2bb   :  { %3636 = vst [vmem:[#allocation3 + $0xd0] sm:$0x8] %v7967_v54  ;;  %v7992_v2 = vrot.slane %v3783_v47, 7  ;;  %v3854_v33 = vld [vmem:[#allocation2 + $0x38] sm:$0x80]  ;;  %v9564_v40 = vld [vmem:[%s11888_s4 + $0x310] sm:$0xff]  }
 0x2bc   :  { %v2769_v38 = vld [vmem:[#allocation2 + $0x10] sm:$0x1]  ;;  %3694 = vst [vmem:[#allocation3 + $0xd0] sm:$0x10] %v7974_v7  ;;  %3767 = vst [vmem:[#allocation3 + $0xd0] sm:$0x20] %v7983_v51  ;;  %9053 = vmatpush3.bf16.msra.mxu1 %v9561_v26  ;;  %9027 = vmatpush3.bf16.msra.mxu0 %v9564_v40 }
 0x2bd   :  { %3898 = vst [vmem:[#allocation3 + $0xd0] sm:$0x80] %v3854_v33  ;;  %2803 = vst [vmem:[#allocation3 + $0x68] sm:$0x1] %v2769_v38  ;;  %v2815_v11 = vld [vmem:[#allocation2 + $0x10] sm:$0x4]  ;;  %9054 = vmatprep.subr.bf16.mxu1 %v9563_v57 }
 0x2be   :  { %v2894_v8 = vld [vmem:[#allocation2 + $0x10] sm:$0x10]  ;;  %v2970_v48 = vld [vmem:[#allocation2 + $0x10] sm:$0x40]  ;;  %v3931_v14 = vld [vmem:[#allocation3 + $0xd8] sm:$0xff]  ;;  %v7886_v43 = vrot.slane %v2815_v11, 9 }
 0x2bf   :  { %3840 = vst [vmem:[#allocation3 + $0xd0] sm:$0x40] %v7992_v2  ;;  %v7898_v62 = vrot.slane %v2894_v8, 10  ;;  %v7908_v36 = vrot.slane %v2970_v48, 11  ;;  %v3035_v52 = vld [vmem:[#allocation2 + $0x20] sm:$0x1]  ;;  %5245 = vmatprep.mubr.bf16.mxu1 %v3931_v14 }
 0x2c0   :  { %v3068_v4 = vrot.slane %v3035_v52, 4  ;;  %v3113_v10 = vld [vmem:[#allocation2 + $0x20] sm:$0x4]  ;;  %v3205_v63 = vld [vmem:[#allocation2 + $0x20] sm:$0x10]  ;;  %v9565_v9 = vld [vmem:[%s11888_s4 + $0x390] sm:$0xff]  }
 0x2c1   :  { %v9566_v6 = vld [vmem:[%s11888_s4 + $0x358] sm:$0xff]   ;;  %2882 = vst [vmem:[#allocation3 + $0x68] sm:$0x2] %v7886_v43  ;;  %2960 = vst [vmem:[#allocation3 + $0x68] sm:$0x4] %v7898_v62  ;;  %v7927_v29 = vrot.slane %v3113_v10, 5  ;;  %9055 = vmatpush3.bf16.msra.mxu1 %v9565_v9 }
 0x2c2   :  { %3023 = vst [vmem:[#allocation3 + $0x68] sm:$0x8] %v7908_v36  ;;  %v7939_v13 = vrot.slane %v3205_v63, 6  ;;  %v3294_v50 = vld [vmem:[#allocation2 + $0x20] sm:$0x40]  ;;  %v9567_v24 = vld [vmem:[%s11888_s4 + $0x3d8] sm:$0xff]   ;;  %9028 = vmatprep.subr.bf16.mxu0 %v9566_v6 }
 0x2c3   :  { %v2771_v5 = vld [vmem:[#allocation2 + $0x10] sm:$0x4]  ;;  %v3928_v61 = vld [vmem:[#allocation3 + $0xc0] sm:$0xff]  ;;  %3097 = vst [vmem:[#allocation3 + $0x68] sm:$0x10] %v3068_v4  ;;  %v7948_v56 = vrot.slane %v3294_v50, 7  ;;  %9056 = vmatprep.subr.bf16.mxu1 %v9567_v24 }
 0x2c4   :  { %v2788_v44 = vrot.slane %v2771_v5, 2  ;;  %v2817_v37 = vld [vmem:[#allocation2 + $0x10] sm:$0x10]  ;;  %v9568_v3 = vld [vmem:[%s11888_s4 + $0x318] sm:$0xff]   ;;  %5197 = vmatmul.mubr.bf16.gmra.mrb[148].mxu0 %v3928_v61  ;;  %3189 = vst [vmem:[#allocation3 + $0x68] sm:$0x20] %v7927_v29 }
 0x2c5   :  { %3281 = vst [vmem:[#allocation3 + $0x68] sm:$0x40] %v7939_v13  ;;  %v7888_v59 = vrot.slane %v2817_v37, 11  ;;  %v2896_v35 = vld [vmem:[#allocation2 + $0x10] sm:$0x40]  ;;  %v9570_v41 = vld [vmem:[%s11888_s4 + $0x360] sm:$0xff]   ;;  %9029 = vmatpush3.bf16.msra.mxu0 %v9568_v3 }
 0x2c6   :  { %v3037_v60 = vld [vmem:[#allocation2 + $0x20] sm:$0x4]  ;;  %3353 = vst [vmem:[#allocation3 + $0x68] sm:$0x80] %v7948_v56  ;;  %2805 = vst [vmem:[#allocation3 + $0x78] sm:$0x1] %v2788_v44  ;;  %9030 = vmatprep.subr.bf16.mxu0 %v9570_v41 }
 0x2c7   :  { %v7900_v49 = vrot.slane %v2896_v35, 12  ;;  %v7917_v27 = vrot.slane %v3037_v60, 6  ;;  %v3115_v23 = vld [vmem:[#allocation2 + $0x20] sm:$0x10]  ;;  %v3207_v34 = vld [vmem:[#allocation2 + $0x20] sm:$0x40] }
 0x2c8   :  { %v9569_v0 = vld [vmem:[%s11888_s4 + $0x398] sm:$0xff]   ;;  %2884 = vst [vmem:[#allocation3 + $0x78] sm:$0x2] %v7888_v59  ;;  %v7929_v1 = vrot.slane %v3115_v23, 7  ;;  %3283 = vst [vmem:[#allocation3 + $0x78] sm:$0x40] %v3207_v34 }
 0x2c9   :  { %v9571_v31 = vld [vmem:[%s11888_s4 + $0x3e0] sm:$0xff]   ;;  %v2814_v17 = vld [vmem:[#allocation2 + $0x10] sm:$0x2]  ;;  %v2893_v15 = vld [vmem:[#allocation2 + $0x10] sm:$0x8]  ;;  %9057 = vmatpush3.bf16.msra.mxu1 %v9569_v0 }
 0x2ca   :  { %v3930_v28 = vld [vmem:[#allocation3 + $0xd0] sm:$0xff]  ;;  %2962 = vst [vmem:[#allocation3 + $0x78] sm:$0x4] %v7900_v49  ;;  %3099 = vst [vmem:[#allocation3 + $0x78] sm:$0x10] %v7917_v27  ;;  %v9572_v12 = vld [vmem:[%s11888_s4 + $0x320] sm:$0xff]   ;;  %9058 = vmatprep.subr.bf16.mxu1 %v9571_v31 }
 0x2cb   :  { %2881 = vst [vmem:[#allocation3 + $0x60] sm:$0x2] %v2814_v17  ;;  %v7897_v30 = vrot.slane %v2893_v15, 9  ;;  %v2969_v32 = vld [vmem:[#allocation2 + $0x10] sm:$0x20]  ;;  %5246 = vmatmul.mubr.bf16.gmra.mrb[148].mxu1 %v3930_v28  ;;  %v9574_v22 = vld [vmem:[%s11888_s4 + $0x368] sm:$0xff]   ;;  %9031 = vmatpush3.bf16.msra.mxu0 %v9572_v12 }
 0x2cc   :  { %v3112_v20 = vld [vmem:[#allocation2 + $0x20] sm:$0x2]  ;;  %3191 = vst [vmem:[#allocation3 + $0x78] sm:$0x20] %v7929_v1  ;;  %v7907_v16 = vrot.slane %v2969_v32, 10  ;;  %v9575_v46 = vld [vmem:[%s11888_s4 + $0x3e8] sm:$0xff]   ;;  %9032 = vmatprep.subr.bf16.mxu0 %v9574_v22 }
 0x2cd   :  { %v3156_v39 = vrot.slane %v3112_v20, 4  ;;  %v3204_v58 = vld [vmem:[#allocation2 + $0x20] sm:$0x8]  ;;  %v3293_v19 = vld [vmem:[#allocation2 + $0x20] sm:$0x20]  ;;  %v3917_v38 = vld [vmem:[#allocation3 + $0x68] sm:$0xff] }
 0x2ce   :  { %v9573_v18 = vld [vmem:[%s11888_s4 + $0x3a0] sm:$0xff]   ;;  %2959 = vst [vmem:[#allocation3 + $0x60] sm:$0x4] %v7897_v30  ;;  %v3248_v54 = vrot.slane %v3204_v58, 5  ;;  %v3325_v42 = vrot.slane %v3293_v19, 6  ;;  %v9576_v40 = vld [vmem:[%s11888_s4 + $0x328] sm:$0xff]   ;;  %5286 = vmatprep.mubr.bf16.mxu0 %v3917_v38 }
 0x2cf   :  { %v2770_v55 = vld [vmem:[#allocation2 + $0x10] sm:$0x2]  ;;  %v2816_v25 = vld [vmem:[#allocation2 + $0x10] sm:$0x8]  ;;  %3022 = vst [vmem:[#allocation3 + $0x60] sm:$0x8] %v7907_v16  ;;  %9059 = vmatpush3.bf16.msra.mxu1 %v9573_v18  ;;  %9033 = vmatpush3.bf16.msra.mxu0 %v9576_v40 }
 0x2d0   :  { %3188 = vst [vmem:[#allocation3 + $0x60] sm:$0x20] %v3156_v39  ;;  %v2785_v21 = vrot.slane %v2770_v55, 1  ;;  %v7887_v26 = vrot.slane %v2816_v25, 10  ;;  %v2895_v7 = vld [vmem:[#allocation2 + $0x10] sm:$0x20]  ;;  %9060 = vmatprep.subr.bf16.mxu1 %v9575_v46 }
 0x2d1   :  { %v2971_v51 = vld [vmem:[#allocation2 + $0x10] sm:$0x80]  ;;  %3280 = vst [vmem:[#allocation3 + $0x60] sm:$0x40] %v3248_v54  ;;  %3352 = vst [vmem:[#allocation3 + $0x60] sm:$0x80] %v3325_v42 }
 0x2d2   :  { %v7899_v47 = vrot.slane %v2895_v7, 11  ;;  %v7909_v2 = vrot.slane %v2971_v51, 12  ;;  %v3036_v33 = vld [vmem:[#allocation2 + $0x20] sm:$0x2]  ;;  %v3114_v57 = vld [vmem:[#allocation2 + $0x20] sm:$0x8] }
 0x2d3   :  { %2804 = vst [vmem:[#allocation3 + $0x70] sm:$0x1] %v2785_v21  ;;  %2883 = vst [vmem:[#allocation3 + $0x70] sm:$0x2] %v7887_v26  ;;  %v7916_v11 = vrot.slane %v3036_v33, 5  ;;  %v7928_v8 = vrot.slane %v3114_v57, 6 }
 0x2d4   :  { %v3206_v48 = vld [vmem:[#allocation2 + $0x20] sm:$0x20]  ;;  %v9577_v14 = vld [vmem:[%s11888_s4 + $0x3a8] sm:$0xff]   ;;  %v9578_v43 = vld [vmem:[%s11888_s4 + $0x370] sm:$0xff]   ;;  %2961 = vst [vmem:[#allocation3 + $0x70] sm:$0x4] %v7899_v47 }
 0x2d5   :  { %3024 = vst [vmem:[#allocation3 + $0x70] sm:$0x8] %v7909_v2  ;;  %v7940_v62 = vrot.slane %v3206_v48, 7  ;;  %v3295_v36 = vld [vmem:[#allocation2 + $0x20] sm:$0x80]  ;;  %v9579_v4 = vld [vmem:[%s11888_s4 + $0x3f0] sm:$0xff]   ;;  %9034 = vmatprep.subr.bf16.mxu0 %v9578_v43  ;;  %9061 = vmatpush3.bf16.msra.mxu1 %v9577_v14 }
 0x2d6   :  { %v3365_v52 = vld [vmem:[#allocation2 + $0x30] sm:$0x1]  ;;  %3098 = vst [vmem:[#allocation3 + $0x70] sm:$0x10] %v7916_v11  ;;  %3190 = vst [vmem:[#allocation3 + $0x70] sm:$0x20] %v7928_v8  ;;  %9062 = vmatprep.subr.bf16.mxu1 %v9579_v4 }
 0x2d7   :  { %3354 = vst [vmem:[#allocation3 + $0x70] sm:$0x80] %v3295_v36  ;;  %3405 = vst [vmem:[#allocation3 + $0xe8] sm:$0x1] %v3365_v52  ;;  %v3421_v10 = vld [vmem:[#allocation2 + $0x30] sm:$0x4] }
 0x2d8   :  { %v3489_v63 = vld [vmem:[#allocation2 + $0x30] sm:$0x10]  ;;  %v3578_v9 = vld [vmem:[#allocation2 + $0x30] sm:$0x40]  ;;  %v3919_v6 = vld [vmem:[#allocation3 + $0x78] sm:$0xff]  ;;  %v3452_v29 = vrot.slane %v3421_v10, 1 }
 0x2d9   :  { %3282 = vst [vmem:[#allocation3 + $0x70] sm:$0x40] %v7940_v62  ;;  %v7959_v13 = vrot.slane %v3489_v63, 2  ;;  %v7968_v50 = vrot.slane %v3578_v9, 3  ;;  %v3367_v5 = vld [vmem:[#allocation2 + $0x30] sm:$0x4]  ;;  %5335 = vmatprep.mubr.bf16.mxu1 %v3919_v6 }
 0x2da   :  { %v9580_v24 = vld [vmem:[%s11888_s4 + $0x330] sm:$0xff]   ;;  %v3390_v61 = vrot.slane %v3367_v5, 2  ;;  %3473 = vst [vmem:[#allocation3 + $0xe8] sm:$0x2] %v3452_v29  ;;  %v9582_v41 = vld [vmem:[%s11888_s4 + $0x378] sm:$0xff]   ;;  %v3916_v22 = vld [vmem:[#allocation3 + $0x60] sm:$0xff] }
 0x2db   :  { %v3423_v56 = vld [vmem:[#allocation2 + $0x30] sm:$0x10]  ;;  %v3491_v44 = vld [vmem:[#allocation2 + $0x30] sm:$0x40]  ;;  %3565 = vst [vmem:[#allocation3 + $0xe8] sm:$0x4] %v7959_v13  ;;  %9035 = vmatpush3.bf16.msra.mxu0 %v9580_v24 }
 0x2dc   :  { %v9581_v37 = vld [vmem:[%s11888_s4 + $0x3b0] sm:$0xff]   ;;  %3639 = vst [vmem:[#allocation3 + $0xe8] sm:$0x8] %v7968_v50  ;;  %v3458_v3 = vrot.slane %v3423_v56, 3  ;;  %v7961_v59 = vrot.slane %v3491_v44, 4  ;;  %v9583_v17 = vld [vmem:[%s11888_s4 + $0x3f8] sm:$0xff]   ;;  %9036 = vmatprep.subr.bf16.mxu0 %v9582_v41 }
 0x2dd   :  { %v3420_v35 = vld [vmem:[#allocation2 + $0x30] sm:$0x2]  ;;  %v3488_v60 = vld [vmem:[#allocation2 + $0x30] sm:$0x8]  ;;  %3407 = vst [vmem:[#allocation3 + $0xf8] sm:$0x1] %v3390_v61  ;;  %9063 = vmatpush3.bf16.msra.mxu1 %v9581_v37 }
 0x2de   :  { %3472 = vst [vmem:[#allocation3 + $0xe0] sm:$0x2] %v3420_v35  ;;  %v3532_v49 = vrot.slane %v3488_v60, 1  ;;  %v3577_v27 = vld [vmem:[#allocation2 + $0x30] sm:$0x20]  ;;  %v9584_v30 = vld [vmem:[%s11888_s4 + $0x338] sm:$0xff]   ;;  %9064 = vmatprep.subr.bf16.mxu1 %v9583_v17 }
 0x2df   :  { %v3366_v23 = vld [vmem:[#allocation2 + $0x30] sm:$0x2]  ;;  %3475 = vst [vmem:[#allocation3 + $0xf8] sm:$0x2] %v3458_v3  ;;  %3567 = vst [vmem:[#allocation3 + $0xf8] sm:$0x4] %v7961_v59  ;;  %9037 = vmatpush3.bf16.msra.mxu0 %v9584_v30  ;;  %v11272_v3 = vcombine.low %v9781_v45, %v9781_v45 }
 0x2e0   :  { %v3610_v34 = vrot.slane %v3577_v27, 2  ;;  %v3387_v0 = vrot.slane %v3366_v23, 1  ;;  %v3422_v1 = vld [vmem:[#allocation2 + $0x30] sm:$0x8]  ;;  %v3490_v31 = vld [vmem:[#allocation2 + $0x30] sm:$0x20] }
 0x2e1   :  { %3564 = vst [vmem:[#allocation3 + $0xe0] sm:$0x4] %v3532_v49  ;;  %v3455_v15 = vrot.slane %v3422_v1, 2  ;;  %v7960_v28 = vrot.slane %v3490_v31, 3  ;;  %v3579_v12 = vld [vmem:[#allocation2 + $0x30] sm:$0x80] }
 0x2e2   :  { %3638 = vst [vmem:[#allocation3 + $0xe0] sm:$0x8] %v3610_v34  ;;  %3406 = vst [vmem:[#allocation3 + $0xf0] sm:$0x1] %v3387_v0  ;;  %v7969_v32 = vrot.slane %v3579_v12, 4  ;;  %v9585_v20 = vld [vmem:[%s11888_s4 + $0x3b8] sm:$0xff]   ;;  %5287 = vmatmul.mubr.bf16.vlgmr.msra.gmra.mrb[152].mxu0 %v3916_v22 }
 0x2e3   :  { %3474 = vst [vmem:[#allocation3 + $0xf0] sm:$0x2] %v3455_v15  ;;  %3566 = vst [vmem:[#allocation3 + $0xf0] sm:$0x4] %v7960_v28  ;;  %9065 = vmatpush3.bf16.msra.mxu1 %v9585_v20  ;;  %v3933_v16 = vld [vmem:[#allocation3 + $0xe8] sm:$0xff]  ;;  %v3918_v39 = vld [vmem:[#allocation3 + $0x70] sm:$0xff] }
 0x2e4   :  { %3640 = vst [vmem:[#allocation3 + $0xf0] sm:$0x8] %v7969_v32  ;;  %5294 = vmatprep.mubr.bf16.mxu0 %v3933_v16  ;;  %v9586_v41 = vld [vmem:[%s11891_s7 + $0x40] sm:$0xff]   ;;  %5461 = vst [vmem:[#allocation5] sm:$0x11] %v11272_v3  ;;  %v5511_v23 = vrot.slane %v11272_v3, 7 }
 0x2e5   :  { %v9587_v27 = vld [vmem:[%s11891_s7 + $0xc0] sm:$0xff]   ;;  %5462 = vst [vmem:[#allocation5 + $0x8] sm:$0x11] %v11272_v3  ;;  %9078 = vmatprep.subr.bf16.mxu0 %v9586_v41  ;;  %v9590_v15 = vld [vmem:[%s11891_s7 + $0x48] sm:$0xff]  }
 0x2e6   :  { %5336 = vmatmul.mubr.bf16.vlgmr.msra.gmra.mrb[152].mxu1 %v3918_v39  ;;  %v3935_v58 = vld [vmem:[#allocation3 + $0xf8] sm:$0xff]  ;;  %v9588_v1 = vld [vmem:[%s11891_s7] sm:$0xff]   ;;  %9100 = vmatprep.subr.bf16.mxu1 %v9587_v27  ;;  %5525 = vst [vmem:[#allocation5] sm:$0x22] %v5511_v23  ;;  %5526 = vst [vmem:[#allocation5 + $0x8] sm:$0x22] %v5511_v23 }
 0x2e7   :  { %5343 = vmatprep.mubr.bf16.mxu1 %v3935_v58  ;;  %v9589_v31 = vld [vmem:[%s11891_s7 + $0x80] sm:$0xff]   ;;  %9079 = vmatpush3.bf16.msra.mxu0 %v9588_v1  ;;  %v9591_v28 = vld [vmem:[%s11891_s7 + $0xc8] sm:$0xff]   ;;  %v9594_v39 = vld [vmem:[%s11891_s7 + $0x50] sm:$0xff]  }
 0x2e8   :  { %9101 = vmatpush3.bf16.msra.mxu1 %v9589_v31  ;;  %9080 = vmatprep.subr.bf16.mxu0 %v9590_v15  ;;  %v9592_v30 = vld [vmem:[%s11891_s7 + $0x8] sm:$0xff]   ;;  %v9622_v23 = vld [vmem:[%s11891_s7 + $0x140] sm:$0xff]  }
 0x2e9   :  { %v3932_v19 = vld [vmem:[#allocation3 + $0xe0] sm:$0xff]  ;;  %9102 = vmatprep.subr.bf16.mxu1 %v9591_v28  ;;  %v9593_v20 = vld [vmem:[%s11891_s7 + $0x88] sm:$0xff]  }
 0x2ea   :  { %5295 = vmatmul.mubr.bf16.gmra.mrb[156].mxu0 %v3932_v19  ;;  %v9595_v19 = vld [vmem:[%s11891_s7 + $0xd0] sm:$0xff]   ;;  %v9623_v1 = vld [vmem:[%s11891_s7 + $0x1c0] sm:$0xff]  }
 0x2eb   :  { %v3934_v18 = vld [vmem:[#allocation3 + $0xf0] sm:$0xff]  ;;  %9081 = vmatpush3.bf16.msra.mxu0 %v9592_v30 }
 0x2ec   :  { %9103 = vmatpush3.bf16.msra.mxu1 %v9593_v20  ;;  %9082 = vmatprep.subr.bf16.mxu0 %v9594_v39 }
 0x2ed   :  { %9104 = vmatprep.subr.bf16.mxu1 %v9595_v19 }
 0x2ee   :  { %5344 = vmatmul.mubr.bf16.gmra.mrb[156].mxu1 %v3934_v18 }
 0x317   :  { %v8870_v54 = vpop.f32.mrb[128].mxu0 }
 0x318   :  { %v8871_v42 = vpop.f32.mrb[129].mxu0 }
 0x319   :  { %v8872_v25 = vadd.f32 %v8871_v42, %v8870_v54  ;;  %v8873_v46 = vpop.f32.mrb[130].mxu0 }
 0x31a   :  { %v8874_v26 = vpop.f32.mrb[131].mxu0 }
 0x31b   :  { %v8875_v47 = vadd.f32 %v8874_v26, %v8873_v46  ;;  %v9597_v46 = vld [vmem:[%s11891_s7 + $0x90] sm:$0xff]  }
 0x31c   :  { %v8898_v55 = vpop.f32.mrb[128].mxu1  ;;  %9105 = vmatpush3.bf16.msra.mxu1 %v9597_v46 }
 0x31d   :  { %v8899_v21 = vpop.f32.mrb[129].mxu1 }
 0x31e   :  { %v8900_v7 = vadd.f32 %v8899_v21, %v8898_v55  ;;  %v8901_v51 = vpop.f32.mrb[130].mxu1  ;;  %v9596_v55 = vld [vmem:[%s11891_s7 + $0x10] sm:$0xff]  }
 0x31f   :  { %v8902_v2 = vpop.f32.mrb[131].mxu1  ;;  %9083 = vmatpush3.bf16.msra.mxu0 %v9596_v55 }
 0x320   :  { %v5044_v33 = vadd.f32 %v8900_v7, %v8872_v25  ;;  %v8903_v57 = vadd.f32 %v8902_v2, %v8901_v51  ;;  %v9598_v51 = vld [vmem:[%s11891_s7 + $0x58] sm:$0xff]  }
 0x321   :  { %v9599_v2 = vld [vmem:[%s11891_s7 + $0xd8] sm:$0xff]   ;;  %9084 = vmatprep.subr.bf16.mxu0 %v9598_v51 }
 0x322   :  { %v5047_v38 = vadd.f32 %v8903_v57, %v8875_v47  ;;  %9106 = vmatprep.subr.bf16.mxu1 %v9599_v2 }
 0x32f   :  { %v8876_v40 = vpop.f32.mrb[132].mxu0 }
 0x330   :  { %v8877_v11 = vpop.f32.mrb[133].mxu0 }
 0x331   :  { %v8878_v8 = vadd.f32 %v8877_v11, %v8876_v40  ;;  %v8879_v48 = vpop.f32.mrb[134].mxu0  ;;  %v9601_v40 = vld [vmem:[%s11891_s7 + $0x98] sm:$0xff]  }
 0x332   :  { %v8880_v14 = vpop.f32.mrb[135].mxu0  ;;  %9107 = vmatpush3.bf16.msra.mxu1 %v9601_v40 }
 0x333   :  { %v8881_v62 = vadd.f32 %v8880_v14, %v8879_v48  ;;  %v9603_v48 = vld [vmem:[%s11891_s7 + $0xe0] sm:$0xff]  }
 0x334   :  { %v8904_v43 = vpop.f32.mrb[132].mxu1  ;;  %v9604_v14 = vld [vmem:[%s11891_s7 + $0x20] sm:$0xff]   ;;  %9108 = vmatprep.subr.bf16.mxu1 %v9603_v48 }
 0x335   :  { %v8905_v36 = vpop.f32.mrb[133].mxu1 }
 0x336   :  { %v8906_v52 = vadd.f32 %v8905_v36, %v8904_v43  ;;  %v8907_v4 = vpop.f32.mrb[134].mxu1  ;;  %v9605_v43 = vld [vmem:[%s11891_s7 + $0xa0] sm:$0xff]   ;;  %v9607_v36 = vld [vmem:[%s11891_s7 + $0xe8] sm:$0xff]  }
 0x337   :  { %v8908_v10 = vpop.f32.mrb[135].mxu1  ;;  %9109 = vmatpush3.bf16.msra.mxu1 %v9605_v43 }
 0x338   :  { %v5052_v63 = vadd.f32 %v8906_v52, %v8878_v8  ;;  %v8909_v9 = vadd.f32 %v8908_v10, %v8907_v4  ;;  %v9602_v8 = vld [vmem:[%s11891_s7 + $0x60] sm:$0xff]   ;;  %v9608_v52 = vld [vmem:[%s11891_s7 + $0x28] sm:$0xff]   ;;  %9110 = vmatprep.subr.bf16.mxu1 %v9607_v36  ;;  %v9610_v10 = vld [vmem:[%s11891_s7 + $0x70] sm:$0xff]  }
 0x339   :  { %v9609_v4 = vld [vmem:[%s11891_s7 + $0xa8] sm:$0xff]  }
 0x33a   :  { %v5055_v6 = vadd.f32 %v8909_v9, %v8881_v62  ;;  %v9606_v62 = vld [vmem:[%s11891_s7 + $0x68] sm:$0xff]   ;;  %v9612_v9 = vld [vmem:[%s11891_s7 + $0x30] sm:$0xff]  }
 0x33b   :  { %9111 = vmatpush3.bf16.msra.mxu1 %v9609_v4 }
 0x34e   :  { %v8926_v29 = vpop.f32.mrb[136].mxu0  ;;  %v8954_v13 = vpop.f32.mrb[136].mxu1 }
 0x34f   :  { %v8927_v50 = vpop.f32.mrb[137].mxu0  ;;  %v8955_v24 = vpop.f32.mrb[137].mxu1 }
 0x350   :  { %v8928_v5 = vadd.f32 %v8927_v50, %v8926_v29  ;;  %v8929_v61 = vpop.f32.mrb[138].mxu0  ;;  %v8956_v56 = vadd.f32 %v8955_v24, %v8954_v13  ;;  %v8957_v44 = vpop.f32.mrb[138].mxu1  ;;  %v9614_v13 = vld [vmem:[%s11891_s7 + $0x78] sm:$0xff]  }
 0x351   :  { %v8930_v37 = vpop.f32.mrb[139].mxu0  ;;  %v8958_v60 = vpop.f32.mrb[139].mxu1 }
 0x352   :  { %v5093_v59 = vadd.f32 %v8928_v5, %v5044_v33  ;;  %v8931_v35 = vadd.f32 %v8930_v37, %v8929_v61  ;;  %v8959_v49 = vadd.f32 %v8958_v60, %v8957_v44  ;;  %v9615_v5 = vld [vmem:[%s11891_s7 + $0xf8] sm:$0xff]  }
 0x354   :  { %v11283_v34 = vadd.f32 %v8956_v56, %v5093_v59  ;;  %v5096_v0 = vadd.f32 %v8931_v35, %v5047_v38  ;;  %v9600_v38 = vld [vmem:[%s11891_s7 + $0x18] sm:$0xff]  }
 0x355   :  { %9085 = vmatpush3.bf16.msra.mxu0 %v9600_v38  ;;  %v9616_v59 = vld [vmem:[%s11891_s7 + $0x38] sm:$0xff]  }
 0x356   :  { %v11291_v17 = vadd.f32 %v8959_v49, %v5096_v0  ;;  %9086 = vmatprep.subr.bf16.mxu0 %v9602_v8  ;;  %v9617_v35 = vld [vmem:[%s11891_s7 + $0xb8] sm:$0xff]  }
 0x359   :  { %9087 = vmatpush3.bf16.msra.mxu0 %v9604_v14 }
 0x35a   :  { %9088 = vmatprep.subr.bf16.mxu0 %v9606_v62 }
 0x35d   :  { %9089 = vmatpush3.bf16.msra.mxu0 %v9608_v52 }
 0x35e   :  { %9090 = vmatprep.subr.bf16.mxu0 %v9610_v10 }
 0x35f   :  { %v8932_v12 = vpop.f32.mrb[140].mxu0 }
 0x360   :  { %v8933_v32 = vpop.f32.mrb[141].mxu0 }
 0x361   :  { %v8934_v22 = vadd.f32 %v8933_v32, %v8932_v12  ;;  %v8935_v16 = vpop.f32.mrb[142].mxu0  ;;  %9091 = vmatpush3.bf16.msra.mxu0 %v9612_v9 }
 0x362   :  { %v8936_v58 = vpop.f32.mrb[143].mxu0  ;;  %9092 = vmatprep.subr.bf16.mxu0 %v9614_v13 }
 0x363   :  { %v5101_v54 = vadd.f32 %v8934_v22, %v5052_v63  ;;  %v8937_v42 = vadd.f32 %v8936_v58, %v8935_v16  ;;  %v9611_v63 = vld [vmem:[%s11891_s7 + $0xf0] sm:$0xff]  }
 0x364   :  { %9112 = vmatprep.subr.bf16.mxu1 %v9611_v63 }
 0x365   :  { %v5104_v7 = vadd.f32 %v8937_v42, %v5055_v6  ;;  %v9613_v6 = vld [vmem:[%s11891_s7 + $0xb0] sm:$0xff]   ;;  %9093 = vmatpush3.bf16.msra.mxu0 %v9616_v59 }
 0x366   :  { %9113 = vmatpush3.bf16.msra.mxu1 %v9613_v6  ;;  %9122 = vmatprep.subr.bf16.mxu0 %v9622_v23 }
 0x367   :  { %9114 = vmatprep.subr.bf16.mxu1 %v9615_v5 }
 0x369   :  { %v8960_v18 = vpop.f32.mrb[140].mxu1 }
 0x36a   :  { %v8961_v25 = vpop.f32.mrb[141].mxu1  ;;  %9115 = vmatpush3.bf16.msra.mxu1 %v9617_v35 }
 0x36b   :  { %v8962_v21 = vadd.f32 %v8961_v25, %v8960_v18  ;;  %v8963_v26 = vpop.f32.mrb[142].mxu1  ;;  %9144 = vmatprep.subr.bf16.mxu1 %v9623_v1 }
 0x36c   :  { %v8964_v47 = vpop.f32.mrb[143].mxu1 }
 0x36d   :  { %v11323_v33 = vadd.f32 %v8962_v21, %v5101_v54  ;;  %v8965_v57 = vadd.f32 %v8964_v47, %v8963_v26 }
 0x36f   :  { %v11331_v11 = vadd.f32 %v8965_v57, %v5104_v7 }
 0x384   :  { %v8982_v29 = vpop.f32.mrb[144].mxu0 }
 0x385   :  { %v8983_v50 = vpop.f32.mrb[145].mxu0 }
 0x386   :  { %v8984_v61 = vadd.f32 %v8983_v50, %v8982_v29  ;;  %v8985_v56 = vpop.f32.mrb[146].mxu0 }
 0x387   :  { %v8986_v37 = vpop.f32.mrb[147].mxu0 }
 0x388   :  { %v5191_v60 = vadd.f32 %v8984_v61, %v11283_v34  ;;  %v8987_v27 = vadd.f32 %v8986_v37, %v8985_v56 }
 0x38a   :  { %v9010_v24 = vpop.f32.mrb[144].mxu1  ;;  %v5194_v15 = vadd.f32 %v8987_v27, %v11291_v17 }
 0x38b   :  { %v9011_v44 = vpop.f32.mrb[145].mxu1 }
 0x38c   :  { %v9012_v41 = vadd.f32 %v9011_v44, %v9010_v24  ;;  %v9013_v49 = vpop.f32.mrb[146].mxu1 }
 0x38d   :  { %v9014_v0 = vpop.f32.mrb[147].mxu1 }
 0x38e   :  { %v5240_v31 = vadd.f32 %v9012_v41, %v5191_v60  ;;  %v9015_v28 = vadd.f32 %v9014_v0, %v9013_v49 }
 0x390   :  { %v5243_v34 = vadd.f32 %v9015_v28, %v5194_v15 }
 0x397   :  { %v8988_v12 = vpop.f32.mrb[148].mxu0 }
 0x398   :  { %v8989_v30 = vpop.f32.mrb[149].mxu0 }
 0x399   :  { %v8990_v32 = vadd.f32 %v8989_v30, %v8988_v12  ;;  %v8991_v20 = vpop.f32.mrb[150].mxu0 }
 0x39a   :  { %v8992_v22 = vpop.f32.mrb[151].mxu0 }
 0x39b   :  { %v5199_v39 = vadd.f32 %v8990_v32, %v11323_v33  ;;  %v8993_v58 = vadd.f32 %v8992_v22, %v8991_v20 }
 0x39d   :  { %v5202_v42 = vadd.f32 %v8993_v58, %v11331_v11 }
 0x39e   :  { %v9016_v16 = vpop.f32.mrb[148].mxu1 }
 0x39f   :  { %v9017_v19 = vpop.f32.mrb[149].mxu1 }
 0x3a0   :  { %v9018_v18 = vadd.f32 %v9017_v19, %v9016_v16  ;;  %v9019_v54 = vpop.f32.mrb[150].mxu1  ;;  %v8153_v19 = vcombine.high %v9781_v45, %v9781_v45 }
 0x3a1   :  { %v9020_v55 = vpop.f32.mrb[151].mxu1 }
 0x3a2   :  { %v5248_v17 = vadd.f32 %v9018_v18, %v5199_v39  ;;  %v9021_v25 = vadd.f32 %v9020_v55, %v9019_v54  ;;  %v5580_v18 = vrot.slane %v11272_v3, 6  ;;  %v5644_v55 = vrot.slane %v8153_v19, 6  ;;  %v5353_v3 = vld [vmem:[%s11893_s6] sm:$0x1] }
 0x3a4   :  { %v5251_v46 = vadd.f32 %v9021_v25, %v5202_v42  ;;  %5594 = vst [vmem:[#allocation5 + $0x30] sm:$0x44] %v5580_v18  ;;  %5595 = vst [vmem:[#allocation5 + $0x38] sm:$0x44] %v5580_v18 }
 0x3a5   :  { %5658 = vst [vmem:[#allocation5 + $0x30] sm:$0x88] %v5644_v55  ;;  %5659 = vst [vmem:[#allocation5 + $0x38] sm:$0x88] %v5644_v55 }
 0x3b5   :  { %v9038_v21 = vpop.f32.mrb[152].mxu0 }
 0x3b6   :  { %v9039_v26 = vpop.f32.mrb[153].mxu0 }
 0x3b7   :  { %v9040_v51 = vadd.f32 %v9039_v26, %v9038_v21  ;;  %v9041_v47 = vpop.f32.mrb[154].mxu0 }
 0x3b8   :  { %v9042_v57 = vpop.f32.mrb[155].mxu0 }
 0x3b9   :  { %v9066_v7 = vpop.f32.mrb[152].mxu1  ;;  %v5289_v38 = vadd.f32 %v9040_v51, %v5240_v31  ;;  %v9043_v8 = vadd.f32 %v9042_v57, %v9041_v47 }
 0x3ba   :  { %v9067_v2 = vpop.f32.mrb[153].mxu1 }
 0x3bb   :  { %v9068_v40 = vadd.f32 %v9067_v2, %v9066_v7  ;;  %v9069_v33 = vpop.f32.mrb[154].mxu1  ;;  %v5292_v43 = vadd.f32 %v9043_v8, %v5243_v34  ;;  %v5352_v7 = vld [vmem:[%s11892_s5] sm:$0x1] }
 0x3bc   :  { %v9070_v48 = vpop.f32.mrb[155].mxu1 }
 0x3bd   :  { %v11391_v14 = vadd.f32 %v9068_v40, %v5289_v38  ;;  %v9071_v11 = vadd.f32 %v9070_v48, %v9069_v33  ;;  %v9044_v36 = vpop.f32.mrb[156].mxu0 }
 0x3be   :  { %v9045_v52 = vpop.f32.mrb[157].mxu0 }
 0x3bf   :  { %v11393_v62 = vadd.f32 %v9071_v11, %v5292_v43  ;;  %v5364_v4 = vmul.f32 %v11391_v14, %v11391_v14  ;;  %v9046_v6 = vadd.f32 %v9045_v52, %v9044_v36  ;;  %v9047_v29 = vpop.f32.mrb[158].mxu0 }
 0x3c0   :  { %v9048_v50 = vpop.f32.mrb[159].mxu0 }
 0x3c1   :  { %v5354_v10 = vadd.f32 %v11393_v62, %v11391_v14  ;;  %v5365_v63 = vmul.f32 %v11393_v62, %v11393_v62  ;;  %v9072_v9 = vpop.f32.mrb[156].mxu1  ;;  %v5297_v24 = vadd.f32 %v9046_v6, %v5248_v17  ;;  %v9049_v44 = vadd.f32 %v9048_v50, %v9047_v29 }
 0x3c2   :  { %v9073_v13 = vpop.f32.mrb[157].mxu1 }
 0x3c3   :  { %v5368_v5 = vadd.f32 %v5365_v63, %v5364_v4  ;;  %v9074_v61 = vadd.f32 %v9073_v13, %v9072_v9  ;;  %v9075_v56 = vpop.f32.mrb[158].mxu1  ;;  %v5300_v35 = vadd.f32 %v9049_v44, %v5251_v46 }
 0x3c4   :  { %v9076_v37 = vpop.f32.mrb[159].mxu1 }
 0x3c5   :  { %v5346_v59 = vadd.f32 %v9074_v61, %v5297_v24  ;;  %v9077_v60 = vadd.f32 %v9076_v37, %v9075_v56 }
 0x3c7   :  { %v5355_v41 = vadd.f32 %v5354_v10, %v5346_v59  ;;  %v5366_v49 = vmul.f32 %v5346_v59, %v5346_v59  ;;  %v5349_v27 = vadd.f32 %v9077_v60, %v5300_v35 }
 0x3c9   :  { %v5369_v23 = vadd.f32 %v5368_v5, %v5366_v49  ;;  %v5356_v0 = vadd.f32 %v5355_v41, %v5349_v27  ;;  %v5367_v1 = vmul.f32 %v5349_v27, %v5349_v27 }
 0x3cb   :  { %v5357_v31 = vrot.slane %v5356_v0, 4  ;;  %v5370_v15 = vadd.f32 %v5369_v23, %v5367_v1 }
 0x3cd   :  { %v5358_v28 = vadd.f32 %v5357_v31, %v5356_v0  ;;  %v5371_v34 = vrot.slane %v5370_v15, 4 }
 0x3cf   :  { %v5359_v12 = vrot.slane %v5358_v28, 2  ;;  %v5372_v30 = vadd.f32 %v5371_v34, %v5370_v15 }
 0x3d1   :  { %v5360_v32 = vadd.f32 %v5359_v12, %v5358_v28  ;;  %v5373_v20 = vrot.slane %v5372_v30, 2 }
 0x3d3   :  { %v5361_v22 = vrot.slane %v5360_v32, 1  ;;  %v5374_v16 = vadd.f32 %v5373_v20, %v5372_v30 }
 0x3d5   :  { %v5362_v39 = vadd.f32 %v5361_v22, %v5360_v32  ;;  %v5375_v58 = vrot.slane %v5374_v16, 1 }
 0x3d7   :  { %v5363_v54 = vmul.f32 0.03125, %v5362_v39  ;;  %v5376_v42 = vadd.f32 %v5375_v58, %v5374_v16 }
 0x3d9   :  { %v5377_v17 = vmul.f32 0.03125, %v5376_v42  ;;  %v5378_v25 = vmul.f32 %v5363_v54, %v5363_v54 }
 0x3db   :  { %v5379_v46 = vsub.f32 %v5377_v17, %v5378_v25 }
 0x3dd   :  { %v5380_v21 = vmax.f32 %v5379_v46, 0.0 }
 0x3df   :  { %v5381_v26 = vadd.f32 1e-05, %v5380_v21 }
 0x3e1   :  { %9775 = vrsqrt.f32 %v5381_v26 }
 0x3eb   :  { %v9776_v51 = vpop.eup %9775 }
 0x3ec   :  { %v5383_v47 = vmul.f32 %v9776_v51, %v5352_v7 }
 0x3ee   :  { %v5384_v2 = vmul.f32 %v5383_v47, %v5363_v54  ;;  %v5389_v57 = vrot.slane %v5383_v47, %v10967_v53 }
 0x3f0   :  { %v5385_v38 = vsub.f32 %v5353_v3, %v5384_v2  ;;  %v5390_v40 = vmul.f32 %v5389_v57, %v11391_v14  ;;  %v5391_v33 = vmul.f32 %v5389_v57, %v11393_v62  ;;  %v5392_v8 = vmul.f32 %v5389_v57, %v5346_v59 }
 0x3f1   :  { %v5393_v48 = vmul.f32 %v5389_v57, %v5349_v27 }
 0x3f2   :  { %v5398_v43 = vrot.slane %v5385_v38, %v10967_v53 }
 0x3f4   :  { %v5400_v11 = vadd.f32 %v5398_v43, %v5390_v40  ;;  %v5401_v36 = vadd.f32 %v5398_v43, %v5391_v33  ;;  %v5402_v52 = vadd.f32 %v5398_v43, %v5392_v8  ;;  %v5403_v4 = vadd.f32 %v5398_v43, %v5393_v48 }
 0x3f6   :  { %v5404_v10 = vmax.f32 %v5400_v11, 0.0  ;;  %v5405_v63 = vmax.f32 %v5401_v36, 0.0  ;;  %v5406_v9 = vmax.f32 %v5402_v52, 0.0  ;;  %v5407_v6 = vmax.f32 %v5403_v4, 0.0 }
 0x3f8   :  { %v5408_v29 = vpack.c.bf16 %v5405_v63, %v5404_v10  ;;  %v5409_v13 = vpack.c.bf16 %v5407_v6, %v5406_v9 }
 0x3fa   :  { %5410 = vst [vmem:[#allocation4] sm:$0xff] %v5408_v29  ;;  %5411 = vst [vmem:[#allocation4 + $0x8] sm:$0xff] %v5409_v13 }
 0x401   :  { %v5533_v50 = vld [vmem:[#allocation4] sm:$0x10]  ;;  %v5596_v14 = vld [vmem:[#allocation4] sm:$0x20]  ;;  %v5597_v5 = vld [vmem:[#allocation4] sm:$0x40] }
 0x402   :  { %v5543_v62 = vrot.slane %v5533_v50, 4  ;;  %v5606_v24 = vrot.slane %v5597_v5, 1  ;;  %v5534_v61 = vld [vmem:[#allocation4] sm:$0x20]  ;;  %v5535_v56 = vld [vmem:[#allocation4] sm:$0x40] }
 0x403   :  { %v5545_v44 = vrot.slane %v5534_v61, 5  ;;  %v5547_v37 = vrot.slane %v5535_v56, 6  ;;  %v5598_v59 = vld [vmem:[#allocation4] sm:$0x80]  ;;  %v5412_v35 = vld [vmem:[#allocation4] sm:$0x1] }
 0x404   :  { %v8141_v60 = vcombine.low %v9781_v45, %v5543_v62  ;;  %v8147_v41 = vcombine.high %v5596_v14, %v5606_v24  ;;  %v5608_v49 = vrot.slane %v5598_v59, 2  ;;  %v8129_v27 = vcombine.low %v9781_v45, %v5412_v35  ;;  %v5469_v23 = vld [vmem:[#allocation4] sm:$0x2]  ;;  %v5470_v0 = vld [vmem:[#allocation4] sm:$0x4] }
 0x405   :  { %v8142_v1 = vcombine.low %v5545_v44, %v5547_v37  ;;  %v5479_v31 = vrot.slane %v5469_v23, 1  ;;  %v5481_v15 = vrot.slane %v5470_v0, 2  ;;  %v5536_v28 = vld [vmem:[#allocation4 + $0x8] sm:$0x1]  ;;  %v5599_v34 = vld [vmem:[#allocation4 + $0x8] sm:$0x2] }
 0x406   :  { %v5574_v12 = vrot.slane %v8141_v60, 6  ;;  %v5638_v30 = vrot.slane %v8147_v41, 6  ;;  %v8148_v32 = vcombine.high %v5608_v49, %v9781_v45  ;;  %5463 = vst [vmem:[#allocation5 + $0x10] sm:$0x11] %v8129_v27  ;;  %v8143_v20 = vcombine.low %v9781_v45, %v5536_v28  ;;  %v5600_v22 = vld [vmem:[#allocation4 + $0x8] sm:$0x4] }
 0x407   :  { %v5413_v16 = vld [vmem:[#allocation4] sm:$0x2]  ;;  %v5575_v39 = vrot.slane %v8142_v1, 6  ;;  %v8135_v58 = vcombine.low %v5479_v31, %v5481_v15  ;;  %v5610_v19 = vrot.slane %v5599_v34, 4  ;;  %v5612_v18 = vrot.slane %v5600_v22, 5  ;;  %v9630_v37 = vld [vmem:[%s11891_s7 + $0x148] sm:$0xff]  }
 0x408   :  { %v5414_v54 = vld [vmem:[#allocation4] sm:$0x4]  ;;  %5588 = vst [vmem:[#allocation5] sm:$0x44] %v5574_v12  ;;  %5652 = vst [vmem:[#allocation5] sm:$0x88] %v5638_v30 }
 0x409   :  { %v5639_v42 = vrot.slane %v8148_v32, 6  ;;  %v5576_v55 = vrot.slane %v8143_v20, 6  ;;  %v5422_v17 = vrot.slane %v5413_v16, 1  ;;  %v5424_v25 = vrot.slane %v5414_v54, 2  ;;  %v5471_v46 = vld [vmem:[#allocation4] sm:$0x8] }
 0x40a   :  { %5589 = vst [vmem:[#allocation5 + $0x8] sm:$0x44] %v5575_v39  ;;  %v5512_v21 = vrot.slane %v8135_v58, 7  ;;  %v8149_v26 = vcombine.high %v5610_v19, %v5612_v18  ;;  %v5483_v7 = vrot.slane %v5471_v46, 3  ;;  %v5537_v51 = vld [vmem:[#allocation4 + $0x8] sm:$0x2] }
 0x40b   :  { %v5538_v47 = vld [vmem:[#allocation4 + $0x8] sm:$0x4]  ;;  %5653 = vst [vmem:[#allocation5 + $0x8] sm:$0x88] %v5639_v42  ;;  %5590 = vst [vmem:[#allocation5 + $0x10] sm:$0x44] %v5576_v55  ;;  %v8130_v3 = vcombine.low %v5422_v17, %v5424_v25 }
 0x40c   :  { %v5549_v2 = vrot.slane %v5537_v51, 1  ;;  %v5551_v57 = vrot.slane %v5538_v47, 2  ;;  %v5601_v38 = vld [vmem:[#allocation4 + $0x8] sm:$0x8]  ;;  %v5415_v40 = vld [vmem:[#allocation4] sm:$0x10]  ;;  %v8136_v8 = vcombine.low %v5483_v7, %v9781_v45 }
 0x40d   :  { %5527 = vst [vmem:[#allocation5 + $0x10] sm:$0x22] %v5512_v21  ;;  %v5640_v33 = vrot.slane %v8149_v26, 6  ;;  %v5614_v48 = vrot.slane %v5601_v38, 6  ;;  %v5426_v43 = vrot.slane %v5415_v40, 4  ;;  %v9624_v14 = vld [vmem:[%s11891_s7 + $0x100] sm:$0xff]  }
 0x40e   :  { %v5472_v11 = vld [vmem:[#allocation4] sm:$0x20]  ;;  %5464 = vst [vmem:[#allocation5 + $0x18] sm:$0x11] %v8130_v3  ;;  %v8144_v36 = vcombine.low %v5549_v2, %v5551_v57  ;;  %v5473_v52 = vld [vmem:[#allocation4] sm:$0x40] }
 0x40f   :  { %v5485_v4 = vrot.slane %v5472_v11, 5  ;;  %v5539_v10 = vld [vmem:[#allocation4 + $0x8] sm:$0x10]  ;;  %5654 = vst [vmem:[#allocation5 + $0x10] sm:$0x88] %v5640_v33  ;;  %v5513_v63 = vrot.slane %v8136_v8, 7  ;;  %v8150_v9 = vcombine.high %v5614_v48, %v9781_v45  ;;  %v8131_v6 = vcombine.low %v9781_v45, %v5426_v43 }
 0x410   :  { %v5487_v29 = vrot.slane %v5473_v52, 6  ;;  %v5602_v13 = vld [vmem:[#allocation4 + $0x8] sm:$0x20]  ;;  %v5603_v50 = vld [vmem:[#allocation4 + $0x8] sm:$0x40]  ;;  %v5577_v5 = vrot.slane %v8144_v36, 6 }
 0x411   :  { %v5553_v62 = vrot.slane %v5539_v10, 4  ;;  %v5616_v24 = vrot.slane %v5603_v50, 1  ;;  %v5416_v61 = vld [vmem:[#allocation4] sm:$0x20]  ;;  %v5660_v56 = vld [vmem:[#allocation5] sm:$0xff]  ;;  %v5641_v44 = vrot.slane %v8150_v9, 6 }
 0x412   :  { %5528 = vst [vmem:[#allocation5 + $0x18] sm:$0x22] %v5513_v63  ;;  %5465 = vst [vmem:[#allocation5 + $0x20] sm:$0x11] %v8131_v6  ;;  %v8137_v59 = vcombine.low %v5485_v4, %v5487_v29  ;;  %v5417_v35 = vld [vmem:[#allocation4] sm:$0x40]  ;;  %v8154_v41 = vcombine.low %v5660_v56, %v5660_v56  ;;  %v8155_v49 = vcombine.high %v5660_v56, %v5660_v56 }
 0x413   :  { %v5428_v60 = vrot.slane %v5416_v61, 5  ;;  %v9625_v27 = vld [vmem:[%s11891_s7 + $0x180] sm:$0xff]   ;;  %5591 = vst [vmem:[#allocation5 + $0x18] sm:$0x44] %v5577_v5  ;;  %v8145_v23 = vcombine.low %v9781_v45, %v5553_v62  ;;  %v8151_v0 = vcombine.high %v5602_v13, %v5616_v24  ;;  %v5540_v31 = vld [vmem:[#allocation4 + $0x8] sm:$0x20] }
 0x414   :  { %v5474_v1 = vld [vmem:[#allocation4] sm:$0x80]  ;;  %v5541_v15 = vld [vmem:[#allocation4 + $0x8] sm:$0x40]  ;;  %v5661_v28 = vld [vmem:[#allocation5 + $0x8] sm:$0xff]  ;;  %v5514_v12 = vrot.slane %v8137_v59, 7  ;;  %6780 = vmatprep.mubr.bf16.mxu0 %v8155_v49 }
 0x415   :  { %5655 = vst [vmem:[#allocation5 + $0x18] sm:$0x88] %v5641_v44  ;;  %v9631_v34 = vld [vmem:[%s11891_s7 + $0x1c8] sm:$0xff]   ;;  %v5430_v30 = vrot.slane %v5417_v35, 6  ;;  %v5489_v32 = vrot.slane %v5474_v1, 7  ;;  %v5555_v20 = vrot.slane %v5540_v31, 5  ;;  %v8156_v22 = vcombine.low %v5661_v28, %v5661_v28  ;;  %6781 = vmatmul.mubr.bf16.vlgmr.msra.gmra.mrb[160].mxu0 %v8154_v41 }
 0x416   :  { %v8157_v16 = vcombine.high %v5661_v28, %v5661_v28  ;;  %v5578_v39 = vrot.slane %v8145_v23, 6  ;;  %v5642_v58 = vrot.slane %v8151_v0, 6  ;;  %v5604_v19 = vld [vmem:[#allocation4 + $0x8] sm:$0x80]  ;;  %v5418_v18 = vld [vmem:[#allocation4 + $0x8] sm:$0x1]  ;;  %9123 = vmatpush3.bf16.msra.mxu0 %v9624_v14 }
 0x417   :  { %5529 = vst [vmem:[#allocation5 + $0x20] sm:$0x22] %v5514_v12  ;;  %v8132_v54 = vcombine.low %v5428_v60, %v5430_v30  ;;  %v8138_v42 = vcombine.low %v5489_v32, %v9781_v45  ;;  %v5557_v55 = vrot.slane %v5541_v15, 6  ;;  %v5618_v17 = vrot.slane %v5604_v19, 2  ;;  %v5475_v25 = vld [vmem:[#allocation4 + $0x8] sm:$0x2]  ;;  %9124 = vmatprep.subr.bf16.mxu0 %v9630_v37 }
 0x418   :  { %v5476_v46 = vld [vmem:[#allocation4 + $0x8] sm:$0x4]  ;;  %6820 = vmatprep.mubr.bf16.mxu1 %v8157_v16  ;;  %v11435_v21 = vld [vmem:[#allocation5 + $0x10] sm:$0xff]  ;;  %5592 = vst [vmem:[#allocation5 + $0x20] sm:$0x44] %v5578_v39  ;;  %v8133_v7 = vcombine.low %v9781_v45, %v5418_v18  ;;  %v5491_v51 = vrot.slane %v5475_v25, 1 }
 0x419   :  { %v9632_v26 = vld [vmem:[%s11891_s7 + $0x108] sm:$0xff]   ;;  %5656 = vst [vmem:[#allocation5 + $0x20] sm:$0x88] %v5642_v58  ;;  %v5493_v47 = vrot.slane %v5476_v46, 2  ;;  %6821 = vmatmul.mubr.bf16.vlgmr.msra.gmra.mrb[160].mxu1 %v8156_v22  ;;  %v8159_v2 = vcombine.high %v11435_v21, %v11435_v21  ;;  %v9634_v57 = vld [vmem:[%s11891_s7 + $0x150] sm:$0xff]   ;;  %v5515_v38 = vrot.slane %v8138_v42, 7  ;;  %v8146_v40 = vcombine.low %v5555_v20, %v5557_v55 }
 0x41a   :  { %v5419_v3 = vld [vmem:[#allocation4 + $0x8] sm:$0x2]  ;;  %5466 = vst [vmem:[#allocation5 + $0x28] sm:$0x11] %v8132_v54  ;;  %v5420_v33 = vld [vmem:[#allocation4 + $0x8] sm:$0x4]  ;;  %9145 = vmatpush3.bf16.msra.mxu1 %v9625_v27  ;;  %v8152_v43 = vcombine.high %v5618_v17, %v9781_v45  ;;  %9125 = vmatpush3.bf16.msra.mxu0 %v9632_v26  ;;  %v8158_v39 = vcombine.low %v11435_v21, %v11435_v21 }
 0x41b   :  { %v5477_v8 = vld [vmem:[#allocation4 + $0x8] sm:$0x8]  ;;  %5467 = vst [vmem:[#allocation5 + $0x30] sm:$0x11] %v8133_v7  ;;  %v8139_v11 = vcombine.low %v5491_v51, %v5493_v47  ;;  %v5432_v36 = vrot.slane %v5419_v3, 1  ;;  %v5434_v52 = vrot.slane %v5420_v33, 2  ;;  %6860 = vmatprep.mubr.bf16.mxu0 %v8159_v2  ;;  %9146 = vmatprep.subr.bf16.mxu1 %v9631_v34 }
 0x41c   :  { %v9633_v48 = vld [vmem:[%s11891_s7 + $0x188] sm:$0xff]   ;;  %v9635_v4 = vld [vmem:[%s11891_s7 + $0x1d0] sm:$0xff]   ;;  %5530 = vst [vmem:[#allocation5 + $0x28] sm:$0x22] %v5515_v38  ;;  %v5579_v10 = vrot.slane %v8146_v40, 6  ;;  %v5495_v63 = vrot.slane %v5477_v8, 3  ;;  %9126 = vmatprep.subr.bf16.mxu0 %v9634_v57 }
 0x41d   :  { %v11453_v9 = vld [vmem:[#allocation5 + $0x18] sm:$0xff]  ;;  %v9636_v6 = vld [vmem:[%s11891_s7 + $0x110] sm:$0xff]   ;;  %v5643_v29 = vrot.slane %v8152_v43, 6  ;;  %v5516_v13 = vrot.slane %v8139_v11, 7  ;;  %v8134_v50 = vcombine.low %v5432_v36, %v5434_v52  ;;  %v9638_v5 = vld [vmem:[%s11891_s7 + $0x158] sm:$0xff]  }
 0x41e   :  { %v8161_v14 = vcombine.high %v11453_v9, %v11453_v9  ;;  %5593 = vst [vmem:[#allocation5 + $0x28] sm:$0x44] %v5579_v10  ;;  %v8140_v62 = vcombine.low %v5495_v63, %v9781_v45  ;;  %9147 = vmatpush3.bf16.msra.mxu1 %v9633_v48  ;;  %v9637_v24 = vld [vmem:[%s11891_s7 + $0x190] sm:$0xff]   ;;  %v9639_v61 = vld [vmem:[%s11891_s7 + $0x1d8] sm:$0xff]   ;;  %9127 = vmatpush3.bf16.msra.mxu0 %v9636_v6  ;;  %v9642_v44 = vld [vmem:[%s11891_s7 + $0x160] sm:$0xff]  }
 0x41f   :  { %5657 = vst [vmem:[#allocation5 + $0x28] sm:$0x88] %v5643_v29  ;;  %5531 = vst [vmem:[#allocation5 + $0x30] sm:$0x22] %v5516_v13  ;;  %9148 = vmatprep.subr.bf16.mxu1 %v9635_v4  ;;  %v9640_v45 = vld [vmem:[%s11891_s7 + $0x118] sm:$0xff]   ;;  %9128 = vmatprep.subr.bf16.mxu0 %v9638_v5  ;;  %v9643_v59 = vld [vmem:[%s11891_s7 + $0x1e0] sm:$0xff]   ;;  %v8160_v42 = vcombine.low %v11453_v9, %v11453_v9 }
 0x420   :  { %5468 = vst [vmem:[#allocation5 + $0x38] sm:$0x11] %v8134_v50  ;;  %6900 = vmatprep.mubr.bf16.mxu1 %v8161_v14  ;;  %v5517_v56 = vrot.slane %v8140_v62, 7  ;;  %v9641_v37 = vld [vmem:[%s11891_s7 + $0x198] sm:$0xff]   ;;  %v9644_v35 = vld [vmem:[%s11891_s7 + $0x120] sm:$0xff]   ;;  %v9646_v60 = vld [vmem:[%s11891_s7 + $0x168] sm:$0xff]  }
 0x421   :  { %v9645_v41 = vld [vmem:[%s11891_s7 + $0x1a0] sm:$0xff]   ;;  %v9647_v49 = vld [vmem:[%s11891_s7 + $0x1e8] sm:$0xff]   ;;  %v9650_v23 = vld [vmem:[%s11891_s7 + $0x170] sm:$0xff]  }
 0x422   :  { %5532 = vst [vmem:[#allocation5 + $0x38] sm:$0x22] %v5517_v56  ;;  %9149 = vmatpush3.bf16.msra.mxu1 %v9637_v24  ;;  %9129 = vmatpush3.bf16.msra.mxu0 %v9640_v45  ;;  %v9648_v27 = vld [vmem:[%s11891_s7 + $0x128] sm:$0xff]   ;;  %v9651_v1 = vld [vmem:[%s11891_s7 + $0x1f0] sm:$0xff]   ;;  %v9654_v15 = vld [vmem:[%s11891_s7 + $0x178] sm:$0xff]  }
 0x423   :  { %9150 = vmatprep.subr.bf16.mxu1 %v9639_v61  ;;  %9130 = vmatprep.subr.bf16.mxu0 %v9642_v44  ;;  %v9649_v0 = vld [vmem:[%s11891_s7 + $0x1a8] sm:$0xff]   ;;  %v9652_v31 = vld [vmem:[%s11891_s7 + $0x130] sm:$0xff]   ;;  %v9655_v34 = vld [vmem:[%s11891_s7 + $0x1f8] sm:$0xff]  }
 0x424   :  { %v9653_v28 = vld [vmem:[%s11891_s7 + $0x1b0] sm:$0xff]   ;;  %v9656_v12 = vld [vmem:[%s11891_s7 + $0x138] sm:$0xff]   ;;  %v9658_v30 = vld [vmem:[%s11891_s7 + $0x240] sm:$0xff]  }
 0x425   :  { %v9657_v32 = vld [vmem:[%s11891_s7 + $0x1b8] sm:$0xff]   ;;  %v9659_v20 = vld [vmem:[%s11891_s7 + $0x2c0] sm:$0xff]   ;;  %v11530_v22 = vld [vmem:[#allocation5 + $0x20] sm:$0xff] }
 0x426   :  { %9151 = vmatpush3.bf16.msra.mxu1 %v9641_v37  ;;  %9131 = vmatpush3.bf16.msra.mxu0 %v9644_v35  ;;  %v9660_v16 = vld [vmem:[%s11891_s7 + $0x200] sm:$0xff]   ;;  %v11537_v58 = vld [vmem:[#allocation5 + $0x28] sm:$0xff]  ;;  %v9666_v19 = vld [vmem:[%s11891_s7 + $0x248] sm:$0xff]   ;;  %v8163_v18 = vcombine.high %v11530_v22, %v11530_v22  ;;  %v8162_v24 = vcombine.low %v11530_v22, %v11530_v22 }
 0x427   :  { %9152 = vmatprep.subr.bf16.mxu1 %v9643_v59  ;;  %9132 = vmatprep.subr.bf16.mxu0 %v9646_v60  ;;  %v9663_v54 = vld [vmem:[%s11891_s7 + $0x280] sm:$0xff]   ;;  %v9667_v55 = vld [vmem:[%s11891_s7 + $0x2c8] sm:$0xff]   ;;  %v8165_v17 = vcombine.high %v11537_v58, %v11537_v58  ;;  %v9670_v46 = vld [vmem:[%s11891_s7 + $0x250] sm:$0xff]   ;;  %v8164_v37 = vcombine.low %v11537_v58, %v11537_v58 }
 0x428   :  { %v9668_v25 = vld [vmem:[%s11891_s7 + $0x208] sm:$0xff]   ;;  %v9671_v26 = vld [vmem:[%s11891_s7 + $0x2d0] sm:$0xff]   ;;  %v9674_v51 = vld [vmem:[%s11891_s7 + $0x258] sm:$0xff]  }
 0x429   :  { %v9669_v21 = vld [vmem:[%s11891_s7 + $0x288] sm:$0xff]   ;;  %v9672_v7 = vld [vmem:[%s11891_s7 + $0x210] sm:$0xff]   ;;  %v9675_v3 = vld [vmem:[%s11891_s7 + $0x2d8] sm:$0xff]  }
 0x42a   :  { %9153 = vmatpush3.bf16.msra.mxu1 %v9645_v41  ;;  %9133 = vmatpush3.bf16.msra.mxu0 %v9648_v27  ;;  %v9673_v47 = vld [vmem:[%s11891_s7 + $0x290] sm:$0xff]   ;;  %v9676_v2 = vld [vmem:[%s11891_s7 + $0x218] sm:$0xff]   ;;  %v9678_v57 = vld [vmem:[%s11891_s7 + $0x260] sm:$0xff]  }
 0x42b   :  { %9154 = vmatprep.subr.bf16.mxu1 %v9647_v49  ;;  %9134 = vmatprep.subr.bf16.mxu0 %v9650_v23  ;;  %v9677_v38 = vld [vmem:[%s11891_s7 + $0x298] sm:$0xff]   ;;  %v9679_v40 = vld [vmem:[%s11891_s7 + $0x2e0] sm:$0xff]   ;;  %v9682_v8 = vld [vmem:[%s11891_s7 + $0x268] sm:$0xff]  }
 0x42c   :  { %v9680_v33 = vld [vmem:[%s11891_s7 + $0x220] sm:$0xff]   ;;  %v9683_v43 = vld [vmem:[%s11891_s7 + $0x2e8] sm:$0xff]   ;;  %v9686_v36 = vld [vmem:[%s11891_s7 + $0x270] sm:$0xff]  }
 0x42d   :  { %v9681_v48 = vld [vmem:[%s11891_s7 + $0x2a0] sm:$0xff]   ;;  %v9684_v11 = vld [vmem:[%s11891_s7 + $0x228] sm:$0xff]   ;;  %v9687_v4 = vld [vmem:[%s11891_s7 + $0x2f0] sm:$0xff]  }
 0x42e   :  { %9155 = vmatpush3.bf16.msra.mxu1 %v9649_v0  ;;  %9135 = vmatpush3.bf16.msra.mxu0 %v9652_v31  ;;  %v9685_v52 = vld [vmem:[%s11891_s7 + $0x2a8] sm:$0xff]   ;;  %v9688_v10 = vld [vmem:[%s11891_s7 + $0x230] sm:$0xff]   ;;  %v9690_v63 = vld [vmem:[%s11891_s7 + $0x278] sm:$0xff]  }
 0x42f   :  { %9156 = vmatprep.subr.bf16.mxu1 %v9651_v1  ;;  %9136 = vmatprep.subr.bf16.mxu0 %v9654_v15  ;;  %v9689_v9 = vld [vmem:[%s11891_s7 + $0x2b0] sm:$0xff]   ;;  %v9691_v6 = vld [vmem:[%s11891_s7 + $0x2f8] sm:$0xff]   ;;  %v9694_v13 = vld [vmem:[%s11891_s7 + $0x340] sm:$0xff]  }
 0x430   :  { %v9692_v29 = vld [vmem:[%s11891_s7 + $0x238] sm:$0xff]   ;;  %v9695_v14 = vld [vmem:[%s11891_s7 + $0x3c0] sm:$0xff]   ;;  %v11645_v61 = vld [vmem:[#allocation5 + $0x38] sm:$0xff] }
 0x431   :  { %v9693_v50 = vld [vmem:[%s11891_s7 + $0x2b8] sm:$0xff]   ;;  %v11638_v5 = vld [vmem:[#allocation5 + $0x30] sm:$0xff]  ;;  %v9702_v56 = vld [vmem:[%s11891_s7 + $0x348] sm:$0xff]   ;;  %v8169_v35 = vcombine.high %v11645_v61, %v11645_v61 }
 0x432   :  { %9157 = vmatpush3.bf16.msra.mxu1 %v9653_v28  ;;  %9137 = vmatpush3.bf16.msra.mxu0 %v9656_v12  ;;  %v9696_v62 = vld [vmem:[%s11891_s7 + $0x300] sm:$0xff]   ;;  %v8167_v45 = vcombine.high %v11638_v5, %v11638_v5  ;;  %v9703_v59 = vld [vmem:[%s11891_s7 + $0x3c8] sm:$0xff]   ;;  %v9706_v41 = vld [vmem:[%s11891_s7 + $0x350] sm:$0xff]  }
 0x433   :  { %9158 = vmatprep.subr.bf16.mxu1 %v9655_v34  ;;  %9166 = vmatprep.subr.bf16.mxu0 %v9658_v30  ;;  %v9699_v44 = vld [vmem:[%s11891_s7 + $0x380] sm:$0xff]   ;;  %v9704_v60 = vld [vmem:[%s11891_s7 + $0x308] sm:$0xff]   ;;  %v9707_v27 = vld [vmem:[%s11891_s7 + $0x3d0] sm:$0xff]  }
 0x434   :  { %v9705_v49 = vld [vmem:[%s11891_s7 + $0x388] sm:$0xff]   ;;  %v9708_v23 = vld [vmem:[%s11891_s7 + $0x310] sm:$0xff]   ;;  %v9710_v0 = vld [vmem:[%s11891_s7 + $0x358] sm:$0xff]  }
 0x435   :  { %6861 = vmatmul.mubr.bf16.vlgmr.msra.gmra.mrb[164].mxu0 %v8158_v39  ;;  %v9709_v1 = vld [vmem:[%s11891_s7 + $0x390] sm:$0xff]   ;;  %v9711_v31 = vld [vmem:[%s11891_s7 + $0x3d8] sm:$0xff]   ;;  %v9714_v28 = vld [vmem:[%s11891_s7 + $0x360] sm:$0xff]  }
 0x436   :  { %9159 = vmatpush3.bf16.msra.mxu1 %v9657_v32  ;;  %9167 = vmatpush3.bf16.msra.mxu0 %v9660_v16  ;;  %v9712_v15 = vld [vmem:[%s11891_s7 + $0x318] sm:$0xff]   ;;  %v9715_v12 = vld [vmem:[%s11891_s7 + $0x3e0] sm:$0xff]   ;;  %v9718_v32 = vld [vmem:[%s11891_s7 + $0x368] sm:$0xff]  }
 0x437   :  { %9188 = vmatprep.subr.bf16.mxu1 %v9659_v20  ;;  %6940 = vmatprep.mubr.bf16.mxu0 %v8163_v18  ;;  %v9713_v34 = vld [vmem:[%s11891_s7 + $0x398] sm:$0xff]   ;;  %v9716_v30 = vld [vmem:[%s11891_s7 + $0x320] sm:$0xff]   ;;  %v9719_v22 = vld [vmem:[%s11891_s7 + $0x3e8] sm:$0xff]  }
 0x438   :  { %9168 = vmatprep.subr.bf16.mxu0 %v9666_v19  ;;  %v9717_v20 = vld [vmem:[%s11891_s7 + $0x3a0] sm:$0xff]   ;;  %v9720_v16 = vld [vmem:[%s11891_s7 + $0x328] sm:$0xff]   ;;  %v9722_v39 = vld [vmem:[%s11891_s7 + $0x370] sm:$0xff]  }
 0x439   :  { %6901 = vmatmul.mubr.bf16.vlgmr.msra.gmra.mrb[164].mxu1 %v8160_v42  ;;  %v9721_v58 = vld [vmem:[%s11891_s7 + $0x3a8] sm:$0xff]   ;;  %v9723_v19 = vld [vmem:[%s11891_s7 + $0x3f0] sm:$0xff]  }
 0x43a   :  { %9189 = vmatpush3.bf16.msra.mxu1 %v9663_v54  ;;  %6980 = vmatprep.mubr.bf16.mxu1 %v8165_v17  ;;  %v9724_v18 = vld [vmem:[%s11891_s7 + $0x330] sm:$0xff]   ;;  %v9726_v54 = vld [vmem:[%s11891_s7 + $0x378] sm:$0xff]  }
 0x43b   :  { %9190 = vmatprep.subr.bf16.mxu1 %v9667_v55  ;;  %9169 = vmatpush3.bf16.msra.mxu0 %v9668_v25  ;;  %v9725_v42 = vld [vmem:[%s11891_s7 + $0x3b0] sm:$0xff]   ;;  %v9727_v55 = vld [vmem:[%s11891_s7 + $0x3f8] sm:$0xff]  }
 0x43c   :  { %9170 = vmatprep.subr.bf16.mxu0 %v9670_v46  ;;  %v9728_v17 = vld [vmem:[%s11891_s7 + $0x338] sm:$0xff]   ;;  %v8166_v46 = vcombine.low %v11638_v5, %v11638_v5 }
 0x43d   :  { %v9729_v25 = vld [vmem:[%s11891_s7 + $0x3b8] sm:$0xff]  }
 0x43e   :  { %9191 = vmatpush3.bf16.msra.mxu1 %v9669_v21  ;;  %v8168_v21 = vcombine.low %v11645_v61, %v11645_v61  ;;  %v9740_v61 = vld [vmem:[%s11894_s10 + $0x10] sm:$0xff]  }
 0x43f   :  { %9192 = vmatprep.subr.bf16.mxu1 %v9671_v26  ;;  %9171 = vmatpush3.bf16.msra.mxu0 %v9672_v7 }
 0x440   :  { %9172 = vmatprep.subr.bf16.mxu0 %v9674_v51 }
 0x442   :  { %9193 = vmatpush3.bf16.msra.mxu1 %v9673_v47 }
 0x443   :  { %9194 = vmatprep.subr.bf16.mxu1 %v9675_v3  ;;  %9173 = vmatpush3.bf16.msra.mxu0 %v9676_v2 }
 0x444   :  { %9174 = vmatprep.subr.bf16.mxu0 %v9678_v57 }
 0x446   :  { %9195 = vmatpush3.bf16.msra.mxu1 %v9677_v38 }
 0x447   :  { %9196 = vmatprep.subr.bf16.mxu1 %v9679_v40  ;;  %9175 = vmatpush3.bf16.msra.mxu0 %v9680_v33 }
 0x448   :  { %9176 = vmatprep.subr.bf16.mxu0 %v9682_v8 }
 0x44a   :  { %9197 = vmatpush3.bf16.msra.mxu1 %v9681_v48  ;;  %v9730_v48 = vld [vmem:[%s11894_s10 + $0x40] sm:$0xff]  }
 0x44b   :  { %9198 = vmatprep.subr.bf16.mxu1 %v9683_v43  ;;  %9177 = vmatpush3.bf16.msra.mxu0 %v9684_v11  ;;  %v9731_v43 = vld [vmem:[%s11894_s10 + $0xc0] sm:$0xff]  }
 0x44c   :  { %9178 = vmatprep.subr.bf16.mxu0 %v9686_v36  ;;  %v9732_v11 = vld [vmem:[%s11894_s10] sm:$0xff]  }
 0x44d   :  { %v9733_v36 = vld [vmem:[%s11894_s10 + $0x80] sm:$0xff]  }
 0x44e   :  { %9199 = vmatpush3.bf16.msra.mxu1 %v9685_v52  ;;  %v9734_v52 = vld [vmem:[%s11894_s10 + $0x48] sm:$0xff]  }
 0x44f   :  { %9200 = vmatprep.subr.bf16.mxu1 %v9687_v4  ;;  %9179 = vmatpush3.bf16.msra.mxu0 %v9688_v10  ;;  %v9735_v4 = vld [vmem:[%s11894_s10 + $0xc8] sm:$0xff]  }
 0x450   :  { %9180 = vmatprep.subr.bf16.mxu0 %v9690_v63  ;;  %v9736_v10 = vld [vmem:[%s11894_s10 + $0x8] sm:$0xff]  }
 0x451   :  { %v9737_v63 = vld [vmem:[%s11894_s10 + $0x88] sm:$0xff]  }
 0x452   :  { %9201 = vmatpush3.bf16.msra.mxu1 %v9689_v9 }
 0x453   :  { %9202 = vmatprep.subr.bf16.mxu1 %v9691_v6  ;;  %9181 = vmatpush3.bf16.msra.mxu0 %v9692_v29  ;;  %v9738_v6 = vld [vmem:[%s11894_s10 + $0x50] sm:$0xff]  }
 0x454   :  { %9210 = vmatprep.subr.bf16.mxu0 %v9694_v13  ;;  %v9739_v13 = vld [vmem:[%s11894_s10 + $0xd0] sm:$0xff]  }
 0x456   :  { %9203 = vmatpush3.bf16.msra.mxu1 %v9693_v50  ;;  %6941 = vmatmul.mubr.bf16.vlgmr.msra.gmra.mrb[168].mxu0 %v8162_v24 }
 0x457   :  { %9232 = vmatprep.subr.bf16.mxu1 %v9695_v14  ;;  %9211 = vmatpush3.bf16.msra.mxu0 %v9696_v62 }
 0x458   :  { %7020 = vmatprep.mubr.bf16.mxu0 %v8167_v45  ;;  %9212 = vmatprep.subr.bf16.mxu0 %v9702_v56  ;;  %v9741_v56 = vld [vmem:[%s11894_s10 + $0x90] sm:$0xff]  }
 0x459   :  { %6981 = vmatmul.mubr.bf16.vlgmr.msra.gmra.mrb[168].mxu1 %v8164_v37 }
 0x45a   :  { %9233 = vmatpush3.bf16.msra.mxu1 %v9699_v44  ;;  %7060 = vmatprep.mubr.bf16.mxu1 %v8169_v35 }
 0x45b   :  { %9234 = vmatprep.subr.bf16.mxu1 %v9703_v59  ;;  %9213 = vmatpush3.bf16.msra.mxu0 %v9704_v60  ;;  %v9742_v59 = vld [vmem:[%s11894_s10 + $0x58] sm:$0xff]  }
 0x45c   :  { %9214 = vmatprep.subr.bf16.mxu0 %v9706_v41  ;;  %v9743_v60 = vld [vmem:[%s11894_s10 + $0xd8] sm:$0xff]  }
 0x45e   :  { %9235 = vmatpush3.bf16.msra.mxu1 %v9705_v49  ;;  %v9744_v49 = vld [vmem:[%s11894_s10 + $0x18] sm:$0xff]  }
 0x45f   :  { %9236 = vmatprep.subr.bf16.mxu1 %v9707_v27  ;;  %9215 = vmatpush3.bf16.msra.mxu0 %v9708_v23  ;;  %v9745_v27 = vld [vmem:[%s11894_s10 + $0x98] sm:$0xff]   ;;  %v9746_v23 = vld [vmem:[%s11894_s10 + $0x60] sm:$0xff]  }
 0x460   :  { %9216 = vmatprep.subr.bf16.mxu0 %v9710_v0  ;;  %v9747_v0 = vld [vmem:[%s11894_s10 + $0xe0] sm:$0xff]  }
 0x462   :  { %9237 = vmatpush3.bf16.msra.mxu1 %v9709_v1  ;;  %v9748_v1 = vld [vmem:[%s11894_s10 + $0x20] sm:$0xff]  }
 0x463   :  { %9238 = vmatprep.subr.bf16.mxu1 %v9711_v31  ;;  %9217 = vmatpush3.bf16.msra.mxu0 %v9712_v15  ;;  %v9749_v31 = vld [vmem:[%s11894_s10 + $0xa0] sm:$0xff]   ;;  %v9750_v15 = vld [vmem:[%s11894_s10 + $0x68] sm:$0xff]  }
 0x464   :  { %9218 = vmatprep.subr.bf16.mxu0 %v9714_v28  ;;  %v9751_v28 = vld [vmem:[%s11894_s10 + $0xe8] sm:$0xff]  }
 0x466   :  { %9239 = vmatpush3.bf16.msra.mxu1 %v9713_v34  ;;  %v9752_v34 = vld [vmem:[%s11894_s10 + $0x28] sm:$0xff]  }
 0x467   :  { %9240 = vmatprep.subr.bf16.mxu1 %v9715_v12  ;;  %9219 = vmatpush3.bf16.msra.mxu0 %v9716_v30  ;;  %v9753_v12 = vld [vmem:[%s11894_s10 + $0xa8] sm:$0xff]   ;;  %v9754_v30 = vld [vmem:[%s11894_s10 + $0x70] sm:$0xff]  }
 0x468   :  { %9220 = vmatprep.subr.bf16.mxu0 %v9718_v32  ;;  %v9755_v32 = vld [vmem:[%s11894_s10 + $0xf0] sm:$0xff]  }
 0x46a   :  { %9241 = vmatpush3.bf16.msra.mxu1 %v9717_v20  ;;  %v9756_v20 = vld [vmem:[%s11894_s10 + $0x30] sm:$0xff]  }
 0x46b   :  { %9242 = vmatprep.subr.bf16.mxu1 %v9719_v22  ;;  %9221 = vmatpush3.bf16.msra.mxu0 %v9720_v16  ;;  %v9757_v22 = vld [vmem:[%s11894_s10 + $0xb0] sm:$0xff]   ;;  %v9758_v16 = vld [vmem:[%s11894_s10 + $0x78] sm:$0xff]  }
 0x46c   :  { %9222 = vmatprep.subr.bf16.mxu0 %v9722_v39  ;;  %v9759_v39 = vld [vmem:[%s11894_s10 + $0xf8] sm:$0xff]  }
 0x46e   :  { %9243 = vmatpush3.bf16.msra.mxu1 %v9721_v58  ;;  %v9760_v58 = vld [vmem:[%s11894_s10 + $0x38] sm:$0xff]  }
 0x46f   :  { %9244 = vmatprep.subr.bf16.mxu1 %v9723_v19  ;;  %9223 = vmatpush3.bf16.msra.mxu0 %v9724_v18  ;;  %v9761_v19 = vld [vmem:[%s11894_s10 + $0xb8] sm:$0xff]  }
 0x470   :  { %9224 = vmatprep.subr.bf16.mxu0 %v9726_v54 }
 0x472   :  { %9245 = vmatpush3.bf16.msra.mxu1 %v9725_v42 }
 0x473   :  { %9246 = vmatprep.subr.bf16.mxu1 %v9727_v55  ;;  %9225 = vmatpush3.bf16.msra.mxu0 %v9728_v17 }
 0x474   :  { %9254 = vmatprep.subr.bf16.mxu0 %v9730_v48 }
 0x476   :  { %9247 = vmatpush3.bf16.msra.mxu1 %v9729_v25  ;;  %7021 = vmatmul.mubr.bf16.vlgmr.msra.gmra.mrb[172].mxu0 %v8166_v46 }
 0x477   :  { %9276 = vmatprep.subr.bf16.mxu1 %v9731_v43  ;;  %9255 = vmatpush3.bf16.msra.mxu0 %v9732_v11 }
 0x478   :  { %9256 = vmatprep.subr.bf16.mxu0 %v9734_v52 }
 0x479   :  { %7061 = vmatmul.mubr.bf16.vlgmr.msra.gmra.mrb[172].mxu1 %v8168_v21 }
 0x47a   :  { %9277 = vmatpush3.bf16.msra.mxu1 %v9733_v36 }
 0x47b   :  { %9278 = vmatprep.subr.bf16.mxu1 %v9735_v4  ;;  %9257 = vmatpush3.bf16.msra.mxu0 %v9736_v10 }
 0x47c   :  { %9258 = vmatprep.subr.bf16.mxu0 %v9738_v6 }
 0x47e   :  { %9279 = vmatpush3.bf16.msra.mxu1 %v9737_v63 }
 0x47f   :  { %9280 = vmatprep.subr.bf16.mxu1 %v9739_v13  ;;  %9259 = vmatpush3.bf16.msra.mxu0 %v9740_v61 }
 0x480   :  { %9260 = vmatprep.subr.bf16.mxu0 %v9742_v59 }
 0x482   :  { %9281 = vmatpush3.bf16.msra.mxu1 %v9741_v56 }
 0x483   :  { %9282 = vmatprep.subr.bf16.mxu1 %v9743_v60  ;;  %9261 = vmatpush3.bf16.msra.mxu0 %v9744_v49  ;;  %v7068_v60 = vld [vmem:[%s11895_s8] sm:$0x1] }
 0x484   :  { %9262 = vmatprep.subr.bf16.mxu0 %v9746_v23 }
 0x486   :  { %9283 = vmatpush3.bf16.msra.mxu1 %v9745_v27  ;;  %v7069_v27 = vld [vmem:[%s11896_s9] sm:$0x1] }
 0x487   :  { %9284 = vmatprep.subr.bf16.mxu1 %v9747_v0  ;;  %9263 = vmatpush3.bf16.msra.mxu0 %v9748_v1 }
 0x488   :  { %9264 = vmatprep.subr.bf16.mxu0 %v9750_v15 }
 0x48a   :  { %9285 = vmatpush3.bf16.msra.mxu1 %v9749_v31 }
 0x48b   :  { %9286 = vmatprep.subr.bf16.mxu1 %v9751_v28  ;;  %9265 = vmatpush3.bf16.msra.mxu0 %v9752_v34 }
 0x48c   :  { %9266 = vmatprep.subr.bf16.mxu0 %v9754_v30 }
 0x48e   :  { %9287 = vmatpush3.bf16.msra.mxu1 %v9753_v12 }
 0x48f   :  { %9288 = vmatprep.subr.bf16.mxu1 %v9755_v32  ;;  %9267 = vmatpush3.bf16.msra.mxu0 %v9756_v20 }
 0x490   :  { %9268 = vmatprep.subr.bf16.mxu0 %v9758_v16 }
 0x492   :  { %9289 = vmatpush3.bf16.msra.mxu1 %v9757_v22 }
 0x493   :  { %9290 = vmatprep.subr.bf16.mxu1 %v9759_v39  ;;  %9269 = vmatpush3.bf16.msra.mxu0 %v9760_v58 }
 0x496   :  { %9291 = vmatpush3.bf16.msra.mxu1 %v9761_v19  ;;  %v9782_v19 = vmov 0.0  }
 0x497   :  { %9307 = vmatprep.subr.bf16.mxu0 %v9782_v19 }
 0x4e8   :  { %v9094_v26 = vpop.f32.mrb[160].mxu0 }
 0x4e9   :  { %v9095_v7 = vpop.f32.mrb[161].mxu0 }
 0x4ea   :  { %v9096_v47 = vadd.f32 %v9095_v7, %v9094_v26  ;;  %v9097_v3 = vpop.f32.mrb[162].mxu0 }
 0x4eb   :  { %v9098_v57 = vpop.f32.mrb[163].mxu0 }
 0x4ec   :  { %v9116_v51 = vpop.f32.mrb[160].mxu1 }
 0x4ed   :  { %v9117_v2 = vpop.f32.mrb[161].mxu1 }
 0x4ee   :  { %v9118_v38 = vadd.f32 %v9117_v2, %v9116_v51  ;;  %v9119_v40 = vpop.f32.mrb[162].mxu1 }
 0x4ef   :  { %v9120_v33 = vpop.f32.mrb[163].mxu1 }
 0x4f0   :  { %v6823_v8 = vadd.f32 %v9118_v38, %v9096_v47 }
 0x508   :  { %v9138_v9 = vpop.f32.mrb[164].mxu0 }
 0x509   :  { %v9139_v29 = vpop.f32.mrb[165].mxu0 }
 0x50a   :  { %v9140_v14 = vadd.f32 %v9139_v29, %v9138_v9  ;;  %v9141_v5 = vpop.f32.mrb[166].mxu0 }
 0x50b   :  { %v9142_v24 = vpop.f32.mrb[167].mxu0 }
 0x50c   :  { %v9160_v50 = vpop.f32.mrb[164].mxu1  ;;  %v6863_v45 = vadd.f32 %v9140_v14, %v6823_v8 }
 0x50d   :  { %v9161_v62 = vpop.f32.mrb[165].mxu1 }
 0x50e   :  { %v9162_v44 = vadd.f32 %v9161_v62, %v9160_v50  ;;  %v9163_v37 = vpop.f32.mrb[166].mxu1 }
 0x50f   :  { %v9164_v35 = vpop.f32.mrb[167].mxu1 }
 0x510   :  { %v6903_v41 = vadd.f32 %v9162_v44, %v6863_v45 }
 0x529   :  { %v9182_v18 = vpop.f32.mrb[168].mxu0 }
 0x52a   :  { %v9183_v54 = vpop.f32.mrb[169].mxu0 }
 0x52b   :  { %v9184_v55 = vadd.f32 %v9183_v54, %v9182_v18  ;;  %v9185_v17 = vpop.f32.mrb[170].mxu0  ;;  %v9765_v18 = vld [vmem:[%s11897_s13] sm:$0xff]   ;;  %v9766_v54 = vld [vmem:[%s11897_s13 + $0x8] sm:$0xff]  }
 0x52c   :  { %v9204_v42 = vpop.f32.mrb[168].mxu1  ;;  %v9186_v46 = vpop.f32.mrb[171].mxu0  ;;  %v9769_v17 = vld [vmem:[%s11897_s13 + $0x20] sm:$0xff]  }
 0x52d   :  { %v9205_v25 = vpop.f32.mrb[169].mxu1  ;;  %v6943_v21 = vadd.f32 %v9184_v55, %v6903_v41  ;;  %v9768_v55 = vld [vmem:[%s11897_s13 + $0x18] sm:$0xff]   ;;  %v9771_v46 = vld [vmem:[%s11897_s13 + $0x30] sm:$0xff]  }
 0x52e   :  { %v9206_v26 = vadd.f32 %v9205_v25, %v9204_v42  ;;  %v9207_v7 = vpop.f32.mrb[170].mxu1  ;;  %v9767_v42 = vld [vmem:[%s11897_s13 + $0x10] sm:$0xff]   ;;  %v9770_v25 = vld [vmem:[%s11897_s13 + $0x28] sm:$0xff]  }
 0x52f   :  { %v9208_v51 = vpop.f32.mrb[171].mxu1 }
 0x530   :  { %v6983_v47 = vadd.f32 %v9206_v26, %v6943_v21  ;;  %v9772_v21 = vld [vmem:[%s11897_s13 + $0x38] sm:$0xff]  }
 0x549   :  { %v9226_v3 = vpop.f32.mrb[172].mxu0 }
 0x54a   :  { %v9227_v2 = vpop.f32.mrb[173].mxu0 }
 0x54b   :  { %v9228_v38 = vadd.f32 %v9227_v2, %v9226_v3  ;;  %v9229_v40 = vpop.f32.mrb[174].mxu0 }
 0x54c   :  { %v9248_v57 = vpop.f32.mrb[172].mxu1  ;;  %v9230_v8 = vpop.f32.mrb[175].mxu0 }
 0x54d   :  { %v9249_v33 = vpop.f32.mrb[173].mxu1  ;;  %v7023_v48 = vadd.f32 %v9228_v38, %v6983_v47 }
 0x54e   :  { %v9250_v43 = vadd.f32 %v9249_v33, %v9248_v57  ;;  %v9251_v11 = vpop.f32.mrb[174].mxu1 }
 0x54f   :  { %v9252_v36 = vpop.f32.mrb[175].mxu1 }
 0x550   :  { %v7063_v52 = vadd.f32 %v9250_v43, %v7023_v48 }
 0x552   :  { %v7070_v4 = vrot.slane %v7063_v52, 4  ;;  %v7077_v10 = vmul.f32 %v7063_v52, %v7063_v52 }
 0x554   :  { %v7071_v63 = vadd.f32 %v7070_v4, %v7063_v52  ;;  %v7078_v9 = vrot.slane %v7077_v10, 4 }
 0x556   :  { %v7072_v6 = vrot.slane %v7071_v63, 2  ;;  %v7079_v29 = vadd.f32 %v7078_v9, %v7077_v10 }
 0x558   :  { %v7073_v13 = vadd.f32 %v7072_v6, %v7071_v63  ;;  %v7080_v50 = vrot.slane %v7079_v29, 2 }
 0x55a   :  { %v7074_v14 = vrot.slane %v7073_v13, 1  ;;  %v7081_v5 = vadd.f32 %v7080_v50, %v7079_v29 }
 0x55c   :  { %v7075_v62 = vadd.f32 %v7074_v14, %v7073_v13  ;;  %v7082_v24 = vrot.slane %v7081_v5, 1 }
 0x55e   :  { %v7076_v61 = vmul.f32 0.125, %v7075_v62  ;;  %v7083_v56 = vadd.f32 %v7082_v24, %v7081_v5 }
 0x560   :  { %v7084_v45 = vmul.f32 0.125, %v7083_v56  ;;  %v7085_v44 = vmul.f32 %v7076_v61, %v7076_v61 }
 0x562   :  { %v7086_v37 = vsub.f32 %v7084_v45, %v7085_v44 }
 0x564   :  { %v7087_v59 = vmax.f32 %v7086_v37, 0.0  ;;  %v7463_v37 = vld [vmem:[%s11898_s11] sm:$0x1] }
 0x566   :  { %v7088_v35 = vadd.f32 1e-05, %v7087_v59 }
 0x568   :  { %9777 = vrsqrt.f32 %v7088_v35 }
 0x572   :  { %v9778_v41 = vpop.eup %9777 }
 0x573   :  { %v7090_v49 = vmul.f32 %v9778_v41, %v7068_v60  ;;  %v7464_v60 = vld [vmem:[%s11899_s12] sm:$0x1] }
 0x575   :  { %v7091_v23 = vmul.f32 %v7090_v49, %v7076_v61  ;;  %v7096_v0 = vrot.slane %v7090_v49, %v10967_v53 }
 0x577   :  { %v7092_v1 = vsub.f32 %v7069_v27, %v7091_v23  ;;  %v7097_v31 = vmul.f32 %v7096_v0, %v7063_v52 }
 0x579   :  { %v7102_v15 = vrot.slane %v7092_v1, %v10967_v53 }
 0x57b   :  { %v7104_v28 = vadd.f32 %v7102_v15, %v7097_v31 }
 0x57d   :  { %v7105_v34 = vmax.f32 %v7104_v28, 0.0  ;;  %v8333_v28 = vld [vmem:[%s11900_s14] ss:$0 sm:$0xff] }
 0x57f   :  { %v7106_v12 = vpack.c.bf16 %v7105_v34, %v7105_v34 }
 0x581   :  { %7107 = vst [vmem:[#allocation6] sm:$0xf] %v7106_v12 }
 0x588   :  { %v9762_v30 = vld [vmem:[#allocation6] ss:$0 sps:$4 sm:$0x22]  }
 0x589   :  { %v9763_v32 = vld [vmem:[#allocation6] ss:$0 sps:$4 sm:$0x88]   ;;  %v7115_v20 = vrot.slane %v9762_v30, 1 }
 0x58a   :  { %v7125_v22 = vrot.slane %v9763_v32, 3  ;;  %v9764_v16 = vld [vmem:[#allocation6] ss:$0 sps:$4 sm:$0x44]  }
 0x58b   :  { %7415 = vmatprep.mubr.bf16.mxu0 %v7115_v20  ;;  %v7108_v39 = vld [vmem:[#allocation6] sm:$0x1]  ;;  %v7120_v58 = vrot.slane %v9764_v16, 2 }
 0x58c   :  { %7455 = vmatprep.mubr.bf16.mxu1 %v7125_v22  ;;  %7416 = vmatmul.mubr.bf16.vlgmr.msra.gmra.mrb[176].mxu0 %v7108_v39 }
 0x58d   :  { %7456 = vmatmul.mubr.bf16.vlgmr.msra.gmra.mrb[176].mxu1 %v7120_v58  ;;  %9323 = vmatprep.mubr.msk.bf16.mxu0 %vm9783_vm0, %v9782_v19 }
 0x58e   :  { %9308 = vmatpush3.bf16.msra.mxu0 %v9765_v18 }
 0x58f   :  { %9309 = vmatprep.subr.bf16.mxu0 %v9782_v19 }
 0x592   :  { %9310 = vmatpush3.bf16.msra.mxu0 %v9766_v54 }
 0x593   :  { %9311 = vmatprep.subr.bf16.mxu0 %v9782_v19 }
 0x596   :  { %9312 = vmatpush3.bf16.msra.mxu0 %v9767_v42 }
 0x597   :  { %9313 = vmatprep.subr.bf16.mxu0 %v9782_v19 }
 0x59a   :  { %9314 = vmatpush3.bf16.msra.mxu0 %v9768_v55 }
 0x59b   :  { %9315 = vmatprep.subr.bf16.mxu0 %v9782_v19 }
 0x59e   :  { %9316 = vmatpush3.bf16.msra.mxu0 %v9769_v17 }
 0x59f   :  { %9317 = vmatprep.subr.bf16.mxu0 %v9782_v19 }
 0x5a2   :  { %9318 = vmatpush3.bf16.msra.mxu0 %v9770_v25 }
 0x5a3   :  { %9319 = vmatprep.subr.bf16.mxu0 %v9782_v19 }
 0x5a6   :  { %9320 = vmatpush3.bf16.msra.mxu0 %v9771_v46 }
 0x5a7   :  { %9321 = vmatprep.subr.bf16.mxu0 %v9782_v19 }
 0x5aa   :  { %9322 = vmatpush3.bf16.msra.mxu0 %v9772_v21 }
 0x65f   :  { %v9270_v26 = vpop.f32.mrb[176].mxu0 }
 0x660   :  { %v9271_v7 = vpop.f32.mrb[177].mxu0  ;;  %v9292_v51 = vpop.f32.mrb[176].mxu1 }
 0x661   :  { %v9272_v47 = vadd.f32 %v9271_v7, %v9270_v26  ;;  %v9273_v3 = vpop.f32.mrb[178].mxu0  ;;  %v9293_v2 = vpop.f32.mrb[177].mxu1 }
 0x662   :  { %v9274_v57 = vpop.f32.mrb[179].mxu0  ;;  %v9294_v38 = vadd.f32 %v9293_v2, %v9292_v51  ;;  %v9295_v40 = vpop.f32.mrb[178].mxu1 }
 0x663   :  { %v9296_v33 = vpop.f32.mrb[179].mxu1 }
 0x664   :  { %v7458_v8 = vadd.f32 %v9294_v38, %v9272_v47 }
 0x666   :  { %v7466_v48 = vsel %vm7465_vm1, %v7458_v8, 0.0  ;;  %v7474_v43 = vmul.f32 %v7458_v8, %v7458_v8 }
 0x667   :  { %v7467_v11 = vrot.slane %v7466_v48, 4 }
 0x668   :  { %v7475_v36 = vsel %vm7465_vm1, %v7474_v43, 0.0 }
 0x669   :  { %v7468_v52 = vadd.f32 %v7467_v11, %v7466_v48  ;;  %v7476_v4 = vrot.slane %v7475_v36, 4 }
 0x66b   :  { %v7469_v10 = vrot.slane %v7468_v52, 2  ;;  %v7477_v63 = vadd.f32 %v7476_v4, %v7475_v36 }
 0x66d   :  { %v7470_v9 = vadd.f32 %v7469_v10, %v7468_v52  ;;  %v7478_v6 = vrot.slane %v7477_v63, 2 }
 0x66f   :  { %v7471_v29 = vrot.slane %v7470_v9, 1  ;;  %v7479_v13 = vadd.f32 %v7478_v6, %v7477_v63 }
 0x671   :  { %v7472_v50 = vadd.f32 %v7471_v29, %v7470_v9  ;;  %v7480_v14 = vrot.slane %v7479_v13, 1 }
 0x673   :  { %v7473_v5 = vmul.f32 0.5, %v7472_v50  ;;  %v7481_v62 = vadd.f32 %v7480_v14, %v7479_v13 }
 0x675   :  { %v7482_v24 = vmul.f32 0.5, %v7481_v62  ;;  %v7483_v61 = vmul.f32 %v7473_v5, %v7473_v5 }
 0x677   :  { %v7484_v56 = vsub.f32 %v7482_v24, %v7483_v61 }
 0x679   :  { %v7485_v45 = vmax.f32 %v7484_v56, 0.0 }
 0x67b   :  { %v7486_v44 = vadd.f32 1e-05, %v7485_v45 }
 0x67d   :  { %9779 = vrsqrt.f32 %v7486_v44 }
 0x687   :  { %v9780_v59 = vpop.eup %9779 }
 0x688   :  { %v7488_v35 = vmul.f32 %v9780_v59, %v7463_v37 }
 0x68a   :  { %v7489_v41 = vmul.f32 %v7488_v35, %v7473_v5  ;;  %v7494_v49 = vrot.slane %v7488_v35, %v10967_v53 }
 0x68c   :  { %v7490_v27 = vsub.f32 %v7464_v60, %v7489_v41  ;;  %v7495_v23 = vmul.f32 %v7494_v49, %v7458_v8 }
 0x68e   :  { %v7500_v0 = vrot.slane %v7490_v27, %v10967_v53 }
 0x690   :  { %v7502_v1 = vadd.f32 %v7500_v0, %v7495_v23 }
 0x692   :  { %v7503_v31 = vmax.f32 %v7502_v1, 0.0 }
 0x694   :  { %v7504_v15 = vpack.c.bf16 %v7503_v31, %v7503_v31 }
 0x696   :  { %9324 = vmatmul.mubr.bf16.vlgmr.msra.gmra.mrb[180].mxu0 %v7504_v15 }
 0x769   :  { %v7610_v34 = vpop.f32.mrb[180].mxu0 }
 0x76a   :  { %v7611_v12 = vadd.f32 %v8333_v28, %v7610_v34  ;;  %v9325_v30 = vpop.f32.mrb[181].mxu0 }
 0x76b   :  { %v7613_v32 = vpop.f32.mrb[182].mxu0 }
 0x76c   :  { %7616 = vst [vmem:[%s11901_s15] sm:$0x3] %v7611_v12  ;;  %v9326_v20 = vpop.f32.mrb[183].mxu0 }

</bundles_post_ra>
